<compile_context>
chip_gen: v6e
topology: v6e:2x2x1
jax: 0.10.0
libtpu: 0.0.40
codegen_flags: <defaults>
</compile_context>

<pallas_src>
import jax
import jax.numpy as jnp
from jax.experimental import pallas as pl
from jax.experimental.pallas import tpu as pltpu

# ------------------------- module-consistent small sizes ----------------------
BATCH = 2
IN_CH = 3
IMG_SIZE = 16
HID = 128           # stands in for 512
VOCAB = 32          # stands in for len(tokenizer)
VOCAB_PAD = 128     # lane-dense padded head output (sliced back to VOCAB outside)
TEXT_MAX_LEN = 8    # stands in for text_max_len=201
SOS_IDX = 1


# ------------------------------ fused Pallas kernel ---------------------------
def _fused_decode_kernel(h0_ref, x0_ref, wih_ref, whh_ref, bi_ref, bh_ref,
                         pw_ref, pb_ref, o_ref, gx_ref, hist_ref):
    """Whole decode: growing-prefix GRU loop + linear head, in one kernel.

    h0 : (B, H) f32   initial hidden (resnet pooled feature)
    x0 : (B, H) f32   embedded <sos>
    wih: (H, 3H) bf16 input-side GRU weight, columns [r | z | n]
    whh: (H, 3H) bf16 hidden-side GRU weight, columns [r | z | n]
    bi : (1, 3H) f32  [b_ir | b_iz | b_in]
    bh : (1, 3H) f32  [b_hr | b_hz | b_hn]
    pw : (H, VOCAB_PAD) bf16 head weight (padded), pb: (1, VOCAB_PAD) f32
    o  : (T*B, VOCAB_PAD) f32 logits, row index = t*B + b
    gx_ref  : VMEM scratch (T*B, 3H) f32  cached input-side gates per prefix row
    hist_ref: VMEM scratch (T*B, H)  bf16 prefix history (head input slab)
    """
    B, H = h0_ref.shape
    T = TEXT_MAX_LEN
    H3 = 3 * H

    # Hoisted bias broadcasts (JAX/Mosaic does not CSE broadcast_in_dim).
    bias_i = jnp.broadcast_to(bi_ref[...], (B, H3))
    bias_h = jnp.broadcast_to(bh_ref[...], (B, H3))

    def put_x_gates(idx, x_bf):
        # Input-side gates: computed once per prefix row, OFF the recurrent chain.
        gx_ref[idx * B:(idx + 1) * B, :] = (
            jnp.dot(x_bf, wih_ref[...], preferred_element_type=jnp.float32)
            + bias_i)

    def h_step(s, h):
        # Recurrent cell: only the K=H h-side matmul sits on the serial chain.
        gx = gx_ref[s * B:(s + 1) * B, :]                        # cached x gates
        gh = (jnp.dot(h.astype(jnp.bfloat16), whh_ref[...],
                      preferred_element_type=jnp.float32) + bias_h)
        r = jax.nn.sigmoid(gx[:, 0:H] + gh[:, 0:H])
        z = jax.nn.sigmoid(gx[:, H:2 * H] + gh[:, H:2 * H])
        n = jnp.tanh(gx[:, 2 * H:3 * H] + r * gh[:, 2 * H:3 * H])
        return (1.0 - z) * n + z * h                             # f32 gate math

    x0_bf = x0_ref[...].astype(jnp.bfloat16)
    hist_ref[0:B, :] = x0_bf                                     # inp[0] = <sos>
    put_x_gates(0, x0_bf)
    hidden = h0_ref[...]                                         # f32

    # Exact BaselineModel semantics: each outer step re-runs the GRU over the
    # full prefix inp[0..t], seeded with the carried hidden; out[-1] is appended.
    for t in range(T - 1):                                       # static -> unrolled
        h = hidden
        for s in range(t + 1):
            h = h_step(s, h)
        hidden = h
        h_bf = h.astype(jnp.bfloat16)
        hist_ref[(t + 1) * B:(t + 2) * B, :] = h_bf              # inp[t+1] = out[-1]
        if t < T - 2:                                            # last row's x-gates
            put_x_gates(t + 1, h_bf)                             # are never consumed

    # proj head over all timesteps; one lane-dense store of the padded logits.
    o_ref[...] = (jnp.dot(hist_ref[...], pw_ref[...],
                          preferred_element_type=jnp.float32)
                  + pb_ref[...]).astype(o_ref.dtype)


def fused_decode(h0, x0, w_ih_t, w_hh_t, b_i, b_h, proj_w_pad, proj_b_pad):
    B, H = h0.shape
    T = TEXT_MAX_LEN
    vmem = pl.BlockSpec(memory_space=pltpu.MemorySpace.VMEM)     # full array, no tiling
    return pl.pallas_call(
        _fused_decode_kernel,
        out_shape=jax.ShapeDtypeStruct((T * B, VOCAB_PAD), jnp.float32),
        in_specs=[vmem] * 8,
        out_specs=vmem,
        scratch_shapes=[pltpu.VMEM((T * B, 3 * H), jnp.float32),   # cached x-gates
                        pltpu.VMEM((T * B, H), jnp.bfloat16)],     # prefix history
    )(h0, x0, w_ih_t, w_hh_t, b_i, b_h, proj_w_pad, proj_b_pad)


# ------------------------------- parameters -----------------------------------
def init_params(key):
    ks = jax.random.split(key, 10)

    def w(k, shape, scale=0.08):
        return (scale * jax.random.normal(k, shape)).astype(jnp.float32)

    return {
        # TODO(synk): pretrained microsoft/resnet-18 backbone has no checkpoint
        # in-script; stand-in = global average pool + linear to HID.
        "backbone_w": w(ks[0], (IN_CH, HID)),
        "backbone_b": w(ks[1], (HID,)),
        "embed": w(ks[2], (VOCAB, HID)),
        # nn.GRU(HID, HID, num_layers=1) in PyTorch layout (gate order r, z, n)
        "gru_w_ih": w(ks[3], (3 * HID, HID)),
        "gru_w_hh": w(ks[4], (3 * HID, HID)),
        "gru_b_ih": w(ks[5], (3 * HID,)),
        "gru_b_hh": w(ks[6], (3 * HID,)),
        # nn.Linear(HID, VOCAB)
        "proj_w": w(ks[7], (VOCAB, HID)),
        "proj_b": w(ks[8], (VOCAB,)),
    }


def prep_params(p):
    """Host-side repack: transpose GRU weights, bf16 cast, pad head to 128 lanes."""
    H = HID
    w_ih_t = p["gru_w_ih"].T                      # (H, 3H)  cols [r | z | n]
    w_hh_t = p["gru_w_hh"].T                      # (H, 3H)  cols [r | z | n]
    b_i = p["gru_b_ih"].reshape(1, 3 * H)         # [b_ir | b_iz | b_in]
    b_h = p["gru_b_hh"].reshape(1, 3 * H)         # [b_hr | b_hz | b_hn]

    proj_w_pad = jnp.zeros((H, VOCAB_PAD), jnp.float32)
    proj_w_pad = proj_w_pad.at[:, :VOCAB].set(p["proj_w"].T)
    proj_b_pad = jnp.zeros((1, VOCAB_PAD), jnp.float32)
    proj_b_pad = proj_b_pad.at[0, :VOCAB].set(p["proj_b"])

    return {
        "backbone_w": p["backbone_w"],
        "backbone_b": p["backbone_b"],
        "x0_embed": p["embed"][SOS_IDX],
        "gru_w_ih_t": w_ih_t.astype(jnp.bfloat16),
        "gru_w_hh_t": w_hh_t.astype(jnp.bfloat16),
        "gru_b_i": b_i.astype(jnp.float32),
        "gru_b_h": b_h.astype(jnp.float32),
        "proj_w_pad": proj_w_pad.astype(jnp.bfloat16),
        "proj_b_pad": proj_b_pad,
    }


# -------------------------------- forward -------------------------------------
def forward(prepped, img):
    B = img.shape[0]

    # resnet(img).pooler_output stand-in: global avg pool + tiny linear.
    # Left as plain jnp (an M=2, K=3 matmul is pure launch overhead as a kernel).
    pooled = jnp.mean(img, axis=(2, 3))                                   # (B, C)
    feat = pooled @ prepped["backbone_w"] + prepped["backbone_b"]         # (B, H)

    # start_embeds = embed(<sos>).repeat(B, 1)
    x0 = jnp.broadcast_to(prepped["x0_embed"][None, :], (B, HID))

    # Fused GRU decode + proj head (single pallas_call, no grid).
    logits_pad = fused_decode(feat.astype(jnp.float32), x0.astype(jnp.float32),
                              prepped["gru_w_ih_t"], prepped["gru_w_hh_t"],
                              prepped["gru_b_i"], prepped["gru_b_h"],
                              prepped["proj_w_pad"], prepped["proj_b_pad"])

    # (T*B, VOCAB_PAD), row = t*B + b  ->  (B, VOCAB, T); tiny permute left to XLA.
    logits = logits_pad[:, :VOCAB].reshape(TEXT_MAX_LEN, B, VOCAB)
    return jnp.transpose(logits, (1, 2, 0))


if __name__ == "__main__":
    key = jax.random.PRNGKey(0)
    pkey, xkey = jax.random.split(key)
    params = init_params(pkey)
    prepped = prep_params(params)
    img = jax.random.normal(xkey, (BATCH, IN_CH, IMG_SIZE, IMG_SIZE),
                            dtype=jnp.float32)
    out = jax.jit(forward)(prepped, img)
    out = jax.block_until_ready(out)
    assert out.shape == (BATCH, VOCAB, TEXT_MAX_LEN), out.shape
    assert bool(jnp.all(jnp.isfinite(out)))
    print("KERNEL_OK")
</pallas_src>

<mosaic_0001>
module attributes {stable_mosaic.version = 11 : i64} {
  func.func @_fused_decode_kernel(%arg0: memref<2x128xf32, #tpu.memory_space<vmem>>, %arg1: memref<2x128xf32, #tpu.memory_space<vmem>>, %arg2: memref<128x384xbf16, #tpu.memory_space<vmem>>, %arg3: memref<128x384xbf16, #tpu.memory_space<vmem>>, %arg4: memref<1x384xf32, #tpu.memory_space<vmem>>, %arg5: memref<1x384xf32, #tpu.memory_space<vmem>>, %arg6: memref<128x128xbf16, #tpu.memory_space<vmem>>, %arg7: memref<1x128xf32, #tpu.memory_space<vmem>>, %arg8: memref<16x128xf32, #tpu.memory_space<vmem>>, %arg9: memref<16x384xf32, #tpu.memory_space<vmem>>, %arg10: memref<16x128xbf16, #tpu.memory_space<vmem>>) attributes {dimension_semantics = [], scalar_prefetch = 0 : i64, scratch_operands = 2 : i64, tpu.core_type = #tpu.core_type<tc>} {
    %c0 = arith.constant 0 : index
    %c0_0 = arith.constant 0 : index
    %0 = vector.load %arg4[%c0, %c0_0] : memref<1x384xf32, #tpu.memory_space<vmem>>, vector<1x384xf32>
    %1 = vector.shape_cast %0 : vector<1x384xf32> to vector<1x384xf32>
    %2 = vector.broadcast %1 : vector<1x384xf32> to vector<2x384xf32>
    %c0_1 = arith.constant 0 : index
    %c0_2 = arith.constant 0 : index
    %3 = vector.load %arg5[%c0_1, %c0_2] : memref<1x384xf32, #tpu.memory_space<vmem>>, vector<1x384xf32>
    %4 = vector.shape_cast %3 : vector<1x384xf32> to vector<1x384xf32>
    %5 = vector.broadcast %4 : vector<1x384xf32> to vector<2x384xf32>
    %c0_3 = arith.constant 0 : index
    %c0_4 = arith.constant 0 : index
    %6 = vector.load %arg1[%c0_3, %c0_4] : memref<2x128xf32, #tpu.memory_space<vmem>>, vector<2x128xf32>
    %7 = arith.truncf %6 : vector<2x128xf32> to vector<2x128xbf16>
    %c0_5 = arith.constant 0 : index
    %c0_6 = arith.constant 0 : index
    %8 = vector.load %arg10[%c0_5, %c0_6] : memref<16x128xbf16, #tpu.memory_space<vmem>>, vector<2x128xbf16>
    tpu.vector_store %arg10[%c0_5, %c0_6], %7 {strides = array<i32>} : memref<16x128xbf16, #tpu.memory_space<vmem>>, vector<2x128xbf16>,
    %c0_7 = arith.constant 0 : index
    %c0_8 = arith.constant 0 : index
    %9 = vector.load %arg2[%c0_7, %c0_8] : memref<128x384xbf16, #tpu.memory_space<vmem>>, vector<128x384xbf16>
    %cst = arith.constant dense<0.000000e+00> : vector<2x384xf32>
    %10 = tpu.matmul %7, %9, %cst {dimension_numbers = #tpu.dot_dimension_numbers<[1], [0], [0], [1], [0, 0, 1, 1], [], []>} : vector<2x128xbf16>, vector<128x384xbf16>, vector<2x384xf32> -> vector<2x384xf32>
    %11 = arith.addf %10, %2 : vector<2x384xf32>
    %c0_9 = arith.constant 0 : index
    %c0_10 = arith.constant 0 : index
    %12 = vector.load %arg9[%c0_9, %c0_10] : memref<16x384xf32, #tpu.memory_space<vmem>>, vector<2x384xf32>
    tpu.vector_store %arg9[%c0_9, %c0_10], %11 {strides = array<i32>} : memref<16x384xf32, #tpu.memory_space<vmem>>, vector<2x384xf32>,
    %c0_11 = arith.constant 0 : index
    %c0_12 = arith.constant 0 : index
    %13 = vector.load %arg0[%c0_11, %c0_12] : memref<2x128xf32, #tpu.memory_space<vmem>>, vector<2x128xf32>
    %c0_13 = arith.constant 0 : index
    %c0_14 = arith.constant 0 : index
    %14 = vector.load %arg9[%c0_13, %c0_14] : memref<16x384xf32, #tpu.memory_space<vmem>>, vector<2x384xf32>
    %15 = arith.truncf %13 : vector<2x128xf32> to vector<2x128xbf16>
    %c0_15 = arith.constant 0 : index
    %c0_16 = arith.constant 0 : index
    %16 = vector.load %arg3[%c0_15, %c0_16] : memref<128x384xbf16, #tpu.memory_space<vmem>>, vector<128x384xbf16>
    %cst_17 = arith.constant dense<0.000000e+00> : vector<2x384xf32>
    %17 = tpu.matmul %15, %16, %cst_17 {dimension_numbers = #tpu.dot_dimension_numbers<[1], [0], [0], [1], [0, 0, 1, 1], [], []>} : vector<2x128xbf16>, vector<128x384xbf16>, vector<2x384xf32> -> vector<2x384xf32>
    %18 = arith.addf %17, %5 : vector<2x384xf32>
    %19 = vector.extract_strided_slice %14 {offsets = [0, 0], sizes = [2, 128], strides = [1, 1]} : vector<2x384xf32> to vector<2x128xf32>
    %20 = vector.extract_strided_slice %18 {offsets = [0, 0], sizes = [2, 128], strides = [1, 1]} : vector<2x384xf32> to vector<2x128xf32>
    %21 = arith.addf %19, %20 : vector<2x128xf32>
    %22 = arith.negf %21 : vector<2x128xf32>
    %23 = math.exp %22 : vector<2x128xf32>
    %cst_18 = arith.constant 1.000000e+00 : f32
    %24 = vector.broadcast %cst_18 : f32 to vector<2x128xf32>
    %25 = arith.addf %24, %23 : vector<2x128xf32>
    %26 = arith.divf %24, %25 : vector<2x128xf32>
    %27 = vector.extract_strided_slice %14 {offsets = [0, 128], sizes = [2, 128], strides = [1, 1]} : vector<2x384xf32> to vector<2x128xf32>
    %28 = vector.extract_strided_slice %18 {offsets = [0, 128], sizes = [2, 128], strides = [1, 1]} : vector<2x384xf32> to vector<2x128xf32>
    %29 = arith.addf %27, %28 : vector<2x128xf32>
    %30 = arith.negf %29 : vector<2x128xf32>
    %31 = math.exp %30 : vector<2x128xf32>
    %cst_19 = arith.constant 1.000000e+00 : f32
    %32 = vector.broadcast %cst_19 : f32 to vector<2x128xf32>
    %33 = arith.addf %32, %31 : vector<2x128xf32>
    %34 = arith.divf %32, %33 : vector<2x128xf32>
    %35 = vector.extract_strided_slice %14 {offsets = [0, 256], sizes = [2, 128], strides = [1, 1]} : vector<2x384xf32> to vector<2x128xf32>
    %36 = vector.extract_strided_slice %18 {offsets = [0, 256], sizes = [2, 128], strides = [1, 1]} : vector<2x384xf32> to vector<2x128xf32>
    %37 = arith.mulf %26, %36 : vector<2x128xf32>
    %38 = arith.addf %35, %37 : vector<2x128xf32>
    %39 = math.tanh %38 : vector<2x128xf32>
    %cst_20 = arith.constant 1.000000e+00 : f32
    %40 = vector.broadcast %cst_20 : f32 to vector<2x128xf32>
    %41 = arith.subf %40, %34 : vector<2x128xf32>
    %42 = arith.mulf %41, %39 : vector<2x128xf32>
    %43 = arith.mulf %34, %13 : vector<2x128xf32>
    %44 = arith.addf %42, %43 : vector<2x128xf32>
    %45 = arith.truncf %44 : vector<2x128xf32> to vector<2x128xbf16>
    %c2 = arith.constant 2 : index
    %c0_21 = arith.constant 0 : index
    %46 = vector.load %arg10[%c2, %c0_21] : memref<16x128xbf16, #tpu.memory_space<vmem>>, vector<2x128xbf16>
    tpu.vector_store %arg10[%c2, %c0_21], %45 {strides = array<i32>} : memref<16x128xbf16, #tpu.memory_space<vmem>>, vector<2x128xbf16>,
    %c0_22 = arith.constant 0 : index
    %c0_23 = arith.constant 0 : index
    %47 = vector.load %arg2[%c0_22, %c0_23] : memref<128x384xbf16, #tpu.memory_space<vmem>>, vector<128x384xbf16>
    %cst_24 = arith.constant dense<0.000000e+00> : vector<2x384xf32>
    %48 = tpu.matmul %45, %47, %cst_24 {dimension_numbers = #tpu.dot_dimension_numbers<[1], [0], [0], [1], [0, 0, 1, 1], [], []>} : vector<2x128xbf16>, vector<128x384xbf16>, vector<2x384xf32> -> vector<2x384xf32>
    %49 = arith.addf %48, %2 : vector<2x384xf32>
    %c2_25 = arith.constant 2 : index
    %c0_26 = arith.constant 0 : index
    %50 = vector.load %arg9[%c2_25, %c0_26] : memref<16x384xf32, #tpu.memory_space<vmem>>, vector<2x384xf32>
    tpu.vector_store %arg9[%c2_25, %c0_26], %49 {strides = array<i32>} : memref<16x384xf32, #tpu.memory_space<vmem>>, vector<2x384xf32>,
    %c0_27 = arith.constant 0 : index
    %c0_28 = arith.constant 0 : index
    %51 = vector.load %arg9[%c0_27, %c0_28] : memref<16x384xf32, #tpu.memory_space<vmem>>, vector<2x384xf32>
    %52 = arith.truncf %44 : vector<2x128xf32> to vector<2x128xbf16>
    %c0_29 = arith.constant 0 : index
    %c0_30 = arith.constant 0 : index
    %53 = vector.load %arg3[%c0_29, %c0_30] : memref<128x384xbf16, #tpu.memory_space<vmem>>, vector<128x384xbf16>
    %cst_31 = arith.constant dense<0.000000e+00> : vector<2x384xf32>
    %54 = tpu.matmul %52, %53, %cst_31 {dimension_numbers = #tpu.dot_dimension_numbers<[1], [0], [0], [1], [0, 0, 1, 1], [], []>} : vector<2x128xbf16>, vector<128x384xbf16>, vector<2x384xf32> -> vector<2x384xf32>
    %55 = arith.addf %54, %5 : vector<2x384xf32>
    %56 = vector.extract_strided_slice %51 {offsets = [0, 0], sizes = [2, 128], strides = [1, 1]} : vector<2x384xf32> to vector<2x128xf32>
    %57 = vector.extract_strided_slice %55 {offsets = [0, 0], sizes = [2, 128], strides = [1, 1]} : vector<2x384xf32> to vector<2x128xf32>
    %58 = arith.addf %56, %57 : vector<2x128xf32>
    %59 = arith.negf %58 : vector<2x128xf32>
    %60 = math.exp %59 : vector<2x128xf32>
    %cst_32 = arith.constant 1.000000e+00 : f32
    %61 = vector.broadcast %cst_32 : f32 to vector<2x128xf32>
    %62 = arith.addf %61, %60 : vector<2x128xf32>
    %63 = arith.divf %61, %62 : vector<2x128xf32>
    %64 = vector.extract_strided_slice %51 {offsets = [0, 128], sizes = [2, 128], strides = [1, 1]} : vector<2x384xf32> to vector<2x128xf32>
    %65 = vector.extract_strided_slice %55 {offsets = [0, 128], sizes = [2, 128], strides = [1, 1]} : vector<2x384xf32> to vector<2x128xf32>
    %66 = arith.addf %64, %65 : vector<2x128xf32>
    %67 = arith.negf %66 : vector<2x128xf32>
    %68 = math.exp %67 : vector<2x128xf32>
    %cst_33 = arith.constant 1.000000e+00 : f32
    %69 = vector.broadcast %cst_33 : f32 to vector<2x128xf32>
    %70 = arith.addf %69, %68 : vector<2x128xf32>
    %71 = arith.divf %69, %70 : vector<2x128xf32>
    %72 = vector.extract_strided_slice %51 {offsets = [0, 256], sizes = [2, 128], strides = [1, 1]} : vector<2x384xf32> to vector<2x128xf32>
    %73 = vector.extract_strided_slice %55 {offsets = [0, 256], sizes = [2, 128], strides = [1, 1]} : vector<2x384xf32> to vector<2x128xf32>
    %74 = arith.mulf %63, %73 : vector<2x128xf32>
    %75 = arith.addf %72, %74 : vector<2x128xf32>
    %76 = math.tanh %75 : vector<2x128xf32>
    %cst_34 = arith.constant 1.000000e+00 : f32
    %77 = vector.broadcast %cst_34 : f32 to vector<2x128xf32>
    %78 = arith.subf %77, %71 : vector<2x128xf32>
    %79 = arith.mulf %78, %76 : vector<2x128xf32>
    %80 = arith.mulf %71, %44 : vector<2x128xf32>
    %81 = arith.addf %79, %80 : vector<2x128xf32>
    %c2_35 = arith.constant 2 : index
    %c0_36 = arith.constant 0 : index
    %82 = vector.load %arg9[%c2_35, %c0_36] : memref<16x384xf32, #tpu.memory_space<vmem>>, vector<2x384xf32>
    %83 = arith.truncf %81 : vector<2x128xf32> to vector<2x128xbf16>
    %c0_37 = arith.constant 0 : index
    %c0_38 = arith.constant 0 : index
    %84 = vector.load %arg3[%c0_37, %c0_38] : memref<128x384xbf16, #tpu.memory_space<vmem>>, vector<128x384xbf16>
    %cst_39 = arith.constant dense<0.000000e+00> : vector<2x384xf32>
    %85 = tpu.matmul %83, %84, %cst_39 {dimension_numbers = #tpu.dot_dimension_numbers<[1], [0], [0], [1], [0, 0, 1, 1], [], []>} : vector<2x128xbf16>, vector<128x384xbf16>, vector<2x384xf32> -> vector<2x384xf32>
    %86 = arith.addf %85, %5 : vector<2x384xf32>
    %87 = vector.extract_strided_slice %82 {offsets = [0, 0], sizes = [2, 128], strides = [1, 1]} : vector<2x384xf32> to vector<2x128xf32>
    %88 = vector.extract_strided_slice %86 {offsets = [0, 0], sizes = [2, 128], strides = [1, 1]} : vector<2x384xf32> to vector<2x128xf32>
    %89 = arith.addf %87, %88 : vector<2x128xf32>
    %90 = arith.negf %89 : vector<2x128xf32>
    %91 = math.exp %90 : vector<2x128xf32>
    %cst_40 = arith.constant 1.000000e+00 : f32
    %92 = vector.broadcast %cst_40 : f32 to vector<2x128xf32>
    %93 = arith.addf %92, %91 : vector<2x128xf32>
    %94 = arith.divf %92, %93 : vector<2x128xf32>
    %95 = vector.extract_strided_slice %82 {offsets = [0, 128], sizes = [2, 128], strides = [1, 1]} : vector<2x384xf32> to vector<2x128xf32>
    %96 = vector.extract_strided_slice %86 {offsets = [0, 128], sizes = [2, 128], strides = [1, 1]} : vector<2x384xf32> to vector<2x128xf32>
    %97 = arith.addf %95, %96 : vector<2x128xf32>
    %98 = arith.negf %97 : vector<2x128xf32>
    %99 = math.exp %98 : vector<2x128xf32>
    %cst_41 = arith.constant 1.000000e+00 : f32
    %100 = vector.broadcast %cst_41 : f32 to vector<2x128xf32>
    %101 = arith.addf %100, %99 : vector<2x128xf32>
    %102 = arith.divf %100, %101 : vector<2x128xf32>
    %103 = vector.extract_strided_slice %82 {offsets = [0, 256], sizes = [2, 128], strides = [1, 1]} : vector<2x384xf32> to vector<2x128xf32>
    %104 = vector.extract_strided_slice %86 {offsets = [0, 256], sizes = [2, 128], strides = [1, 1]} : vector<2x384xf32> to vector<2x128xf32>
    %105 = arith.mulf %94, %104 : vector<2x128xf32>
    %106 = arith.addf %103, %105 : vector<2x128xf32>
    %107 = math.tanh %106 : vector<2x128xf32>
    %cst_42 = arith.constant 1.000000e+00 : f32
    %108 = vector.broadcast %cst_42 : f32 to vector<2x128xf32>
    %109 = arith.subf %108, %102 : vector<2x128xf32>
    %110 = arith.mulf %109, %107 : vector<2x128xf32>
    %111 = arith.mulf %102, %81 : vector<2x128xf32>
    %112 = arith.addf %110, %111 : vector<2x128xf32>
    %113 = arith.truncf %112 : vector<2x128xf32> to vector<2x128xbf16>
    %c4 = arith.constant 4 : index
    %c0_43 = arith.constant 0 : index
    %114 = vector.load %arg10[%c4, %c0_43] : memref<16x128xbf16, #tpu.memory_space<vmem>>, vector<2x128xbf16>
    tpu.vector_store %arg10[%c4, %c0_43], %113 {strides = array<i32>} : memref<16x128xbf16, #tpu.memory_space<vmem>>, vector<2x128xbf16>,
    %c0_44 = arith.constant 0 : index
    %c0_45 = arith.constant 0 : index
    %115 = vector.load %arg2[%c0_44, %c0_45] : memref<128x384xbf16, #tpu.memory_space<vmem>>, vector<128x384xbf16>
    %cst_46 = arith.constant dense<0.000000e+00> : vector<2x384xf32>
    %116 = tpu.matmul %113, %115, %cst_46 {dimension_numbers = #tpu.dot_dimension_numbers<[1], [0], [0], [1], [0, 0, 1, 1], [], []>} : vector<2x128xbf16>, vector<128x384xbf16>, vector<2x384xf32> -> vector<2x384xf32>
    %117 = arith.addf %116, %2 : vector<2x384xf32>
    %c4_47 = arith.constant 4 : index
    %c0_48 = arith.constant 0 : index
    %118 = vector.load %arg9[%c4_47, %c0_48] : memref<16x384xf32, #tpu.memory_space<vmem>>, vector<2x384xf32>
    tpu.vector_store %arg9[%c4_47, %c0_48], %117 {strides = array<i32>} : memref<16x384xf32, #tpu.memory_space<vmem>>, vector<2x384xf32>,
    %c0_49 = arith.constant 0 : index
    %c0_50 = arith.constant 0 : index
    %119 = vector.load %arg9[%c0_49, %c0_50] : memref<16x384xf32, #tpu.memory_space<vmem>>, vector<2x384xf32>
    %120 = arith.truncf %112 : vector<2x128xf32> to vector<2x128xbf16>
    %c0_51 = arith.constant 0 : index
    %c0_52 = arith.constant 0 : index
    %121 = vector.load %arg3[%c0_51, %c0_52] : memref<128x384xbf16, #tpu.memory_space<vmem>>, vector<128x384xbf16>
    %cst_53 = arith.constant dense<0.000000e+00> : vector<2x384xf32>
    %122 = tpu.matmul %120, %121, %cst_53 {dimension_numbers = #tpu.dot_dimension_numbers<[1], [0], [0], [1], [0, 0, 1, 1], [], []>} : vector<2x128xbf16>, vector<128x384xbf16>, vector<2x384xf32> -> vector<2x384xf32>
    %123 = arith.addf %122, %5 : vector<2x384xf32>
    %124 = vector.extract_strided_slice %119 {offsets = [0, 0], sizes = [2, 128], strides = [1, 1]} : vector<2x384xf32> to vector<2x128xf32>
    %125 = vector.extract_strided_slice %123 {offsets = [0, 0], sizes = [2, 128], strides = [1, 1]} : vector<2x384xf32> to vector<2x128xf32>
    %126 = arith.addf %124, %125 : vector<2x128xf32>
    %127 = arith.negf %126 : vector<2x128xf32>
    %128 = math.exp %127 : vector<2x128xf32>
    %cst_54 = arith.constant 1.000000e+00 : f32
    %129 = vector.broadcast %cst_54 : f32 to vector<2x128xf32>
    %130 = arith.addf %129, %128 : vector<2x128xf32>
    %131 = arith.divf %129, %130 : vector<2x128xf32>
    %132 = vector.extract_strided_slice %119 {offsets = [0, 128], sizes = [2, 128], strides = [1, 1]} : vector<2x384xf32> to vector<2x128xf32>
    %133 = vector.extract_strided_slice %123 {offsets = [0, 128], sizes = [2, 128], strides = [1, 1]} : vector<2x384xf32> to vector<2x128xf32>
    %134 = arith.addf %132, %133 : vector<2x128xf32>
    %135 = arith.negf %134 : vector<2x128xf32>
    %136 = math.exp %135 : vector<2x128xf32>
    %cst_55 = arith.constant 1.000000e+00 : f32
    %137 = vector.broadcast %cst_55 : f32 to vector<2x128xf32>
    %138 = arith.addf %137, %136 : vector<2x128xf32>
    %139 = arith.divf %137, %138 : vector<2x128xf32>
    %140 = vector.extract_strided_slice %119 {offsets = [0, 256], sizes = [2, 128], strides = [1, 1]} : vector<2x384xf32> to vector<2x128xf32>
    %141 = vector.extract_strided_slice %123 {offsets = [0, 256], sizes = [2, 128], strides = [1, 1]} : vector<2x384xf32> to vector<2x128xf32>
    %142 = arith.mulf %131, %141 : vector<2x128xf32>
    %143 = arith.addf %140, %142 : vector<2x128xf32>
    %144 = math.tanh %143 : vector<2x128xf32>
    %cst_56 = arith.constant 1.000000e+00 : f32
    %145 = vector.broadcast %cst_56 : f32 to vector<2x128xf32>
    %146 = arith.subf %145, %139 : vector<2x128xf32>
    %147 = arith.mulf %146, %144 : vector<2x128xf32>
    %148 = arith.mulf %139, %112 : vector<2x128xf32>
    %149 = arith.addf %147, %148 : vector<2x128xf32>
    %c2_57 = arith.constant 2 : index
    %c0_58 = arith.constant 0 : index
    %150 = vector.load %arg9[%c2_57, %c0_58] : memref<16x384xf32, #tpu.memory_space<vmem>>, vector<2x384xf32>
    %151 = arith.truncf %149 : vector<2x128xf32> to vector<2x128xbf16>
    %c0_59 = arith.constant 0 : index
    %c0_60 = arith.constant 0 : index
    %152 = vector.load %arg3[%c0_59, %c0_60] : memref<128x384xbf16, #tpu.memory_space<vmem>>, vector<128x384xbf16>
    %cst_61 = arith.constant dense<0.000000e+00> : vector<2x384xf32>
    %153 = tpu.matmul %151, %152, %cst_61 {dimension_numbers = #tpu.dot_dimension_numbers<[1], [0], [0], [1], [0, 0, 1, 1], [], []>} : vector<2x128xbf16>, vector<128x384xbf16>, vector<2x384xf32> -> vector<2x384xf32>
    %154 = arith.addf %153, %5 : vector<2x384xf32>
    %155 = vector.extract_strided_slice %150 {offsets = [0, 0], sizes = [2, 128], strides = [1, 1]} : vector<2x384xf32> to vector<2x128xf32>
    %156 = vector.extract_strided_slice %154 {offsets = [0, 0], sizes = [2, 128], strides = [1, 1]} : vector<2x384xf32> to vector<2x128xf32>
    %157 = arith.addf %155, %156 : vector<2x128xf32>
    %158 = arith.negf %157 : vector<2x128xf32>
    %159 = math.exp %158 : vector<2x128xf32>
    %cst_62 = arith.constant 1.000000e+00 : f32
    %160 = vector.broadcast %cst_62 : f32 to vector<2x128xf32>
    %161 = arith.addf %160, %159 : vector<2x128xf32>
    %162 = arith.divf %160, %161 : vector<2x128xf32>
    %163 = vector.extract_strided_slice %150 {offsets = [0, 128], sizes = [2, 128], strides = [1, 1]} : vector<2x384xf32> to vector<2x128xf32>
    %164 = vector.extract_strided_slice %154 {offsets = [0, 128], sizes = [2, 128], strides = [1, 1]} : vector<2x384xf32> to vector<2x128xf32>
    %165 = arith.addf %163, %164 : vector<2x128xf32>
    %166 = arith.negf %165 : vector<2x128xf32>
    %167 = math.exp %166 : vector<2x128xf32>
    %cst_63 = arith.constant 1.000000e+00 : f32
    %168 = vector.broadcast %cst_63 : f32 to vector<2x128xf32>
    %169 = arith.addf %168, %167 : vector<2x128xf32>
    %170 = arith.divf %168, %169 : vector<2x128xf32>
    %171 = vector.extract_strided_slice %150 {offsets = [0, 256], sizes = [2, 128], strides = [1, 1]} : vector<2x384xf32> to vector<2x128xf32>
    %172 = vector.extract_strided_slice %154 {offsets = [0, 256], sizes = [2, 128], strides = [1, 1]} : vector<2x384xf32> to vector<2x128xf32>
    %173 = arith.mulf %162, %172 : vector<2x128xf32>
    %174 = arith.addf %171, %173 : vector<2x128xf32>
    %175 = math.tanh %174 : vector<2x128xf32>
    %cst_64 = arith.constant 1.000000e+00 : f32
    %176 = vector.broadcast %cst_64 : f32 to vector<2x128xf32>
    %177 = arith.subf %176, %170 : vector<2x128xf32>
    %178 = arith.mulf %177, %175 : vector<2x128xf32>
    %179 = arith.mulf %170, %149 : vector<2x128xf32>
    %180 = arith.addf %178, %179 : vector<2x128xf32>
    %c4_65 = arith.constant 4 : index
    %c0_66 = arith.constant 0 : index
    %181 = vector.load %arg9[%c4_65, %c0_66] : memref<16x384xf32, #tpu.memory_space<vmem>>, vector<2x384xf32>
    %182 = arith.truncf %180 : vector<2x128xf32> to vector<2x128xbf16>
    %c0_67 = arith.constant 0 : index
    %c0_68 = arith.constant 0 : index
    %183 = vector.load %arg3[%c0_67, %c0_68] : memref<128x384xbf16, #tpu.memory_space<vmem>>, vector<128x384xbf16>
    %cst_69 = arith.constant dense<0.000000e+00> : vector<2x384xf32>
    %184 = tpu.matmul %182, %183, %cst_69 {dimension_numbers = #tpu.dot_dimension_numbers<[1], [0], [0], [1], [0, 0, 1, 1], [], []>} : vector<2x128xbf16>, vector<128x384xbf16>, vector<2x384xf32> -> vector<2x384xf32>
    %185 = arith.addf %184, %5 : vector<2x384xf32>
    %186 = vector.extract_strided_slice %181 {offsets = [0, 0], sizes = [2, 128], strides = [1, 1]} : vector<2x384xf32> to vector<2x128xf32>
    %187 = vector.extract_strided_slice %185 {offsets = [0, 0], sizes = [2, 128], strides = [1, 1]} : vector<2x384xf32> to vector<2x128xf32>
    %188 = arith.addf %186, %187 : vector<2x128xf32>
    %189 = arith.negf %188 : vector<2x128xf32>
    %190 = math.exp %189 : vector<2x128xf32>
    %cst_70 = arith.constant 1.000000e+00 : f32
    %191 = vector.broadcast %cst_70 : f32 to vector<2x128xf32>
    %192 = arith.addf %191, %190 : vector<2x128xf32>
    %193 = arith.divf %191, %192 : vector<2x128xf32>
    %194 = vector.extract_strided_slice %181 {offsets = [0, 128], sizes = [2, 128], strides = [1, 1]} : vector<2x384xf32> to vector<2x128xf32>
    %195 = vector.extract_strided_slice %185 {offsets = [0, 128], sizes = [2, 128], strides = [1, 1]} : vector<2x384xf32> to vector<2x128xf32>
    %196 = arith.addf %194, %195 : vector<2x128xf32>
    %197 = arith.negf %196 : vector<2x128xf32>
    %198 = math.exp %197 : vector<2x128xf32>
    %cst_71 = arith.constant 1.000000e+00 : f32
    %199 = vector.broadcast %cst_71 : f32 to vector<2x128xf32>
    %200 = arith.addf %199, %198 : vector<2x128xf32>
    %201 = arith.divf %199, %200 : vector<2x128xf32>
    %202 = vector.extract_strided_slice %181 {offsets = [0, 256], sizes = [2, 128], strides = [1, 1]} : vector<2x384xf32> to vector<2x128xf32>
    %203 = vector.extract_strided_slice %185 {offsets = [0, 256], sizes = [2, 128], strides = [1, 1]} : vector<2x384xf32> to vector<2x128xf32>
    %204 = arith.mulf %193, %203 : vector<2x128xf32>
    %205 = arith.addf %202, %204 : vector<2x128xf32>
    %206 = math.tanh %205 : vector<2x128xf32>
    %cst_72 = arith.constant 1.000000e+00 : f32
    %207 = vector.broadcast %cst_72 : f32 to vector<2x128xf32>
    %208 = arith.subf %207, %201 : vector<2x128xf32>
    %209 = arith.mulf %208, %206 : vector<2x128xf32>
    %210 = arith.mulf %201, %180 : vector<2x128xf32>
    %211 = arith.addf %209, %210 : vector<2x128xf32>
    %212 = arith.truncf %211 : vector<2x128xf32> to vector<2x128xbf16>
    %c6 = arith.constant 6 : index
    %c0_73 = arith.constant 0 : index
    %213 = vector.load %arg10[%c6, %c0_73] : memref<16x128xbf16, #tpu.memory_space<vmem>>, vector<2x128xbf16>
    tpu.vector_store %arg10[%c6, %c0_73], %212 {strides = array<i32>} : memref<16x128xbf16, #tpu.memory_space<vmem>>, vector<2x128xbf16>,
    %c0_74 = arith.constant 0 : index
    %c0_75 = arith.constant 0 : index
    %214 = vector.load %arg2[%c0_74, %c0_75] : memref<128x384xbf16, #tpu.memory_space<vmem>>, vector<128x384xbf16>
    %cst_76 = arith.constant dense<0.000000e+00> : vector<2x384xf32>
    %215 = tpu.matmul %212, %214, %cst_76 {dimension_numbers = #tpu.dot_dimension_numbers<[1], [0], [0], [1], [0, 0, 1, 1], [], []>} : vector<2x128xbf16>, vector<128x384xbf16>, vector<2x384xf32> -> vector<2x384xf32>
    %216 = arith.addf %215, %2 : vector<2x384xf32>
    %c6_77 = arith.constant 6 : index
    %c0_78 = arith.constant 0 : index
    %217 = vector.load %arg9[%c6_77, %c0_78] : memref<16x384xf32, #tpu.memory_space<vmem>>, vector<2x384xf32>
    tpu.vector_store %arg9[%c6_77, %c0_78], %216 {strides = array<i32>} : memref<16x384xf32, #tpu.memory_space<vmem>>, vector<2x384xf32>,
    %c0_79 = arith.constant 0 : index
    %c0_80 = arith.constant 0 : index
    %218 = vector.load %arg9[%c0_79, %c0_80] : memref<16x384xf32, #tpu.memory_space<vmem>>, vector<2x384xf32>
    %219 = arith.truncf %211 : vector<2x128xf32> to vector<2x128xbf16>
    %c0_81 = arith.constant 0 : index
    %c0_82 = arith.constant 0 : index
    %220 = vector.load %arg3[%c0_81, %c0_82] : memref<128x384xbf16, #tpu.memory_space<vmem>>, vector<128x384xbf16>
    %cst_83 = arith.constant dense<0.000000e+00> : vector<2x384xf32>
    %221 = tpu.matmul %219, %220, %cst_83 {dimension_numbers = #tpu.dot_dimension_numbers<[1], [0], [0], [1], [0, 0, 1, 1], [], []>} : vector<2x128xbf16>, vector<128x384xbf16>, vector<2x384xf32> -> vector<2x384xf32>
    %222 = arith.addf %221, %5 : vector<2x384xf32>
    %223 = vector.extract_strided_slice %218 {offsets = [0, 0], sizes = [2, 128], strides = [1, 1]} : vector<2x384xf32> to vector<2x128xf32>
    %224 = vector.extract_strided_slice %222 {offsets = [0, 0], sizes = [2, 128], strides = [1, 1]} : vector<2x384xf32> to vector<2x128xf32>
    %225 = arith.addf %223, %224 : vector<2x128xf32>
    %226 = arith.negf %225 : vector<2x128xf32>
    %227 = math.exp %226 : vector<2x128xf32>
    %cst_84 = arith.constant 1.000000e+00 : f32
    %228 = vector.broadcast %cst_84 : f32 to vector<2x128xf32>
    %229 = arith.addf %228, %227 : vector<2x128xf32>
    %230 = arith.divf %228, %229 : vector<2x128xf32>
    %231 = vector.extract_strided_slice %218 {offsets = [0, 128], sizes = [2, 128], strides = [1, 1]} : vector<2x384xf32> to vector<2x128xf32>
    %232 = vector.extract_strided_slice %222 {offsets = [0, 128], sizes = [2, 128], strides = [1, 1]} : vector<2x384xf32> to vector<2x128xf32>
    %233 = arith.addf %231, %232 : vector<2x128xf32>
    %234 = arith.negf %233 : vector<2x128xf32>
    %235 = math.exp %234 : vector<2x128xf32>
    %cst_85 = arith.constant 1.000000e+00 : f32
    %236 = vector.broadcast %cst_85 : f32 to vector<2x128xf32>
    %237 = arith.addf %236, %235 : vector<2x128xf32>
    %238 = arith.divf %236, %237 : vector<2x128xf32>
    %239 = vector.extract_strided_slice %218 {offsets = [0, 256], sizes = [2, 128], strides = [1, 1]} : vector<2x384xf32> to vector<2x128xf32>
    %240 = vector.extract_strided_slice %222 {offsets = [0, 256], sizes = [2, 128], strides = [1, 1]} : vector<2x384xf32> to vector<2x128xf32>
    %241 = arith.mulf %230, %240 : vector<2x128xf32>
    %242 = arith.addf %239, %241 : vector<2x128xf32>
    %243 = math.tanh %242 : vector<2x128xf32>
    %cst_86 = arith.constant 1.000000e+00 : f32
    %244 = vector.broadcast %cst_86 : f32 to vector<2x128xf32>
    %245 = arith.subf %244, %238 : vector<2x128xf32>
    %246 = arith.mulf %245, %243 : vector<2x128xf32>
    %247 = arith.mulf %238, %211 : vector<2x128xf32>
    %248 = arith.addf %246, %247 : vector<2x128xf32>
    %c2_87 = arith.constant 2 : index
    %c0_88 = arith.constant 0 : index
    %249 = vector.load %arg9[%c2_87, %c0_88] : memref<16x384xf32, #tpu.memory_space<vmem>>, vector<2x384xf32>
    %250 = arith.truncf %248 : vector<2x128xf32> to vector<2x128xbf16>
    %c0_89 = arith.constant 0 : index
    %c0_90 = arith.constant 0 : index
    %251 = vector.load %arg3[%c0_89, %c0_90] : memref<128x384xbf16, #tpu.memory_space<vmem>>, vector<128x384xbf16>
    %cst_91 = arith.constant dense<0.000000e+00> : vector<2x384xf32>
    %252 = tpu.matmul %250, %251, %cst_91 {dimension_numbers = #tpu.dot_dimension_numbers<[1], [0], [0], [1], [0, 0, 1, 1], [], []>} : vector<2x128xbf16>, vector<128x384xbf16>, vector<2x384xf32> -> vector<2x384xf32>
    %253 = arith.addf %252, %5 : vector<2x384xf32>
    %254 = vector.extract_strided_slice %249 {offsets = [0, 0], sizes = [2, 128], strides = [1, 1]} : vector<2x384xf32> to vector<2x128xf32>
    %255 = vector.extract_strided_slice %253 {offsets = [0, 0], sizes = [2, 128], strides = [1, 1]} : vector<2x384xf32> to vector<2x128xf32>
    %256 = arith.addf %254, %255 : vector<2x128xf32>
    %257 = arith.negf %256 : vector<2x128xf32>
    %258 = math.exp %257 : vector<2x128xf32>
    %cst_92 = arith.constant 1.000000e+00 : f32
    %259 = vector.broadcast %cst_92 : f32 to vector<2x128xf32>
    %260 = arith.addf %259, %258 : vector<2x128xf32>
    %261 = arith.divf %259, %260 : vector<2x128xf32>
    %262 = vector.extract_strided_slice %249 {offsets = [0, 128], sizes = [2, 128], strides = [1, 1]} : vector<2x384xf32> to vector<2x128xf32>
    %263 = vector.extract_strided_slice %253 {offsets = [0, 128], sizes = [2, 128], strides = [1, 1]} : vector<2x384xf32> to vector<2x128xf32>
    %264 = arith.addf %262, %263 : vector<2x128xf32>
    %265 = arith.negf %264 : vector<2x128xf32>
    %266 = math.exp %265 : vector<2x128xf32>
    %cst_93 = arith.constant 1.000000e+00 : f32
    %267 = vector.broadcast %cst_93 : f32 to vector<2x128xf32>
    %268 = arith.addf %267, %266 : vector<2x128xf32>
    %269 = arith.divf %267, %268 : vector<2x128xf32>
    %270 = vector.extract_strided_slice %249 {offsets = [0, 256], sizes = [2, 128], strides = [1, 1]} : vector<2x384xf32> to vector<2x128xf32>
    %271 = vector.extract_strided_slice %253 {offsets = [0, 256], sizes = [2, 128], strides = [1, 1]} : vector<2x384xf32> to vector<2x128xf32>
    %272 = arith.mulf %261, %271 : vector<2x128xf32>
    %273 = arith.addf %270, %272 : vector<2x128xf32>
    %274 = math.tanh %273 : vector<2x128xf32>
    %cst_94 = arith.constant 1.000000e+00 : f32
    %275 = vector.broadcast %cst_94 : f32 to vector<2x128xf32>
    %276 = arith.subf %275, %269 : vector<2x128xf32>
    %277 = arith.mulf %276, %274 : vector<2x128xf32>
    %278 = arith.mulf %269, %248 : vector<2x128xf32>
    %279 = arith.addf %277, %278 : vector<2x128xf32>
    %c4_95 = arith.constant 4 : index
    %c0_96 = arith.constant 0 : index
    %280 = vector.load %arg9[%c4_95, %c0_96] : memref<16x384xf32, #tpu.memory_space<vmem>>, vector<2x384xf32>
    %281 = arith.truncf %279 : vector<2x128xf32> to vector<2x128xbf16>
    %c0_97 = arith.constant 0 : index
    %c0_98 = arith.constant 0 : index
    %282 = vector.load %arg3[%c0_97, %c0_98] : memref<128x384xbf16, #tpu.memory_space<vmem>>, vector<128x384xbf16>
    %cst_99 = arith.constant dense<0.000000e+00> : vector<2x384xf32>
    %283 = tpu.matmul %281, %282, %cst_99 {dimension_numbers = #tpu.dot_dimension_numbers<[1], [0], [0], [1], [0, 0, 1, 1], [], []>} : vector<2x128xbf16>, vector<128x384xbf16>, vector<2x384xf32> -> vector<2x384xf32>
    %284 = arith.addf %283, %5 : vector<2x384xf32>
    %285 = vector.extract_strided_slice %280 {offsets = [0, 0], sizes = [2, 128], strides = [1, 1]} : vector<2x384xf32> to vector<2x128xf32>
    %286 = vector.extract_strided_slice %284 {offsets = [0, 0], sizes = [2, 128], strides = [1, 1]} : vector<2x384xf32> to vector<2x128xf32>
    %287 = arith.addf %285, %286 : vector<2x128xf32>
    %288 = arith.negf %287 : vector<2x128xf32>
    %289 = math.exp %288 : vector<2x128xf32>
    %cst_100 = arith.constant 1.000000e+00 : f32
    %290 = vector.broadcast %cst_100 : f32 to vector<2x128xf32>
    %291 = arith.addf %290, %289 : vector<2x128xf32>
    %292 = arith.divf %290, %291 : vector<2x128xf32>
    %293 = vector.extract_strided_slice %280 {offsets = [0, 128], sizes = [2, 128], strides = [1, 1]} : vector<2x384xf32> to vector<2x128xf32>
    %294 = vector.extract_strided_slice %284 {offsets = [0, 128], sizes = [2, 128], strides = [1, 1]} : vector<2x384xf32> to vector<2x128xf32>
    %295 = arith.addf %293, %294 : vector<2x128xf32>
    %296 = arith.negf %295 : vector<2x128xf32>
    %297 = math.exp %296 : vector<2x128xf32>
    %cst_101 = arith.constant 1.000000e+00 : f32
    %298 = vector.broadcast %cst_101 : f32 to vector<2x128xf32>
    %299 = arith.addf %298, %297 : vector<2x128xf32>
    %300 = arith.divf %298, %299 : vector<2x128xf32>
    %301 = vector.extract_strided_slice %280 {offsets = [0, 256], sizes = [2, 128], strides = [1, 1]} : vector<2x384xf32> to vector<2x128xf32>
    %302 = vector.extract_strided_slice %284 {offsets = [0, 256], sizes = [2, 128], strides = [1, 1]} : vector<2x384xf32> to vector<2x128xf32>
    %303 = arith.mulf %292, %302 : vector<2x128xf32>
    %304 = arith.addf %301, %303 : vector<2x128xf32>
    %305 = math.tanh %304 : vector<2x128xf32>
    %cst_102 = arith.constant 1.000000e+00 : f32
    %306 = vector.broadcast %cst_102 : f32 to vector<2x128xf32>
    %307 = arith.subf %306, %300 : vector<2x128xf32>
    %308 = arith.mulf %307, %305 : vector<2x128xf32>
    %309 = arith.mulf %300, %279 : vector<2x128xf32>
    %310 = arith.addf %308, %309 : vector<2x128xf32>
    %c6_103 = arith.constant 6 : index
    %c0_104 = arith.constant 0 : index
    %311 = vector.load %arg9[%c6_103, %c0_104] : memref<16x384xf32, #tpu.memory_space<vmem>>, vector<2x384xf32>
    %312 = arith.truncf %310 : vector<2x128xf32> to vector<2x128xbf16>
    %c0_105 = arith.constant 0 : index
    %c0_106 = arith.constant 0 : index
    %313 = vector.load %arg3[%c0_105, %c0_106] : memref<128x384xbf16, #tpu.memory_space<vmem>>, vector<128x384xbf16>
    %cst_107 = arith.constant dense<0.000000e+00> : vector<2x384xf32>
    %314 = tpu.matmul %312, %313, %cst_107 {dimension_numbers = #tpu.dot_dimension_numbers<[1], [0], [0], [1], [0, 0, 1, 1], [], []>} : vector<2x128xbf16>, vector<128x384xbf16>, vector<2x384xf32> -> vector<2x384xf32>
    %315 = arith.addf %314, %5 : vector<2x384xf32>
    %316 = vector.extract_strided_slice %311 {offsets = [0, 0], sizes = [2, 128], strides = [1, 1]} : vector<2x384xf32> to vector<2x128xf32>
    %317 = vector.extract_strided_slice %315 {offsets = [0, 0], sizes = [2, 128], strides = [1, 1]} : vector<2x384xf32> to vector<2x128xf32>
    %318 = arith.addf %316, %317 : vector<2x128xf32>
    %319 = arith.negf %318 : vector<2x128xf32>
    %320 = math.exp %319 : vector<2x128xf32>
    %cst_108 = arith.constant 1.000000e+00 : f32
    %321 = vector.broadcast %cst_108 : f32 to vector<2x128xf32>
    %322 = arith.addf %321, %320 : vector<2x128xf32>
    %323 = arith.divf %321, %322 : vector<2x128xf32>
    %324 = vector.extract_strided_slice %311 {offsets = [0, 128], sizes = [2, 128], strides = [1, 1]} : vector<2x384xf32> to vector<2x128xf32>
    %325 = vector.extract_strided_slice %315 {offsets = [0, 128], sizes = [2, 128], strides = [1, 1]} : vector<2x384xf32> to vector<2x128xf32>
    %326 = arith.addf %324, %325 : vector<2x128xf32>
    %327 = arith.negf %326 : vector<2x128xf32>
    %328 = math.exp %327 : vector<2x128xf32>
    %cst_109 = arith.constant 1.000000e+00 : f32
    %329 = vector.broadcast %cst_109 : f32 to vector<2x128xf32>
    %330 = arith.addf %329, %328 : vector<2x128xf32>
    %331 = arith.divf %329, %330 : vector<2x128xf32>
    %332 = vector.extract_strided_slice %311 {offsets = [0, 256], sizes = [2, 128], strides = [1, 1]} : vector<2x384xf32> to vector<2x128xf32>
    %333 = vector.extract_strided_slice %315 {offsets = [0, 256], sizes = [2, 128], strides = [1, 1]} : vector<2x384xf32> to vector<2x128xf32>
    %334 = arith.mulf %323, %333 : vector<2x128xf32>
    %335 = arith.addf %332, %334 : vector<2x128xf32>
    %336 = math.tanh %335 : vector<2x128xf32>
    %cst_110 = arith.constant 1.000000e+00 : f32
    %337 = vector.broadcast %cst_110 : f32 to vector<2x128xf32>
    %338 = arith.subf %337, %331 : vector<2x128xf32>
    %339 = arith.mulf %338, %336 : vector<2x128xf32>
    %340 = arith.mulf %331, %310 : vector<2x128xf32>
    %341 = arith.addf %339, %340 : vector<2x128xf32>
    %342 = arith.truncf %341 : vector<2x128xf32> to vector<2x128xbf16>
    %c8 = arith.constant 8 : index
    %c0_111 = arith.constant 0 : index
    %343 = vector.load %arg10[%c8, %c0_111] : memref<16x128xbf16, #tpu.memory_space<vmem>>, vector<2x128xbf16>
    tpu.vector_store %arg10[%c8, %c0_111], %342 {strides = array<i32>} : memref<16x128xbf16, #tpu.memory_space<vmem>>, vector<2x128xbf16>,
    %c0_112 = arith.constant 0 : index
    %c0_113 = arith.constant 0 : index
    %344 = vector.load %arg2[%c0_112, %c0_113] : memref<128x384xbf16, #tpu.memory_space<vmem>>, vector<128x384xbf16>
    %cst_114 = arith.constant dense<0.000000e+00> : vector<2x384xf32>
    %345 = tpu.matmul %342, %344, %cst_114 {dimension_numbers = #tpu.dot_dimension_numbers<[1], [0], [0], [1], [0, 0, 1, 1], [], []>} : vector<2x128xbf16>, vector<128x384xbf16>, vector<2x384xf32> -> vector<2x384xf32>
    %346 = arith.addf %345, %2 : vector<2x384xf32>
    %c8_115 = arith.constant 8 : index
    %c0_116 = arith.constant 0 : index
    %347 = vector.load %arg9[%c8_115, %c0_116] : memref<16x384xf32, #tpu.memory_space<vmem>>, vector<2x384xf32>
    tpu.vector_store %arg9[%c8_115, %c0_116], %346 {strides = array<i32>} : memref<16x384xf32, #tpu.memory_space<vmem>>, vector<2x384xf32>,
    %c0_117 = arith.constant 0 : index
    %c0_118 = arith.constant 0 : index
    %348 = vector.load %arg9[%c0_117, %c0_118] : memref<16x384xf32, #tpu.memory_space<vmem>>, vector<2x384xf32>
    %349 = arith.truncf %341 : vector<2x128xf32> to vector<2x128xbf16>
    %c0_119 = arith.constant 0 : index
    %c0_120 = arith.constant 0 : index
    %350 = vector.load %arg3[%c0_119, %c0_120] : memref<128x384xbf16, #tpu.memory_space<vmem>>, vector<128x384xbf16>
    %cst_121 = arith.constant dense<0.000000e+00> : vector<2x384xf32>
    %351 = tpu.matmul %349, %350, %cst_121 {dimension_numbers = #tpu.dot_dimension_numbers<[1], [0], [0], [1], [0, 0, 1, 1], [], []>} : vector<2x128xbf16>, vector<128x384xbf16>, vector<2x384xf32> -> vector<2x384xf32>
    %352 = arith.addf %351, %5 : vector<2x384xf32>
    %353 = vector.extract_strided_slice %348 {offsets = [0, 0], sizes = [2, 128], strides = [1, 1]} : vector<2x384xf32> to vector<2x128xf32>
    %354 = vector.extract_strided_slice %352 {offsets = [0, 0], sizes = [2, 128], strides = [1, 1]} : vector<2x384xf32> to vector<2x128xf32>
    %355 = arith.addf %353, %354 : vector<2x128xf32>
    %356 = arith.negf %355 : vector<2x128xf32>
    %357 = math.exp %356 : vector<2x128xf32>
    %cst_122 = arith.constant 1.000000e+00 : f32
    %358 = vector.broadcast %cst_122 : f32 to vector<2x128xf32>
    %359 = arith.addf %358, %357 : vector<2x128xf32>
    %360 = arith.divf %358, %359 : vector<2x128xf32>
    %361 = vector.extract_strided_slice %348 {offsets = [0, 128], sizes = [2, 128], strides = [1, 1]} : vector<2x384xf32> to vector<2x128xf32>
    %362 = vector.extract_strided_slice %352 {offsets = [0, 128], sizes = [2, 128], strides = [1, 1]} : vector<2x384xf32> to vector<2x128xf32>
    %363 = arith.addf %361, %362 : vector<2x128xf32>
    %364 = arith.negf %363 : vector<2x128xf32>
    %365 = math.exp %364 : vector<2x128xf32>
    %cst_123 = arith.constant 1.000000e+00 : f32
    %366 = vector.broadcast %cst_123 : f32 to vector<2x128xf32>
    %367 = arith.addf %366, %365 : vector<2x128xf32>
    %368 = arith.divf %366, %367 : vector<2x128xf32>
    %369 = vector.extract_strided_slice %348 {offsets = [0, 256], sizes = [2, 128], strides = [1, 1]} : vector<2x384xf32> to vector<2x128xf32>
    %370 = vector.extract_strided_slice %352 {offsets = [0, 256], sizes = [2, 128], strides = [1, 1]} : vector<2x384xf32> to vector<2x128xf32>
    %371 = arith.mulf %360, %370 : vector<2x128xf32>
    %372 = arith.addf %369, %371 : vector<2x128xf32>
    %373 = math.tanh %372 : vector<2x128xf32>
    %cst_124 = arith.constant 1.000000e+00 : f32
    %374 = vector.broadcast %cst_124 : f32 to vector<2x128xf32>
    %375 = arith.subf %374, %368 : vector<2x128xf32>
    %376 = arith.mulf %375, %373 : vector<2x128xf32>
    %377 = arith.mulf %368, %341 : vector<2x128xf32>
    %378 = arith.addf %376, %377 : vector<2x128xf32>
    %c2_125 = arith.constant 2 : index
    %c0_126 = arith.constant 0 : index
    %379 = vector.load %arg9[%c2_125, %c0_126] : memref<16x384xf32, #tpu.memory_space<vmem>>, vector<2x384xf32>
    %380 = arith.truncf %378 : vector<2x128xf32> to vector<2x128xbf16>
    %c0_127 = arith.constant 0 : index
    %c0_128 = arith.constant 0 : index
    %381 = vector.load %arg3[%c0_127, %c0_128] : memref<128x384xbf16, #tpu.memory_space<vmem>>, vector<128x384xbf16>
    %cst_129 = arith.constant dense<0.000000e+00> : vector<2x384xf32>
    %382 = tpu.matmul %380, %381, %cst_129 {dimension_numbers = #tpu.dot_dimension_numbers<[1], [0], [0], [1], [0, 0, 1, 1], [], []>} : vector<2x128xbf16>, vector<128x384xbf16>, vector<2x384xf32> -> vector<2x384xf32>
    %383 = arith.addf %382, %5 : vector<2x384xf32>
    %384 = vector.extract_strided_slice %379 {offsets = [0, 0], sizes = [2, 128], strides = [1, 1]} : vector<2x384xf32> to vector<2x128xf32>
    %385 = vector.extract_strided_slice %383 {offsets = [0, 0], sizes = [2, 128], strides = [1, 1]} : vector<2x384xf32> to vector<2x128xf32>
    %386 = arith.addf %384, %385 : vector<2x128xf32>
    %387 = arith.negf %386 : vector<2x128xf32>
    %388 = math.exp %387 : vector<2x128xf32>
    %cst_130 = arith.constant 1.000000e+00 : f32
    %389 = vector.broadcast %cst_130 : f32 to vector<2x128xf32>
    %390 = arith.addf %389, %388 : vector<2x128xf32>
    %391 = arith.divf %389, %390 : vector<2x128xf32>
    %392 = vector.extract_strided_slice %379 {offsets = [0, 128], sizes = [2, 128], strides = [1, 1]} : vector<2x384xf32> to vector<2x128xf32>
    %393 = vector.extract_strided_slice %383 {offsets = [0, 128], sizes = [2, 128], strides = [1, 1]} : vector<2x384xf32> to vector<2x128xf32>
    %394 = arith.addf %392, %393 : vector<2x128xf32>
    %395 = arith.negf %394 : vector<2x128xf32>
    %396 = math.exp %395 : vector<2x128xf32>
    %cst_131 = arith.constant 1.000000e+00 : f32
    %397 = vector.broadcast %cst_131 : f32 to vector<2x128xf32>
    %398 = arith.addf %397, %396 : vector<2x128xf32>
    %399 = arith.divf %397, %398 : vector<2x128xf32>
    %400 = vector.extract_strided_slice %379 {offsets = [0, 256], sizes = [2, 128], strides = [1, 1]} : vector<2x384xf32> to vector<2x128xf32>
    %401 = vector.extract_strided_slice %383 {offsets = [0, 256], sizes = [2, 128], strides = [1, 1]} : vector<2x384xf32> to vector<2x128xf32>
    %402 = arith.mulf %391, %401 : vector<2x128xf32>
    %403 = arith.addf %400, %402 : vector<2x128xf32>
    %404 = math.tanh %403 : vector<2x128xf32>
    %cst_132 = arith.constant 1.000000e+00 : f32
    %405 = vector.broadcast %cst_132 : f32 to vector<2x128xf32>
    %406 = arith.subf %405, %399 : vector<2x128xf32>
    %407 = arith.mulf %406, %404 : vector<2x128xf32>
    %408 = arith.mulf %399, %378 : vector<2x128xf32>
    %409 = arith.addf %407, %408 : vector<2x128xf32>
    %c4_133 = arith.constant 4 : index
    %c0_134 = arith.constant 0 : index
    %410 = vector.load %arg9[%c4_133, %c0_134] : memref<16x384xf32, #tpu.memory_space<vmem>>, vector<2x384xf32>
    %411 = arith.truncf %409 : vector<2x128xf32> to vector<2x128xbf16>
    %c0_135 = arith.constant 0 : index
    %c0_136 = arith.constant 0 : index
    %412 = vector.load %arg3[%c0_135, %c0_136] : memref<128x384xbf16, #tpu.memory_space<vmem>>, vector<128x384xbf16>
    %cst_137 = arith.constant dense<0.000000e+00> : vector<2x384xf32>
    %413 = tpu.matmul %411, %412, %cst_137 {dimension_numbers = #tpu.dot_dimension_numbers<[1], [0], [0], [1], [0, 0, 1, 1], [], []>} : vector<2x128xbf16>, vector<128x384xbf16>, vector<2x384xf32> -> vector<2x384xf32>
    %414 = arith.addf %413, %5 : vector<2x384xf32>
    %415 = vector.extract_strided_slice %410 {offsets = [0, 0], sizes = [2, 128], strides = [1, 1]} : vector<2x384xf32> to vector<2x128xf32>
    %416 = vector.extract_strided_slice %414 {offsets = [0, 0], sizes = [2, 128], strides = [1, 1]} : vector<2x384xf32> to vector<2x128xf32>
    %417 = arith.addf %415, %416 : vector<2x128xf32>
    %418 = arith.negf %417 : vector<2x128xf32>
    %419 = math.exp %418 : vector<2x128xf32>
    %cst_138 = arith.constant 1.000000e+00 : f32
    %420 = vector.broadcast %cst_138 : f32 to vector<2x128xf32>
    %421 = arith.addf %420, %419 : vector<2x128xf32>
    %422 = arith.divf %420, %421 : vector<2x128xf32>
    %423 = vector.extract_strided_slice %410 {offsets = [0, 128], sizes = [2, 128], strides = [1, 1]} : vector<2x384xf32> to vector<2x128xf32>
    %424 = vector.extract_strided_slice %414 {offsets = [0, 128], sizes = [2, 128], strides = [1, 1]} : vector<2x384xf32> to vector<2x128xf32>
    %425 = arith.addf %423, %424 : vector<2x128xf32>
    %426 = arith.negf %425 : vector<2x128xf32>
    %427 = math.exp %426 : vector<2x128xf32>
    %cst_139 = arith.constant 1.000000e+00 : f32
    %428 = vector.broadcast %cst_139 : f32 to vector<2x128xf32>
    %429 = arith.addf %428, %427 : vector<2x128xf32>
    %430 = arith.divf %428, %429 : vector<2x128xf32>
    %431 = vector.extract_strided_slice %410 {offsets = [0, 256], sizes = [2, 128], strides = [1, 1]} : vector<2x384xf32> to vector<2x128xf32>
    %432 = vector.extract_strided_slice %414 {offsets = [0, 256], sizes = [2, 128], strides = [1, 1]} : vector<2x384xf32> to vector<2x128xf32>
    %433 = arith.mulf %422, %432 : vector<2x128xf32>
    %434 = arith.addf %431, %433 : vector<2x128xf32>
    %435 = math.tanh %434 : vector<2x128xf32>
    %cst_140 = arith.constant 1.000000e+00 : f32
    %436 = vector.broadcast %cst_140 : f32 to vector<2x128xf32>
    %437 = arith.subf %436, %430 : vector<2x128xf32>
    %438 = arith.mulf %437, %435 : vector<2x128xf32>
    %439 = arith.mulf %430, %409 : vector<2x128xf32>
    %440 = arith.addf %438, %439 : vector<2x128xf32>
    %c6_141 = arith.constant 6 : index
    %c0_142 = arith.constant 0 : index
    %441 = vector.load %arg9[%c6_141, %c0_142] : memref<16x384xf32, #tpu.memory_space<vmem>>, vector<2x384xf32>
    %442 = arith.truncf %440 : vector<2x128xf32> to vector<2x128xbf16>
    %c0_143 = arith.constant 0 : index
    %c0_144 = arith.constant 0 : index
    %443 = vector.load %arg3[%c0_143, %c0_144] : memref<128x384xbf16, #tpu.memory_space<vmem>>, vector<128x384xbf16>
    %cst_145 = arith.constant dense<0.000000e+00> : vector<2x384xf32>
    %444 = tpu.matmul %442, %443, %cst_145 {dimension_numbers = #tpu.dot_dimension_numbers<[1], [0], [0], [1], [0, 0, 1, 1], [], []>} : vector<2x128xbf16>, vector<128x384xbf16>, vector<2x384xf32> -> vector<2x384xf32>
    %445 = arith.addf %444, %5 : vector<2x384xf32>
    %446 = vector.extract_strided_slice %441 {offsets = [0, 0], sizes = [2, 128], strides = [1, 1]} : vector<2x384xf32> to vector<2x128xf32>
    %447 = vector.extract_strided_slice %445 {offsets = [0, 0], sizes = [2, 128], strides = [1, 1]} : vector<2x384xf32> to vector<2x128xf32>
    %448 = arith.addf %446, %447 : vector<2x128xf32>
    %449 = arith.negf %448 : vector<2x128xf32>
    %450 = math.exp %449 : vector<2x128xf32>
    %cst_146 = arith.constant 1.000000e+00 : f32
    %451 = vector.broadcast %cst_146 : f32 to vector<2x128xf32>
    %452 = arith.addf %451, %450 : vector<2x128xf32>
    %453 = arith.divf %451, %452 : vector<2x128xf32>
    %454 = vector.extract_strided_slice %441 {offsets = [0, 128], sizes = [2, 128], strides = [1, 1]} : vector<2x384xf32> to vector<2x128xf32>
    %455 = vector.extract_strided_slice %445 {offsets = [0, 128], sizes = [2, 128], strides = [1, 1]} : vector<2x384xf32> to vector<2x128xf32>
    %456 = arith.addf %454, %455 : vector<2x128xf32>
    %457 = arith.negf %456 : vector<2x128xf32>
    %458 = math.exp %457 : vector<2x128xf32>
    %cst_147 = arith.constant 1.000000e+00 : f32
    %459 = vector.broadcast %cst_147 : f32 to vector<2x128xf32>
    %460 = arith.addf %459, %458 : vector<2x128xf32>
    %461 = arith.divf %459, %460 : vector<2x128xf32>
    %462 = vector.extract_strided_slice %441 {offsets = [0, 256], sizes = [2, 128], strides = [1, 1]} : vector<2x384xf32> to vector<2x128xf32>
    %463 = vector.extract_strided_slice %445 {offsets = [0, 256], sizes = [2, 128], strides = [1, 1]} : vector<2x384xf32> to vector<2x128xf32>
    %464 = arith.mulf %453, %463 : vector<2x128xf32>
    %465 = arith.addf %462, %464 : vector<2x128xf32>
    %466 = math.tanh %465 : vector<2x128xf32>
    %cst_148 = arith.constant 1.000000e+00 : f32
    %467 = vector.broadcast %cst_148 : f32 to vector<2x128xf32>
    %468 = arith.subf %467, %461 : vector<2x128xf32>
    %469 = arith.mulf %468, %466 : vector<2x128xf32>
    %470 = arith.mulf %461, %440 : vector<2x128xf32>
    %471 = arith.addf %469, %470 : vector<2x128xf32>
    %c8_149 = arith.constant 8 : index
    %c0_150 = arith.constant 0 : index
    %472 = vector.load %arg9[%c8_149, %c0_150] : memref<16x384xf32, #tpu.memory_space<vmem>>, vector<2x384xf32>
    %473 = arith.truncf %471 : vector<2x128xf32> to vector<2x128xbf16>
    %c0_151 = arith.constant 0 : index
    %c0_152 = arith.constant 0 : index
    %474 = vector.load %arg3[%c0_151, %c0_152] : memref<128x384xbf16, #tpu.memory_space<vmem>>, vector<128x384xbf16>
    %cst_153 = arith.constant dense<0.000000e+00> : vector<2x384xf32>
    %475 = tpu.matmul %473, %474, %cst_153 {dimension_numbers = #tpu.dot_dimension_numbers<[1], [0], [0], [1], [0, 0, 1, 1], [], []>} : vector<2x128xbf16>, vector<128x384xbf16>, vector<2x384xf32> -> vector<2x384xf32>
    %476 = arith.addf %475, %5 : vector<2x384xf32>
    %477 = vector.extract_strided_slice %472 {offsets = [0, 0], sizes = [2, 128], strides = [1, 1]} : vector<2x384xf32> to vector<2x128xf32>
    %478 = vector.extract_strided_slice %476 {offsets = [0, 0], sizes = [2, 128], strides = [1, 1]} : vector<2x384xf32> to vector<2x128xf32>
    %479 = arith.addf %477, %478 : vector<2x128xf32>
    %480 = arith.negf %479 : vector<2x128xf32>
    %481 = math.exp %480 : vector<2x128xf32>
    %cst_154 = arith.constant 1.000000e+00 : f32
    %482 = vector.broadcast %cst_154 : f32 to vector<2x128xf32>
    %483 = arith.addf %482, %481 : vector<2x128xf32>
    %484 = arith.divf %482, %483 : vector<2x128xf32>
    %485 = vector.extract_strided_slice %472 {offsets = [0, 128], sizes = [2, 128], strides = [1, 1]} : vector<2x384xf32> to vector<2x128xf32>
    %486 = vector.extract_strided_slice %476 {offsets = [0, 128], sizes = [2, 128], strides = [1, 1]} : vector<2x384xf32> to vector<2x128xf32>
    %487 = arith.addf %485, %486 : vector<2x128xf32>
    %488 = arith.negf %487 : vector<2x128xf32>
    %489 = math.exp %488 : vector<2x128xf32>
    %cst_155 = arith.constant 1.000000e+00 : f32
    %490 = vector.broadcast %cst_155 : f32 to vector<2x128xf32>
    %491 = arith.addf %490, %489 : vector<2x128xf32>
    %492 = arith.divf %490, %491 : vector<2x128xf32>
    %493 = vector.extract_strided_slice %472 {offsets = [0, 256], sizes = [2, 128], strides = [1, 1]} : vector<2x384xf32> to vector<2x128xf32>
    %494 = vector.extract_strided_slice %476 {offsets = [0, 256], sizes = [2, 128], strides = [1, 1]} : vector<2x384xf32> to vector<2x128xf32>
    %495 = arith.mulf %484, %494 : vector<2x128xf32>
    %496 = arith.addf %493, %495 : vector<2x128xf32>
    %497 = math.tanh %496 : vector<2x128xf32>
    %cst_156 = arith.constant 1.000000e+00 : f32
    %498 = vector.broadcast %cst_156 : f32 to vector<2x128xf32>
    %499 = arith.subf %498, %492 : vector<2x128xf32>
    %500 = arith.mulf %499, %497 : vector<2x128xf32>
    %501 = arith.mulf %492, %471 : vector<2x128xf32>
    %502 = arith.addf %500, %501 : vector<2x128xf32>
    %503 = arith.truncf %502 : vector<2x128xf32> to vector<2x128xbf16>
    %c10 = arith.constant 10 : index
    %c0_157 = arith.constant 0 : index
    %504 = vector.load %arg10[%c10, %c0_157] : memref<16x128xbf16, #tpu.memory_space<vmem>>, vector<2x128xbf16>
    tpu.vector_store %arg10[%c10, %c0_157], %503 {strides = array<i32>} : memref<16x128xbf16, #tpu.memory_space<vmem>>, vector<2x128xbf16>,
    %c0_158 = arith.constant 0 : index
    %c0_159 = arith.constant 0 : index
    %505 = vector.load %arg2[%c0_158, %c0_159] : memref<128x384xbf16, #tpu.memory_space<vmem>>, vector<128x384xbf16>
    %cst_160 = arith.constant dense<0.000000e+00> : vector<2x384xf32>
    %506 = tpu.matmul %503, %505, %cst_160 {dimension_numbers = #tpu.dot_dimension_numbers<[1], [0], [0], [1], [0, 0, 1, 1], [], []>} : vector<2x128xbf16>, vector<128x384xbf16>, vector<2x384xf32> -> vector<2x384xf32>
    %507 = arith.addf %506, %2 : vector<2x384xf32>
    %c10_161 = arith.constant 10 : index
    %c0_162 = arith.constant 0 : index
    %508 = vector.load %arg9[%c10_161, %c0_162] : memref<16x384xf32, #tpu.memory_space<vmem>>, vector<2x384xf32>
    tpu.vector_store %arg9[%c10_161, %c0_162], %507 {strides = array<i32>} : memref<16x384xf32, #tpu.memory_space<vmem>>, vector<2x384xf32>,
    %c0_163 = arith.constant 0 : index
    %c0_164 = arith.constant 0 : index
    %509 = vector.load %arg9[%c0_163, %c0_164] : memref<16x384xf32, #tpu.memory_space<vmem>>, vector<2x384xf32>
    %510 = arith.truncf %502 : vector<2x128xf32> to vector<2x128xbf16>
    %c0_165 = arith.constant 0 : index
    %c0_166 = arith.constant 0 : index
    %511 = vector.load %arg3[%c0_165, %c0_166] : memref<128x384xbf16, #tpu.memory_space<vmem>>, vector<128x384xbf16>
    %cst_167 = arith.constant dense<0.000000e+00> : vector<2x384xf32>
    %512 = tpu.matmul %510, %511, %cst_167 {dimension_numbers = #tpu.dot_dimension_numbers<[1], [0], [0], [1], [0, 0, 1, 1], [], []>} : vector<2x128xbf16>, vector<128x384xbf16>, vector<2x384xf32> -> vector<2x384xf32>
    %513 = arith.addf %512, %5 : vector<2x384xf32>
    %514 = vector.extract_strided_slice %509 {offsets = [0, 0], sizes = [2, 128], strides = [1, 1]} : vector<2x384xf32> to vector<2x128xf32>
    %515 = vector.extract_strided_slice %513 {offsets = [0, 0], sizes = [2, 128], strides = [1, 1]} : vector<2x384xf32> to vector<2x128xf32>
    %516 = arith.addf %514, %515 : vector<2x128xf32>
    %517 = arith.negf %516 : vector<2x128xf32>
    %518 = math.exp %517 : vector<2x128xf32>
    %cst_168 = arith.constant 1.000000e+00 : f32
    %519 = vector.broadcast %cst_168 : f32 to vector<2x128xf32>
    %520 = arith.addf %519, %518 : vector<2x128xf32>
    %521 = arith.divf %519, %520 : vector<2x128xf32>
    %522 = vector.extract_strided_slice %509 {offsets = [0, 128], sizes = [2, 128], strides = [1, 1]} : vector<2x384xf32> to vector<2x128xf32>
    %523 = vector.extract_strided_slice %513 {offsets = [0, 128], sizes = [2, 128], strides = [1, 1]} : vector<2x384xf32> to vector<2x128xf32>
    %524 = arith.addf %522, %523 : vector<2x128xf32>
    %525 = arith.negf %524 : vector<2x128xf32>
    %526 = math.exp %525 : vector<2x128xf32>
    %cst_169 = arith.constant 1.000000e+00 : f32
    %527 = vector.broadcast %cst_169 : f32 to vector<2x128xf32>
    %528 = arith.addf %527, %526 : vector<2x128xf32>
    %529 = arith.divf %527, %528 : vector<2x128xf32>
    %530 = vector.extract_strided_slice %509 {offsets = [0, 256], sizes = [2, 128], strides = [1, 1]} : vector<2x384xf32> to vector<2x128xf32>
    %531 = vector.extract_strided_slice %513 {offsets = [0, 256], sizes = [2, 128], strides = [1, 1]} : vector<2x384xf32> to vector<2x128xf32>
    %532 = arith.mulf %521, %531 : vector<2x128xf32>
    %533 = arith.addf %530, %532 : vector<2x128xf32>
    %534 = math.tanh %533 : vector<2x128xf32>
    %cst_170 = arith.constant 1.000000e+00 : f32
    %535 = vector.broadcast %cst_170 : f32 to vector<2x128xf32>
    %536 = arith.subf %535, %529 : vector<2x128xf32>
    %537 = arith.mulf %536, %534 : vector<2x128xf32>
    %538 = arith.mulf %529, %502 : vector<2x128xf32>
    %539 = arith.addf %537, %538 : vector<2x128xf32>
    %c2_171 = arith.constant 2 : index
    %c0_172 = arith.constant 0 : index
    %540 = vector.load %arg9[%c2_171, %c0_172] : memref<16x384xf32, #tpu.memory_space<vmem>>, vector<2x384xf32>
    %541 = arith.truncf %539 : vector<2x128xf32> to vector<2x128xbf16>
    %c0_173 = arith.constant 0 : index
    %c0_174 = arith.constant 0 : index
    %542 = vector.load %arg3[%c0_173, %c0_174] : memref<128x384xbf16, #tpu.memory_space<vmem>>, vector<128x384xbf16>
    %cst_175 = arith.constant dense<0.000000e+00> : vector<2x384xf32>
    %543 = tpu.matmul %541, %542, %cst_175 {dimension_numbers = #tpu.dot_dimension_numbers<[1], [0], [0], [1], [0, 0, 1, 1], [], []>} : vector<2x128xbf16>, vector<128x384xbf16>, vector<2x384xf32> -> vector<2x384xf32>
    %544 = arith.addf %543, %5 : vector<2x384xf32>
    %545 = vector.extract_strided_slice %540 {offsets = [0, 0], sizes = [2, 128], strides = [1, 1]} : vector<2x384xf32> to vector<2x128xf32>
    %546 = vector.extract_strided_slice %544 {offsets = [0, 0], sizes = [2, 128], strides = [1, 1]} : vector<2x384xf32> to vector<2x128xf32>
    %547 = arith.addf %545, %546 : vector<2x128xf32>
    %548 = arith.negf %547 : vector<2x128xf32>
    %549 = math.exp %548 : vector<2x128xf32>
    %cst_176 = arith.constant 1.000000e+00 : f32
    %550 = vector.broadcast %cst_176 : f32 to vector<2x128xf32>
    %551 = arith.addf %550, %549 : vector<2x128xf32>
    %552 = arith.divf %550, %551 : vector<2x128xf32>
    %553 = vector.extract_strided_slice %540 {offsets = [0, 128], sizes = [2, 128], strides = [1, 1]} : vector<2x384xf32> to vector<2x128xf32>
    %554 = vector.extract_strided_slice %544 {offsets = [0, 128], sizes = [2, 128], strides = [1, 1]} : vector<2x384xf32> to vector<2x128xf32>
    %555 = arith.addf %553, %554 : vector<2x128xf32>
    %556 = arith.negf %555 : vector<2x128xf32>
    %557 = math.exp %556 : vector<2x128xf32>
    %cst_177 = arith.constant 1.000000e+00 : f32
    %558 = vector.broadcast %cst_177 : f32 to vector<2x128xf32>
    %559 = arith.addf %558, %557 : vector<2x128xf32>
    %560 = arith.divf %558, %559 : vector<2x128xf32>
    %561 = vector.extract_strided_slice %540 {offsets = [0, 256], sizes = [2, 128], strides = [1, 1]} : vector<2x384xf32> to vector<2x128xf32>
    %562 = vector.extract_strided_slice %544 {offsets = [0, 256], sizes = [2, 128], strides = [1, 1]} : vector<2x384xf32> to vector<2x128xf32>
    %563 = arith.mulf %552, %562 : vector<2x128xf32>
    %564 = arith.addf %561, %563 : vector<2x128xf32>
    %565 = math.tanh %564 : vector<2x128xf32>
    %cst_178 = arith.constant 1.000000e+00 : f32
    %566 = vector.broadcast %cst_178 : f32 to vector<2x128xf32>
    %567 = arith.subf %566, %560 : vector<2x128xf32>
    %568 = arith.mulf %567, %565 : vector<2x128xf32>
    %569 = arith.mulf %560, %539 : vector<2x128xf32>
    %570 = arith.addf %568, %569 : vector<2x128xf32>
    %c4_179 = arith.constant 4 : index
    %c0_180 = arith.constant 0 : index
    %571 = vector.load %arg9[%c4_179, %c0_180] : memref<16x384xf32, #tpu.memory_space<vmem>>, vector<2x384xf32>
    %572 = arith.truncf %570 : vector<2x128xf32> to vector<2x128xbf16>
    %c0_181 = arith.constant 0 : index
    %c0_182 = arith.constant 0 : index
    %573 = vector.load %arg3[%c0_181, %c0_182] : memref<128x384xbf16, #tpu.memory_space<vmem>>, vector<128x384xbf16>
    %cst_183 = arith.constant dense<0.000000e+00> : vector<2x384xf32>
    %574 = tpu.matmul %572, %573, %cst_183 {dimension_numbers = #tpu.dot_dimension_numbers<[1], [0], [0], [1], [0, 0, 1, 1], [], []>} : vector<2x128xbf16>, vector<128x384xbf16>, vector<2x384xf32> -> vector<2x384xf32>
    %575 = arith.addf %574, %5 : vector<2x384xf32>
    %576 = vector.extract_strided_slice %571 {offsets = [0, 0], sizes = [2, 128], strides = [1, 1]} : vector<2x384xf32> to vector<2x128xf32>
    %577 = vector.extract_strided_slice %575 {offsets = [0, 0], sizes = [2, 128], strides = [1, 1]} : vector<2x384xf32> to vector<2x128xf32>
    %578 = arith.addf %576, %577 : vector<2x128xf32>
    %579 = arith.negf %578 : vector<2x128xf32>
    %580 = math.exp %579 : vector<2x128xf32>
    %cst_184 = arith.constant 1.000000e+00 : f32
    %581 = vector.broadcast %cst_184 : f32 to vector<2x128xf32>
    %582 = arith.addf %581, %580 : vector<2x128xf32>
    %583 = arith.divf %581, %582 : vector<2x128xf32>
    %584 = vector.extract_strided_slice %571 {offsets = [0, 128], sizes = [2, 128], strides = [1, 1]} : vector<2x384xf32> to vector<2x128xf32>
    %585 = vector.extract_strided_slice %575 {offsets = [0, 128], sizes = [2, 128], strides = [1, 1]} : vector<2x384xf32> to vector<2x128xf32>
    %586 = arith.addf %584, %585 : vector<2x128xf32>
    %587 = arith.negf %586 : vector<2x128xf32>
    %588 = math.exp %587 : vector<2x128xf32>
    %cst_185 = arith.constant 1.000000e+00 : f32
    %589 = vector.broadcast %cst_185 : f32 to vector<2x128xf32>
    %590 = arith.addf %589, %588 : vector<2x128xf32>
    %591 = arith.divf %589, %590 : vector<2x128xf32>
    %592 = vector.extract_strided_slice %571 {offsets = [0, 256], sizes = [2, 128], strides = [1, 1]} : vector<2x384xf32> to vector<2x128xf32>
    %593 = vector.extract_strided_slice %575 {offsets = [0, 256], sizes = [2, 128], strides = [1, 1]} : vector<2x384xf32> to vector<2x128xf32>
    %594 = arith.mulf %583, %593 : vector<2x128xf32>
    %595 = arith.addf %592, %594 : vector<2x128xf32>
    %596 = math.tanh %595 : vector<2x128xf32>
    %cst_186 = arith.constant 1.000000e+00 : f32
    %597 = vector.broadcast %cst_186 : f32 to vector<2x128xf32>
    %598 = arith.subf %597, %591 : vector<2x128xf32>
    %599 = arith.mulf %598, %596 : vector<2x128xf32>
    %600 = arith.mulf %591, %570 : vector<2x128xf32>
    %601 = arith.addf %599, %600 : vector<2x128xf32>
    %c6_187 = arith.constant 6 : index
    %c0_188 = arith.constant 0 : index
    %602 = vector.load %arg9[%c6_187, %c0_188] : memref<16x384xf32, #tpu.memory_space<vmem>>, vector<2x384xf32>
    %603 = arith.truncf %601 : vector<2x128xf32> to vector<2x128xbf16>
    %c0_189 = arith.constant 0 : index
    %c0_190 = arith.constant 0 : index
    %604 = vector.load %arg3[%c0_189, %c0_190] : memref<128x384xbf16, #tpu.memory_space<vmem>>, vector<128x384xbf16>
    %cst_191 = arith.constant dense<0.000000e+00> : vector<2x384xf32>
    %605 = tpu.matmul %603, %604, %cst_191 {dimension_numbers = #tpu.dot_dimension_numbers<[1], [0], [0], [1], [0, 0, 1, 1], [], []>} : vector<2x128xbf16>, vector<128x384xbf16>, vector<2x384xf32> -> vector<2x384xf32>
    %606 = arith.addf %605, %5 : vector<2x384xf32>
    %607 = vector.extract_strided_slice %602 {offsets = [0, 0], sizes = [2, 128], strides = [1, 1]} : vector<2x384xf32> to vector<2x128xf32>
    %608 = vector.extract_strided_slice %606 {offsets = [0, 0], sizes = [2, 128], strides = [1, 1]} : vector<2x384xf32> to vector<2x128xf32>
    %609 = arith.addf %607, %608 : vector<2x128xf32>
    %610 = arith.negf %609 : vector<2x128xf32>
    %611 = math.exp %610 : vector<2x128xf32>
    %cst_192 = arith.constant 1.000000e+00 : f32
    %612 = vector.broadcast %cst_192 : f32 to vector<2x128xf32>
    %613 = arith.addf %612, %611 : vector<2x128xf32>
    %614 = arith.divf %612, %613 : vector<2x128xf32>
    %615 = vector.extract_strided_slice %602 {offsets = [0, 128], sizes = [2, 128], strides = [1, 1]} : vector<2x384xf32> to vector<2x128xf32>
    %616 = vector.extract_strided_slice %606 {offsets = [0, 128], sizes = [2, 128], strides = [1, 1]} : vector<2x384xf32> to vector<2x128xf32>
    %617 = arith.addf %615, %616 : vector<2x128xf32>
    %618 = arith.negf %617 : vector<2x128xf32>
    %619 = math.exp %618 : vector<2x128xf32>
    %cst_193 = arith.constant 1.000000e+00 : f32
    %620 = vector.broadcast %cst_193 : f32 to vector<2x128xf32>
    %621 = arith.addf %620, %619 : vector<2x128xf32>
    %622 = arith.divf %620, %621 : vector<2x128xf32>
    %623 = vector.extract_strided_slice %602 {offsets = [0, 256], sizes = [2, 128], strides = [1, 1]} : vector<2x384xf32> to vector<2x128xf32>
    %624 = vector.extract_strided_slice %606 {offsets = [0, 256], sizes = [2, 128], strides = [1, 1]} : vector<2x384xf32> to vector<2x128xf32>
    %625 = arith.mulf %614, %624 : vector<2x128xf32>
    %626 = arith.addf %623, %625 : vector<2x128xf32>
    %627 = math.tanh %626 : vector<2x128xf32>
    %cst_194 = arith.constant 1.000000e+00 : f32
    %628 = vector.broadcast %cst_194 : f32 to vector<2x128xf32>
    %629 = arith.subf %628, %622 : vector<2x128xf32>
    %630 = arith.mulf %629, %627 : vector<2x128xf32>
    %631 = arith.mulf %622, %601 : vector<2x128xf32>
    %632 = arith.addf %630, %631 : vector<2x128xf32>
    %c8_195 = arith.constant 8 : index
    %c0_196 = arith.constant 0 : index
    %633 = vector.load %arg9[%c8_195, %c0_196] : memref<16x384xf32, #tpu.memory_space<vmem>>, vector<2x384xf32>
    %634 = arith.truncf %632 : vector<2x128xf32> to vector<2x128xbf16>
    %c0_197 = arith.constant 0 : index
    %c0_198 = arith.constant 0 : index
    %635 = vector.load %arg3[%c0_197, %c0_198] : memref<128x384xbf16, #tpu.memory_space<vmem>>, vector<128x384xbf16>
    %cst_199 = arith.constant dense<0.000000e+00> : vector<2x384xf32>
    %636 = tpu.matmul %634, %635, %cst_199 {dimension_numbers = #tpu.dot_dimension_numbers<[1], [0], [0], [1], [0, 0, 1, 1], [], []>} : vector<2x128xbf16>, vector<128x384xbf16>, vector<2x384xf32> -> vector<2x384xf32>
    %637 = arith.addf %636, %5 : vector<2x384xf32>
    %638 = vector.extract_strided_slice %633 {offsets = [0, 0], sizes = [2, 128], strides = [1, 1]} : vector<2x384xf32> to vector<2x128xf32>
    %639 = vector.extract_strided_slice %637 {offsets = [0, 0], sizes = [2, 128], strides = [1, 1]} : vector<2x384xf32> to vector<2x128xf32>
    %640 = arith.addf %638, %639 : vector<2x128xf32>
    %641 = arith.negf %640 : vector<2x128xf32>
    %642 = math.exp %641 : vector<2x128xf32>
    %cst_200 = arith.constant 1.000000e+00 : f32
    %643 = vector.broadcast %cst_200 : f32 to vector<2x128xf32>
    %644 = arith.addf %643, %642 : vector<2x128xf32>
    %645 = arith.divf %643, %644 : vector<2x128xf32>
    %646 = vector.extract_strided_slice %633 {offsets = [0, 128], sizes = [2, 128], strides = [1, 1]} : vector<2x384xf32> to vector<2x128xf32>
    %647 = vector.extract_strided_slice %637 {offsets = [0, 128], sizes = [2, 128], strides = [1, 1]} : vector<2x384xf32> to vector<2x128xf32>
    %648 = arith.addf %646, %647 : vector<2x128xf32>
    %649 = arith.negf %648 : vector<2x128xf32>
    %650 = math.exp %649 : vector<2x128xf32>
    %cst_201 = arith.constant 1.000000e+00 : f32
    %651 = vector.broadcast %cst_201 : f32 to vector<2x128xf32>
    %652 = arith.addf %651, %650 : vector<2x128xf32>
    %653 = arith.divf %651, %652 : vector<2x128xf32>
    %654 = vector.extract_strided_slice %633 {offsets = [0, 256], sizes = [2, 128], strides = [1, 1]} : vector<2x384xf32> to vector<2x128xf32>
    %655 = vector.extract_strided_slice %637 {offsets = [0, 256], sizes = [2, 128], strides = [1, 1]} : vector<2x384xf32> to vector<2x128xf32>
    %656 = arith.mulf %645, %655 : vector<2x128xf32>
    %657 = arith.addf %654, %656 : vector<2x128xf32>
    %658 = math.tanh %657 : vector<2x128xf32>
    %cst_202 = arith.constant 1.000000e+00 : f32
    %659 = vector.broadcast %cst_202 : f32 to vector<2x128xf32>
    %660 = arith.subf %659, %653 : vector<2x128xf32>
    %661 = arith.mulf %660, %658 : vector<2x128xf32>
    %662 = arith.mulf %653, %632 : vector<2x128xf32>
    %663 = arith.addf %661, %662 : vector<2x128xf32>
    %c10_203 = arith.constant 10 : index
    %c0_204 = arith.constant 0 : index
    %664 = vector.load %arg9[%c10_203, %c0_204] : memref<16x384xf32, #tpu.memory_space<vmem>>, vector<2x384xf32>
    %665 = arith.truncf %663 : vector<2x128xf32> to vector<2x128xbf16>
    %c0_205 = arith.constant 0 : index
    %c0_206 = arith.constant 0 : index
    %666 = vector.load %arg3[%c0_205, %c0_206] : memref<128x384xbf16, #tpu.memory_space<vmem>>, vector<128x384xbf16>
    %cst_207 = arith.constant dense<0.000000e+00> : vector<2x384xf32>
    %667 = tpu.matmul %665, %666, %cst_207 {dimension_numbers = #tpu.dot_dimension_numbers<[1], [0], [0], [1], [0, 0, 1, 1], [], []>} : vector<2x128xbf16>, vector<128x384xbf16>, vector<2x384xf32> -> vector<2x384xf32>
    %668 = arith.addf %667, %5 : vector<2x384xf32>
    %669 = vector.extract_strided_slice %664 {offsets = [0, 0], sizes = [2, 128], strides = [1, 1]} : vector<2x384xf32> to vector<2x128xf32>
    %670 = vector.extract_strided_slice %668 {offsets = [0, 0], sizes = [2, 128], strides = [1, 1]} : vector<2x384xf32> to vector<2x128xf32>
    %671 = arith.addf %669, %670 : vector<2x128xf32>
    %672 = arith.negf %671 : vector<2x128xf32>
    %673 = math.exp %672 : vector<2x128xf32>
    %cst_208 = arith.constant 1.000000e+00 : f32
    %674 = vector.broadcast %cst_208 : f32 to vector<2x128xf32>
    %675 = arith.addf %674, %673 : vector<2x128xf32>
    %676 = arith.divf %674, %675 : vector<2x128xf32>
    %677 = vector.extract_strided_slice %664 {offsets = [0, 128], sizes = [2, 128], strides = [1, 1]} : vector<2x384xf32> to vector<2x128xf32>
    %678 = vector.extract_strided_slice %668 {offsets = [0, 128], sizes = [2, 128], strides = [1, 1]} : vector<2x384xf32> to vector<2x128xf32>
    %679 = arith.addf %677, %678 : vector<2x128xf32>
    %680 = arith.negf %679 : vector<2x128xf32>
    %681 = math.exp %680 : vector<2x128xf32>
    %cst_209 = arith.constant 1.000000e+00 : f32
    %682 = vector.broadcast %cst_209 : f32 to vector<2x128xf32>
    %683 = arith.addf %682, %681 : vector<2x128xf32>
    %684 = arith.divf %682, %683 : vector<2x128xf32>
    %685 = vector.extract_strided_slice %664 {offsets = [0, 256], sizes = [2, 128], strides = [1, 1]} : vector<2x384xf32> to vector<2x128xf32>
    %686 = vector.extract_strided_slice %668 {offsets = [0, 256], sizes = [2, 128], strides = [1, 1]} : vector<2x384xf32> to vector<2x128xf32>
    %687 = arith.mulf %676, %686 : vector<2x128xf32>
    %688 = arith.addf %685, %687 : vector<2x128xf32>
    %689 = math.tanh %688 : vector<2x128xf32>
    %cst_210 = arith.constant 1.000000e+00 : f32
    %690 = vector.broadcast %cst_210 : f32 to vector<2x128xf32>
    %691 = arith.subf %690, %684 : vector<2x128xf32>
    %692 = arith.mulf %691, %689 : vector<2x128xf32>
    %693 = arith.mulf %684, %663 : vector<2x128xf32>
    %694 = arith.addf %692, %693 : vector<2x128xf32>
    %695 = arith.truncf %694 : vector<2x128xf32> to vector<2x128xbf16>
    %c12 = arith.constant 12 : index
    %c0_211 = arith.constant 0 : index
    %696 = vector.load %arg10[%c12, %c0_211] : memref<16x128xbf16, #tpu.memory_space<vmem>>, vector<2x128xbf16>
    tpu.vector_store %arg10[%c12, %c0_211], %695 {strides = array<i32>} : memref<16x128xbf16, #tpu.memory_space<vmem>>, vector<2x128xbf16>,
    %c0_212 = arith.constant 0 : index
    %c0_213 = arith.constant 0 : index
    %697 = vector.load %arg2[%c0_212, %c0_213] : memref<128x384xbf16, #tpu.memory_space<vmem>>, vector<128x384xbf16>
    %cst_214 = arith.constant dense<0.000000e+00> : vector<2x384xf32>
    %698 = tpu.matmul %695, %697, %cst_214 {dimension_numbers = #tpu.dot_dimension_numbers<[1], [0], [0], [1], [0, 0, 1, 1], [], []>} : vector<2x128xbf16>, vector<128x384xbf16>, vector<2x384xf32> -> vector<2x384xf32>
    %699 = arith.addf %698, %2 : vector<2x384xf32>
    %c12_215 = arith.constant 12 : index
    %c0_216 = arith.constant 0 : index
    %700 = vector.load %arg9[%c12_215, %c0_216] : memref<16x384xf32, #tpu.memory_space<vmem>>, vector<2x384xf32>
    tpu.vector_store %arg9[%c12_215, %c0_216], %699 {strides = array<i32>} : memref<16x384xf32, #tpu.memory_space<vmem>>, vector<2x384xf32>,
    %c0_217 = arith.constant 0 : index
    %c0_218 = arith.constant 0 : index
    %701 = vector.load %arg9[%c0_217, %c0_218] : memref<16x384xf32, #tpu.memory_space<vmem>>, vector<2x384xf32>
    %702 = arith.truncf %694 : vector<2x128xf32> to vector<2x128xbf16>
    %c0_219 = arith.constant 0 : index
    %c0_220 = arith.constant 0 : index
    %703 = vector.load %arg3[%c0_219, %c0_220] : memref<128x384xbf16, #tpu.memory_space<vmem>>, vector<128x384xbf16>
    %cst_221 = arith.constant dense<0.000000e+00> : vector<2x384xf32>
    %704 = tpu.matmul %702, %703, %cst_221 {dimension_numbers = #tpu.dot_dimension_numbers<[1], [0], [0], [1], [0, 0, 1, 1], [], []>} : vector<2x128xbf16>, vector<128x384xbf16>, vector<2x384xf32> -> vector<2x384xf32>
    %705 = arith.addf %704, %5 : vector<2x384xf32>
    %706 = vector.extract_strided_slice %701 {offsets = [0, 0], sizes = [2, 128], strides = [1, 1]} : vector<2x384xf32> to vector<2x128xf32>
    %707 = vector.extract_strided_slice %705 {offsets = [0, 0], sizes = [2, 128], strides = [1, 1]} : vector<2x384xf32> to vector<2x128xf32>
    %708 = arith.addf %706, %707 : vector<2x128xf32>
    %709 = arith.negf %708 : vector<2x128xf32>
    %710 = math.exp %709 : vector<2x128xf32>
    %cst_222 = arith.constant 1.000000e+00 : f32
    %711 = vector.broadcast %cst_222 : f32 to vector<2x128xf32>
    %712 = arith.addf %711, %710 : vector<2x128xf32>
    %713 = arith.divf %711, %712 : vector<2x128xf32>
    %714 = vector.extract_strided_slice %701 {offsets = [0, 128], sizes = [2, 128], strides = [1, 1]} : vector<2x384xf32> to vector<2x128xf32>
    %715 = vector.extract_strided_slice %705 {offsets = [0, 128], sizes = [2, 128], strides = [1, 1]} : vector<2x384xf32> to vector<2x128xf32>
    %716 = arith.addf %714, %715 : vector<2x128xf32>
    %717 = arith.negf %716 : vector<2x128xf32>
    %718 = math.exp %717 : vector<2x128xf32>
    %cst_223 = arith.constant 1.000000e+00 : f32
    %719 = vector.broadcast %cst_223 : f32 to vector<2x128xf32>
    %720 = arith.addf %719, %718 : vector<2x128xf32>
    %721 = arith.divf %719, %720 : vector<2x128xf32>
    %722 = vector.extract_strided_slice %701 {offsets = [0, 256], sizes = [2, 128], strides = [1, 1]} : vector<2x384xf32> to vector<2x128xf32>
    %723 = vector.extract_strided_slice %705 {offsets = [0, 256], sizes = [2, 128], strides = [1, 1]} : vector<2x384xf32> to vector<2x128xf32>
    %724 = arith.mulf %713, %723 : vector<2x128xf32>
    %725 = arith.addf %722, %724 : vector<2x128xf32>
    %726 = math.tanh %725 : vector<2x128xf32>
    %cst_224 = arith.constant 1.000000e+00 : f32
    %727 = vector.broadcast %cst_224 : f32 to vector<2x128xf32>
    %728 = arith.subf %727, %721 : vector<2x128xf32>
    %729 = arith.mulf %728, %726 : vector<2x128xf32>
    %730 = arith.mulf %721, %694 : vector<2x128xf32>
    %731 = arith.addf %729, %730 : vector<2x128xf32>
    %c2_225 = arith.constant 2 : index
    %c0_226 = arith.constant 0 : index
    %732 = vector.load %arg9[%c2_225, %c0_226] : memref<16x384xf32, #tpu.memory_space<vmem>>, vector<2x384xf32>
    %733 = arith.truncf %731 : vector<2x128xf32> to vector<2x128xbf16>
    %c0_227 = arith.constant 0 : index
    %c0_228 = arith.constant 0 : index
    %734 = vector.load %arg3[%c0_227, %c0_228] : memref<128x384xbf16, #tpu.memory_space<vmem>>, vector<128x384xbf16>
    %cst_229 = arith.constant dense<0.000000e+00> : vector<2x384xf32>
    %735 = tpu.matmul %733, %734, %cst_229 {dimension_numbers = #tpu.dot_dimension_numbers<[1], [0], [0], [1], [0, 0, 1, 1], [], []>} : vector<2x128xbf16>, vector<128x384xbf16>, vector<2x384xf32> -> vector<2x384xf32>
    %736 = arith.addf %735, %5 : vector<2x384xf32>
    %737 = vector.extract_strided_slice %732 {offsets = [0, 0], sizes = [2, 128], strides = [1, 1]} : vector<2x384xf32> to vector<2x128xf32>
    %738 = vector.extract_strided_slice %736 {offsets = [0, 0], sizes = [2, 128], strides = [1, 1]} : vector<2x384xf32> to vector<2x128xf32>
    %739 = arith.addf %737, %738 : vector<2x128xf32>
    %740 = arith.negf %739 : vector<2x128xf32>
    %741 = math.exp %740 : vector<2x128xf32>
    %cst_230 = arith.constant 1.000000e+00 : f32
    %742 = vector.broadcast %cst_230 : f32 to vector<2x128xf32>
    %743 = arith.addf %742, %741 : vector<2x128xf32>
    %744 = arith.divf %742, %743 : vector<2x128xf32>
    %745 = vector.extract_strided_slice %732 {offsets = [0, 128], sizes = [2, 128], strides = [1, 1]} : vector<2x384xf32> to vector<2x128xf32>
    %746 = vector.extract_strided_slice %736 {offsets = [0, 128], sizes = [2, 128], strides = [1, 1]} : vector<2x384xf32> to vector<2x128xf32>
    %747 = arith.addf %745, %746 : vector<2x128xf32>
    %748 = arith.negf %747 : vector<2x128xf32>
    %749 = math.exp %748 : vector<2x128xf32>
    %cst_231 = arith.constant 1.000000e+00 : f32
    %750 = vector.broadcast %cst_231 : f32 to vector<2x128xf32>
    %751 = arith.addf %750, %749 : vector<2x128xf32>
    %752 = arith.divf %750, %751 : vector<2x128xf32>
    %753 = vector.extract_strided_slice %732 {offsets = [0, 256], sizes = [2, 128], strides = [1, 1]} : vector<2x384xf32> to vector<2x128xf32>
    %754 = vector.extract_strided_slice %736 {offsets = [0, 256], sizes = [2, 128], strides = [1, 1]} : vector<2x384xf32> to vector<2x128xf32>
    %755 = arith.mulf %744, %754 : vector<2x128xf32>
    %756 = arith.addf %753, %755 : vector<2x128xf32>
    %757 = math.tanh %756 : vector<2x128xf32>
    %cst_232 = arith.constant 1.000000e+00 : f32
    %758 = vector.broadcast %cst_232 : f32 to vector<2x128xf32>
    %759 = arith.subf %758, %752 : vector<2x128xf32>
    %760 = arith.mulf %759, %757 : vector<2x128xf32>
    %761 = arith.mulf %752, %731 : vector<2x128xf32>
    %762 = arith.addf %760, %761 : vector<2x128xf32>
    %c4_233 = arith.constant 4 : index
    %c0_234 = arith.constant 0 : index
    %763 = vector.load %arg9[%c4_233, %c0_234] : memref<16x384xf32, #tpu.memory_space<vmem>>, vector<2x384xf32>
    %764 = arith.truncf %762 : vector<2x128xf32> to vector<2x128xbf16>
    %c0_235 = arith.constant 0 : index
    %c0_236 = arith.constant 0 : index
    %765 = vector.load %arg3[%c0_235, %c0_236] : memref<128x384xbf16, #tpu.memory_space<vmem>>, vector<128x384xbf16>
    %cst_237 = arith.constant dense<0.000000e+00> : vector<2x384xf32>
    %766 = tpu.matmul %764, %765, %cst_237 {dimension_numbers = #tpu.dot_dimension_numbers<[1], [0], [0], [1], [0, 0, 1, 1], [], []>} : vector<2x128xbf16>, vector<128x384xbf16>, vector<2x384xf32> -> vector<2x384xf32>
    %767 = arith.addf %766, %5 : vector<2x384xf32>
    %768 = vector.extract_strided_slice %763 {offsets = [0, 0], sizes = [2, 128], strides = [1, 1]} : vector<2x384xf32> to vector<2x128xf32>
    %769 = vector.extract_strided_slice %767 {offsets = [0, 0], sizes = [2, 128], strides = [1, 1]} : vector<2x384xf32> to vector<2x128xf32>
    %770 = arith.addf %768, %769 : vector<2x128xf32>
    %771 = arith.negf %770 : vector<2x128xf32>
    %772 = math.exp %771 : vector<2x128xf32>
    %cst_238 = arith.constant 1.000000e+00 : f32
    %773 = vector.broadcast %cst_238 : f32 to vector<2x128xf32>
    %774 = arith.addf %773, %772 : vector<2x128xf32>
    %775 = arith.divf %773, %774 : vector<2x128xf32>
    %776 = vector.extract_strided_slice %763 {offsets = [0, 128], sizes = [2, 128], strides = [1, 1]} : vector<2x384xf32> to vector<2x128xf32>
    %777 = vector.extract_strided_slice %767 {offsets = [0, 128], sizes = [2, 128], strides = [1, 1]} : vector<2x384xf32> to vector<2x128xf32>
    %778 = arith.addf %776, %777 : vector<2x128xf32>
    %779 = arith.negf %778 : vector<2x128xf32>
    %780 = math.exp %779 : vector<2x128xf32>
    %cst_239 = arith.constant 1.000000e+00 : f32
    %781 = vector.broadcast %cst_239 : f32 to vector<2x128xf32>
    %782 = arith.addf %781, %780 : vector<2x128xf32>
    %783 = arith.divf %781, %782 : vector<2x128xf32>
    %784 = vector.extract_strided_slice %763 {offsets = [0, 256], sizes = [2, 128], strides = [1, 1]} : vector<2x384xf32> to vector<2x128xf32>
    %785 = vector.extract_strided_slice %767 {offsets = [0, 256], sizes = [2, 128], strides = [1, 1]} : vector<2x384xf32> to vector<2x128xf32>
    %786 = arith.mulf %775, %785 : vector<2x128xf32>
    %787 = arith.addf %784, %786 : vector<2x128xf32>
    %788 = math.tanh %787 : vector<2x128xf32>
    %cst_240 = arith.constant 1.000000e+00 : f32
    %789 = vector.broadcast %cst_240 : f32 to vector<2x128xf32>
    %790 = arith.subf %789, %783 : vector<2x128xf32>
    %791 = arith.mulf %790, %788 : vector<2x128xf32>
    %792 = arith.mulf %783, %762 : vector<2x128xf32>
    %793 = arith.addf %791, %792 : vector<2x128xf32>
    %c6_241 = arith.constant 6 : index
    %c0_242 = arith.constant 0 : index
    %794 = vector.load %arg9[%c6_241, %c0_242] : memref<16x384xf32, #tpu.memory_space<vmem>>, vector<2x384xf32>
    %795 = arith.truncf %793 : vector<2x128xf32> to vector<2x128xbf16>
    %c0_243 = arith.constant 0 : index
    %c0_244 = arith.constant 0 : index
    %796 = vector.load %arg3[%c0_243, %c0_244] : memref<128x384xbf16, #tpu.memory_space<vmem>>, vector<128x384xbf16>
    %cst_245 = arith.constant dense<0.000000e+00> : vector<2x384xf32>
    %797 = tpu.matmul %795, %796, %cst_245 {dimension_numbers = #tpu.dot_dimension_numbers<[1], [0], [0], [1], [0, 0, 1, 1], [], []>} : vector<2x128xbf16>, vector<128x384xbf16>, vector<2x384xf32> -> vector<2x384xf32>
    %798 = arith.addf %797, %5 : vector<2x384xf32>
    %799 = vector.extract_strided_slice %794 {offsets = [0, 0], sizes = [2, 128], strides = [1, 1]} : vector<2x384xf32> to vector<2x128xf32>
    %800 = vector.extract_strided_slice %798 {offsets = [0, 0], sizes = [2, 128], strides = [1, 1]} : vector<2x384xf32> to vector<2x128xf32>
    %801 = arith.addf %799, %800 : vector<2x128xf32>
    %802 = arith.negf %801 : vector<2x128xf32>
    %803 = math.exp %802 : vector<2x128xf32>
    %cst_246 = arith.constant 1.000000e+00 : f32
    %804 = vector.broadcast %cst_246 : f32 to vector<2x128xf32>
    %805 = arith.addf %804, %803 : vector<2x128xf32>
    %806 = arith.divf %804, %805 : vector<2x128xf32>
    %807 = vector.extract_strided_slice %794 {offsets = [0, 128], sizes = [2, 128], strides = [1, 1]} : vector<2x384xf32> to vector<2x128xf32>
    %808 = vector.extract_strided_slice %798 {offsets = [0, 128], sizes = [2, 128], strides = [1, 1]} : vector<2x384xf32> to vector<2x128xf32>
    %809 = arith.addf %807, %808 : vector<2x128xf32>
    %810 = arith.negf %809 : vector<2x128xf32>
    %811 = math.exp %810 : vector<2x128xf32>
    %cst_247 = arith.constant 1.000000e+00 : f32
    %812 = vector.broadcast %cst_247 : f32 to vector<2x128xf32>
    %813 = arith.addf %812, %811 : vector<2x128xf32>
    %814 = arith.divf %812, %813 : vector<2x128xf32>
    %815 = vector.extract_strided_slice %794 {offsets = [0, 256], sizes = [2, 128], strides = [1, 1]} : vector<2x384xf32> to vector<2x128xf32>
    %816 = vector.extract_strided_slice %798 {offsets = [0, 256], sizes = [2, 128], strides = [1, 1]} : vector<2x384xf32> to vector<2x128xf32>
    %817 = arith.mulf %806, %816 : vector<2x128xf32>
    %818 = arith.addf %815, %817 : vector<2x128xf32>
    %819 = math.tanh %818 : vector<2x128xf32>
    %cst_248 = arith.constant 1.000000e+00 : f32
    %820 = vector.broadcast %cst_248 : f32 to vector<2x128xf32>
    %821 = arith.subf %820, %814 : vector<2x128xf32>
    %822 = arith.mulf %821, %819 : vector<2x128xf32>
    %823 = arith.mulf %814, %793 : vector<2x128xf32>
    %824 = arith.addf %822, %823 : vector<2x128xf32>
    %c8_249 = arith.constant 8 : index
    %c0_250 = arith.constant 0 : index
    %825 = vector.load %arg9[%c8_249, %c0_250] : memref<16x384xf32, #tpu.memory_space<vmem>>, vector<2x384xf32>
    %826 = arith.truncf %824 : vector<2x128xf32> to vector<2x128xbf16>
    %c0_251 = arith.constant 0 : index
    %c0_252 = arith.constant 0 : index
    %827 = vector.load %arg3[%c0_251, %c0_252] : memref<128x384xbf16, #tpu.memory_space<vmem>>, vector<128x384xbf16>
    %cst_253 = arith.constant dense<0.000000e+00> : vector<2x384xf32>
    %828 = tpu.matmul %826, %827, %cst_253 {dimension_numbers = #tpu.dot_dimension_numbers<[1], [0], [0], [1], [0, 0, 1, 1], [], []>} : vector<2x128xbf16>, vector<128x384xbf16>, vector<2x384xf32> -> vector<2x384xf32>
    %829 = arith.addf %828, %5 : vector<2x384xf32>
    %830 = vector.extract_strided_slice %825 {offsets = [0, 0], sizes = [2, 128], strides = [1, 1]} : vector<2x384xf32> to vector<2x128xf32>
    %831 = vector.extract_strided_slice %829 {offsets = [0, 0], sizes = [2, 128], strides = [1, 1]} : vector<2x384xf32> to vector<2x128xf32>
    %832 = arith.addf %830, %831 : vector<2x128xf32>
    %833 = arith.negf %832 : vector<2x128xf32>
    %834 = math.exp %833 : vector<2x128xf32>
    %cst_254 = arith.constant 1.000000e+00 : f32
    %835 = vector.broadcast %cst_254 : f32 to vector<2x128xf32>
    %836 = arith.addf %835, %834 : vector<2x128xf32>
    %837 = arith.divf %835, %836 : vector<2x128xf32>
    %838 = vector.extract_strided_slice %825 {offsets = [0, 128], sizes = [2, 128], strides = [1, 1]} : vector<2x384xf32> to vector<2x128xf32>
    %839 = vector.extract_strided_slice %829 {offsets = [0, 128], sizes = [2, 128], strides = [1, 1]} : vector<2x384xf32> to vector<2x128xf32>
    %840 = arith.addf %838, %839 : vector<2x128xf32>
    %841 = arith.negf %840 : vector<2x128xf32>
    %842 = math.exp %841 : vector<2x128xf32>
    %cst_255 = arith.constant 1.000000e+00 : f32
    %843 = vector.broadcast %cst_255 : f32 to vector<2x128xf32>
    %844 = arith.addf %843, %842 : vector<2x128xf32>
    %845 = arith.divf %843, %844 : vector<2x128xf32>
    %846 = vector.extract_strided_slice %825 {offsets = [0, 256], sizes = [2, 128], strides = [1, 1]} : vector<2x384xf32> to vector<2x128xf32>
    %847 = vector.extract_strided_slice %829 {offsets = [0, 256], sizes = [2, 128], strides = [1, 1]} : vector<2x384xf32> to vector<2x128xf32>
    %848 = arith.mulf %837, %847 : vector<2x128xf32>
    %849 = arith.addf %846, %848 : vector<2x128xf32>
    %850 = math.tanh %849 : vector<2x128xf32>
    %cst_256 = arith.constant 1.000000e+00 : f32
    %851 = vector.broadcast %cst_256 : f32 to vector<2x128xf32>
    %852 = arith.subf %851, %845 : vector<2x128xf32>
    %853 = arith.mulf %852, %850 : vector<2x128xf32>
    %854 = arith.mulf %845, %824 : vector<2x128xf32>
    %855 = arith.addf %853, %854 : vector<2x128xf32>
    %c10_257 = arith.constant 10 : index
    %c0_258 = arith.constant 0 : index
    %856 = vector.load %arg9[%c10_257, %c0_258] : memref<16x384xf32, #tpu.memory_space<vmem>>, vector<2x384xf32>
    %857 = arith.truncf %855 : vector<2x128xf32> to vector<2x128xbf16>
    %c0_259 = arith.constant 0 : index
    %c0_260 = arith.constant 0 : index
    %858 = vector.load %arg3[%c0_259, %c0_260] : memref<128x384xbf16, #tpu.memory_space<vmem>>, vector<128x384xbf16>
    %cst_261 = arith.constant dense<0.000000e+00> : vector<2x384xf32>
    %859 = tpu.matmul %857, %858, %cst_261 {dimension_numbers = #tpu.dot_dimension_numbers<[1], [0], [0], [1], [0, 0, 1, 1], [], []>} : vector<2x128xbf16>, vector<128x384xbf16>, vector<2x384xf32> -> vector<2x384xf32>
    %860 = arith.addf %859, %5 : vector<2x384xf32>
    %861 = vector.extract_strided_slice %856 {offsets = [0, 0], sizes = [2, 128], strides = [1, 1]} : vector<2x384xf32> to vector<2x128xf32>
    %862 = vector.extract_strided_slice %860 {offsets = [0, 0], sizes = [2, 128], strides = [1, 1]} : vector<2x384xf32> to vector<2x128xf32>
    %863 = arith.addf %861, %862 : vector<2x128xf32>
    %864 = arith.negf %863 : vector<2x128xf32>
    %865 = math.exp %864 : vector<2x128xf32>
    %cst_262 = arith.constant 1.000000e+00 : f32
    %866 = vector.broadcast %cst_262 : f32 to vector<2x128xf32>
    %867 = arith.addf %866, %865 : vector<2x128xf32>
    %868 = arith.divf %866, %867 : vector<2x128xf32>
    %869 = vector.extract_strided_slice %856 {offsets = [0, 128], sizes = [2, 128], strides = [1, 1]} : vector<2x384xf32> to vector<2x128xf32>
    %870 = vector.extract_strided_slice %860 {offsets = [0, 128], sizes = [2, 128], strides = [1, 1]} : vector<2x384xf32> to vector<2x128xf32>
    %871 = arith.addf %869, %870 : vector<2x128xf32>
    %872 = arith.negf %871 : vector<2x128xf32>
    %873 = math.exp %872 : vector<2x128xf32>
    %cst_263 = arith.constant 1.000000e+00 : f32
    %874 = vector.broadcast %cst_263 : f32 to vector<2x128xf32>
    %875 = arith.addf %874, %873 : vector<2x128xf32>
    %876 = arith.divf %874, %875 : vector<2x128xf32>
    %877 = vector.extract_strided_slice %856 {offsets = [0, 256], sizes = [2, 128], strides = [1, 1]} : vector<2x384xf32> to vector<2x128xf32>
    %878 = vector.extract_strided_slice %860 {offsets = [0, 256], sizes = [2, 128], strides = [1, 1]} : vector<2x384xf32> to vector<2x128xf32>
    %879 = arith.mulf %868, %878 : vector<2x128xf32>
    %880 = arith.addf %877, %879 : vector<2x128xf32>
    %881 = math.tanh %880 : vector<2x128xf32>
    %cst_264 = arith.constant 1.000000e+00 : f32
    %882 = vector.broadcast %cst_264 : f32 to vector<2x128xf32>
    %883 = arith.subf %882, %876 : vector<2x128xf32>
    %884 = arith.mulf %883, %881 : vector<2x128xf32>
    %885 = arith.mulf %876, %855 : vector<2x128xf32>
    %886 = arith.addf %884, %885 : vector<2x128xf32>
    %c12_265 = arith.constant 12 : index
    %c0_266 = arith.constant 0 : index
    %887 = vector.load %arg9[%c12_265, %c0_266] : memref<16x384xf32, #tpu.memory_space<vmem>>, vector<2x384xf32>
    %888 = arith.truncf %886 : vector<2x128xf32> to vector<2x128xbf16>
    %c0_267 = arith.constant 0 : index
    %c0_268 = arith.constant 0 : index
    %889 = vector.load %arg3[%c0_267, %c0_268] : memref<128x384xbf16, #tpu.memory_space<vmem>>, vector<128x384xbf16>
    %cst_269 = arith.constant dense<0.000000e+00> : vector<2x384xf32>
    %890 = tpu.matmul %888, %889, %cst_269 {dimension_numbers = #tpu.dot_dimension_numbers<[1], [0], [0], [1], [0, 0, 1, 1], [], []>} : vector<2x128xbf16>, vector<128x384xbf16>, vector<2x384xf32> -> vector<2x384xf32>
    %891 = arith.addf %890, %5 : vector<2x384xf32>
    %892 = vector.extract_strided_slice %887 {offsets = [0, 0], sizes = [2, 128], strides = [1, 1]} : vector<2x384xf32> to vector<2x128xf32>
    %893 = vector.extract_strided_slice %891 {offsets = [0, 0], sizes = [2, 128], strides = [1, 1]} : vector<2x384xf32> to vector<2x128xf32>
    %894 = arith.addf %892, %893 : vector<2x128xf32>
    %895 = arith.negf %894 : vector<2x128xf32>
    %896 = math.exp %895 : vector<2x128xf32>
    %cst_270 = arith.constant 1.000000e+00 : f32
    %897 = vector.broadcast %cst_270 : f32 to vector<2x128xf32>
    %898 = arith.addf %897, %896 : vector<2x128xf32>
    %899 = arith.divf %897, %898 : vector<2x128xf32>
    %900 = vector.extract_strided_slice %887 {offsets = [0, 128], sizes = [2, 128], strides = [1, 1]} : vector<2x384xf32> to vector<2x128xf32>
    %901 = vector.extract_strided_slice %891 {offsets = [0, 128], sizes = [2, 128], strides = [1, 1]} : vector<2x384xf32> to vector<2x128xf32>
    %902 = arith.addf %900, %901 : vector<2x128xf32>
    %903 = arith.negf %902 : vector<2x128xf32>
    %904 = math.exp %903 : vector<2x128xf32>
    %cst_271 = arith.constant 1.000000e+00 : f32
    %905 = vector.broadcast %cst_271 : f32 to vector<2x128xf32>
    %906 = arith.addf %905, %904 : vector<2x128xf32>
    %907 = arith.divf %905, %906 : vector<2x128xf32>
    %908 = vector.extract_strided_slice %887 {offsets = [0, 256], sizes = [2, 128], strides = [1, 1]} : vector<2x384xf32> to vector<2x128xf32>
    %909 = vector.extract_strided_slice %891 {offsets = [0, 256], sizes = [2, 128], strides = [1, 1]} : vector<2x384xf32> to vector<2x128xf32>
    %910 = arith.mulf %899, %909 : vector<2x128xf32>
    %911 = arith.addf %908, %910 : vector<2x128xf32>
    %912 = math.tanh %911 : vector<2x128xf32>
    %cst_272 = arith.constant 1.000000e+00 : f32
    %913 = vector.broadcast %cst_272 : f32 to vector<2x128xf32>
    %914 = arith.subf %913, %907 : vector<2x128xf32>
    %915 = arith.mulf %914, %912 : vector<2x128xf32>
    %916 = arith.mulf %907, %886 : vector<2x128xf32>
    %917 = arith.addf %915, %916 : vector<2x128xf32>
    %918 = arith.truncf %917 : vector<2x128xf32> to vector<2x128xbf16>
    %c14 = arith.constant 14 : index
    %c0_273 = arith.constant 0 : index
    %919 = vector.load %arg10[%c14, %c0_273] : memref<16x128xbf16, #tpu.memory_space<vmem>>, vector<2x128xbf16>
    tpu.vector_store %arg10[%c14, %c0_273], %918 {strides = array<i32>} : memref<16x128xbf16, #tpu.memory_space<vmem>>, vector<2x128xbf16>,
    %c0_274 = arith.constant 0 : index
    %c0_275 = arith.constant 0 : index
    %920 = vector.load %arg10[%c0_274, %c0_275] : memref<16x128xbf16, #tpu.memory_space<vmem>>, vector<16x128xbf16>
    %c0_276 = arith.constant 0 : index
    %c0_277 = arith.constant 0 : index
    %921 = vector.load %arg6[%c0_276, %c0_277] : memref<128x128xbf16, #tpu.memory_space<vmem>>, vector<128x128xbf16>
    %cst_278 = arith.constant dense<0.000000e+00> : vector<16x128xf32>
    %922 = tpu.matmul %920, %921, %cst_278 {dimension_numbers = #tpu.dot_dimension_numbers<[1], [0], [0], [1], [0, 0, 1, 1], [], []>} : vector<16x128xbf16>, vector<128x128xbf16>, vector<16x128xf32> -> vector<16x128xf32>
    %c0_279 = arith.constant 0 : index
    %c0_280 = arith.constant 0 : index
    %923 = vector.load %arg7[%c0_279, %c0_280] : memref<1x128xf32, #tpu.memory_space<vmem>>, vector<1x128xf32>
    %924 = vector.broadcast %923 : vector<1x128xf32> to vector<16x128xf32>
    %925 = arith.addf %922, %924 : vector<16x128xf32>
    %c0_281 = arith.constant 0 : index
    %c0_282 = arith.constant 0 : index
    %926 = vector.load %arg8[%c0_281, %c0_282] : memref<16x128xf32, #tpu.memory_space<vmem>>, vector<16x128xf32>
    tpu.vector_store %arg8[%c0_281, %c0_282], %925 {strides = array<i32>} : memref<16x128xf32, #tpu.memory_space<vmem>>, vector<16x128xf32>,
    return
  }
}

</mosaic_0001>

<bundles_post_ra>
// kernel: forward.1
= control target key start
LH: loop header
LB: loop body
LE: loop exit
PB: predicated region body
PF: predicated region fallthrough
CT: control target
= control target key end

     0   :  { %13 = vsyncpa [#allocation5], 0  ;;  %s10293_s0 = inlined_call_operand.vmem [shape: f32[2,128], index: 0, kind: input, shape index: {}]   ;;  %s10294_s1 = inlined_call_operand.vmem [shape: f32[2,128], index: 1, kind: input, shape index: {}]   ;;  %s10295_s2 = inlined_call_operand.hbm [shape: bf16[128,384], index: 2, kind: input, shape index: {}]   ;;  %s10296_s3 = inlined_call_operand.hbm [shape: bf16[128,384], index: 3, kind: input, shape index: {}]   ;;  %s10297_s4 = inlined_call_operand.vmem [shape: f32[1,384], index: 4, kind: input, shape index: {}]   ;;  %s10298_s5 = inlined_call_operand.vmem [shape: f32[1,384], index: 5, kind: input, shape index: {}]   ;;  %s10299_s6 = inlined_call_operand.vmem [shape: bf16[128,128], index: 6, kind: input, shape index: {}]   ;;  %s10300_s7 = inlined_call_operand.vmem [shape: f32[1,128], index: 7, kind: input, shape index: {}]   ;;  %s10301_s8 = inlined_call_operand.vmem [shape: f32[16,128], index: 8, kind: output, shape index: {}]  }
   0x1   :  { %14 = vsyncpa [#allocation7], 0  ;;  %s8574_s27 = smov [#allocation4]  }
   0x2   :  { %s24_s28 = sshll.u32 %s8574_s27, 4  ;;  %s25_s28 = int_to_ptr.vmem [resolvable:$true] %s24_s28 }
   0x3   :  { %s8538_s29 = scalar_lea.vmem %s25_s28, 3072  ;;  %p8543_p1 = scmp.lt.s32.totalorder %s25_s28, %s25_s28 }
   0x4   :  { %p8539_p0 = scmp.ne.s32.totalorder %s25_s28, %s8538_s29  ;;  %p8544_p2 = scmp.lt.s32.totalorder %s8538_s29, %s8538_s29 }
   0x6   :  { %p8545_p3 = por %p8544_p2, %p8543_p1 }
   0x8   :  { %p8546_p4 = pnand %p8545_p3, %p8539_p0 }
   0xa   :  { %8549 = shalt.err (!%p8546_p4)
}
   0xb   :  { %s8575_s30 = smov 192   ;;  %s8576_s9 = smov 12  }
   0xc   :  { %30 = dma.hbm_to_vmem [thread:$0]  %s10295_s2, 3072, %s25_s28, [#allocation5], %s8575_s30, %s8575_s30, %s8576_s9  }
   0xd   :  { %s8577_s12 = smov [#allocation6]  }
   0xe   :  { %s36_s13 = sshll.u32 %s8577_s12, 4  ;;  %s37_s13 = int_to_ptr.vmem [resolvable:$true] %s36_s13 }
   0xf   :  { %s8558_s14 = scalar_lea.vmem %s37_s13, 3072  ;;  %p8563_p6 = scmp.lt.s32.totalorder %s37_s13, %s37_s13 }
  0x10   :  { %p8559_p5 = scmp.ne.s32.totalorder %s37_s13, %s8558_s14  ;;  %p8564_p7 = scmp.lt.s32.totalorder %s8558_s14, %s8558_s14 }
  0x12   :  { %p8565_p8 = por %p8564_p7, %p8563_p6 }
  0x14   :  { %p8566_p9 = pnand %p8565_p8, %p8559_p5 }
  0x16   :  { %8569 = shalt.err (!%p8566_p9)
}
  0x17   :  { %42 = dma.hbm_to_vmem [thread:$0]  %s10296_s3, 3072, %s37_s13, [#allocation7], %s8575_s30, %s8575_s30, %s8576_s9  }
  0x18   :  { %8570 = dma.done.wait [#allocation5], 3072  }
  0x19   :  { %8571 = vsyncadd [#allocation5], 4294964224 }
  0x1a   :  { %8572 = dma.done.wait [#allocation7], 3072  }
  0x1b   :  { %8573 = vsyncadd [#allocation7], 4294964224  ;;  %v10304_v0 = vmov 0.0   ;;  %v10302_v1 = vmov 0   ;;  %vm8580_vm0 = vmmov 0   ;;  %v60_v62 = vlaneseq }
  0x1c   :  { %7134 = vmatprep.subr.bf16.mxu1 %v10304_v0  ;;  %287 = vmatprep.mubr.bf16.mxu0 %v10302_v1  ;;  %v8636_v2 = vld [vmem:[#allocation4 + $0xac] ss:$12 sps:$4 sm:$0xff]   ;;  %v8638_v3 = vld [vmem:[#allocation4 + $0xa8] ss:$12 sps:$4 sm:$0xff]   ;;  %v8644_v5 = vld [vmem:[#allocation4 + $0x90] ss:$12 sps:$4 sm:$0xff]  }
  0x1d   :  { %7150 = vmatprep.mubr.msk.bf16.mxu1 %vm8580_vm0, %v10304_v0  ;;  %255 = vmatprep.subr.bf16.mxu0 %v8636_v2  ;;  %v8641_v4 = vld [vmem:[#allocation4 + $0x94] ss:$12 sps:$4 sm:$0xff]   ;;  %v8647_v6 = vld [vmem:[#allocation4 + $0x7c] ss:$12 sps:$4 sm:$0xff]   ;;  %v8650_v7 = vld [vmem:[#allocation4 + $0x78] ss:$12 sps:$4 sm:$0xff]  }
  0x1e   :  { %256 = vmatpush1.bf16.msra.mxu0 %v8638_v3  ;;  %v8653_v8 = vld [vmem:[#allocation4 + $0x64] ss:$12 sps:$4 sm:$0xff]   ;;  %v8655_v9 = vld [vmem:[#allocation4 + $0x60] ss:$12 sps:$4 sm:$0xff]   ;;  %v92_v11 = vld [vmem:[%s10294_s1] sm:$0x3] }
  0x1f   :  { %257 = vmatprep.subr.bf16.mxu0 %v8641_v4  ;;  %v7885_v10 = vld [vmem:[#allocation4 + $0xb0] ss:$12 sps:$4 sm:$0xff]   ;;  %v8662_v12 = vld [vmem:[#allocation4 + $0x4c] ss:$12 sps:$4 sm:$0xff]   ;;  %v93_v13 = vpack.c.bf16 %v92_v11, %v92_v11  ;;  %v8666_v15 = vld [vmem:[#allocation4 + $0x48] ss:$12 sps:$4 sm:$0xff]  }
  0x20   :  { %7135 = vmatpush3.bf16.msra.mxu1 %v7885_v10  ;;  %v7889_v14 = vld [vmem:[#allocation4 + $0x98] ss:$12 sps:$4 sm:$0xff]   ;;  %v8669_v16 = vld [vmem:[#allocation4 + $0x34] ss:$12 sps:$4 sm:$0xff]   ;;  %v8673_v18 = vld [vmem:[#allocation4 + $0x30] ss:$12 sps:$4 sm:$0xff]  }
  0x21   :  { %94 = vst [vmem:[#allocation3] sm:$0x1] %v93_v13  ;;  %7136 = vmatprep.subr.bf16.mxu1 %v10304_v0  ;;  %v7893_v17 = vld [vmem:[#allocation4 + $0x80] ss:$12 sps:$4 sm:$0xff]   ;;  %v8676_v19 = vld [vmem:[#allocation4 + $0x1c] ss:$12 sps:$4 sm:$0xff]  }
  0x22   :  { %258 = vmatpush1.bf16.msra.mxu0 %v8644_v5  ;;  %v7897_v20 = vld [vmem:[#allocation4 + $0x68] ss:$12 sps:$4 sm:$0xff]   ;;  %v8680_v21 = vld [vmem:[#allocation4 + $0x18] ss:$12 sps:$4 sm:$0xff]   ;;  %v7901_v23 = vld [vmem:[#allocation4 + $0x50] ss:$12 sps:$4 sm:$0xff]  }
  0x23   :  { %259 = vmatprep.subr.bf16.mxu0 %v8647_v6  ;;  %v8683_v22 = vld [vmem:[#allocation4 + $0x4] ss:$12 sps:$4 sm:$0xff]   ;;  %v8687_v24 = vld [vmem:[#allocation4] ss:$12 sps:$4 sm:$0xff]   ;;  %v7886_v27 = vld [vmem:[#allocation6 + $0xa8] ss:$12 sps:$4 sm:$0xff]  }
  0x24   :  { %7137 = vmatpush3.bf16.msra.mxu1 %v7889_v14  ;;  %v8690_v25 = vld [vmem:[#allocation6 + $0xac] ss:$12 sps:$4 sm:$0xff]   ;;  %v7892_v28 = vld [vmem:[#allocation6 + $0x94] ss:$12 sps:$4 sm:$0xff]   ;;  %v7890_v30 = vld [vmem:[#allocation6 + $0x90] ss:$12 sps:$4 sm:$0xff]  }
  0x25   :  { %7138 = vmatprep.subr.bf16.mxu1 %v10304_v0  ;;  %v7905_v26 = vld [vmem:[#allocation4 + $0x38] ss:$12 sps:$4 sm:$0xff]   ;;  %v7909_v29 = vld [vmem:[#allocation4 + $0x20] ss:$12 sps:$4 sm:$0xff]   ;;  %v7896_v31 = vld [vmem:[#allocation6 + $0x7c] ss:$12 sps:$4 sm:$0xff]  }
  0x26   :  { %260 = vmatpush1.bf16.msra.mxu0 %v8650_v7  ;;  %v7913_v32 = vld [vmem:[#allocation4 + $0x8] ss:$12 sps:$4 sm:$0xff]   ;;  %v7894_v33 = vld [vmem:[#allocation6 + $0x78] ss:$12 sps:$4 sm:$0xff]   ;;  %v7917_v35 = vld [vmem:[#allocation6 + $0xb0] ss:$12 sps:$4 sm:$0xff]  }
  0x27   :  { %261 = vmatprep.subr.bf16.mxu0 %v8653_v8  ;;  %v7900_v34 = vld [vmem:[#allocation6 + $0x64] ss:$12 sps:$4 sm:$0xff]   ;;  %v8698_v36 = vld [vmem:[#allocation6 + $0x60] ss:$12 sps:$4 sm:$0xff]   ;;  %v8703_v39 = vld [vmem:[#allocation6 + $0x48] ss:$12 sps:$4 sm:$0xff]  }
  0x28   :  { %7139 = vmatpush3.bf16.msra.mxu1 %v7893_v17  ;;  %v8700_v37 = vld [vmem:[#allocation6 + $0x4c] ss:$12 sps:$4 sm:$0xff]   ;;  %v8707_v40 = vld [vmem:[#allocation6 + $0x34] ss:$12 sps:$4 sm:$0xff]   ;;  %v8712_v42 = vld [vmem:[#allocation6 + $0x30] ss:$12 sps:$4 sm:$0xff]  }
  0x29   :  { %7140 = vmatprep.subr.bf16.mxu1 %v10304_v0  ;;  %v7918_v38 = vld [vmem:[#allocation6 + $0x98] ss:$12 sps:$4 sm:$0xff]   ;;  %v7919_v41 = vld [vmem:[#allocation6 + $0x80] ss:$12 sps:$4 sm:$0xff]   ;;  %v8714_v43 = vld [vmem:[#allocation6 + $0x1c] ss:$12 sps:$4 sm:$0xff]  }
  0x2a   :  { %262 = vmatpush1.bf16.msra.mxu0 %v8655_v9  ;;  %v7920_v44 = vld [vmem:[#allocation6 + $0x68] ss:$12 sps:$4 sm:$0xff]   ;;  %v8719_v45 = vld [vmem:[#allocation6 + $0x18] ss:$12 sps:$4 sm:$0xff]   ;;  %v7921_v47 = vld [vmem:[#allocation6 + $0x50] ss:$12 sps:$4 sm:$0xff]  }
  0x2b   :  { %263 = vmatprep.subr.bf16.mxu0 %v8662_v12  ;;  %v8721_v46 = vld [vmem:[#allocation6 + $0x4] ss:$12 sps:$4 sm:$0xff]   ;;  %v8726_v48 = vld [vmem:[#allocation6] ss:$12 sps:$4 sm:$0xff]   ;;  %v8731_v49 = vld [vmem:[%s10293_s0] sm:$0x3] }
  0x2c   :  { %7141 = vmatpush3.bf16.msra.mxu1 %v7897_v20  ;;  %v7922_v50 = vld [vmem:[#allocation6 + $0x38] ss:$12 sps:$4 sm:$0xff]   ;;  %v343_v51 = vpack.c.bf16 %v8731_v49, %v8731_v49  ;;  %v7923_v52 = vld [vmem:[#allocation6 + $0x20] ss:$12 sps:$4 sm:$0xff]   ;;  %v7924_v53 = vld [vmem:[#allocation6 + $0x8] ss:$12 sps:$4 sm:$0xff]  }
  0x2d   :  { %7142 = vmatprep.subr.bf16.mxu1 %v10304_v0  ;;  %v7925_v54 = vld [vmem:[#allocation4 + $0xb0] ss:$12 sps:$4 sm:$0xff]   ;;  %v7926_v55 = vld [vmem:[#allocation4 + $0x98] ss:$12 sps:$4 sm:$0xff]   ;;  %v7927_v56 = vld [vmem:[#allocation4 + $0x80] ss:$12 sps:$4 sm:$0xff]  }
  0x2e   :  { %264 = vmatpush1.bf16.msra.mxu0 %v8666_v15  ;;  %v7928_v57 = vld [vmem:[#allocation4 + $0x68] ss:$12 sps:$4 sm:$0xff]   ;;  %v7929_v58 = vld [vmem:[#allocation4 + $0x50] ss:$12 sps:$4 sm:$0xff]   ;;  %v7930_v59 = vld [vmem:[#allocation4 + $0x38] ss:$12 sps:$4 sm:$0xff]  }
  0x2f   :  { %265 = vmatprep.subr.bf16.mxu0 %v8669_v16  ;;  %v7931_v60 = vld [vmem:[#allocation4 + $0x20] ss:$12 sps:$4 sm:$0xff]   ;;  %v7932_v61 = vld [vmem:[#allocation4 + $0x8] ss:$12 sps:$4 sm:$0xff]   ;;  %v61_v63 = vshrl.u32 %v60_v62, 7 }
  0x30   :  { %7143 = vmatpush3.bf16.msra.mxu1 %v7901_v23  ;;  %v75_v20 = vld [vmem:[%s10298_s5] sm:$0x7] }
  0x31   :  { %7144 = vmatprep.subr.bf16.mxu1 %v10304_v0  ;;  %v70_v11 = vsub.s32 2, %v61_v63 }
  0x32   :  { %266 = vmatpush1.bf16.msra.mxu0 %v8673_v18 }
  0x33   :  { %267 = vmatprep.subr.bf16.mxu0 %v8676_v19 }
  0x34   :  { %7145 = vmatpush3.bf16.msra.mxu1 %v7905_v26 }
  0x35   :  { %7146 = vmatprep.subr.bf16.mxu1 %v10304_v0 }
  0x36   :  { %268 = vmatpush1.bf16.msra.mxu0 %v8680_v21 }
  0x37   :  { %269 = vmatprep.subr.bf16.mxu0 %v8683_v22 }
  0x38   :  { %7147 = vmatpush3.bf16.msra.mxu1 %v7909_v29 }
  0x39   :  { %7148 = vmatprep.subr.bf16.mxu1 %v10304_v0 }
  0x3a   :  { %270 = vmatpush1.bf16.msra.mxu0 %v8687_v24 }
  0x3b   :  { %504 = vmatprep.subr.bf16.mxu0 %v8690_v25 }
  0x3c   :  { %7149 = vmatpush3.bf16.msra.mxu1 %v7913_v32 }
  0x3d   :  { %288 = vmatmul.mubr.bf16.vlgmr.msra.gmra.mxu0 %v93_v13  ;;  %7154 = vmatprep.subr.bf16.mxu1 %v10304_v0 }
  0x3e   :  { %505 = vmatpush1.bf16.msra.mxu0 %v7886_v27  ;;  %536 = vmatprep.mubr.bf16.mxu0 %v10302_v1 }
  0x3f   :  { %506 = vmatprep.subr.bf16.mxu0 %v7892_v28  ;;  %7151 = vmatmul.mubr.bf16.vlgmr.msra.gmra.mxu1 %v93_v13 }
  0x40   :  { %7155 = vmatpush3.bf16.msra.mxu1 %v7917_v35  ;;  %7170 = vmatprep.mubr.msk.bf16.mxu1 %vm8580_vm0, %v10304_v0 }
  0x41   :  { %7156 = vmatprep.subr.bf16.mxu1 %v10304_v0 }
  0x42   :  { %507 = vmatpush1.bf16.msra.mxu0 %v7890_v30 }
  0x43   :  { %508 = vmatprep.subr.bf16.mxu0 %v7896_v31 }
  0x44   :  { %7157 = vmatpush3.bf16.msra.mxu1 %v7918_v38 }
  0x45   :  { %7158 = vmatprep.subr.bf16.mxu1 %v10304_v0 }
  0x46   :  { %509 = vmatpush1.bf16.msra.mxu0 %v7894_v33 }
  0x47   :  { %510 = vmatprep.subr.bf16.mxu0 %v7900_v34 }
  0x48   :  { %7159 = vmatpush3.bf16.msra.mxu1 %v7919_v41 }
  0x49   :  { %7160 = vmatprep.subr.bf16.mxu1 %v10304_v0 }
  0x4a   :  { %511 = vmatpush1.bf16.msra.mxu0 %v8698_v36 }
  0x4b   :  { %512 = vmatprep.subr.bf16.mxu0 %v8700_v37 }
  0x4c   :  { %7161 = vmatpush3.bf16.msra.mxu1 %v7920_v44 }
  0x4d   :  { %7162 = vmatprep.subr.bf16.mxu1 %v10304_v0 }
  0x4e   :  { %513 = vmatpush1.bf16.msra.mxu0 %v8703_v39 }
  0x4f   :  { %514 = vmatprep.subr.bf16.mxu0 %v8707_v40 }
  0x50   :  { %7163 = vmatpush3.bf16.msra.mxu1 %v7921_v47 }
  0x51   :  { %7164 = vmatprep.subr.bf16.mxu1 %v10304_v0 }
  0x52   :  { %515 = vmatpush1.bf16.msra.mxu0 %v8712_v42 }
  0x53   :  { %516 = vmatprep.subr.bf16.mxu0 %v8714_v43 }
  0x54   :  { %7165 = vmatpush3.bf16.msra.mxu1 %v7922_v50 }
  0x55   :  { %7166 = vmatprep.subr.bf16.mxu1 %v10304_v0 }
  0x56   :  { %517 = vmatpush1.bf16.msra.mxu0 %v8719_v45 }
  0x57   :  { %518 = vmatprep.subr.bf16.mxu0 %v8721_v46 }
  0x58   :  { %7167 = vmatpush3.bf16.msra.mxu1 %v7923_v52 }
  0x59   :  { %7168 = vmatprep.subr.bf16.mxu1 %v10304_v0 }
  0x5a   :  { %519 = vmatpush1.bf16.msra.mxu0 %v8726_v48 }
  0x5b   :  { %773 = vmatprep.subr.bf16.mxu0 %v8636_v2  ;;  %v62_v2 = vsub.s32 0, %v61_v63 }
  0x5c   :  { %7169 = vmatpush3.bf16.msra.mxu1 %v7924_v53 }
  0x5d   :  { %537 = vmatmul.mubr.bf16.vlgmr.msra.gmra.mxu0 %v343_v51  ;;  %7174 = vmatprep.subr.bf16.mxu1 %v10304_v0 }
  0x5e   :  { %774 = vmatpush1.bf16.msra.mxu0 %v8638_v3  ;;  %805 = vmatprep.mubr.bf16.mxu0 %v10302_v1  ;;  %v58_v3 = vld [vmem:[%s10297_s4] sm:$0x7] }
  0x5f   :  { %775 = vmatprep.subr.bf16.mxu0 %v8641_v4  ;;  %7171 = vmatmul.mubr.bf16.vlgmr.msra.gmra.mxu1 %v343_v51  ;;  %v66_v4 = vsub.s32 1, %v61_v63  ;;  %v8780_v14 = vrot.slane %v58_v3, %v70_v11  ;;  %v8792_v51 = vrot.slane %v75_v20, %v70_v11  ;;  %v7935_v11 = vld [vmem:[#allocation6 + $0x80] ss:$12 sps:$4 sm:$0xff]  }
  0x60   :  { %7190 = vmatprep.mubr.msk.bf16.mxu1 %vm8580_vm0, %v10304_v0  ;;  %7175 = vmatpush3.bf16.msra.mxu1 %v7925_v54 }
  0x61   :  { %7176 = vmatprep.subr.bf16.mxu1 %v10304_v0  ;;  %10311 = vst [vmem:[#allocation11_spill] sm:$0xff] %v8780_v14  ;;  %v8788_v23 = vrot.slane %v75_v20, %v66_v4 }
  0x62   :  { %776 = vmatpush1.bf16.msra.mxu0 %v8644_v5  ;;  %v8774_v5 = vrot.slane %v58_v3, %v62_v2 }
  0x63   :  { %777 = vmatprep.subr.bf16.mxu0 %v8647_v6  ;;  %v8776_v6 = vrot.slane %v58_v3, %v66_v4  ;;  %v7933_v3 = vld [vmem:[#allocation6 + $0xb0] ss:$12 sps:$4 sm:$0xff]  }
  0x64   :  { %7177 = vmatpush3.bf16.msra.mxu1 %v7926_v55  ;;  %10310 = vst [vmem:[#allocation10_spill] sm:$0xff] %v8774_v5 }
  0x65   :  { %7178 = vmatprep.subr.bf16.mxu1 %v10304_v0 }
  0x66   :  { %778 = vmatpush1.bf16.msra.mxu0 %v8650_v7 }
  0x67   :  { %779 = vmatprep.subr.bf16.mxu0 %v8653_v8 }
  0x68   :  { %7179 = vmatpush3.bf16.msra.mxu1 %v7927_v56 }
  0x69   :  { %7180 = vmatprep.subr.bf16.mxu1 %v10304_v0 }
  0x6a   :  { %780 = vmatpush1.bf16.msra.mxu0 %v8655_v9 }
  0x6b   :  { %781 = vmatprep.subr.bf16.mxu0 %v8662_v12 }
  0x6c   :  { %7181 = vmatpush3.bf16.msra.mxu1 %v7928_v57 }
  0x6d   :  { %7182 = vmatprep.subr.bf16.mxu1 %v10304_v0 }
  0x6e   :  { %782 = vmatpush1.bf16.msra.mxu0 %v8666_v15 }
  0x6f   :  { %783 = vmatprep.subr.bf16.mxu0 %v8669_v16 }
  0x70   :  { %7183 = vmatpush3.bf16.msra.mxu1 %v7929_v58 }
  0x71   :  { %7184 = vmatprep.subr.bf16.mxu1 %v10304_v0 }
  0x72   :  { %784 = vmatpush1.bf16.msra.mxu0 %v8673_v18 }
  0x73   :  { %785 = vmatprep.subr.bf16.mxu0 %v8676_v19 }
  0x74   :  { %7185 = vmatpush3.bf16.msra.mxu1 %v7930_v59 }
  0x75   :  { %7186 = vmatprep.subr.bf16.mxu1 %v10304_v0 }
  0x76   :  { %786 = vmatpush1.bf16.msra.mxu0 %v8680_v21  ;;  %v8786_v21 = vrot.slane %v75_v20, %v62_v2  ;;  %v8513_v20 = vld [vmem:[#allocation6 + $0x30] ss:$12 sps:$4 sm:$0xff]  }
  0x77   :  { %787 = vmatprep.subr.bf16.mxu0 %v8683_v22 }
  0x78   :  { %7187 = vmatpush3.bf16.msra.mxu1 %v7931_v60 }
  0x79   :  { %7188 = vmatprep.subr.bf16.mxu1 %v10304_v0 }
  0x7a   :  { %788 = vmatpush1.bf16.msra.mxu0 %v8687_v24 }
  0x7b   :  { %1029 = vmatprep.subr.bf16.mxu0 %v8690_v25 }
  0x7c   :  { %7189 = vmatpush3.bf16.msra.mxu1 %v7932_v61 }
  0x7d   :  { %7194 = vmatprep.subr.bf16.mxu1 %v10304_v0 }
  0xfd   :  { %v289_v7 = vpop.f32.mrf.mxu0 }
  0xfe   :  { %v290_v8 = vadd.f32 %v289_v7, %v8774_v5 }
  0xff   :  { %v291_v9 = vpop.f32.mrf.mxu0  ;;  %v330_v15 = vpop.f32.mrf.mxu1 }
 0x100   :  { %336 = vst [vmem:[#allocation2 + $0x28] sm:$0x3] %v290_v8  ;;  %v292_v10 = vadd.f32 %v291_v9, %v8776_v6  ;;  %v331_v16 = vadd.f32 %v330_v15, %v8780_v14  ;;  %v8502_v8 = vld [vmem:[#allocation6 + $0xa8] ss:$12 sps:$4 sm:$0xff]   ;;  %v7934_v9 = vld [vmem:[#allocation6 + $0x98] ss:$12 sps:$4 sm:$0xff]  }
 0x101   :  { %v293_v12 = vpop.f32.mrf.mxu0  ;;  %v7152_v17 = vpop.f32.mrf.mxu1  ;;  %v7936_v15 = vld [vmem:[#allocation6 + $0x68] ss:$12 sps:$4 sm:$0xff]  }
 0x102   :  { %337 = vst [vmem:[#allocation2 + $0x10] sm:$0x3] %v292_v10  ;;  %338 = vst [vmem:[#allocation2 + $0x8] sm:$0x3] %v331_v16  ;;  %v8503_v10 = vld [vmem:[#allocation6 + $0x94] ss:$12 sps:$4 sm:$0xff]  }
 0x103   :  { %v294_v13 = vpop.f32.mrf.mxu0  ;;  %v333_v18 = vpop.f32.mrf.mxu1  ;;  %v8505_v12 = vld [vmem:[#allocation6 + $0x7c] ss:$12 sps:$4 sm:$0xff]   ;;  %v8507_v16 = vld [vmem:[#allocation6 + $0x64] ss:$12 sps:$4 sm:$0xff]  }
 0x104   :  { %v8506_v13 = vld [vmem:[#allocation6 + $0x78] ss:$12 sps:$4 sm:$0xff]   ;;  %v7937_v17 = vld [vmem:[#allocation6 + $0x50] ss:$12 sps:$4 sm:$0xff]  }
 0x105   :  { %v7153_v19 = vpop.f32.mrf.mxu1  ;;  %v7938_v18 = vld [vmem:[#allocation6 + $0x38] ss:$12 sps:$4 sm:$0xff]  }
 0x106   :  { %v7939_v19 = vld [vmem:[#allocation6 + $0x20] ss:$12 sps:$4 sm:$0xff]  }
 0x107   :  { %v340_v25 = vld [vmem:[#allocation2 + $0x28] sm:$0x3] }
 0x109   :  { %v341_v32 = vld [vmem:[#allocation2 + $0x10] sm:$0x3]  ;;  %v342_v57 = vld [vmem:[#allocation2 + $0x8] sm:$0x3] }
 0x11d   :  { %v538_v22 = vpop.f32.mrf.mxu0 }
 0x11e   :  { %v539_v24 = vadd.f32 %v538_v22, %v8786_v21  ;;  %v8514_v22 = vld [vmem:[#allocation6 + $0x1c] ss:$12 sps:$4 sm:$0xff]  }
 0x11f   :  { %v540_v26 = vpop.f32.mrf.mxu0  ;;  %v579_v34 = vpop.f32.mrf.mxu1 }
 0x120   :  { %v585_v27 = vadd.f32 %v539_v24, %v340_v25  ;;  %v541_v30 = vadd.f32 %v540_v26, %v8788_v23  ;;  %v580_v54 = vadd.f32 %v579_v34, %v8792_v51 }
 0x121   :  { %v542_v28 = vpop.f32.mrf.mxu0  ;;  %v7172_v35 = vpop.f32.mrf.mxu1 }
 0x122   :  { %v6441_v29 = vmul.f32 -1.442695, %v585_v27  ;;  %v592_v33 = vadd.f32 %v541_v30, %v341_v32 }
 0x123   :  { %v543_v31 = vpop.f32.mrf.mxu0  ;;  %v582_v41 = vpop.f32.mrf.mxu1 }
 0x124   :  { %8222 = vpow2.f32 %v6441_v29  ;;  %v6442_v38 = vmul.f32 -1.442695, %v592_v33 }
 0x125   :  { %v7173_v44 = vpop.f32.mrf.mxu1 }
 0x126   :  { %8224 = vpow2.f32 %v6442_v38  ;;  %v866_v44 = vld [vmem:[#allocation2 + $0x28] sm:$0x3] }
 0x131   :  { %v8223_v47 = vpop.eup %8222 }
 0x132   :  { %v589_v50 = vadd.f32 1.0, %v8223_v47 }
 0x133   :  { %v8225_v52 = vpop.eup %8224 }
 0x134   :  { %8226 = vrcp.f32 %v589_v50  ;;  %v596_v53 = vadd.f32 1.0, %v8225_v52 }
 0x136   :  { %8228 = vrcp.f32 %v596_v53 }
 0x141   :  { %v8227_v55 = vpop.eup %8226 }
 0x142   :  { %v599_v56 = vmul.f32 %v8227_v55, %v580_v54 }
 0x143   :  { %v8229_v59 = vpop.eup %8228 }
 0x144   :  { %v600_v58 = vadd.f32 %v599_v56, %v342_v57  ;;  %v602_v60 = vsub.f32 1.0, %v8229_v59  ;;  %v604_v63 = vmul.f32 %v8229_v59, %v8731_v49  ;;  %v8504_v49 = vld [vmem:[#allocation6 + $0x90] ss:$12 sps:$4 sm:$0xff]   ;;  %v867_v59 = vld [vmem:[#allocation2 + $0x10] sm:$0x3] }
 0x146   :  { %8230 = vtanh.f32 %v600_v58 }
 0x153   :  { %v8231_v61 = vpop.eup %8230 }
 0x154   :  { %v603_v62 = vmul.f32 %v8231_v61, %v602_v60 }
 0x156   :  { %v8796_v2 = vadd.f32 %v604_v63, %v603_v62 }
 0x158   :  { %v606_v4 = vpack.c.bf16 %v8796_v2, %v8796_v2 }
 0x15a   :  { %v610_v7 = vrot.slane %v606_v4, 7  ;;  %806 = vmatmul.mubr.bf16.vlgmr.msra.gmra.mxu0 %v606_v4  ;;  %7191 = vmatmul.mubr.bf16.vlgmr.msra.gmra.mxu1 %v606_v4 }
 0x15b   :  { %1030 = vmatpush1.bf16.msra.mxu0 %v8502_v8  ;;  %7195 = vmatpush3.bf16.msra.mxu1 %v7933_v3 }
 0x15c   :  { %612 = vst [vmem:[#allocation3] sm:$0x2] %v610_v7  ;;  %1031 = vmatprep.subr.bf16.mxu0 %v8503_v10  ;;  %7196 = vmatprep.subr.bf16.mxu1 %v10304_v0 }
 0x15d   :  { %1061 = vmatprep.mubr.bf16.mxu0 %v10302_v1  ;;  %7210 = vmatprep.mubr.msk.bf16.mxu1 %vm8580_vm0, %v10304_v0 }
 0x15f   :  { %1032 = vmatpush1.bf16.msra.mxu0 %v8504_v49  ;;  %7197 = vmatpush3.bf16.msra.mxu1 %v7934_v9 }
 0x160   :  { %1033 = vmatprep.subr.bf16.mxu0 %v8505_v12  ;;  %7198 = vmatprep.subr.bf16.mxu1 %v10304_v0 }
 0x163   :  { %1034 = vmatpush1.bf16.msra.mxu0 %v8506_v13  ;;  %7199 = vmatpush3.bf16.msra.mxu1 %v7935_v11 }
 0x164   :  { %1035 = vmatprep.subr.bf16.mxu0 %v8507_v16  ;;  %7200 = vmatprep.subr.bf16.mxu1 %v10304_v0 }
 0x167   :  { %1036 = vmatpush1.bf16.msra.mxu0 %v8698_v36  ;;  %7201 = vmatpush3.bf16.msra.mxu1 %v7936_v15  ;;  %v7940_v36 = vld [vmem:[#allocation6 + $0x8] ss:$12 sps:$4 sm:$0xff]  }
 0x168   :  { %1037 = vmatprep.subr.bf16.mxu0 %v8700_v37  ;;  %7202 = vmatprep.subr.bf16.mxu1 %v10304_v0  ;;  %v8508_v37 = vld [vmem:[#allocation6 + $0xac] ss:$12 sps:$4 sm:$0xff]  }
 0x16b   :  { %1038 = vmatpush1.bf16.msra.mxu0 %v8703_v39  ;;  %7203 = vmatpush3.bf16.msra.mxu1 %v7937_v17  ;;  %v8509_v39 = vld [vmem:[#allocation6 + $0x60] ss:$12 sps:$4 sm:$0xff]  }
 0x16c   :  { %1039 = vmatprep.subr.bf16.mxu0 %v8707_v40  ;;  %7204 = vmatprep.subr.bf16.mxu1 %v10304_v0  ;;  %v8510_v40 = vld [vmem:[#allocation6 + $0x4c] ss:$12 sps:$4 sm:$0xff]  }
 0x16f   :  { %1040 = vmatpush1.bf16.msra.mxu0 %v8712_v42  ;;  %7205 = vmatpush3.bf16.msra.mxu1 %v7938_v18  ;;  %v8511_v42 = vld [vmem:[#allocation6 + $0x48] ss:$12 sps:$4 sm:$0xff]  }
 0x170   :  { %1041 = vmatprep.subr.bf16.mxu0 %v8714_v43  ;;  %7206 = vmatprep.subr.bf16.mxu1 %v10304_v0  ;;  %v8512_v43 = vld [vmem:[#allocation6 + $0x34] ss:$12 sps:$4 sm:$0xff]  }
 0x173   :  { %1042 = vmatpush1.bf16.msra.mxu0 %v8719_v45  ;;  %7207 = vmatpush3.bf16.msra.mxu1 %v7939_v19 }
 0x174   :  { %1043 = vmatprep.subr.bf16.mxu0 %v8721_v46  ;;  %7208 = vmatprep.subr.bf16.mxu1 %v10304_v0 }
 0x177   :  { %1044 = vmatpush1.bf16.msra.mxu0 %v8726_v48  ;;  %7209 = vmatpush3.bf16.msra.mxu1 %v7940_v36 }
 0x178   :  { %1135 = vmatprep.subr.bf16.mxu0 %v8508_v37  ;;  %7214 = vmatprep.subr.bf16.mxu1 %v10304_v0  ;;  %v7944_v37 = vld [vmem:[#allocation4 + $0xb0] ss:$12 sps:$4 sm:$0xff]  }
 0x17a   :  { %1062 = vmatmul.mubr.bf16.vlgmr.msra.gmra.mxu0 %v606_v4  ;;  %7211 = vmatmul.mubr.bf16.vlgmr.msra.gmra.mxu1 %v606_v4 }
 0x17b   :  { %1136 = vmatpush1.bf16.msra.mxu0 %v8502_v8  ;;  %7215 = vmatpush3.bf16.msra.mxu1 %v7933_v3 }
 0x17c   :  { %1137 = vmatprep.subr.bf16.mxu0 %v8503_v10  ;;  %7216 = vmatprep.subr.bf16.mxu1 %v10304_v0  ;;  %v868_v10 = vld [vmem:[#allocation2 + $0x8] sm:$0x3] }
 0x17d   :  { %1167 = vmatprep.mubr.bf16.mxu0 %v10302_v1  ;;  %7230 = vmatprep.mubr.msk.bf16.mxu1 %vm8580_vm0, %v10304_v0 }
 0x17f   :  { %1138 = vmatpush1.bf16.msra.mxu0 %v8504_v49  ;;  %7217 = vmatpush3.bf16.msra.mxu1 %v7934_v9 }
 0x180   :  { %1139 = vmatprep.subr.bf16.mxu0 %v8505_v12  ;;  %7218 = vmatprep.subr.bf16.mxu1 %v10304_v0 }
 0x183   :  { %1140 = vmatpush1.bf16.msra.mxu0 %v8506_v13  ;;  %7219 = vmatpush3.bf16.msra.mxu1 %v7935_v11 }
 0x184   :  { %1141 = vmatprep.subr.bf16.mxu0 %v8507_v16  ;;  %7220 = vmatprep.subr.bf16.mxu1 %v10304_v0 }
 0x187   :  { %1142 = vmatpush1.bf16.msra.mxu0 %v8509_v39  ;;  %7221 = vmatpush3.bf16.msra.mxu1 %v7936_v15  ;;  %v8857_v39 = vld [vmem:[#allocation4 + $0x90] ss:$12 sps:$4 sm:$0xff]  }
 0x188   :  { %1143 = vmatprep.subr.bf16.mxu0 %v8510_v40  ;;  %7222 = vmatprep.subr.bf16.mxu1 %v10304_v0  ;;  %v7948_v40 = vld [vmem:[#allocation4 + $0x98] ss:$12 sps:$4 sm:$0xff]  }
 0x18b   :  { %1144 = vmatpush1.bf16.msra.mxu0 %v8511_v42  ;;  %7223 = vmatpush3.bf16.msra.mxu1 %v7937_v17  ;;  %v8861_v42 = vld [vmem:[#allocation4 + $0x7c] ss:$12 sps:$4 sm:$0xff]  }
 0x18c   :  { %1145 = vmatprep.subr.bf16.mxu0 %v8512_v43  ;;  %7224 = vmatprep.subr.bf16.mxu1 %v10304_v0  ;;  %v8864_v43 = vld [vmem:[#allocation4 + $0x78] ss:$12 sps:$4 sm:$0xff]  }
 0x18f   :  { %1146 = vmatpush1.bf16.msra.mxu0 %v8513_v20  ;;  %7225 = vmatpush3.bf16.msra.mxu1 %v7938_v18  ;;  %v7952_v20 = vld [vmem:[#allocation4 + $0x80] ss:$12 sps:$4 sm:$0xff]  }
 0x190   :  { %1147 = vmatprep.subr.bf16.mxu0 %v8514_v22  ;;  %7226 = vmatprep.subr.bf16.mxu1 %v10304_v0  ;;  %v8868_v22 = vld [vmem:[#allocation4 + $0x64] ss:$12 sps:$4 sm:$0xff]  }
 0x193   :  { %1148 = vmatpush1.bf16.msra.mxu0 %v8719_v45  ;;  %7227 = vmatpush3.bf16.msra.mxu1 %v7939_v19  ;;  %v8848_v19 = vld [vmem:[#allocation4 + $0xac] ss:$12 sps:$4 sm:$0xff]  }
 0x194   :  { %1149 = vmatprep.subr.bf16.mxu0 %v8721_v46  ;;  %7228 = vmatprep.subr.bf16.mxu1 %v10304_v0 }
 0x197   :  { %1150 = vmatpush1.bf16.msra.mxu0 %v8726_v48  ;;  %7229 = vmatpush3.bf16.msra.mxu1 %v7940_v36  ;;  %v8850_v36 = vld [vmem:[#allocation4 + $0xa8] ss:$12 sps:$4 sm:$0xff]  }
 0x198   :  { %7234 = vmatprep.subr.bf16.mxu1 %v10304_v0  ;;  %1418 = vmatprep.subr.bf16.mxu0 %v8848_v19 }
 0x21a   :  { %v807_v24 = vpop.f32.mrf.mxu0  ;;  %v848_v25 = vpop.f32.mrf.mxu1 }
 0x21b   :  { %v808_v26 = vadd.f32 %v807_v24, %v8774_v5  ;;  %v849_v27 = vadd.f32 %v848_v25, %v8780_v14  ;;  %v8871_v24 = vld [vmem:[#allocation4 + $0x60] ss:$12 sps:$4 sm:$0xff]   ;;  %v7956_v25 = vld [vmem:[#allocation4 + $0x68] ss:$12 sps:$4 sm:$0xff]  }
 0x21c   :  { %v809_v28 = vpop.f32.mrf.mxu0  ;;  %v7192_v29 = vpop.f32.mrf.mxu1 }
 0x21d   :  { %v857_v30 = vrot.slane %v808_v26, 6  ;;  %v859_v45 = vrot.slane %v849_v27, 6  ;;  %v810_v31 = vadd.f32 %v809_v28, %v8776_v6  ;;  %v8874_v26 = vld [vmem:[#allocation4 + $0x4c] ss:$12 sps:$4 sm:$0xff]   ;;  %v8877_v27 = vld [vmem:[#allocation4 + $0x48] ss:$12 sps:$4 sm:$0xff]  }
 0x21e   :  { %v811_v46 = vpop.f32.mrf.mxu0  ;;  %v851_v32 = vpop.f32.mrf.mxu1  ;;  %v7960_v28 = vld [vmem:[#allocation4 + $0x50] ss:$12 sps:$4 sm:$0xff]   ;;  %v8881_v29 = vld [vmem:[#allocation4 + $0x34] ss:$12 sps:$4 sm:$0xff]  }
 0x21f   :  { %863 = vst [vmem:[#allocation2 + $0x28] sm:$0xc] %v857_v30  ;;  %865 = vst [vmem:[#allocation2 + $0x8] sm:$0xc] %v859_v45  ;;  %v858_v48 = vrot.slane %v810_v31, 6 }
 0x220   :  { %v812_v33 = vpop.f32.mrf.mxu0  ;;  %v7193_v34 = vpop.f32.mrf.mxu1  ;;  %v8884_v30 = vld [vmem:[#allocation4 + $0x30] ss:$12 sps:$4 sm:$0xff]   ;;  %v7964_v45 = vld [vmem:[#allocation4 + $0x38] ss:$12 sps:$4 sm:$0xff]   ;;  %v7968_v32 = vld [vmem:[#allocation4 + $0x20] ss:$12 sps:$4 sm:$0xff]  }
 0x221   :  { %864 = vst [vmem:[#allocation2 + $0x10] sm:$0xc] %v858_v48  ;;  %v8888_v31 = vld [vmem:[#allocation4 + $0x1c] ss:$12 sps:$4 sm:$0xff]   ;;  %v8891_v46 = vld [vmem:[#allocation4 + $0x18] ss:$12 sps:$4 sm:$0xff]  }
 0x222   :  { %v8895_v48 = vld [vmem:[#allocation4 + $0x4] ss:$12 sps:$4 sm:$0xff]   ;;  %v8898_v33 = vld [vmem:[#allocation4] ss:$12 sps:$4 sm:$0xff]   ;;  %v7972_v34 = vld [vmem:[#allocation4 + $0x8] ss:$12 sps:$4 sm:$0xff]  }
 0x23a   :  { %v1063_v35 = vpop.f32.mrf.mxu0  ;;  %v1104_v38 = vpop.f32.mrf.mxu1 }
 0x23b   :  { %v1064_v41 = vadd.f32 %v1063_v35, %v8786_v21  ;;  %v1105_v7 = vadd.f32 %v1104_v38, %v8792_v51  ;;  %v8902_v35 = vld [vmem:[#allocation6 + $0xac] ss:$12 sps:$4 sm:$0xff]  }
 0x23c   :  { %v1065_v47 = vpop.f32.mrf.mxu0  ;;  %v7212_v50 = vpop.f32.mrf.mxu1 }
 0x23d   :  { %v1110_v52 = vadd.f32 %v1064_v41, %v866_v44  ;;  %v1066_v56 = vadd.f32 %v1065_v47, %v8788_v23 }
 0x23e   :  { %v1067_v53 = vpop.f32.mrf.mxu0  ;;  %v1107_v54 = vpop.f32.mrf.mxu1 }
 0x23f   :  { %v6492_v55 = vmul.f32 -1.442695, %v1110_v52  ;;  %v1117_v60 = vadd.f32 %v1066_v56, %v867_v59  ;;  %v1131_v54 = vld [vmem:[#allocation2 + $0x28] sm:$0xc] }
 0x240   :  { %v1068_v57 = vpop.f32.mrf.mxu0  ;;  %v7213_v58 = vpop.f32.mrf.mxu1 }
 0x241   :  { %8232 = vpow2.f32 %v6492_v55  ;;  %v6493_v61 = vmul.f32 -1.442695, %v1117_v60 }
 0x243   :  { %8234 = vpow2.f32 %v6493_v61 }
 0x24e   :  { %v8233_v62 = vpop.eup %8232 }
 0x24f   :  { %v1114_v63 = vadd.f32 1.0, %v8233_v62  ;;  %v1132_v62 = vld [vmem:[#allocation2 + $0x10] sm:$0xc] }
 0x250   :  { %v8235_v3 = vpop.eup %8234 }
 0x251   :  { %8236 = vrcp.f32 %v1114_v63  ;;  %v1121_v4 = vadd.f32 1.0, %v8235_v3 }
 0x253   :  { %8238 = vrcp.f32 %v1121_v4 }
 0x25e   :  { %v8237_v8 = vpop.eup %8236 }
 0x25f   :  { %v1124_v9 = vmul.f32 %v8237_v8, %v1105_v7 }
 0x260   :  { %v8239_v11 = vpop.eup %8238 }
 0x261   :  { %v1125_v49 = vadd.f32 %v1124_v9, %v868_v10  ;;  %v1127_v12 = vsub.f32 1.0, %v8239_v11  ;;  %v1129_v16 = vmul.f32 %v8239_v11, %v8796_v2  ;;  %v8854_v2 = vld [vmem:[#allocation4 + $0x94] ss:$12 sps:$4 sm:$0xff]  }
 0x263   :  { %8240 = vtanh.f32 %v1125_v49 }
 0x270   :  { %v8241_v13 = vpop.eup %8240 }
 0x271   :  { %v1128_v15 = vmul.f32 %v8241_v13, %v1127_v12  ;;  %v1133_v13 = vld [vmem:[#allocation2 + $0x8] sm:$0xc] }
 0x273   :  { %v8841_v17 = vadd.f32 %v1129_v16, %v1128_v15 }
 0x275   :  { %v1134_v18 = vpack.c.bf16 %v8841_v17, %v8841_v17 }
 0x277   :  { %1168 = vmatmul.mubr.bf16.vlgmr.msra.gmra.mxu0 %v1134_v18  ;;  %7231 = vmatmul.mubr.bf16.vlgmr.msra.gmra.mxu1 %v1134_v18  ;;  %v1245_v18 = vrot.slane %v8841_v17, 6  ;;  %v8923_v17 = vld [vmem:[#allocation6 + $0x90] ss:$12 sps:$4 sm:$0xff]  }
 0x278   :  { %1450 = vmatprep.mubr.bf16.mxu0 %v10302_v1  ;;  %7250 = vmatprep.mubr.msk.bf16.mxu1 %vm8580_vm0, %v10304_v0 }
 0x279   :  { %1419 = vmatpush1.bf16.msra.mxu0 %v8850_v36  ;;  %7235 = vmatpush3.bf16.msra.mxu1 %v7944_v37 }
 0x27a   :  { %7236 = vmatprep.subr.bf16.mxu1 %v10304_v0  ;;  %1420 = vmatprep.subr.bf16.mxu0 %v8854_v2 }
 0x27d   :  { %1421 = vmatpush1.bf16.msra.mxu0 %v8857_v39  ;;  %7237 = vmatpush3.bf16.msra.mxu1 %v7948_v40 }
 0x27e   :  { %7238 = vmatprep.subr.bf16.mxu1 %v10304_v0  ;;  %1422 = vmatprep.subr.bf16.mxu0 %v8861_v42 }
 0x281   :  { %1423 = vmatpush1.bf16.msra.mxu0 %v8864_v43  ;;  %7239 = vmatpush3.bf16.msra.mxu1 %v7952_v20 }
 0x282   :  { %7240 = vmatprep.subr.bf16.mxu1 %v10304_v0  ;;  %1424 = vmatprep.subr.bf16.mxu0 %v8868_v22 }
 0x285   :  { %1425 = vmatpush1.bf16.msra.mxu0 %v8871_v24  ;;  %7241 = vmatpush3.bf16.msra.mxu1 %v7956_v25 }
 0x286   :  { %1426 = vmatprep.subr.bf16.mxu0 %v8874_v26  ;;  %7242 = vmatprep.subr.bf16.mxu1 %v10304_v0 }
 0x289   :  { %1427 = vmatpush1.bf16.msra.mxu0 %v8877_v27  ;;  %7243 = vmatpush3.bf16.msra.mxu1 %v7960_v28 }
 0x28a   :  { %1428 = vmatprep.subr.bf16.mxu0 %v8881_v29  ;;  %7244 = vmatprep.subr.bf16.mxu1 %v10304_v0 }
 0x28d   :  { %1429 = vmatpush1.bf16.msra.mxu0 %v8884_v30  ;;  %7245 = vmatpush3.bf16.msra.mxu1 %v7964_v45 }
 0x28e   :  { %1430 = vmatprep.subr.bf16.mxu0 %v8888_v31  ;;  %7246 = vmatprep.subr.bf16.mxu1 %v10304_v0 }
 0x291   :  { %1431 = vmatpush1.bf16.msra.mxu0 %v8891_v46  ;;  %7247 = vmatpush3.bf16.msra.mxu1 %v7968_v32  ;;  %v8915_v32 = vld [vmem:[#allocation6 + $0xa8] ss:$12 sps:$4 sm:$0xff]  }
 0x292   :  { %1432 = vmatprep.subr.bf16.mxu0 %v8895_v48  ;;  %7248 = vmatprep.subr.bf16.mxu1 %v10304_v0 }
 0x295   :  { %1433 = vmatpush1.bf16.msra.mxu0 %v8898_v33  ;;  %7249 = vmatpush3.bf16.msra.mxu1 %v7972_v34  ;;  %v8917_v34 = vld [vmem:[#allocation6 + $0xb0] ss:$12 sps:$4 sm:$0xff]  }
 0x296   :  { %1674 = vmatprep.subr.bf16.mxu0 %v8902_v35  ;;  %7254 = vmatprep.subr.bf16.mxu1 %v10304_v0 }
 0x337   :  { %v1169_v38 = vpop.f32.mrf.mxu0  ;;  %v1210_v41 = vpop.f32.mrf.mxu1 }
 0x338   :  { %v1170_v44 = vadd.f32 %v1169_v38, %v8786_v21  ;;  %v1211_v9 = vadd.f32 %v1210_v41, %v8792_v51 }
 0x339   :  { %v1171_v47 = vpop.f32.mrf.mxu0  ;;  %v7232_v50 = vpop.f32.mrf.mxu1 }
 0x33a   :  { %v1217_v52 = vrot.slane %v1170_v44, 6  ;;  %v1172_v53 = vadd.f32 %v1171_v47, %v8788_v23  ;;  %v1237_v49 = vrot.slane %v1211_v9, 6  ;;  %v8919_v44 = vld [vmem:[#allocation6 + $0x94] ss:$12 sps:$4 sm:$0xff]   ;;  %v8925_v47 = vld [vmem:[#allocation6 + $0x98] ss:$12 sps:$4 sm:$0xff]  }
 0x33b   :  { %v1173_v55 = vpop.f32.mrf.mxu0  ;;  %v1213_v56 = vpop.f32.mrf.mxu1  ;;  %v8929_v50 = vld [vmem:[#allocation6 + $0x7c] ss:$12 sps:$4 sm:$0xff]  }
 0x33c   :  { %v1219_v57 = vadd.f32 %v1217_v52, %v1131_v54  ;;  %v1227_v61 = vrot.slane %v1172_v53, 6  ;;  %v8936_v52 = vld [vmem:[#allocation6 + $0x78] ss:$12 sps:$4 sm:$0xff]   ;;  %v8938_v53 = vld [vmem:[#allocation6 + $0x80] ss:$12 sps:$4 sm:$0xff]  }
 0x33d   :  { %v1174_v58 = vpop.f32.mrf.mxu0  ;;  %v7233_v59 = vpop.f32.mrf.mxu1  ;;  %v8942_v54 = vld [vmem:[#allocation6 + $0x64] ss:$12 sps:$4 sm:$0xff]   ;;  %v8946_v55 = vld [vmem:[#allocation6 + $0x60] ss:$12 sps:$4 sm:$0xff]   ;;  %v8948_v56 = vld [vmem:[#allocation6 + $0x68] ss:$12 sps:$4 sm:$0xff]  }
 0x33e   :  { %v6494_v60 = vmul.f32 -1.442695, %v1219_v57  ;;  %v1229_v63 = vadd.f32 %v1227_v61, %v1132_v62  ;;  %v8952_v57 = vld [vmem:[#allocation6 + $0x4c] ss:$12 sps:$4 sm:$0xff]   ;;  %v8956_v58 = vld [vmem:[#allocation6 + $0x48] ss:$12 sps:$4 sm:$0xff]  }
 0x33f   :  { %v8958_v59 = vld [vmem:[#allocation6 + $0x50] ss:$12 sps:$4 sm:$0xff]   ;;  %v8968_v62 = vld [vmem:[#allocation6 + $0x38] ss:$12 sps:$4 sm:$0xff]   ;;  %v8988_v9 = vld [vmem:[#allocation6 + $0x8] ss:$12 sps:$4 sm:$0xff]  }
 0x340   :  { %8242 = vpow2.f32 %v6494_v60  ;;  %v6495_v3 = vmul.f32 -1.442695, %v1229_v63  ;;  %v8962_v60 = vld [vmem:[#allocation6 + $0x34] ss:$12 sps:$4 sm:$0xff]   ;;  %v8966_v61 = vld [vmem:[#allocation6 + $0x30] ss:$12 sps:$4 sm:$0xff]  }
 0x341   :  { %v8972_v63 = vld [vmem:[#allocation6 + $0x1c] ss:$12 sps:$4 sm:$0xff]  }
 0x342   :  { %8244 = vpow2.f32 %v6495_v3  ;;  %v8976_v3 = vld [vmem:[#allocation6 + $0x18] ss:$12 sps:$4 sm:$0xff]  }
 0x34d   :  { %v8243_v4 = vpop.eup %8242 }
 0x34e   :  { %v1223_v7 = vadd.f32 1.0, %v8243_v4  ;;  %v8978_v4 = vld [vmem:[#allocation6 + $0x20] ss:$12 sps:$4 sm:$0xff]  }
 0x34f   :  { %v8245_v8 = vpop.eup %8244 }
 0x350   :  { %8246 = vrcp.f32 %v1223_v7  ;;  %v1233_v10 = vadd.f32 1.0, %v8245_v8  ;;  %v8982_v7 = vld [vmem:[#allocation6 + $0x4] ss:$12 sps:$4 sm:$0xff]   ;;  %v8986_v8 = vld [vmem:[#allocation6] ss:$12 sps:$4 sm:$0xff]  }
 0x352   :  { %8248 = vrcp.f32 %v1233_v10 }
 0x35d   :  { %v8247_v11 = vpop.eup %8246 }
 0x35e   :  { %v1239_v12 = vmul.f32 %v8247_v11, %v1237_v49 }
 0x35f   :  { %v8249_v16 = vpop.eup %8248 }
 0x360   :  { %v1240_v15 = vadd.f32 %v1239_v12, %v1133_v13  ;;  %v1242_v37 = vsub.f32 1.0, %v8249_v16  ;;  %v1247_v25 = vmul.f32 %v8249_v16, %v1245_v18 }
 0x362   :  { %8250 = vtanh.f32 %v1240_v15 }
 0x36f   :  { %v8251_v40 = vpop.eup %8250 }
 0x370   :  { %v1243_v20 = vmul.f32 %v8251_v40, %v1242_v37 }
 0x372   :  { %v8911_v28 = vadd.f32 %v1247_v25, %v1243_v20 }
 0x374   :  { %v1249_v45 = vpack.c.bf16 %v8911_v28, %v8911_v28 }
 0x376   :  { %v1253_v38 = vrot.slane %v1249_v45, 7  ;;  %v1288_v41 = vrot.slane %v1249_v45, 1 }
 0x378   :  { %1255 = vst [vmem:[#allocation3] sm:$0x4] %v1253_v38  ;;  %1451 = vmatmul.mubr.bf16.vlgmr.msra.gmra.mxu0 %v1288_v41  ;;  %7251 = vmatmul.mubr.bf16.vlgmr.msra.gmra.mxu1 %v1288_v41 }
 0x379   :  { %1675 = vmatpush1.bf16.msra.mxu0 %v8915_v32  ;;  %7255 = vmatpush3.bf16.msra.mxu1 %v8917_v34 }
 0x37a   :  { %1676 = vmatprep.subr.bf16.mxu0 %v8919_v44  ;;  %7256 = vmatprep.subr.bf16.mxu1 %v10304_v0 }
 0x37b   :  { %1706 = vmatprep.mubr.bf16.mxu0 %v10302_v1  ;;  %7270 = vmatprep.mubr.msk.bf16.mxu1 %vm8580_vm0, %v10304_v0 }
 0x37d   :  { %1677 = vmatpush1.bf16.msra.mxu0 %v8923_v17  ;;  %7257 = vmatpush3.bf16.msra.mxu1 %v8925_v47 }
 0x37e   :  { %1678 = vmatprep.subr.bf16.mxu0 %v8929_v50  ;;  %7258 = vmatprep.subr.bf16.mxu1 %v10304_v0 }
 0x381   :  { %1679 = vmatpush1.bf16.msra.mxu0 %v8936_v52  ;;  %7259 = vmatpush3.bf16.msra.mxu1 %v8938_v53 }
 0x382   :  { %1680 = vmatprep.subr.bf16.mxu0 %v8942_v54  ;;  %7260 = vmatprep.subr.bf16.mxu1 %v10304_v0 }
 0x385   :  { %1681 = vmatpush1.bf16.msra.mxu0 %v8946_v55  ;;  %7261 = vmatpush3.bf16.msra.mxu1 %v8948_v56 }
 0x386   :  { %1682 = vmatprep.subr.bf16.mxu0 %v8952_v57  ;;  %7262 = vmatprep.subr.bf16.mxu1 %v10304_v0 }
 0x389   :  { %1683 = vmatpush1.bf16.msra.mxu0 %v8956_v58  ;;  %7263 = vmatpush3.bf16.msra.mxu1 %v8958_v59 }
 0x38a   :  { %1684 = vmatprep.subr.bf16.mxu0 %v8962_v60  ;;  %7264 = vmatprep.subr.bf16.mxu1 %v10304_v0 }
 0x38d   :  { %1685 = vmatpush1.bf16.msra.mxu0 %v8966_v61  ;;  %7265 = vmatpush3.bf16.msra.mxu1 %v8968_v62 }
 0x38e   :  { %1686 = vmatprep.subr.bf16.mxu0 %v8972_v63  ;;  %7266 = vmatprep.subr.bf16.mxu1 %v10304_v0 }
 0x391   :  { %1687 = vmatpush1.bf16.msra.mxu0 %v8976_v3  ;;  %7267 = vmatpush3.bf16.msra.mxu1 %v8978_v4 }
 0x392   :  { %1688 = vmatprep.subr.bf16.mxu0 %v8982_v7  ;;  %7268 = vmatprep.subr.bf16.mxu1 %v10304_v0 }
 0x395   :  { %1689 = vmatpush1.bf16.msra.mxu0 %v8986_v8  ;;  %7269 = vmatpush3.bf16.msra.mxu1 %v8988_v9 }
 0x396   :  { %1783 = vmatprep.subr.bf16.mxu0 %v8902_v35  ;;  %7274 = vmatprep.subr.bf16.mxu1 %v10304_v0 }
 0x398   :  { %1707 = vmatmul.mubr.bf16.vlgmr.msra.gmra.mxu0 %v1288_v41  ;;  %7271 = vmatmul.mubr.bf16.vlgmr.msra.gmra.mxu1 %v1288_v41 }
 0x399   :  { %1784 = vmatpush1.bf16.msra.mxu0 %v8915_v32  ;;  %7275 = vmatpush3.bf16.msra.mxu1 %v8917_v34 }
 0x39a   :  { %1785 = vmatprep.subr.bf16.mxu0 %v8919_v44  ;;  %7276 = vmatprep.subr.bf16.mxu1 %v10304_v0 }
 0x39b   :  { %1815 = vmatprep.mubr.bf16.mxu0 %v10302_v1  ;;  %7290 = vmatprep.mubr.msk.bf16.mxu1 %vm8580_vm0, %v10304_v0 }
 0x39d   :  { %1786 = vmatpush1.bf16.msra.mxu0 %v8923_v17  ;;  %7277 = vmatpush3.bf16.msra.mxu1 %v8925_v47 }
 0x39e   :  { %1787 = vmatprep.subr.bf16.mxu0 %v8929_v50  ;;  %7278 = vmatprep.subr.bf16.mxu1 %v10304_v0 }
 0x3a1   :  { %1788 = vmatpush1.bf16.msra.mxu0 %v8936_v52  ;;  %7279 = vmatpush3.bf16.msra.mxu1 %v8938_v53 }
 0x3a2   :  { %1789 = vmatprep.subr.bf16.mxu0 %v8942_v54  ;;  %7280 = vmatprep.subr.bf16.mxu1 %v10304_v0 }
 0x3a5   :  { %1790 = vmatpush1.bf16.msra.mxu0 %v8946_v55  ;;  %7281 = vmatpush3.bf16.msra.mxu1 %v8948_v56 }
 0x3a6   :  { %1791 = vmatprep.subr.bf16.mxu0 %v8952_v57  ;;  %7282 = vmatprep.subr.bf16.mxu1 %v10304_v0 }
 0x3a9   :  { %1792 = vmatpush1.bf16.msra.mxu0 %v8956_v58  ;;  %7283 = vmatpush3.bf16.msra.mxu1 %v8958_v59 }
 0x3aa   :  { %1793 = vmatprep.subr.bf16.mxu0 %v8962_v60  ;;  %7284 = vmatprep.subr.bf16.mxu1 %v10304_v0 }
 0x3ad   :  { %1794 = vmatpush1.bf16.msra.mxu0 %v8966_v61  ;;  %7285 = vmatpush3.bf16.msra.mxu1 %v8968_v62 }
 0x3ae   :  { %1795 = vmatprep.subr.bf16.mxu0 %v8972_v63  ;;  %7286 = vmatprep.subr.bf16.mxu1 %v10304_v0 }
 0x3b1   :  { %1796 = vmatpush1.bf16.msra.mxu0 %v8976_v3  ;;  %7287 = vmatpush3.bf16.msra.mxu1 %v8978_v4 }
 0x3b2   :  { %1797 = vmatprep.subr.bf16.mxu0 %v8982_v7  ;;  %7288 = vmatprep.subr.bf16.mxu1 %v10304_v0 }
 0x3b5   :  { %1798 = vmatpush1.bf16.msra.mxu0 %v8986_v8  ;;  %7289 = vmatpush3.bf16.msra.mxu1 %v8988_v9 }
 0x3b6   :  { %1904 = vmatprep.subr.bf16.mxu0 %v8902_v35  ;;  %7294 = vmatprep.subr.bf16.mxu1 %v10304_v0  ;;  %v1511_v0 = vld [vmem:[#allocation2 + $0x28] sm:$0x3] }
 0x438   :  { %v1452_v10 = vpop.f32.mrf.mxu0  ;;  %v1493_v49 = vpop.f32.mrf.mxu1 }
 0x439   :  { %v1453_v11 = vadd.f32 %v1452_v10, %v8774_v5  ;;  %v1494_v12 = vadd.f32 %v1493_v49, %v8780_v14 }
 0x43a   :  { %v1454_v13 = vpop.f32.mrf.mxu0  ;;  %v7252_v15 = vpop.f32.mrf.mxu1 }
 0x43b   :  { %v1502_v16 = vrot.slane %v1453_v11, 4  ;;  %v1504_v18 = vrot.slane %v1494_v12, 4  ;;  %v1455_v37 = vadd.f32 %v1454_v13, %v8776_v6 }
 0x43c   :  { %v1456_v40 = vpop.f32.mrf.mxu0  ;;  %v1496_v20 = vpop.f32.mrf.mxu1 }
 0x43d   :  { %1508 = vst [vmem:[#allocation2 + $0x28] sm:$0x30] %v1502_v16  ;;  %1510 = vst [vmem:[#allocation2 + $0x8] sm:$0x30] %v1504_v18  ;;  %v1503_v25 = vrot.slane %v1455_v37, 4 }
 0x43e   :  { %v1457_v45 = vpop.f32.mrf.mxu0  ;;  %v7253_v38 = vpop.f32.mrf.mxu1  ;;  %v1512_v18 = vld [vmem:[#allocation2 + $0x10] sm:$0x3] }
 0x43f   :  { %1509 = vst [vmem:[#allocation2 + $0x10] sm:$0x30] %v1503_v25 }
 0x458   :  { %v1708_v41 = vpop.f32.mrf.mxu0  ;;  %v1749_v1 = vpop.f32.mrf.mxu1 }
 0x459   :  { %v1709_v10 = vadd.f32 %v1708_v41, %v8786_v21 }
 0x45a   :  { %v1710_v49 = vpop.f32.mrf.mxu0  ;;  %v7272_v14 = vpop.f32.mrf.mxu1 }
 0x45b   :  { %v1755_v15 = vadd.f32 %v1709_v10, %v1511_v0  ;;  %v1711_v13 = vadd.f32 %v1710_v49, %v8788_v23  ;;  %v1750_v14 = vadd.f32 %v1749_v1, %v8792_v51  ;;  %v10312_v1 = vmov 0.0  }
 0x45c   :  { %v1712_v11 = vpop.f32.mrf.mxu0  ;;  %v1752_v12 = vpop.f32.mrf.mxu1 }
 0x45d   :  { %v6545_v5 = vmul.f32 -1.442695, %v1755_v15  ;;  %v1762_v37 = vadd.f32 %v1711_v13, %v1512_v18  ;;  %v1513_v15 = vld [vmem:[#allocation2 + $0x8] sm:$0x3] }
 0x45e   :  { %v1713_v40 = vpop.f32.mrf.mxu0  ;;  %v7273_v16 = vpop.f32.mrf.mxu1 }
 0x45f   :  { %8252 = vpow2.f32 %v6545_v5  ;;  %v6546_v20 = vmul.f32 -1.442695, %v1762_v37  ;;  %v1775_v5 = vrot.slane %v8911_v28, 2 }
 0x461   :  { %8254 = vpow2.f32 %v6546_v20  ;;  %v10313_v20 = vmov 0  }
 0x46c   :  { %v8253_v25 = vpop.eup %8252 }
 0x46d   :  { %v1759_v45 = vadd.f32 1.0, %v8253_v25 }
 0x46e   :  { %v8255_v38 = vpop.eup %8254 }
 0x46f   :  { %8256 = vrcp.f32 %v1759_v45  ;;  %v1766_v41 = vadd.f32 1.0, %v8255_v38 }
 0x471   :  { %8258 = vrcp.f32 %v1766_v41 }
 0x47c   :  { %v8257_v0 = vpop.eup %8256 }
 0x47d   :  { %v1769_v10 = vmul.f32 %v8257_v0, %v1750_v14 }
 0x47e   :  { %v8259_v49 = vpop.eup %8258 }
 0x47f   :  { %v1770_v11 = vadd.f32 %v1769_v10, %v1513_v15  ;;  %v1772_v12 = vsub.f32 1.0, %v8259_v49  ;;  %v1777_v16 = vmul.f32 %v8259_v49, %v1775_v5 }
 0x481   :  { %8260 = vtanh.f32 %v1770_v11 }
 0x48e   :  { %v8261_v13 = vpop.eup %8260 }
 0x48f   :  { %v1773_v40 = vmul.f32 %v8261_v13, %v1772_v12 }
 0x491   :  { %v9038_v18 = vadd.f32 %v1777_v16, %v1773_v40 }
 0x493   :  { %v1782_v37 = vpack.c.bf16 %v9038_v18, %v9038_v18 }
 0x495   :  { %1816 = vmatmul.mubr.bf16.vlgmr.msra.gmra.mxu0 %v1782_v37  ;;  %7291 = vmatmul.mubr.bf16.vlgmr.msra.gmra.mxu1 %v1782_v37 }
 0x496   :  { %1905 = vmatpush1.bf16.msra.mxu0 %v8915_v32  ;;  %7295 = vmatpush3.bf16.msra.mxu1 %v8917_v34 }
 0x497   :  { %1906 = vmatprep.subr.bf16.mxu0 %v8919_v44  ;;  %7296 = vmatprep.subr.bf16.mxu1 %v10312_v1 }
 0x498   :  { %1936 = vmatprep.mubr.bf16.mxu0 %v10313_v20  ;;  %7310 = vmatprep.mubr.msk.bf16.mxu1 %vm8580_vm0, %v10312_v1 }
 0x49a   :  { %1907 = vmatpush1.bf16.msra.mxu0 %v8923_v17  ;;  %7297 = vmatpush3.bf16.msra.mxu1 %v8925_v47 }
 0x49b   :  { %1908 = vmatprep.subr.bf16.mxu0 %v8929_v50  ;;  %7298 = vmatprep.subr.bf16.mxu1 %v10312_v1 }
 0x49e   :  { %1909 = vmatpush1.bf16.msra.mxu0 %v8936_v52  ;;  %7299 = vmatpush3.bf16.msra.mxu1 %v8938_v53 }
 0x49f   :  { %1910 = vmatprep.subr.bf16.mxu0 %v8942_v54  ;;  %7300 = vmatprep.subr.bf16.mxu1 %v10312_v1 }
 0x4a2   :  { %1911 = vmatpush1.bf16.msra.mxu0 %v8946_v55  ;;  %7301 = vmatpush3.bf16.msra.mxu1 %v8948_v56 }
 0x4a3   :  { %1912 = vmatprep.subr.bf16.mxu0 %v8952_v57  ;;  %7302 = vmatprep.subr.bf16.mxu1 %v10312_v1 }
 0x4a6   :  { %1913 = vmatpush1.bf16.msra.mxu0 %v8956_v58  ;;  %7303 = vmatpush3.bf16.msra.mxu1 %v8958_v59 }
 0x4a7   :  { %1914 = vmatprep.subr.bf16.mxu0 %v8962_v60  ;;  %7304 = vmatprep.subr.bf16.mxu1 %v10312_v1 }
 0x4aa   :  { %1915 = vmatpush1.bf16.msra.mxu0 %v8966_v61  ;;  %7305 = vmatpush3.bf16.msra.mxu1 %v8968_v62 }
 0x4ab   :  { %1916 = vmatprep.subr.bf16.mxu0 %v8972_v63  ;;  %7306 = vmatprep.subr.bf16.mxu1 %v10312_v1 }
 0x4ae   :  { %1917 = vmatpush1.bf16.msra.mxu0 %v8976_v3  ;;  %7307 = vmatpush3.bf16.msra.mxu1 %v8978_v4  ;;  %v1779_v4 = vld [vmem:[#allocation2 + $0x28] sm:$0xc] }
 0x4af   :  { %1918 = vmatprep.subr.bf16.mxu0 %v8982_v7  ;;  %7308 = vmatprep.subr.bf16.mxu1 %v10312_v1 }
 0x4b2   :  { %1919 = vmatpush1.bf16.msra.mxu0 %v8986_v8  ;;  %7309 = vmatpush3.bf16.msra.mxu1 %v8988_v9 }
 0x4b3   :  { %2187 = vmatprep.subr.bf16.mxu0 %v8848_v19  ;;  %7314 = vmatprep.subr.bf16.mxu1 %v10312_v1  ;;  %v1780_v19 = vld [vmem:[#allocation2 + $0x10] sm:$0xc] }
 0x555   :  { %v1817_v28 = vpop.f32.mrf.mxu0  ;;  %v1858_v34 = vpop.f32.mrf.mxu1 }
 0x556   :  { %v1818_v47 = vadd.f32 %v1817_v28, %v8786_v21  ;;  %v1859_v5 = vadd.f32 %v1858_v34, %v8792_v51  ;;  %v1781_v28 = vld [vmem:[#allocation2 + $0x8] sm:$0xc] }
 0x557   :  { %v1819_v53 = vpop.f32.mrf.mxu0  ;;  %v7292_v56 = vpop.f32.mrf.mxu1 }
 0x558   :  { %v1865_v59 = vrot.slane %v1818_v47, 6  ;;  %v1820_v62 = vadd.f32 %v1819_v53, %v8788_v23  ;;  %v1885_v40 = vrot.slane %v1859_v5, 6  ;;  %v1893_v56 = vrot.slane %v9038_v18, 6  ;;  %v1897_v18 = vld [vmem:[#allocation2 + $0x28] sm:$0x30] }
 0x559   :  { %v1821_v25 = vpop.f32.mrf.mxu0  ;;  %v1861_v45 = vpop.f32.mrf.mxu1 }
 0x55a   :  { %v1867_v38 = vadd.f32 %v1865_v59, %v1779_v4  ;;  %v1875_v0 = vrot.slane %v1820_v62, 6 }
 0x55b   :  { %v1822_v41 = vpop.f32.mrf.mxu0  ;;  %v7293_v14 = vpop.f32.mrf.mxu1 }
 0x55c   :  { %v6547_v9 = vmul.f32 -1.442695, %v1867_v38  ;;  %v1877_v10 = vadd.f32 %v1875_v0, %v1780_v19 }
 0x55e   :  { %8262 = vpow2.f32 %v6547_v9  ;;  %v6548_v15 = vmul.f32 -1.442695, %v1877_v10 }
 0x560   :  { %8264 = vpow2.f32 %v6548_v15 }
 0x56b   :  { %v8263_v11 = vpop.eup %8262 }
 0x56c   :  { %v1871_v49 = vadd.f32 1.0, %v8263_v11  ;;  %v1898_v11 = vld [vmem:[#allocation2 + $0x10] sm:$0x30] }
 0x56d   :  { %v8265_v12 = vpop.eup %8264 }
 0x56e   :  { %8266 = vrcp.f32 %v1871_v49  ;;  %v1881_v13 = vadd.f32 1.0, %v8265_v12 }
 0x570   :  { %8268 = vrcp.f32 %v1881_v13 }
 0x57b   :  { %v8267_v16 = vpop.eup %8266 }
 0x57c   :  { %v1887_v37 = vmul.f32 %v8267_v16, %v1885_v40 }
 0x57d   :  { %v8269_v53 = vpop.eup %8268 }
 0x57e   :  { %v1888_v47 = vadd.f32 %v1887_v37, %v1781_v28  ;;  %v1890_v59 = vsub.f32 1.0, %v8269_v53  ;;  %v1895_v25 = vmul.f32 %v8269_v53, %v1893_v56  ;;  %v1899_v56 = vld [vmem:[#allocation2 + $0x8] sm:$0x30] }
 0x580   :  { %8270 = vtanh.f32 %v1888_v47 }
 0x58d   :  { %v8271_v62 = vpop.eup %8270 }
 0x58e   :  { %v1891_v4 = vmul.f32 %v8271_v62, %v1890_v59 }
 0x590   :  { %v9081_v45 = vadd.f32 %v1895_v25, %v1891_v4 }
 0x592   :  { %v1900_v34 = vpack.c.bf16 %v9081_v45, %v9081_v45  ;;  %v2014_v4 = vrot.slane %v9081_v45, 6  ;;  %v9124_v45 = vld [vmem:[#allocation6 + $0x98] ss:$12 sps:$4 sm:$0xff]  }
 0x594   :  { %v1902_v38 = vrot.slane %v1900_v34, 1 }
 0x596   :  { %1937 = vmatmul.mubr.bf16.vlgmr.msra.gmra.mxu0 %v1902_v38  ;;  %7311 = vmatmul.mubr.bf16.vlgmr.msra.gmra.mxu1 %v1902_v38 }
 0x597   :  { %2188 = vmatpush1.bf16.msra.mxu0 %v8850_v36  ;;  %2219 = vmatprep.mubr.bf16.mxu0 %v10313_v20  ;;  %v8005_v36 = vld [vmem:[#allocation4 + $0xb0] ss:$12 sps:$4 sm:$0xff]  }
 0x598   :  { %2189 = vmatprep.subr.bf16.mxu0 %v8854_v2  ;;  %7330 = vmatprep.mubr.msk.bf16.mxu1 %vm8580_vm0, %v10312_v1  ;;  %v8006_v2 = vld [vmem:[#allocation4 + $0x98] ss:$12 sps:$4 sm:$0xff]  }
 0x599   :  { %7315 = vmatpush3.bf16.msra.mxu1 %v8005_v36 }
 0x59a   :  { %7316 = vmatprep.subr.bf16.mxu1 %v10312_v1 }
 0x59b   :  { %2190 = vmatpush1.bf16.msra.mxu0 %v8857_v39  ;;  %v8007_v39 = vld [vmem:[#allocation4 + $0x80] ss:$12 sps:$4 sm:$0xff]  }
 0x59c   :  { %2191 = vmatprep.subr.bf16.mxu0 %v8861_v42  ;;  %v8008_v42 = vld [vmem:[#allocation4 + $0x68] ss:$12 sps:$4 sm:$0xff]  }
 0x59d   :  { %7317 = vmatpush3.bf16.msra.mxu1 %v8006_v2 }
 0x59e   :  { %7318 = vmatprep.subr.bf16.mxu1 %v10312_v1 }
 0x59f   :  { %2192 = vmatpush1.bf16.msra.mxu0 %v8864_v43  ;;  %v8009_v43 = vld [vmem:[#allocation4 + $0x50] ss:$12 sps:$4 sm:$0xff]  }
 0x5a0   :  { %2193 = vmatprep.subr.bf16.mxu0 %v8868_v22  ;;  %v8010_v22 = vld [vmem:[#allocation4 + $0x38] ss:$12 sps:$4 sm:$0xff]  }
 0x5a1   :  { %7319 = vmatpush3.bf16.msra.mxu1 %v8007_v39 }
 0x5a2   :  { %7320 = vmatprep.subr.bf16.mxu1 %v10312_v1 }
 0x5a3   :  { %2194 = vmatpush1.bf16.msra.mxu0 %v8871_v24  ;;  %v8011_v24 = vld [vmem:[#allocation4 + $0x20] ss:$12 sps:$4 sm:$0xff]  }
 0x5a4   :  { %2195 = vmatprep.subr.bf16.mxu0 %v8874_v26  ;;  %v8012_v26 = vld [vmem:[#allocation4 + $0x8] ss:$12 sps:$4 sm:$0xff]  }
 0x5a5   :  { %7321 = vmatpush3.bf16.msra.mxu1 %v8008_v42  ;;  %v9120_v42 = vld [vmem:[#allocation6 + $0xb0] ss:$12 sps:$4 sm:$0xff]  }
 0x5a6   :  { %7322 = vmatprep.subr.bf16.mxu1 %v10312_v1 }
 0x5a7   :  { %2196 = vmatpush1.bf16.msra.mxu0 %v8877_v27 }
 0x5a8   :  { %2197 = vmatprep.subr.bf16.mxu0 %v8881_v29 }
 0x5a9   :  { %7323 = vmatpush3.bf16.msra.mxu1 %v8009_v43 }
 0x5aa   :  { %7324 = vmatprep.subr.bf16.mxu1 %v10312_v1 }
 0x5ab   :  { %2198 = vmatpush1.bf16.msra.mxu0 %v8884_v30 }
 0x5ac   :  { %2199 = vmatprep.subr.bf16.mxu0 %v8888_v31 }
 0x5ad   :  { %7325 = vmatpush3.bf16.msra.mxu1 %v8010_v22 }
 0x5ae   :  { %7326 = vmatprep.subr.bf16.mxu1 %v10312_v1 }
 0x5af   :  { %2200 = vmatpush1.bf16.msra.mxu0 %v8891_v46 }
 0x5b0   :  { %2201 = vmatprep.subr.bf16.mxu0 %v8895_v48 }
 0x5b1   :  { %7327 = vmatpush3.bf16.msra.mxu1 %v8011_v24  ;;  %v9133_v24 = vld [vmem:[#allocation6 + $0x80] ss:$12 sps:$4 sm:$0xff]  }
 0x5b2   :  { %7328 = vmatprep.subr.bf16.mxu1 %v10312_v1 }
 0x5b3   :  { %2202 = vmatpush1.bf16.msra.mxu0 %v8898_v33 }
 0x5b4   :  { %2443 = vmatprep.subr.bf16.mxu0 %v8902_v35 }
 0x5b5   :  { %7329 = vmatpush3.bf16.msra.mxu1 %v8012_v26  ;;  %v9139_v26 = vld [vmem:[#allocation6 + $0x68] ss:$12 sps:$4 sm:$0xff]  }
 0x5b6   :  { %7334 = vmatprep.subr.bf16.mxu1 %v10312_v1 }
 0x656   :  { %v1938_v27 = vpop.f32.mrf.mxu0  ;;  %v1979_v29 = vpop.f32.mrf.mxu1 }
 0x657   :  { %v1939_v30 = vadd.f32 %v1938_v27, %v8786_v21  ;;  %v1980_v16 = vadd.f32 %v1979_v29, %v8792_v51  ;;  %v9145_v27 = vld [vmem:[#allocation6 + $0x50] ss:$12 sps:$4 sm:$0xff]   ;;  %v9151_v29 = vld [vmem:[#allocation6 + $0x38] ss:$12 sps:$4 sm:$0xff]  }
 0x658   :  { %v1940_v31 = vpop.f32.mrf.mxu0  ;;  %v7312_v46 = vpop.f32.mrf.mxu1 }
 0x659   :  { %v1986_v48 = vrot.slane %v1939_v30, 4  ;;  %v1941_v33 = vadd.f32 %v1940_v31, %v8788_v23  ;;  %v2006_v28 = vrot.slane %v1980_v16, 4  ;;  %v9157_v30 = vld [vmem:[#allocation6 + $0x20] ss:$12 sps:$4 sm:$0xff]   ;;  %v9163_v31 = vld [vmem:[#allocation6 + $0x8] ss:$12 sps:$4 sm:$0xff]  }
 0x65a   :  { %v1942_v41 = vpop.f32.mrf.mxu0  ;;  %v1982_v14 = vpop.f32.mrf.mxu1 }
 0x65b   :  { %v1988_v9 = vadd.f32 %v1986_v48, %v1897_v18  ;;  %v1996_v15 = vrot.slane %v1941_v33, 4  ;;  %v10314_v33 = vld [vmem:[#allocation10_spill] sm:$0xff]  ;;  %v10315_v41 = vld [vmem:[#allocation11_spill] sm:$0xff] }
 0x65c   :  { %v1943_v0 = vpop.f32.mrf.mxu0  ;;  %v7313_v19 = vpop.f32.mrf.mxu1 }
 0x65d   :  { %v6549_v10 = vmul.f32 -1.442695, %v1988_v9  ;;  %v1998_v49 = vadd.f32 %v1996_v15, %v1898_v11 }
 0x65f   :  { %8272 = vpow2.f32 %v6549_v10  ;;  %v6550_v12 = vmul.f32 -1.442695, %v1998_v49 }
 0x661   :  { %8274 = vpow2.f32 %v6550_v12 }
 0x66c   :  { %v8273_v5 = vpop.eup %8272 }
 0x66d   :  { %v1992_v13 = vadd.f32 1.0, %v8273_v5 }
 0x66e   :  { %v8275_v40 = vpop.eup %8274 }
 0x66f   :  { %8276 = vrcp.f32 %v1992_v13  ;;  %v2002_v37 = vadd.f32 1.0, %v8275_v40 }
 0x671   :  { %8278 = vrcp.f32 %v2002_v37  ;;  %v2280_v37 = vld [vmem:[#allocation2 + $0x28] sm:$0x3] }
 0x67c   :  { %v8277_v47 = vpop.eup %8276 }
 0x67d   :  { %v2008_v53 = vmul.f32 %v8277_v47, %v2006_v28 }
 0x67e   :  { %v8279_v62 = vpop.eup %8278 }
 0x67f   :  { %v2009_v59 = vadd.f32 %v2008_v53, %v1899_v56  ;;  %v2011_v25 = vsub.f32 1.0, %v8279_v62  ;;  %v2016_v36 = vmul.f32 %v8279_v62, %v2014_v4 }
 0x681   :  { %8280 = vtanh.f32 %v2009_v59 }
 0x68e   :  { %v8281_v34 = vpop.eup %8280 }
 0x68f   :  { %v2012_v38 = vmul.f32 %v8281_v34, %v2011_v25 }
 0x691   :  { %v9116_v2 = vadd.f32 %v2016_v36, %v2012_v38  ;;  %v2281_v38 = vld [vmem:[#allocation2 + $0x10] sm:$0x3] }
 0x693   :  { %v2018_v39 = vpack.c.bf16 %v9116_v2, %v9116_v2 }
 0x695   :  { %v2022_v43 = vrot.slane %v2018_v39, 7  ;;  %v2057_v22 = vrot.slane %v2018_v39, 2 }
 0x697   :  { %2024 = vst [vmem:[#allocation3] sm:$0x8] %v2022_v43  ;;  %2220 = vmatmul.mubr.bf16.vlgmr.msra.gmra.mxu0 %v2057_v22  ;;  %7331 = vmatmul.mubr.bf16.vlgmr.msra.gmra.mxu1 %v2057_v22 }
 0x698   :  { %2444 = vmatpush1.bf16.msra.mxu0 %v8915_v32  ;;  %7335 = vmatpush3.bf16.msra.mxu1 %v9120_v42 }
 0x699   :  { %2445 = vmatprep.subr.bf16.mxu0 %v8919_v44  ;;  %7336 = vmatprep.subr.bf16.mxu1 %v10312_v1 }
 0x69a   :  { %2475 = vmatprep.mubr.bf16.mxu0 %v10313_v20  ;;  %7350 = vmatprep.mubr.msk.bf16.mxu1 %vm8580_vm0, %v10312_v1 }
 0x69c   :  { %2446 = vmatpush1.bf16.msra.mxu0 %v8923_v17  ;;  %7337 = vmatpush3.bf16.msra.mxu1 %v9124_v45 }
 0x69d   :  { %2447 = vmatprep.subr.bf16.mxu0 %v8929_v50  ;;  %7338 = vmatprep.subr.bf16.mxu1 %v10312_v1 }
 0x6a0   :  { %2448 = vmatpush1.bf16.msra.mxu0 %v8936_v52  ;;  %7339 = vmatpush3.bf16.msra.mxu1 %v9133_v24 }
 0x6a1   :  { %2449 = vmatprep.subr.bf16.mxu0 %v8942_v54  ;;  %7340 = vmatprep.subr.bf16.mxu1 %v10312_v1 }
 0x6a4   :  { %2450 = vmatpush1.bf16.msra.mxu0 %v8946_v55  ;;  %7341 = vmatpush3.bf16.msra.mxu1 %v9139_v26 }
 0x6a5   :  { %2451 = vmatprep.subr.bf16.mxu0 %v8952_v57  ;;  %7342 = vmatprep.subr.bf16.mxu1 %v10312_v1 }
 0x6a8   :  { %2452 = vmatpush1.bf16.msra.mxu0 %v8956_v58  ;;  %7343 = vmatpush3.bf16.msra.mxu1 %v9145_v27 }
 0x6a9   :  { %2453 = vmatprep.subr.bf16.mxu0 %v8962_v60  ;;  %7344 = vmatprep.subr.bf16.mxu1 %v10312_v1 }
 0x6ac   :  { %2454 = vmatpush1.bf16.msra.mxu0 %v8966_v61  ;;  %7345 = vmatpush3.bf16.msra.mxu1 %v9151_v29 }
 0x6ad   :  { %2455 = vmatprep.subr.bf16.mxu0 %v8972_v63  ;;  %7346 = vmatprep.subr.bf16.mxu1 %v10312_v1 }
 0x6b0   :  { %2456 = vmatpush1.bf16.msra.mxu0 %v8976_v3  ;;  %7347 = vmatpush3.bf16.msra.mxu1 %v9157_v30 }
 0x6b1   :  { %2457 = vmatprep.subr.bf16.mxu0 %v8982_v7  ;;  %7348 = vmatprep.subr.bf16.mxu1 %v10312_v1 }
 0x6b4   :  { %2458 = vmatpush1.bf16.msra.mxu0 %v8986_v8  ;;  %7349 = vmatpush3.bf16.msra.mxu1 %v9163_v31 }
 0x6b5   :  { %2552 = vmatprep.subr.bf16.mxu0 %v8902_v35  ;;  %7354 = vmatprep.subr.bf16.mxu1 %v10312_v1 }
 0x6b7   :  { %2476 = vmatmul.mubr.bf16.vlgmr.msra.gmra.mxu0 %v2057_v22  ;;  %7351 = vmatmul.mubr.bf16.vlgmr.msra.gmra.mxu1 %v2057_v22 }
 0x6b8   :  { %2553 = vmatpush1.bf16.msra.mxu0 %v8915_v32  ;;  %7355 = vmatpush3.bf16.msra.mxu1 %v9120_v42 }
 0x6b9   :  { %2554 = vmatprep.subr.bf16.mxu0 %v8919_v44  ;;  %7356 = vmatprep.subr.bf16.mxu1 %v10312_v1 }
 0x6ba   :  { %2584 = vmatprep.mubr.bf16.mxu0 %v10313_v20  ;;  %7370 = vmatprep.mubr.msk.bf16.mxu1 %vm8580_vm0, %v10312_v1 }
 0x6bc   :  { %2555 = vmatpush1.bf16.msra.mxu0 %v8923_v17  ;;  %7357 = vmatpush3.bf16.msra.mxu1 %v9124_v45 }
 0x6bd   :  { %2556 = vmatprep.subr.bf16.mxu0 %v8929_v50  ;;  %7358 = vmatprep.subr.bf16.mxu1 %v10312_v1 }
 0x6c0   :  { %2557 = vmatpush1.bf16.msra.mxu0 %v8936_v52  ;;  %7359 = vmatpush3.bf16.msra.mxu1 %v9133_v24 }
 0x6c1   :  { %2558 = vmatprep.subr.bf16.mxu0 %v8942_v54  ;;  %7360 = vmatprep.subr.bf16.mxu1 %v10312_v1 }
 0x6c4   :  { %2559 = vmatpush1.bf16.msra.mxu0 %v8946_v55  ;;  %7361 = vmatpush3.bf16.msra.mxu1 %v9139_v26 }
 0x6c5   :  { %2560 = vmatprep.subr.bf16.mxu0 %v8952_v57  ;;  %7362 = vmatprep.subr.bf16.mxu1 %v10312_v1 }
 0x6c8   :  { %2561 = vmatpush1.bf16.msra.mxu0 %v8956_v58  ;;  %7363 = vmatpush3.bf16.msra.mxu1 %v9145_v27 }
 0x6c9   :  { %2562 = vmatprep.subr.bf16.mxu0 %v8962_v60  ;;  %7364 = vmatprep.subr.bf16.mxu1 %v10312_v1 }
 0x6cc   :  { %2563 = vmatpush1.bf16.msra.mxu0 %v8966_v61  ;;  %7365 = vmatpush3.bf16.msra.mxu1 %v9151_v29 }
 0x6cd   :  { %2564 = vmatprep.subr.bf16.mxu0 %v8972_v63  ;;  %7366 = vmatprep.subr.bf16.mxu1 %v10312_v1 }
 0x6d0   :  { %2565 = vmatpush1.bf16.msra.mxu0 %v8976_v3  ;;  %7367 = vmatpush3.bf16.msra.mxu1 %v9157_v30 }
 0x6d1   :  { %2566 = vmatprep.subr.bf16.mxu0 %v8982_v7  ;;  %7368 = vmatprep.subr.bf16.mxu1 %v10312_v1 }
 0x6d4   :  { %2567 = vmatpush1.bf16.msra.mxu0 %v8986_v8  ;;  %7369 = vmatpush3.bf16.msra.mxu1 %v9163_v31 }
 0x6d5   :  { %2673 = vmatprep.subr.bf16.mxu0 %v8902_v35  ;;  %7374 = vmatprep.subr.bf16.mxu1 %v10312_v1 }
 0x757   :  { %v2221_v46 = vpop.f32.mrf.mxu0  ;;  %v2262_v48 = vpop.f32.mrf.mxu1 }
 0x758   :  { %v2222_v18 = vadd.f32 %v2221_v46, %v10314_v33  ;;  %v2263_v14 = vadd.f32 %v2262_v48, %v10315_v41 }
 0x759   :  { %v2223_v9 = vpop.f32.mrf.mxu0  ;;  %v7332_v0 = vpop.f32.mrf.mxu1 }
 0x75a   :  { %v2271_v19 = vrot.slane %v2222_v18, 2  ;;  %v2273_v10 = vrot.slane %v2263_v14, 2  ;;  %v2224_v15 = vadd.f32 %v2223_v9, %v8776_v6  ;;  %v2282_v0 = vld [vmem:[#allocation2 + $0x8] sm:$0x3] }
 0x75b   :  { %v2225_v11 = vpop.f32.mrf.mxu0  ;;  %v2265_v49 = vpop.f32.mrf.mxu1 }
 0x75c   :  { %2277 = vst [vmem:[#allocation2 + $0x28] sm:$0xc0] %v2271_v19  ;;  %2279 = vst [vmem:[#allocation2 + $0x8] sm:$0xc0] %v2273_v10  ;;  %v2272_v12 = vrot.slane %v2224_v15, 2  ;;  %v2544_v11 = vrot.slane %v9116_v2, 4 }
 0x75d   :  { %v2226_v35 = vpop.f32.mrf.mxu0  ;;  %v7333_v5 = vpop.f32.mrf.mxu1 }
 0x75e   :  { %2278 = vst [vmem:[#allocation2 + $0x10] sm:$0xc0] %v2272_v12 }
 0x777   :  { %v2477_v13 = vpop.f32.mrf.mxu0  ;;  %v2518_v40 = vpop.f32.mrf.mxu1 }
 0x778   :  { %v2478_v16 = vadd.f32 %v2477_v13, %v8786_v21  ;;  %v2519_v18 = vadd.f32 %v2518_v40, %v8792_v51 }
 0x779   :  { %v2479_v28 = vpop.f32.mrf.mxu0  ;;  %v7352_v47 = vpop.f32.mrf.mxu1 }
 0x77a   :  { %v2524_v53 = vadd.f32 %v2478_v16, %v2280_v37  ;;  %v2480_v4 = vadd.f32 %v2479_v28, %v8788_v23  ;;  %v2549_v16 = vld [vmem:[#allocation2 + $0x10] sm:$0xc] }
 0x77b   :  { %v2481_v56 = vpop.f32.mrf.mxu0  ;;  %v2521_v59 = vpop.f32.mrf.mxu1 }
 0x77c   :  { %v6600_v62 = vmul.f32 -1.442695, %v2524_v53  ;;  %v2531_v36 = vadd.f32 %v2480_v4, %v2281_v38  ;;  %v2550_v38 = vld [vmem:[#allocation2 + $0x8] sm:$0xc] }
 0x77d   :  { %v2482_v25 = vpop.f32.mrf.mxu0  ;;  %v7353_v34 = vpop.f32.mrf.mxu1 }
 0x77e   :  { %8282 = vpow2.f32 %v6600_v62  ;;  %v6601_v39 = vmul.f32 -1.442695, %v2531_v36 }
 0x780   :  { %8284 = vpow2.f32 %v6601_v39 }
 0x78b   :  { %v8283_v43 = vpop.eup %8282 }
 0x78c   :  { %v2528_v22 = vadd.f32 1.0, %v8283_v43 }
 0x78d   :  { %v8285_v46 = vpop.eup %8284 }
 0x78e   :  { %8286 = vrcp.f32 %v2528_v22  ;;  %v2535_v48 = vadd.f32 1.0, %v8285_v46 }
 0x790   :  { %8288 = vrcp.f32 %v2535_v48 }
 0x79b   :  { %v8287_v14 = vpop.eup %8286 }
 0x79c   :  { %v2538_v9 = vmul.f32 %v8287_v14, %v2519_v18 }
 0x79d   :  { %v8289_v10 = vpop.eup %8288 }
 0x79e   :  { %v2539_v19 = vadd.f32 %v2538_v9, %v2282_v0  ;;  %v2541_v15 = vsub.f32 1.0, %v8289_v10  ;;  %v2546_v35 = vmul.f32 %v8289_v10, %v2544_v11  ;;  %v8517_v10 = vld [vmem:[#allocation6 + $0x94] ss:$12 sps:$4 sm:$0xff]   ;;  %v8519_v11 = vld [vmem:[#allocation6 + $0x7c] ss:$12 sps:$4 sm:$0xff]  }
 0x7a0   :  { %8290 = vtanh.f32 %v2539_v19  ;;  %v8516_v19 = vld [vmem:[#allocation6 + $0xa8] ss:$12 sps:$4 sm:$0xff]  }
 0x7ad   :  { %v8291_v49 = vpop.eup %8290 }
 0x7ae   :  { %v2542_v12 = vmul.f32 %v8291_v49, %v2541_v15  ;;  %v8518_v15 = vld [vmem:[#allocation6 + $0x90] ss:$12 sps:$4 sm:$0xff]   ;;  %v8520_v49 = vld [vmem:[#allocation6 + $0x78] ss:$12 sps:$4 sm:$0xff]  }
 0x7b0   :  { %v9213_v5 = vadd.f32 %v2546_v35, %v2542_v12  ;;  %v8522_v12 = vld [vmem:[#allocation6 + $0x60] ss:$12 sps:$4 sm:$0xff]  }
 0x7b1   :  { %v8523_v35 = vld [vmem:[#allocation6 + $0x4c] ss:$12 sps:$4 sm:$0xff]  }
 0x7b2   :  { %v2551_v13 = vpack.c.bf16 %v9213_v5, %v9213_v5  ;;  %v2662_v43 = vrot.slane %v9213_v5, 6  ;;  %v8525_v5 = vld [vmem:[#allocation6 + $0x34] ss:$12 sps:$4 sm:$0xff]  }
 0x7b4   :  { %2585 = vmatmul.mubr.bf16.vlgmr.msra.gmra.mxu0 %v2551_v13  ;;  %7371 = vmatmul.mubr.bf16.vlgmr.msra.gmra.mxu1 %v2551_v13  ;;  %v8527_v13 = vld [vmem:[#allocation6 + $0x1c] ss:$12 sps:$4 sm:$0xff]  }
 0x7b5   :  { %2674 = vmatpush1.bf16.msra.mxu0 %v8915_v32  ;;  %7375 = vmatpush3.bf16.msra.mxu1 %v9120_v42  ;;  %v8515_v32 = vld [vmem:[#allocation6 + $0xac] ss:$12 sps:$4 sm:$0xff]  }
 0x7b6   :  { %2675 = vmatprep.subr.bf16.mxu0 %v8919_v44  ;;  %7376 = vmatprep.subr.bf16.mxu1 %v10312_v1 }
 0x7b7   :  { %2705 = vmatprep.mubr.bf16.mxu0 %v10313_v20  ;;  %7390 = vmatprep.mubr.msk.bf16.mxu1 %vm8580_vm0, %v10312_v1 }
 0x7b9   :  { %2676 = vmatpush1.bf16.msra.mxu0 %v8923_v17  ;;  %7377 = vmatpush3.bf16.msra.mxu1 %v9124_v45 }
 0x7ba   :  { %2677 = vmatprep.subr.bf16.mxu0 %v8929_v50  ;;  %7378 = vmatprep.subr.bf16.mxu1 %v10312_v1 }
 0x7bd   :  { %2678 = vmatpush1.bf16.msra.mxu0 %v8936_v52  ;;  %7379 = vmatpush3.bf16.msra.mxu1 %v9133_v24 }
 0x7be   :  { %2679 = vmatprep.subr.bf16.mxu0 %v8942_v54  ;;  %7380 = vmatprep.subr.bf16.mxu1 %v10312_v1 }
 0x7c1   :  { %2680 = vmatpush1.bf16.msra.mxu0 %v8946_v55  ;;  %7381 = vmatpush3.bf16.msra.mxu1 %v9139_v26 }
 0x7c2   :  { %2681 = vmatprep.subr.bf16.mxu0 %v8952_v57  ;;  %7382 = vmatprep.subr.bf16.mxu1 %v10312_v1 }
 0x7c5   :  { %2682 = vmatpush1.bf16.msra.mxu0 %v8956_v58  ;;  %7383 = vmatpush3.bf16.msra.mxu1 %v9145_v27  ;;  %v2548_v58 = vld [vmem:[#allocation2 + $0x28] sm:$0xc] }
 0x7c6   :  { %2683 = vmatprep.subr.bf16.mxu0 %v8962_v60  ;;  %7384 = vmatprep.subr.bf16.mxu1 %v10312_v1 }
 0x7c9   :  { %2684 = vmatpush1.bf16.msra.mxu0 %v8966_v61  ;;  %7385 = vmatpush3.bf16.msra.mxu1 %v9151_v29 }
 0x7ca   :  { %2685 = vmatprep.subr.bf16.mxu0 %v8972_v63  ;;  %7386 = vmatprep.subr.bf16.mxu1 %v10312_v1 }
 0x7cd   :  { %2686 = vmatpush1.bf16.msra.mxu0 %v8976_v3  ;;  %7387 = vmatpush3.bf16.msra.mxu1 %v9157_v30 }
 0x7ce   :  { %2687 = vmatprep.subr.bf16.mxu0 %v8982_v7  ;;  %7388 = vmatprep.subr.bf16.mxu1 %v10312_v1 }
 0x7d1   :  { %2688 = vmatpush1.bf16.msra.mxu0 %v8986_v8  ;;  %7389 = vmatpush3.bf16.msra.mxu1 %v9163_v31 }
 0x7d2   :  { %2794 = vmatprep.subr.bf16.mxu0 %v8515_v32  ;;  %7394 = vmatprep.subr.bf16.mxu1 %v10312_v1  ;;  %v8529_v32 = vld [vmem:[#allocation6 + $0x4] ss:$12 sps:$4 sm:$0xff]  }
 0x874   :  { %v2586_v44 = vpop.f32.mrf.mxu0  ;;  %v2627_v17 = vpop.f32.mrf.mxu1 }
 0x875   :  { %v2587_v50 = vadd.f32 %v2586_v44, %v8786_v21  ;;  %v2628_v59 = vadd.f32 %v2627_v17, %v8792_v51 }
 0x876   :  { %v2588_v52 = vpop.f32.mrf.mxu0  ;;  %v7372_v54 = vpop.f32.mrf.mxu1 }
 0x877   :  { %v2634_v55 = vrot.slane %v2587_v50, 6  ;;  %v2589_v57 = vadd.f32 %v2588_v52, %v8788_v23  ;;  %v2654_v4 = vrot.slane %v2628_v59, 6  ;;  %v2668_v59 = vld [vmem:[#allocation2 + $0x8] sm:$0x30] }
 0x878   :  { %v2590_v60 = vpop.f32.mrf.mxu0  ;;  %v2630_v61 = vpop.f32.mrf.mxu1 }
 0x879   :  { %v2636_v63 = vadd.f32 %v2634_v55, %v2548_v58  ;;  %v2644_v40 = vrot.slane %v2589_v57, 6 }
 0x87a   :  { %v2591_v3 = vpop.f32.mrf.mxu0  ;;  %v7373_v7 = vpop.f32.mrf.mxu1 }
 0x87b   :  { %v6602_v2 = vmul.f32 -1.442695, %v2636_v63  ;;  %v2646_v37 = vadd.f32 %v2644_v40, %v2549_v16 }
 0x87d   :  { %8292 = vpow2.f32 %v6602_v2  ;;  %v6603_v28 = vmul.f32 -1.442695, %v2646_v37 }
 0x87f   :  { %8294 = vpow2.f32 %v6603_v28 }
 0x88a   :  { %v8293_v47 = vpop.eup %8292 }
 0x88b   :  { %v2640_v53 = vadd.f32 1.0, %v8293_v47 }
 0x88c   :  { %v8295_v56 = vpop.eup %8294 }
 0x88d   :  { %8296 = vrcp.f32 %v2640_v53  ;;  %v2650_v62 = vadd.f32 1.0, %v8295_v56 }
 0x88f   :  { %8298 = vrcp.f32 %v2650_v62 }
 0x89a   :  { %v8297_v25 = vpop.eup %8296 }
 0x89b   :  { %v2656_v34 = vmul.f32 %v8297_v25, %v2654_v4 }
 0x89c   :  { %v8299_v39 = vpop.eup %8298 }
 0x89d   :  { %v2657_v36 = vadd.f32 %v2656_v34, %v2550_v38  ;;  %v2659_v22 = vsub.f32 1.0, %v8299_v39  ;;  %v2664_v18 = vmul.f32 %v8299_v39, %v2662_v43 }
 0x89f   :  { %8300 = vtanh.f32 %v2657_v36 }
 0x8ac   :  { %v8301_v46 = vpop.eup %8300 }
 0x8ad   :  { %v2660_v48 = vmul.f32 %v8301_v46, %v2659_v22 }
 0x8af   :  { %v9255_v14 = vadd.f32 %v2664_v18, %v2660_v48  ;;  %v8023_v48 = vld [vmem:[#allocation4 + $0xac] ss:$12 sps:$4 sm:$0xff]   ;;  %v8021_v18 = vld [vmem:[#allocation4 + $0xa8] ss:$12 sps:$4 sm:$0xff]  }
 0x8b1   :  { %v2669_v9 = vpack.c.bf16 %v9255_v14, %v9255_v14  ;;  %v2783_v25 = vrot.slane %v9255_v14, 6  ;;  %v8024_v14 = vld [vmem:[#allocation4 + $0xb0] ss:$12 sps:$4 sm:$0xff]  }
 0x8b3   :  { %v2671_v0 = vrot.slane %v2669_v9, 1  ;;  %v8027_v9 = vld [vmem:[#allocation4 + $0x94] ss:$12 sps:$4 sm:$0xff]  }
 0x8b5   :  { %2706 = vmatmul.mubr.bf16.vlgmr.msra.gmra.mxu0 %v2671_v0  ;;  %7391 = vmatmul.mubr.bf16.vlgmr.msra.gmra.mxu1 %v2671_v0  ;;  %v8025_v0 = vld [vmem:[#allocation4 + $0x90] ss:$12 sps:$4 sm:$0xff]  }
 0x8b6   :  { %2795 = vmatpush1.bf16.msra.mxu0 %v8516_v19  ;;  %7395 = vmatpush3.bf16.msra.mxu1 %v9120_v42  ;;  %v8521_v42 = vld [vmem:[#allocation6 + $0x64] ss:$12 sps:$4 sm:$0xff]  }
 0x8b7   :  { %2796 = vmatprep.subr.bf16.mxu0 %v8517_v10  ;;  %7396 = vmatprep.subr.bf16.mxu1 %v10312_v1  ;;  %v8028_v19 = vld [vmem:[#allocation4 + $0x98] ss:$12 sps:$4 sm:$0xff]   ;;  %v8031_v10 = vld [vmem:[#allocation4 + $0x7c] ss:$12 sps:$4 sm:$0xff]  }
 0x8b8   :  { %2826 = vmatprep.mubr.bf16.mxu0 %v10313_v20  ;;  %7410 = vmatprep.mubr.msk.bf16.mxu1 %vm8580_vm0, %v10312_v1 }
 0x8ba   :  { %2797 = vmatpush1.bf16.msra.mxu0 %v8518_v15  ;;  %7397 = vmatpush3.bf16.msra.mxu1 %v9124_v45  ;;  %v8524_v45 = vld [vmem:[#allocation6 + $0x48] ss:$12 sps:$4 sm:$0xff]   ;;  %v8029_v15 = vld [vmem:[#allocation4 + $0x78] ss:$12 sps:$4 sm:$0xff]  }
 0x8bb   :  { %2798 = vmatprep.subr.bf16.mxu0 %v8519_v11  ;;  %7398 = vmatprep.subr.bf16.mxu1 %v10312_v1  ;;  %v8032_v11 = vld [vmem:[#allocation4 + $0x80] ss:$12 sps:$4 sm:$0xff]  }
 0x8be   :  { %2799 = vmatpush1.bf16.msra.mxu0 %v8520_v49  ;;  %7399 = vmatpush3.bf16.msra.mxu1 %v9133_v24  ;;  %v8526_v24 = vld [vmem:[#allocation6 + $0x30] ss:$12 sps:$4 sm:$0xff]  }
 0x8bf   :  { %2800 = vmatprep.subr.bf16.mxu0 %v8521_v42  ;;  %7400 = vmatprep.subr.bf16.mxu1 %v10312_v1  ;;  %v8035_v49 = vld [vmem:[#allocation4 + $0x64] ss:$12 sps:$4 sm:$0xff]   ;;  %v8033_v42 = vld [vmem:[#allocation4 + $0x60] ss:$12 sps:$4 sm:$0xff]  }
 0x8c2   :  { %2801 = vmatpush1.bf16.msra.mxu0 %v8522_v12  ;;  %7401 = vmatpush3.bf16.msra.mxu1 %v9139_v26  ;;  %v8528_v26 = vld [vmem:[#allocation6 + $0x18] ss:$12 sps:$4 sm:$0xff]   ;;  %v8036_v12 = vld [vmem:[#allocation4 + $0x68] ss:$12 sps:$4 sm:$0xff]  }
 0x8c3   :  { %2802 = vmatprep.subr.bf16.mxu0 %v8523_v35  ;;  %7402 = vmatprep.subr.bf16.mxu1 %v10312_v1  ;;  %v8039_v35 = vld [vmem:[#allocation4 + $0x4c] ss:$12 sps:$4 sm:$0xff]  }
 0x8c6   :  { %2803 = vmatpush1.bf16.msra.mxu0 %v8524_v45  ;;  %7403 = vmatpush3.bf16.msra.mxu1 %v9145_v27  ;;  %v8037_v45 = vld [vmem:[#allocation4 + $0x48] ss:$12 sps:$4 sm:$0xff]  }
 0x8c7   :  { %2804 = vmatprep.subr.bf16.mxu0 %v8525_v5  ;;  %7404 = vmatprep.subr.bf16.mxu1 %v10312_v1  ;;  %v8040_v5 = vld [vmem:[#allocation4 + $0x50] ss:$12 sps:$4 sm:$0xff]  }
 0x8ca   :  { %2805 = vmatpush1.bf16.msra.mxu0 %v8526_v24  ;;  %7405 = vmatpush3.bf16.msra.mxu1 %v9151_v29  ;;  %v8043_v24 = vld [vmem:[#allocation4 + $0x34] ss:$12 sps:$4 sm:$0xff]  }
 0x8cb   :  { %2806 = vmatprep.subr.bf16.mxu0 %v8527_v13  ;;  %7406 = vmatprep.subr.bf16.mxu1 %v10312_v1  ;;  %v8041_v13 = vld [vmem:[#allocation4 + $0x30] ss:$12 sps:$4 sm:$0xff]  }
 0x8ce   :  { %2807 = vmatpush1.bf16.msra.mxu0 %v8528_v26  ;;  %7407 = vmatpush3.bf16.msra.mxu1 %v9157_v30  ;;  %v2666_v30 = vld [vmem:[#allocation2 + $0x28] sm:$0x30]  ;;  %v8044_v26 = vld [vmem:[#allocation4 + $0x38] ss:$12 sps:$4 sm:$0xff]  }
 0x8cf   :  { %2808 = vmatprep.subr.bf16.mxu0 %v8529_v32  ;;  %7408 = vmatprep.subr.bf16.mxu1 %v10312_v1  ;;  %v8047_v32 = vld [vmem:[#allocation4 + $0x1c] ss:$12 sps:$4 sm:$0xff]  }
 0x8d2   :  { %2809 = vmatpush1.bf16.msra.mxu0 %v8986_v8  ;;  %7409 = vmatpush3.bf16.msra.mxu1 %v9163_v31  ;;  %v2667_v31 = vld [vmem:[#allocation2 + $0x10] sm:$0x30] }
 0x8d3   :  { %7414 = vmatprep.subr.bf16.mxu1 %v10312_v1  ;;  %3078 = vmatprep.subr.bf16.mxu0 %v8023_v48 }
 0x975   :  { %v2707_v27 = vpop.f32.mrf.mxu0  ;;  %v2748_v29 = vpop.f32.mrf.mxu1 }
 0x976   :  { %v2708_v44 = vadd.f32 %v2707_v27, %v8786_v21  ;;  %v2749_v37 = vadd.f32 %v2748_v29, %v8792_v51  ;;  %v8045_v27 = vld [vmem:[#allocation4 + $0x18] ss:$12 sps:$4 sm:$0xff]   ;;  %v8048_v29 = vld [vmem:[#allocation4 + $0x20] ss:$12 sps:$4 sm:$0xff]  }
 0x977   :  { %v2709_v17 = vpop.f32.mrf.mxu0  ;;  %v7392_v50 = vpop.f32.mrf.mxu1 }
 0x978   :  { %v2755_v52 = vrot.slane %v2708_v44, 4  ;;  %v2710_v54 = vadd.f32 %v2709_v17, %v8788_v23  ;;  %v2775_v47 = vrot.slane %v2749_v37, 4  ;;  %v8051_v44 = vld [vmem:[#allocation4 + $0x4] ss:$12 sps:$4 sm:$0xff]   ;;  %v8049_v17 = vld [vmem:[#allocation4] ss:$12 sps:$4 sm:$0xff]  }
 0x979   :  { %v2711_v55 = vpop.f32.mrf.mxu0  ;;  %v2751_v57 = vpop.f32.mrf.mxu1  ;;  %v8052_v50 = vld [vmem:[#allocation4 + $0x8] ss:$12 sps:$4 sm:$0xff]   ;;  %v2788_v37 = vld [vmem:[#allocation2 + $0x10] sm:$0xc0] }
 0x97a   :  { %v2757_v58 = vadd.f32 %v2755_v52, %v2666_v30  ;;  %v2765_v63 = vrot.slane %v2710_v54, 4  ;;  %v9297_v52 = vld [vmem:[#allocation6 + $0xac] ss:$12 sps:$4 sm:$0xff]  }
 0x97b   :  { %v2712_v60 = vpop.f32.mrf.mxu0  ;;  %v7393_v61 = vpop.f32.mrf.mxu1 }
 0x97c   :  { %v6604_v8 = vmul.f32 -1.442695, %v2757_v58  ;;  %v2767_v3 = vadd.f32 %v2765_v63, %v2667_v31 }
 0x97e   :  { %8302 = vpow2.f32 %v6604_v8  ;;  %v6605_v7 = vmul.f32 -1.442695, %v2767_v3  ;;  %v2787_v8 = vld [vmem:[#allocation2 + $0x28] sm:$0xc0] }
 0x980   :  { %8304 = vpow2.f32 %v6605_v7 }
 0x98b   :  { %v8303_v2 = vpop.eup %8302 }
 0x98c   :  { %v2761_v40 = vadd.f32 1.0, %v8303_v2 }
 0x98d   :  { %v8305_v16 = vpop.eup %8304 }
 0x98e   :  { %8306 = vrcp.f32 %v2761_v40  ;;  %v2771_v28 = vadd.f32 1.0, %v8305_v16 }
 0x990   :  { %8308 = vrcp.f32 %v2771_v28 }
 0x99b   :  { %v8307_v53 = vpop.eup %8306 }
 0x99c   :  { %v2777_v56 = vmul.f32 %v8307_v53, %v2775_v47 }
 0x99d   :  { %v8309_v4 = vpop.eup %8308 }
 0x99e   :  { %v2778_v62 = vadd.f32 %v2777_v56, %v2668_v59  ;;  %v2780_v34 = vsub.f32 1.0, %v8309_v4  ;;  %v2785_v39 = vmul.f32 %v8309_v4, %v2783_v25 }
 0x9a0   :  { %8310 = vtanh.f32 %v2778_v62 }
 0x9ad   :  { %v8311_v38 = vpop.eup %8310 }
 0x9ae   :  { %v2781_v36 = vmul.f32 %v8311_v38, %v2780_v34 }
 0x9b0   :  { %v9283_v43 = vadd.f32 %v2785_v39, %v2781_v36  ;;  %v2789_v36 = vld [vmem:[#allocation2 + $0x8] sm:$0xc0] }
 0x9b2   :  { %v2790_v22 = vpack.c.bf16 %v9283_v43, %v9283_v43 }
 0x9b4   :  { %v2792_v46 = vrot.slane %v2790_v22, 2 }
 0x9b6   :  { %2827 = vmatmul.mubr.bf16.vlgmr.msra.gmra.mxu0 %v2792_v46  ;;  %7411 = vmatmul.mubr.bf16.vlgmr.msra.gmra.mxu1 %v2792_v46  ;;  %v2904_v46 = vrot.slane %v9283_v43, 6  ;;  %v9317_v43 = vld [vmem:[#allocation6 + $0x90] ss:$12 sps:$4 sm:$0xff]  }
 0x9b7   :  { %3110 = vmatprep.mubr.bf16.mxu0 %v10313_v20  ;;  %7430 = vmatprep.mubr.msk.bf16.mxu1 %vm8580_vm0, %v10312_v1 }
 0x9b8   :  { %3079 = vmatpush1.bf16.msra.mxu0 %v8021_v18  ;;  %7415 = vmatpush3.bf16.msra.mxu1 %v8024_v14 }
 0x9b9   :  { %7416 = vmatprep.subr.bf16.mxu1 %v10312_v1  ;;  %3080 = vmatprep.subr.bf16.mxu0 %v8027_v9 }
 0x9bc   :  { %3081 = vmatpush1.bf16.msra.mxu0 %v8025_v0  ;;  %7417 = vmatpush3.bf16.msra.mxu1 %v8028_v19 }
 0x9bd   :  { %7418 = vmatprep.subr.bf16.mxu1 %v10312_v1  ;;  %3082 = vmatprep.subr.bf16.mxu0 %v8031_v10  ;;  %v9309_v10 = vld [vmem:[#allocation6 + $0xa8] ss:$12 sps:$4 sm:$0xff]  }
 0x9c0   :  { %3083 = vmatpush1.bf16.msra.mxu0 %v8029_v15  ;;  %7419 = vmatpush3.bf16.msra.mxu1 %v8032_v11  ;;  %v9311_v15 = vld [vmem:[#allocation6 + $0xb0] ss:$12 sps:$4 sm:$0xff]  }
 0x9c1   :  { %7420 = vmatprep.subr.bf16.mxu1 %v10312_v1  ;;  %3084 = vmatprep.subr.bf16.mxu0 %v8035_v49 }
 0x9c4   :  { %3085 = vmatpush1.bf16.msra.mxu0 %v8033_v42  ;;  %7421 = vmatpush3.bf16.msra.mxu1 %v8036_v12  ;;  %v9313_v42 = vld [vmem:[#allocation6 + $0x94] ss:$12 sps:$4 sm:$0xff]   ;;  %v9319_v12 = vld [vmem:[#allocation6 + $0x98] ss:$12 sps:$4 sm:$0xff]  }
 0x9c5   :  { %3086 = vmatprep.subr.bf16.mxu0 %v8039_v35  ;;  %7422 = vmatprep.subr.bf16.mxu1 %v10312_v1  ;;  %v9323_v35 = vld [vmem:[#allocation6 + $0x7c] ss:$12 sps:$4 sm:$0xff]  }
 0x9c8   :  { %3087 = vmatpush1.bf16.msra.mxu0 %v8037_v45  ;;  %7423 = vmatpush3.bf16.msra.mxu1 %v8040_v5  ;;  %v9330_v45 = vld [vmem:[#allocation6 + $0x78] ss:$12 sps:$4 sm:$0xff]   ;;  %v9332_v5 = vld [vmem:[#allocation6 + $0x80] ss:$12 sps:$4 sm:$0xff]  }
 0x9c9   :  { %3088 = vmatprep.subr.bf16.mxu0 %v8043_v24  ;;  %7424 = vmatprep.subr.bf16.mxu1 %v10312_v1  ;;  %v9336_v24 = vld [vmem:[#allocation6 + $0x64] ss:$12 sps:$4 sm:$0xff]  }
 0x9cc   :  { %3089 = vmatpush1.bf16.msra.mxu0 %v8041_v13  ;;  %7425 = vmatpush3.bf16.msra.mxu1 %v8044_v26  ;;  %v9340_v13 = vld [vmem:[#allocation6 + $0x60] ss:$12 sps:$4 sm:$0xff]   ;;  %v9342_v26 = vld [vmem:[#allocation6 + $0x68] ss:$12 sps:$4 sm:$0xff]  }
 0x9cd   :  { %3090 = vmatprep.subr.bf16.mxu0 %v8047_v32  ;;  %7426 = vmatprep.subr.bf16.mxu1 %v10312_v1  ;;  %v9346_v32 = vld [vmem:[#allocation6 + $0x4c] ss:$12 sps:$4 sm:$0xff]  }
 0x9d0   :  { %3091 = vmatpush1.bf16.msra.mxu0 %v8045_v27  ;;  %7427 = vmatpush3.bf16.msra.mxu1 %v8048_v29  ;;  %v9350_v27 = vld [vmem:[#allocation6 + $0x48] ss:$12 sps:$4 sm:$0xff]   ;;  %v9352_v29 = vld [vmem:[#allocation6 + $0x50] ss:$12 sps:$4 sm:$0xff]  }
 0x9d1   :  { %3092 = vmatprep.subr.bf16.mxu0 %v8051_v44  ;;  %7428 = vmatprep.subr.bf16.mxu1 %v10312_v1  ;;  %v9356_v44 = vld [vmem:[#allocation6 + $0x34] ss:$12 sps:$4 sm:$0xff]  }
 0x9d4   :  { %3093 = vmatpush1.bf16.msra.mxu0 %v8049_v17  ;;  %7429 = vmatpush3.bf16.msra.mxu1 %v8052_v50  ;;  %v9360_v17 = vld [vmem:[#allocation6 + $0x30] ss:$12 sps:$4 sm:$0xff]   ;;  %v9362_v50 = vld [vmem:[#allocation6 + $0x38] ss:$12 sps:$4 sm:$0xff]  }
 0x9d5   :  { %3325 = vmatprep.subr.bf16.mxu0 %v9297_v52  ;;  %7434 = vmatprep.subr.bf16.mxu1 %v10312_v1 }
 0xa76   :  { %v2828_v54 = vpop.f32.mrf.mxu0  ;;  %v2869_v30 = vpop.f32.mrf.mxu1 }
 0xa77   :  { %v2829_v55 = vadd.f32 %v2828_v54, %v8786_v21  ;;  %v2870_v62 = vadd.f32 %v2869_v30, %v8792_v51  ;;  %v9366_v54 = vld [vmem:[#allocation6 + $0x1c] ss:$12 sps:$4 sm:$0xff]   ;;  %v9370_v30 = vld [vmem:[#allocation6 + $0x18] ss:$12 sps:$4 sm:$0xff]  }
 0xa78   :  { %v2830_v57 = vpop.f32.mrf.mxu0  ;;  %v7412_v58 = vpop.f32.mrf.mxu1 }
 0xa79   :  { %v2876_v60 = vrot.slane %v2829_v55, 2  ;;  %v2831_v61 = vadd.f32 %v2830_v57, %v8788_v23  ;;  %v2896_v25 = vrot.slane %v2870_v62, 2  ;;  %v9372_v55 = vld [vmem:[#allocation6 + $0x20] ss:$12 sps:$4 sm:$0xff]   ;;  %v9376_v57 = vld [vmem:[#allocation6 + $0x4] ss:$12 sps:$4 sm:$0xff]  }
 0xa7a   :  { %v2832_v63 = vpop.f32.mrf.mxu0  ;;  %v2872_v31 = vpop.f32.mrf.mxu1  ;;  %v9380_v58 = vld [vmem:[#allocation6] ss:$12 sps:$4 sm:$0xff]  }
 0xa7b   :  { %v2878_v3 = vadd.f32 %v2876_v60, %v2787_v8  ;;  %v2886_v16 = vrot.slane %v2831_v61, 2  ;;  %v9382_v60 = vld [vmem:[#allocation6 + $0x8] ss:$12 sps:$4 sm:$0xff]  }
 0xa7c   :  { %v2833_v7 = vpop.f32.mrf.mxu0  ;;  %v7413_v2 = vpop.f32.mrf.mxu1 }
 0xa7d   :  { %v6606_v40 = vmul.f32 -1.442695, %v2878_v3  ;;  %v2888_v28 = vadd.f32 %v2886_v16, %v2788_v37 }
 0xa7f   :  { %8312 = vpow2.f32 %v6606_v40  ;;  %v6607_v47 = vmul.f32 -1.442695, %v2888_v28 }
 0xa81   :  { %8314 = vpow2.f32 %v6607_v47 }
 0xa8c   :  { %v8313_v53 = vpop.eup %8312 }
 0xa8d   :  { %v2882_v56 = vadd.f32 1.0, %v8313_v53 }
 0xa8e   :  { %v8315_v59 = vpop.eup %8314 }
 0xa8f   :  { %8316 = vrcp.f32 %v2882_v56  ;;  %v2892_v4 = vadd.f32 1.0, %v8315_v59  ;;  %v3162_v59 = vld [vmem:[#allocation2 + $0x28] sm:$0x3] }
 0xa91   :  { %8318 = vrcp.f32 %v2892_v4 }
 0xa9c   :  { %v8317_v34 = vpop.eup %8316 }
 0xa9d   :  { %v2898_v38 = vmul.f32 %v8317_v34, %v2896_v25 }
 0xa9e   :  { %v8319_v22 = vpop.eup %8318 }
 0xa9f   :  { %v2899_v39 = vadd.f32 %v2898_v38, %v2789_v36  ;;  %v2901_v48 = vsub.f32 1.0, %v8319_v22  ;;  %v2906_v9 = vmul.f32 %v8319_v22, %v2904_v46 }
 0xaa1   :  { %8320 = vtanh.f32 %v2899_v39 }
 0xaae   :  { %v8321_v18 = vpop.eup %8320 }
 0xaaf   :  { %v2902_v14 = vmul.f32 %v8321_v18, %v2901_v48  ;;  %v3163_v48 = vld [vmem:[#allocation2 + $0x10] sm:$0x3] }
 0xab1   :  { %v9305_v0 = vadd.f32 %v2906_v9, %v2902_v14 }
 0xab3   :  { %v2908_v19 = vpack.c.bf16 %v9305_v0, %v9305_v0 }
 0xab5   :  { %v6609_v11 = vrot.slane %v2908_v19, 11  ;;  %v2948_v49 = vrot.slane %v2908_v19, 3 }
 0xab7   :  { %2915 = vst [vmem:[#allocation3 + $0x4] sm:$0x1] %v6609_v11  ;;  %3111 = vmatmul.mubr.bf16.vlgmr.msra.gmra.mxu0 %v2948_v49  ;;  %7431 = vmatmul.mubr.bf16.vlgmr.msra.gmra.mxu1 %v2948_v49 }
 0xab8   :  { %3326 = vmatpush1.bf16.msra.mxu0 %v9309_v10  ;;  %7435 = vmatpush3.bf16.msra.mxu1 %v9311_v15 }
 0xab9   :  { %3327 = vmatprep.subr.bf16.mxu0 %v9313_v42  ;;  %7436 = vmatprep.subr.bf16.mxu1 %v10312_v1 }
 0xaba   :  { %3357 = vmatprep.mubr.bf16.mxu0 %v10313_v20  ;;  %7450 = vmatprep.mubr.msk.bf16.mxu1 %vm8580_vm0, %v10312_v1 }
 0xabc   :  { %3328 = vmatpush1.bf16.msra.mxu0 %v9317_v43  ;;  %7437 = vmatpush3.bf16.msra.mxu1 %v9319_v12 }
 0xabd   :  { %3329 = vmatprep.subr.bf16.mxu0 %v9323_v35  ;;  %7438 = vmatprep.subr.bf16.mxu1 %v10312_v1 }
 0xac0   :  { %3330 = vmatpush1.bf16.msra.mxu0 %v9330_v45  ;;  %7439 = vmatpush3.bf16.msra.mxu1 %v9332_v5 }
 0xac1   :  { %3331 = vmatprep.subr.bf16.mxu0 %v9336_v24  ;;  %7440 = vmatprep.subr.bf16.mxu1 %v10312_v1 }
 0xac4   :  { %3332 = vmatpush1.bf16.msra.mxu0 %v9340_v13  ;;  %7441 = vmatpush3.bf16.msra.mxu1 %v9342_v26 }
 0xac5   :  { %3333 = vmatprep.subr.bf16.mxu0 %v9346_v32  ;;  %7442 = vmatprep.subr.bf16.mxu1 %v10312_v1 }
 0xac8   :  { %3334 = vmatpush1.bf16.msra.mxu0 %v9350_v27  ;;  %7443 = vmatpush3.bf16.msra.mxu1 %v9352_v29 }
 0xac9   :  { %3335 = vmatprep.subr.bf16.mxu0 %v9356_v44  ;;  %7444 = vmatprep.subr.bf16.mxu1 %v10312_v1 }
 0xacc   :  { %3336 = vmatpush1.bf16.msra.mxu0 %v9360_v17  ;;  %7445 = vmatpush3.bf16.msra.mxu1 %v9362_v50 }
 0xacd   :  { %3337 = vmatprep.subr.bf16.mxu0 %v9366_v54  ;;  %7446 = vmatprep.subr.bf16.mxu1 %v10312_v1 }
 0xad0   :  { %3338 = vmatpush1.bf16.msra.mxu0 %v9370_v30  ;;  %7447 = vmatpush3.bf16.msra.mxu1 %v9372_v55 }
 0xad1   :  { %3339 = vmatprep.subr.bf16.mxu0 %v9376_v57  ;;  %7448 = vmatprep.subr.bf16.mxu1 %v10312_v1 }
 0xad4   :  { %3340 = vmatpush1.bf16.msra.mxu0 %v9380_v58  ;;  %7449 = vmatpush3.bf16.msra.mxu1 %v9382_v60 }
 0xad5   :  { %3434 = vmatprep.subr.bf16.mxu0 %v9297_v52  ;;  %7454 = vmatprep.subr.bf16.mxu1 %v10312_v1 }
 0xad7   :  { %3358 = vmatmul.mubr.bf16.vlgmr.msra.gmra.mxu0 %v2948_v49  ;;  %7451 = vmatmul.mubr.bf16.vlgmr.msra.gmra.mxu1 %v2948_v49 }
 0xad8   :  { %3435 = vmatpush1.bf16.msra.mxu0 %v9309_v10  ;;  %7455 = vmatpush3.bf16.msra.mxu1 %v9311_v15 }
 0xad9   :  { %3436 = vmatprep.subr.bf16.mxu0 %v9313_v42  ;;  %7456 = vmatprep.subr.bf16.mxu1 %v10312_v1 }
 0xada   :  { %3466 = vmatprep.mubr.bf16.mxu0 %v10313_v20  ;;  %7470 = vmatprep.mubr.msk.bf16.mxu1 %vm8580_vm0, %v10312_v1 }
 0xadc   :  { %3437 = vmatpush1.bf16.msra.mxu0 %v9317_v43  ;;  %7457 = vmatpush3.bf16.msra.mxu1 %v9319_v12 }
 0xadd   :  { %3438 = vmatprep.subr.bf16.mxu0 %v9323_v35  ;;  %7458 = vmatprep.subr.bf16.mxu1 %v10312_v1 }
 0xae0   :  { %3439 = vmatpush1.bf16.msra.mxu0 %v9330_v45  ;;  %7459 = vmatpush3.bf16.msra.mxu1 %v9332_v5 }
 0xae1   :  { %3440 = vmatprep.subr.bf16.mxu0 %v9336_v24  ;;  %7460 = vmatprep.subr.bf16.mxu1 %v10312_v1 }
 0xae4   :  { %3441 = vmatpush1.bf16.msra.mxu0 %v9340_v13  ;;  %7461 = vmatpush3.bf16.msra.mxu1 %v9342_v26 }
 0xae5   :  { %3442 = vmatprep.subr.bf16.mxu0 %v9346_v32  ;;  %7462 = vmatprep.subr.bf16.mxu1 %v10312_v1 }
 0xae8   :  { %3443 = vmatpush1.bf16.msra.mxu0 %v9350_v27  ;;  %7463 = vmatpush3.bf16.msra.mxu1 %v9352_v29 }
 0xae9   :  { %3444 = vmatprep.subr.bf16.mxu0 %v9356_v44  ;;  %7464 = vmatprep.subr.bf16.mxu1 %v10312_v1 }
 0xaec   :  { %3445 = vmatpush1.bf16.msra.mxu0 %v9360_v17  ;;  %7465 = vmatpush3.bf16.msra.mxu1 %v9362_v50 }
 0xaed   :  { %3446 = vmatprep.subr.bf16.mxu0 %v9366_v54  ;;  %7466 = vmatprep.subr.bf16.mxu1 %v10312_v1 }
 0xaf0   :  { %3447 = vmatpush1.bf16.msra.mxu0 %v9370_v30  ;;  %7467 = vmatpush3.bf16.msra.mxu1 %v9372_v55 }
 0xaf1   :  { %3448 = vmatprep.subr.bf16.mxu0 %v9376_v57  ;;  %7468 = vmatprep.subr.bf16.mxu1 %v10312_v1 }
 0xaf4   :  { %3449 = vmatpush1.bf16.msra.mxu0 %v9380_v58  ;;  %7469 = vmatpush3.bf16.msra.mxu1 %v9382_v60 }
 0xaf5   :  { %3555 = vmatprep.subr.bf16.mxu0 %v9297_v52  ;;  %7474 = vmatprep.subr.bf16.mxu1 %v10312_v1 }
 0xb77   :  { %v3112_v61 = vpop.f32.mrf.mxu0  ;;  %v3153_v8 = vpop.f32.mrf.mxu1 }
 0xb78   :  { %v3113_v63 = vadd.f32 %v3112_v61, %v10314_v33  ;;  %v3154_v31 = vadd.f32 %v3153_v8, %v10315_v41 }
 0xb79   :  { %v3114_v3 = vpop.f32.mrf.mxu0  ;;  %v7432_v7 = vpop.f32.mrf.mxu1 }
 0xb7a   :  { %3159 = vst [vmem:[#allocation2] sm:$0x3] %v3113_v63  ;;  %3161 = vst [vmem:[#allocation2 + $0x20] sm:$0x3] %v3154_v31  ;;  %v3115_v2 = vadd.f32 %v3114_v3, %v8776_v6  ;;  %v3164_v31 = vld [vmem:[#allocation2 + $0x8] sm:$0x3] }
 0xb7b   :  { %v3116_v40 = vpop.f32.mrf.mxu0  ;;  %v3156_v16 = vpop.f32.mrf.mxu1 }
 0xb7c   :  { %3160 = vst [vmem:[#allocation2 + $0x18] sm:$0x3] %v3115_v2  ;;  %v3426_v40 = vrot.slane %v9305_v0, 6 }
 0xb7d   :  { %v3117_v37 = vpop.f32.mrf.mxu0  ;;  %v7433_v28 = vpop.f32.mrf.mxu1 }
 0xb97   :  { %v3359_v47 = vpop.f32.mrf.mxu0  ;;  %v3400_v53 = vpop.f32.mrf.mxu1 }
 0xb98   :  { %v3360_v56 = vadd.f32 %v3359_v47, %v8786_v21  ;;  %v3401_v61 = vadd.f32 %v3400_v53, %v8792_v51 }
 0xb99   :  { %v3361_v62 = vpop.f32.mrf.mxu0  ;;  %v7452_v4 = vpop.f32.mrf.mxu1 }
 0xb9a   :  { %v3406_v25 = vadd.f32 %v3360_v56, %v3162_v59  ;;  %v3362_v39 = vadd.f32 %v3361_v62, %v8788_v23 }
 0xb9b   :  { %v3363_v34 = vpop.f32.mrf.mxu0  ;;  %v3403_v38 = vpop.f32.mrf.mxu1 }
 0xb9c   :  { %v6658_v36 = vmul.f32 -1.442695, %v3406_v25  ;;  %v3413_v18 = vadd.f32 %v3362_v39, %v3163_v48  ;;  %v3430_v38 = vld [vmem:[#allocation2 + $0x28] sm:$0xc] }
 0xb9d   :  { %v3364_v22 = vpop.f32.mrf.mxu0  ;;  %v7453_v46 = vpop.f32.mrf.mxu1 }
 0xb9e   :  { %8322 = vpow2.f32 %v6658_v36  ;;  %v6659_v14 = vmul.f32 -1.442695, %v3413_v18 }
 0xba0   :  { %8324 = vpow2.f32 %v6659_v14 }
 0xbab   :  { %v8323_v9 = vpop.eup %8322 }
 0xbac   :  { %v3410_v19 = vadd.f32 1.0, %v8323_v9  ;;  %v3431_v9 = vld [vmem:[#allocation2 + $0x10] sm:$0xc] }
 0xbad   :  { %v8325_v11 = vpop.eup %8324 }
 0xbae   :  { %8326 = vrcp.f32 %v3410_v19  ;;  %v3417_v49 = vadd.f32 1.0, %v8325_v11 }
 0xbb0   :  { %8328 = vrcp.f32 %v3417_v49 }
 0xbbb   :  { %v8327_v8 = vpop.eup %8326 }
 0xbbc   :  { %v3420_v63 = vmul.f32 %v8327_v8, %v3401_v61 }
 0xbbd   :  { %v8329_v7 = vpop.eup %8328 }
 0xbbe   :  { %v3421_v3 = vadd.f32 %v3420_v63, %v3164_v31  ;;  %v3423_v2 = vsub.f32 1.0, %v8329_v7  ;;  %v3428_v28 = vmul.f32 %v8329_v7, %v3426_v40  ;;  %v3432_v40 = vld [vmem:[#allocation2 + $0x8] sm:$0xc] }
 0xbc0   :  { %8330 = vtanh.f32 %v3421_v3 }
 0xbcd   :  { %v8331_v16 = vpop.eup %8330 }
 0xbce   :  { %v3424_v37 = vmul.f32 %v8331_v16, %v3423_v2 }
 0xbd0   :  { %v9432_v47 = vadd.f32 %v3428_v28, %v3424_v37 }
 0xbd2   :  { %v3433_v56 = vpack.c.bf16 %v9432_v47, %v9432_v47  ;;  %v3544_v28 = vrot.slane %v9432_v47, 6 }
 0xbd4   :  { %3467 = vmatmul.mubr.bf16.vlgmr.msra.gmra.mxu0 %v3433_v56  ;;  %7471 = vmatmul.mubr.bf16.vlgmr.msra.gmra.mxu1 %v3433_v56 }
 0xbd5   :  { %3556 = vmatpush1.bf16.msra.mxu0 %v9309_v10  ;;  %7475 = vmatpush3.bf16.msra.mxu1 %v9311_v15 }
 0xbd6   :  { %3557 = vmatprep.subr.bf16.mxu0 %v9313_v42  ;;  %7476 = vmatprep.subr.bf16.mxu1 %v10312_v1 }
 0xbd7   :  { %3587 = vmatprep.mubr.bf16.mxu0 %v10313_v20  ;;  %7490 = vmatprep.mubr.msk.bf16.mxu1 %vm8580_vm0, %v10312_v1 }
 0xbd9   :  { %3558 = vmatpush1.bf16.msra.mxu0 %v9317_v43  ;;  %7477 = vmatpush3.bf16.msra.mxu1 %v9319_v12 }
 0xbda   :  { %3559 = vmatprep.subr.bf16.mxu0 %v9323_v35  ;;  %7478 = vmatprep.subr.bf16.mxu1 %v10312_v1 }
 0xbdd   :  { %3560 = vmatpush1.bf16.msra.mxu0 %v9330_v45  ;;  %7479 = vmatpush3.bf16.msra.mxu1 %v9332_v5 }
 0xbde   :  { %3561 = vmatprep.subr.bf16.mxu0 %v9336_v24  ;;  %7480 = vmatprep.subr.bf16.mxu1 %v10312_v1 }
 0xbe1   :  { %3562 = vmatpush1.bf16.msra.mxu0 %v9340_v13  ;;  %7481 = vmatpush3.bf16.msra.mxu1 %v9342_v26 }
 0xbe2   :  { %3563 = vmatprep.subr.bf16.mxu0 %v9346_v32  ;;  %7482 = vmatprep.subr.bf16.mxu1 %v10312_v1 }
 0xbe5   :  { %3564 = vmatpush1.bf16.msra.mxu0 %v9350_v27  ;;  %7483 = vmatpush3.bf16.msra.mxu1 %v9352_v29 }
 0xbe6   :  { %3565 = vmatprep.subr.bf16.mxu0 %v9356_v44  ;;  %7484 = vmatprep.subr.bf16.mxu1 %v10312_v1 }
 0xbe9   :  { %3566 = vmatpush1.bf16.msra.mxu0 %v9360_v17  ;;  %7485 = vmatpush3.bf16.msra.mxu1 %v9362_v50 }
 0xbea   :  { %3567 = vmatprep.subr.bf16.mxu0 %v9366_v54  ;;  %7486 = vmatprep.subr.bf16.mxu1 %v10312_v1 }
 0xbed   :  { %3568 = vmatpush1.bf16.msra.mxu0 %v9370_v30  ;;  %7487 = vmatpush3.bf16.msra.mxu1 %v9372_v55 }
 0xbee   :  { %3569 = vmatprep.subr.bf16.mxu0 %v9376_v57  ;;  %7488 = vmatprep.subr.bf16.mxu1 %v10312_v1 }
 0xbf1   :  { %3570 = vmatpush1.bf16.msra.mxu0 %v9380_v58  ;;  %7489 = vmatpush3.bf16.msra.mxu1 %v9382_v60 }
 0xbf2   :  { %3676 = vmatprep.subr.bf16.mxu0 %v9297_v52  ;;  %7494 = vmatprep.subr.bf16.mxu1 %v10312_v1 }
 0xc94   :  { %v3468_v0 = vpop.f32.mrf.mxu0  ;;  %v3509_v53 = vpop.f32.mrf.mxu1 }
 0xc95   :  { %v3469_v59 = vadd.f32 %v3468_v0, %v8786_v21  ;;  %v3510_v63 = vadd.f32 %v3509_v53, %v8792_v51 }
 0xc96   :  { %v3470_v62 = vpop.f32.mrf.mxu0  ;;  %v7472_v4 = vpop.f32.mrf.mxu1 }
 0xc97   :  { %v3516_v25 = vrot.slane %v3469_v59, 6  ;;  %v3471_v34 = vadd.f32 %v3470_v62, %v8788_v23  ;;  %v3536_v3 = vrot.slane %v3510_v63, 6 }
 0xc98   :  { %v3472_v36 = vpop.f32.mrf.mxu0  ;;  %v3512_v39 = vpop.f32.mrf.mxu1 }
 0xc99   :  { %v3518_v22 = vadd.f32 %v3516_v25, %v3430_v38  ;;  %v3526_v14 = vrot.slane %v3471_v34, 6 }
 0xc9a   :  { %v3473_v46 = vpop.f32.mrf.mxu0  ;;  %v7473_v48 = vpop.f32.mrf.mxu1 }
 0xc9b   :  { %v6660_v18 = vmul.f32 -1.442695, %v3518_v22  ;;  %v3528_v19 = vadd.f32 %v3526_v14, %v3431_v9  ;;  %v3548_v48 = vld [vmem:[#allocation2 + $0x28] sm:$0x30] }
 0xc9d   :  { %8332 = vpow2.f32 %v6660_v18  ;;  %v6661_v11 = vmul.f32 -1.442695, %v3528_v19 }
 0xc9f   :  { %8334 = vpow2.f32 %v6661_v11 }
 0xcaa   :  { %v8333_v49 = vpop.eup %8332 }
 0xcab   :  { %v3522_v61 = vadd.f32 1.0, %v8333_v49 }
 0xcac   :  { %v8335_v8 = vpop.eup %8334 }
 0xcad   :  { %8336 = vrcp.f32 %v3522_v61  ;;  %v3532_v31 = vadd.f32 1.0, %v8335_v8 }
 0xcaf   :  { %8338 = vrcp.f32 %v3532_v31 }
 0xcba   :  { %v8337_v7 = vpop.eup %8336 }
 0xcbb   :  { %v3538_v2 = vmul.f32 %v8337_v7, %v3536_v3 }
 0xcbc   :  { %v8339_v37 = vpop.eup %8338 }
 0xcbd   :  { %v3539_v16 = vadd.f32 %v3538_v2, %v3432_v40  ;;  %v3541_v56 = vsub.f32 1.0, %v8339_v37  ;;  %v3546_v62 = vmul.f32 %v8339_v37, %v3544_v28 }
 0xcbf   :  { %8340 = vtanh.f32 %v3539_v16 }
 0xccc   :  { %v8341_v0 = vpop.eup %8340 }
 0xccd   :  { %v3542_v59 = vmul.f32 %v8341_v0, %v3541_v56  ;;  %v3550_v56 = vld [vmem:[#allocation2 + $0x8] sm:$0x30] }
 0xccf   :  { %v9475_v4 = vadd.f32 %v3546_v62, %v3542_v59 }
 0xcd1   :  { %v3551_v53 = vpack.c.bf16 %v9475_v4, %v9475_v4  ;;  %v3665_v62 = vrot.slane %v9475_v4, 6 }
 0xcd3   :  { %v3553_v25 = vrot.slane %v3551_v53, 1 }
 0xcd5   :  { %3588 = vmatmul.mubr.bf16.vlgmr.msra.gmra.mxu0 %v3553_v25  ;;  %7491 = vmatmul.mubr.bf16.vlgmr.msra.gmra.mxu1 %v3553_v25 }
 0xcd6   :  { %3677 = vmatpush1.bf16.msra.mxu0 %v9309_v10  ;;  %7495 = vmatpush3.bf16.msra.mxu1 %v9311_v15 }
 0xcd7   :  { %3678 = vmatprep.subr.bf16.mxu0 %v9313_v42  ;;  %7496 = vmatprep.subr.bf16.mxu1 %v10312_v1 }
 0xcd8   :  { %3708 = vmatprep.mubr.bf16.mxu0 %v10313_v20  ;;  %7510 = vmatprep.mubr.msk.bf16.mxu1 %vm8580_vm0, %v10312_v1 }
 0xcda   :  { %3679 = vmatpush1.bf16.msra.mxu0 %v9317_v43  ;;  %7497 = vmatpush3.bf16.msra.mxu1 %v9319_v12 }
 0xcdb   :  { %3680 = vmatprep.subr.bf16.mxu0 %v9323_v35  ;;  %7498 = vmatprep.subr.bf16.mxu1 %v10312_v1 }
 0xcde   :  { %3681 = vmatpush1.bf16.msra.mxu0 %v9330_v45  ;;  %7499 = vmatpush3.bf16.msra.mxu1 %v9332_v5 }
 0xcdf   :  { %3682 = vmatprep.subr.bf16.mxu0 %v9336_v24  ;;  %7500 = vmatprep.subr.bf16.mxu1 %v10312_v1 }
 0xce2   :  { %3683 = vmatpush1.bf16.msra.mxu0 %v9340_v13  ;;  %7501 = vmatpush3.bf16.msra.mxu1 %v9342_v26 }
 0xce3   :  { %3684 = vmatprep.subr.bf16.mxu0 %v9346_v32  ;;  %7502 = vmatprep.subr.bf16.mxu1 %v10312_v1 }
 0xce6   :  { %3685 = vmatpush1.bf16.msra.mxu0 %v9350_v27  ;;  %7503 = vmatpush3.bf16.msra.mxu1 %v9352_v29 }
 0xce7   :  { %3686 = vmatprep.subr.bf16.mxu0 %v9356_v44  ;;  %7504 = vmatprep.subr.bf16.mxu1 %v10312_v1 }
 0xcea   :  { %3687 = vmatpush1.bf16.msra.mxu0 %v9360_v17  ;;  %7505 = vmatpush3.bf16.msra.mxu1 %v9362_v50 }
 0xceb   :  { %3688 = vmatprep.subr.bf16.mxu0 %v9366_v54  ;;  %7506 = vmatprep.subr.bf16.mxu1 %v10312_v1 }
 0xcee   :  { %3689 = vmatpush1.bf16.msra.mxu0 %v9370_v30  ;;  %7507 = vmatpush3.bf16.msra.mxu1 %v9372_v55 }
 0xcef   :  { %3690 = vmatprep.subr.bf16.mxu0 %v9376_v57  ;;  %7508 = vmatprep.subr.bf16.mxu1 %v10312_v1 }
 0xcf2   :  { %3691 = vmatpush1.bf16.msra.mxu0 %v9380_v58  ;;  %7509 = vmatpush3.bf16.msra.mxu1 %v9382_v60 }
 0xcf3   :  { %3797 = vmatprep.subr.bf16.mxu0 %v9297_v52  ;;  %7514 = vmatprep.subr.bf16.mxu1 %v10312_v1  ;;  %v3549_v52 = vld [vmem:[#allocation2 + $0x10] sm:$0x30] }
 0xd95   :  { %v3589_v47 = vpop.f32.mrf.mxu0  ;;  %v3630_v34 = vpop.f32.mrf.mxu1 }
 0xd96   :  { %v3590_v38 = vadd.f32 %v3589_v47, %v8786_v21  ;;  %v3631_v2 = vadd.f32 %v3630_v34, %v8792_v51 }
 0xd97   :  { %v3591_v36 = vpop.f32.mrf.mxu0  ;;  %v7492_v39 = vpop.f32.mrf.mxu1 }
 0xd98   :  { %v3637_v22 = vrot.slane %v3590_v38, 4  ;;  %v3592_v46 = vadd.f32 %v3591_v36, %v8788_v23  ;;  %v3657_v16 = vrot.slane %v3631_v2, 4  ;;  %v8091_v2 = vld [vmem:[#allocation4 + $0x94] ss:$12 sps:$4 sm:$0xff]  }
 0xd99   :  { %v3593_v18 = vpop.f32.mrf.mxu0  ;;  %v3633_v14 = vpop.f32.mrf.mxu1 }
 0xd9a   :  { %v3639_v9 = vadd.f32 %v3637_v22, %v3548_v48  ;;  %v3647_v61 = vrot.slane %v3592_v46, 4  ;;  %v3671_v48 = vld [vmem:[#allocation2 + $0x8] sm:$0xc0] }
 0xd9b   :  { %v3594_v19 = vpop.f32.mrf.mxu0  ;;  %v7493_v11 = vpop.f32.mrf.mxu1 }
 0xd9c   :  { %v6662_v49 = vmul.f32 -1.442695, %v3639_v9  ;;  %v3649_v8 = vadd.f32 %v3647_v61, %v3549_v52 }
 0xd9e   :  { %8342 = vpow2.f32 %v6662_v49  ;;  %v6663_v63 = vmul.f32 -1.442695, %v3649_v8 }
 0xda0   :  { %8344 = vpow2.f32 %v6663_v63 }
 0xdab   :  { %v8343_v31 = vpop.eup %8342 }
 0xdac   :  { %v3643_v3 = vadd.f32 1.0, %v8343_v31  ;;  %v8087_v31 = vld [vmem:[#allocation4 + $0xac] ss:$12 sps:$4 sm:$0xff]  }
 0xdad   :  { %v8345_v7 = vpop.eup %8344 }
 0xdae   :  { %8346 = vrcp.f32 %v3643_v3  ;;  %v3653_v40 = vadd.f32 1.0, %v8345_v7  ;;  %v8085_v3 = vld [vmem:[#allocation4 + $0xa8] ss:$12 sps:$4 sm:$0xff]   ;;  %v8088_v7 = vld [vmem:[#allocation4 + $0xb0] ss:$12 sps:$4 sm:$0xff]  }
 0xdb0   :  { %8348 = vrcp.f32 %v3653_v40  ;;  %v8089_v40 = vld [vmem:[#allocation4 + $0x90] ss:$12 sps:$4 sm:$0xff]  }
 0xdbb   :  { %v8347_v37 = vpop.eup %8346 }
 0xdbc   :  { %v3659_v28 = vmul.f32 %v8347_v37, %v3657_v16  ;;  %v8092_v16 = vld [vmem:[#allocation4 + $0x98] ss:$12 sps:$4 sm:$0xff]   ;;  %v8095_v37 = vld [vmem:[#allocation4 + $0x7c] ss:$12 sps:$4 sm:$0xff]  }
 0xdbd   :  { %v8349_v59 = vpop.eup %8348 }
 0xdbe   :  { %v3660_v0 = vadd.f32 %v3659_v28, %v3550_v56  ;;  %v3662_v53 = vsub.f32 1.0, %v8349_v59  ;;  %v3667_v38 = vmul.f32 %v8349_v59, %v3665_v62  ;;  %v8093_v28 = vld [vmem:[#allocation4 + $0x78] ss:$12 sps:$4 sm:$0xff]   ;;  %v8096_v56 = vld [vmem:[#allocation4 + $0x80] ss:$12 sps:$4 sm:$0xff]  }
 0xdbf   :  { %v8097_v59 = vld [vmem:[#allocation4 + $0x60] ss:$12 sps:$4 sm:$0xff]   ;;  %v8100_v62 = vld [vmem:[#allocation4 + $0x68] ss:$12 sps:$4 sm:$0xff]  }
 0xdc0   :  { %8350 = vtanh.f32 %v3660_v0  ;;  %v8099_v0 = vld [vmem:[#allocation4 + $0x64] ss:$12 sps:$4 sm:$0xff]  }
 0xdcd   :  { %v8351_v25 = vpop.eup %8350 }
 0xdce   :  { %v3663_v47 = vmul.f32 %v8351_v25, %v3662_v53  ;;  %v8101_v53 = vld [vmem:[#allocation4 + $0x48] ss:$12 sps:$4 sm:$0xff]   ;;  %v8103_v25 = vld [vmem:[#allocation4 + $0x4c] ss:$12 sps:$4 sm:$0xff]  }
 0xdd0   :  { %v9518_v36 = vadd.f32 %v3667_v38, %v3663_v47  ;;  %v8104_v47 = vld [vmem:[#allocation4 + $0x50] ss:$12 sps:$4 sm:$0xff]   ;;  %v8107_v38 = vld [vmem:[#allocation4 + $0x34] ss:$12 sps:$4 sm:$0xff]  }
 0xdd2   :  { %v3672_v34 = vpack.c.bf16 %v9518_v36, %v9518_v36  ;;  %v3786_v9 = vrot.slane %v9518_v36, 6  ;;  %v8105_v36 = vld [vmem:[#allocation4 + $0x30] ss:$12 sps:$4 sm:$0xff]  }
 0xdd4   :  { %v3674_v39 = vrot.slane %v3672_v34, 2  ;;  %v8108_v34 = vld [vmem:[#allocation4 + $0x38] ss:$12 sps:$4 sm:$0xff]  }
 0xdd6   :  { %3709 = vmatmul.mubr.bf16.vlgmr.msra.gmra.mxu0 %v3674_v39  ;;  %7511 = vmatmul.mubr.bf16.vlgmr.msra.gmra.mxu1 %v3674_v39  ;;  %v8111_v39 = vld [vmem:[#allocation4 + $0x1c] ss:$12 sps:$4 sm:$0xff]  }
 0xdd7   :  { %3798 = vmatpush1.bf16.msra.mxu0 %v9309_v10  ;;  %7515 = vmatpush3.bf16.msra.mxu1 %v9311_v15 }
 0xdd8   :  { %3799 = vmatprep.subr.bf16.mxu0 %v9313_v42  ;;  %7516 = vmatprep.subr.bf16.mxu1 %v10312_v1 }
 0xdd9   :  { %3829 = vmatprep.mubr.bf16.mxu0 %v10313_v20  ;;  %7530 = vmatprep.mubr.msk.bf16.mxu1 %vm8580_vm0, %v10312_v1 }
 0xddb   :  { %3800 = vmatpush1.bf16.msra.mxu0 %v9317_v43  ;;  %7517 = vmatpush3.bf16.msra.mxu1 %v9319_v12 }
 0xddc   :  { %3801 = vmatprep.subr.bf16.mxu0 %v9323_v35  ;;  %7518 = vmatprep.subr.bf16.mxu1 %v10312_v1 }
 0xddf   :  { %3802 = vmatpush1.bf16.msra.mxu0 %v9330_v45  ;;  %7519 = vmatpush3.bf16.msra.mxu1 %v9332_v5  ;;  %v3669_v5 = vld [vmem:[#allocation2 + $0x28] sm:$0xc0] }
 0xde0   :  { %3803 = vmatprep.subr.bf16.mxu0 %v9336_v24  ;;  %7520 = vmatprep.subr.bf16.mxu1 %v10312_v1 }
 0xde3   :  { %3804 = vmatpush1.bf16.msra.mxu0 %v9340_v13  ;;  %7521 = vmatpush3.bf16.msra.mxu1 %v9342_v26 }
 0xde4   :  { %3805 = vmatprep.subr.bf16.mxu0 %v9346_v32  ;;  %7522 = vmatprep.subr.bf16.mxu1 %v10312_v1 }
 0xde7   :  { %3806 = vmatpush1.bf16.msra.mxu0 %v9350_v27  ;;  %7523 = vmatpush3.bf16.msra.mxu1 %v9352_v29 }
 0xde8   :  { %3807 = vmatprep.subr.bf16.mxu0 %v9356_v44  ;;  %7524 = vmatprep.subr.bf16.mxu1 %v10312_v1 }
 0xdeb   :  { %3808 = vmatpush1.bf16.msra.mxu0 %v9360_v17  ;;  %7525 = vmatpush3.bf16.msra.mxu1 %v9362_v50  ;;  %v3670_v17 = vld [vmem:[#allocation2 + $0x10] sm:$0xc0] }
 0xdec   :  { %3809 = vmatprep.subr.bf16.mxu0 %v9366_v54  ;;  %7526 = vmatprep.subr.bf16.mxu1 %v10312_v1 }
 0xdef   :  { %3810 = vmatpush1.bf16.msra.mxu0 %v9370_v30  ;;  %7527 = vmatpush3.bf16.msra.mxu1 %v9372_v55 }
 0xdf0   :  { %3811 = vmatprep.subr.bf16.mxu0 %v9376_v57  ;;  %7528 = vmatprep.subr.bf16.mxu1 %v10312_v1 }
 0xdf3   :  { %3812 = vmatpush1.bf16.msra.mxu0 %v9380_v58  ;;  %7529 = vmatpush3.bf16.msra.mxu1 %v9382_v60 }
 0xdf4   :  { %7534 = vmatprep.subr.bf16.mxu1 %v10312_v1  ;;  %4069 = vmatprep.subr.bf16.mxu0 %v8087_v31 }
 0xe96   :  { %v3710_v10 = vpop.f32.mrf.mxu0  ;;  %v3751_v15 = vpop.f32.mrf.mxu1 }
 0xe97   :  { %v3711_v42 = vadd.f32 %v3710_v10, %v8786_v21  ;;  %v3752_v58 = vadd.f32 %v3751_v15, %v8792_v51  ;;  %v8109_v10 = vld [vmem:[#allocation4 + $0x18] ss:$12 sps:$4 sm:$0xff]   ;;  %v8112_v15 = vld [vmem:[#allocation4 + $0x20] ss:$12 sps:$4 sm:$0xff]  }
 0xe98   :  { %v3712_v43 = vpop.f32.mrf.mxu0  ;;  %v7512_v12 = vpop.f32.mrf.mxu1 }
 0xe99   :  { %v3758_v35 = vrot.slane %v3711_v42, 2  ;;  %v3713_v45 = vadd.f32 %v3712_v43, %v8788_v23  ;;  %v3778_v4 = vrot.slane %v3752_v58, 2  ;;  %v8115_v42 = vld [vmem:[#allocation4 + $0x4] ss:$12 sps:$4 sm:$0xff]   ;;  %v8113_v43 = vld [vmem:[#allocation4] ss:$12 sps:$4 sm:$0xff]  }
 0xe9a   :  { %v3714_v24 = vpop.f32.mrf.mxu0  ;;  %v3754_v13 = vpop.f32.mrf.mxu1  ;;  %v8116_v12 = vld [vmem:[#allocation4 + $0x8] ss:$12 sps:$4 sm:$0xff]  }
 0xe9b   :  { %v3760_v26 = vadd.f32 %v3758_v35, %v3669_v5  ;;  %v3768_v44 = vrot.slane %v3713_v45, 2  ;;  %v9574_v35 = vld [vmem:[#allocation6 + $0xac] ss:$12 sps:$4 sm:$0xff]   ;;  %v3790_v13 = vld [vmem:[#allocation2] sm:$0x3] }
 0xe9c   :  { %v3715_v32 = vpop.f32.mrf.mxu0  ;;  %v7513_v27 = vpop.f32.mrf.mxu1 }
 0xe9d   :  { %v6664_v29 = vmul.f32 -1.442695, %v3760_v26  ;;  %v3770_v50 = vadd.f32 %v3768_v44, %v3670_v17 }
 0xe9f   :  { %8352 = vpow2.f32 %v6664_v29  ;;  %v6665_v54 = vmul.f32 -1.442695, %v3770_v50 }
 0xea1   :  { %8354 = vpow2.f32 %v6665_v54 }
 0xeac   :  { %v8353_v30 = vpop.eup %8352 }
 0xead   :  { %v3764_v55 = vadd.f32 1.0, %v8353_v30 }
 0xeae   :  { %v8355_v57 = vpop.eup %8354 }
 0xeaf   :  { %8356 = vrcp.f32 %v3764_v55  ;;  %v3774_v60 = vadd.f32 1.0, %v8355_v57  ;;  %v3791_v55 = vld [vmem:[#allocation2 + $0x18] sm:$0x3] }
 0xeb1   :  { %8358 = vrcp.f32 %v3774_v60 }
 0xebc   :  { %v8357_v22 = vpop.eup %8356 }
 0xebd   :  { %v3780_v46 = vmul.f32 %v8357_v22, %v3778_v4 }
 0xebe   :  { %v8359_v14 = vpop.eup %8358 }
 0xebf   :  { %v3781_v18 = vadd.f32 %v3780_v46, %v3671_v48  ;;  %v3783_v19 = vsub.f32 1.0, %v8359_v14  ;;  %v3788_v61 = vmul.f32 %v8359_v14, %v3786_v9  ;;  %v3792_v9 = vld [vmem:[#allocation2 + $0x20] sm:$0x3] }
 0xec1   :  { %8360 = vtanh.f32 %v3781_v18 }
 0xece   :  { %v8361_v11 = vpop.eup %8360 }
 0xecf   :  { %v3784_v49 = vmul.f32 %v8361_v11, %v3783_v19 }
 0xed1   :  { %v9560_v52 = vadd.f32 %v3788_v61, %v3784_v49 }
 0xed3   :  { %v3793_v8 = vpack.c.bf16 %v9560_v52, %v9560_v52  ;;  %v3898_v49 = vrot.slane %v9560_v52, 6  ;;  %v9594_v52 = vld [vmem:[#allocation6 + $0x90] ss:$12 sps:$4 sm:$0xff]  }
 0xed5   :  { %v3795_v63 = vrot.slane %v3793_v8, 3 }
 0xed7   :  { %3830 = vmatmul.mubr.bf16.vlgmr.msra.gmra.mxu0 %v3795_v63  ;;  %7531 = vmatmul.mubr.bf16.vlgmr.msra.gmra.mxu1 %v3795_v63 }
 0xed8   :  { %4101 = vmatprep.mubr.bf16.mxu0 %v10313_v20  ;;  %7550 = vmatprep.mubr.msk.bf16.mxu1 %vm8580_vm0, %v10312_v1 }
 0xed9   :  { %4070 = vmatpush1.bf16.msra.mxu0 %v8085_v3  ;;  %7535 = vmatpush3.bf16.msra.mxu1 %v8088_v7  ;;  %v9584_v7 = vld [vmem:[#allocation6 + $0xa8] ss:$12 sps:$4 sm:$0xff]  }
 0xeda   :  { %7536 = vmatprep.subr.bf16.mxu1 %v10312_v1  ;;  %4071 = vmatprep.subr.bf16.mxu0 %v8091_v2  ;;  %v9586_v2 = vld [vmem:[#allocation6 + $0xb0] ss:$12 sps:$4 sm:$0xff]  }
 0xedd   :  { %4072 = vmatpush1.bf16.msra.mxu0 %v8089_v40  ;;  %7537 = vmatpush3.bf16.msra.mxu1 %v8092_v16  ;;  %v9590_v16 = vld [vmem:[#allocation6 + $0x94] ss:$12 sps:$4 sm:$0xff]  }
 0xede   :  { %7538 = vmatprep.subr.bf16.mxu1 %v10312_v1  ;;  %4073 = vmatprep.subr.bf16.mxu0 %v8095_v37 }
 0xee1   :  { %4074 = vmatpush1.bf16.msra.mxu0 %v8093_v28  ;;  %7539 = vmatpush3.bf16.msra.mxu1 %v8096_v56  ;;  %v9596_v28 = vld [vmem:[#allocation6 + $0x98] ss:$12 sps:$4 sm:$0xff]   ;;  %v9600_v56 = vld [vmem:[#allocation6 + $0x7c] ss:$12 sps:$4 sm:$0xff]  }
 0xee2   :  { %7540 = vmatprep.subr.bf16.mxu1 %v10312_v1  ;;  %4075 = vmatprep.subr.bf16.mxu0 %v8099_v0  ;;  %v9607_v0 = vld [vmem:[#allocation6 + $0x78] ss:$12 sps:$4 sm:$0xff]  }
 0xee5   :  { %4076 = vmatpush1.bf16.msra.mxu0 %v8097_v59  ;;  %7541 = vmatpush3.bf16.msra.mxu1 %v8100_v62  ;;  %v9609_v59 = vld [vmem:[#allocation6 + $0x80] ss:$12 sps:$4 sm:$0xff]   ;;  %v9613_v62 = vld [vmem:[#allocation6 + $0x64] ss:$12 sps:$4 sm:$0xff]  }
 0xee6   :  { %7542 = vmatprep.subr.bf16.mxu1 %v10312_v1  ;;  %4077 = vmatprep.subr.bf16.mxu0 %v8103_v25  ;;  %v9619_v25 = vld [vmem:[#allocation6 + $0x68] ss:$12 sps:$4 sm:$0xff]  }
 0xee9   :  { %4078 = vmatpush1.bf16.msra.mxu0 %v8101_v53  ;;  %7543 = vmatpush3.bf16.msra.mxu1 %v8104_v47  ;;  %v9617_v53 = vld [vmem:[#allocation6 + $0x60] ss:$12 sps:$4 sm:$0xff]  }
 0xeea   :  { %4079 = vmatprep.subr.bf16.mxu0 %v8107_v38  ;;  %7544 = vmatprep.subr.bf16.mxu1 %v10312_v1  ;;  %v9623_v47 = vld [vmem:[#allocation6 + $0x4c] ss:$12 sps:$4 sm:$0xff]   ;;  %v9627_v38 = vld [vmem:[#allocation6 + $0x48] ss:$12 sps:$4 sm:$0xff]  }
 0xeed   :  { %4080 = vmatpush1.bf16.msra.mxu0 %v8105_v36  ;;  %7545 = vmatpush3.bf16.msra.mxu1 %v8108_v34  ;;  %v9629_v36 = vld [vmem:[#allocation6 + $0x50] ss:$12 sps:$4 sm:$0xff]   ;;  %v9633_v34 = vld [vmem:[#allocation6 + $0x34] ss:$12 sps:$4 sm:$0xff]  }
 0xeee   :  { %4081 = vmatprep.subr.bf16.mxu0 %v8111_v39  ;;  %7546 = vmatprep.subr.bf16.mxu1 %v10312_v1  ;;  %v9637_v39 = vld [vmem:[#allocation6 + $0x30] ss:$12 sps:$4 sm:$0xff]  }
 0xef1   :  { %4082 = vmatpush1.bf16.msra.mxu0 %v8109_v10  ;;  %7547 = vmatpush3.bf16.msra.mxu1 %v8112_v15  ;;  %v9639_v10 = vld [vmem:[#allocation6 + $0x38] ss:$12 sps:$4 sm:$0xff]   ;;  %v9643_v15 = vld [vmem:[#allocation6 + $0x1c] ss:$12 sps:$4 sm:$0xff]  }
 0xef2   :  { %4083 = vmatprep.subr.bf16.mxu0 %v8115_v42  ;;  %7548 = vmatprep.subr.bf16.mxu1 %v10312_v1  ;;  %v9647_v42 = vld [vmem:[#allocation6 + $0x18] ss:$12 sps:$4 sm:$0xff]  }
 0xef5   :  { %4084 = vmatpush1.bf16.msra.mxu0 %v8113_v43  ;;  %7549 = vmatpush3.bf16.msra.mxu1 %v8116_v12  ;;  %v9649_v43 = vld [vmem:[#allocation6 + $0x20] ss:$12 sps:$4 sm:$0xff]   ;;  %v9653_v12 = vld [vmem:[#allocation6 + $0x4] ss:$12 sps:$4 sm:$0xff]  }
 0xef6   :  { %4325 = vmatprep.subr.bf16.mxu0 %v9574_v35  ;;  %7554 = vmatprep.subr.bf16.mxu1 %v10312_v1 }
 0xf97   :  { %v3831_v45 = vpop.f32.mrf.mxu0  ;;  %v3872_v5 = vpop.f32.mrf.mxu1 }
 0xf98   :  { %v3832_v24 = vadd.f32 %v3831_v45, %v8786_v21  ;;  %v3873_v48 = vadd.f32 %v3872_v5, %v8792_v51  ;;  %v9657_v45 = vld [vmem:[#allocation6] ss:$12 sps:$4 sm:$0xff]   ;;  %v9659_v5 = vld [vmem:[#allocation6 + $0x8] ss:$12 sps:$4 sm:$0xff]  }
 0xf99   :  { %v3833_v26 = vpop.f32.mrf.mxu0  ;;  %v7532_v32 = vpop.f32.mrf.mxu1 }
 0xf9a   :  { %v3878_v27 = vadd.f32 %v3832_v24, %v3790_v13  ;;  %v3834_v50 = vadd.f32 %v3833_v26, %v8788_v23 }
 0xf9b   :  { %v3835_v29 = vpop.f32.mrf.mxu0  ;;  %v3875_v44 = vpop.f32.mrf.mxu1 }
 0xf9c   :  { %v6666_v17 = vmul.f32 -1.442695, %v3878_v27  ;;  %v3885_v57 = vadd.f32 %v3834_v50, %v3791_v55 }
 0xf9d   :  { %v3836_v54 = vpop.f32.mrf.mxu0  ;;  %v7533_v30 = vpop.f32.mrf.mxu1 }
 0xf9e   :  { %8362 = vpow2.f32 %v6666_v17  ;;  %v6667_v58 = vmul.f32 -1.442695, %v3885_v57 }
 0xfa0   :  { %8364 = vpow2.f32 %v6667_v58 }
 0xfab   :  { %v8363_v60 = vpop.eup %8362 }
 0xfac   :  { %v3882_v4 = vadd.f32 1.0, %v8363_v60 }
 0xfad   :  { %v8365_v22 = vpop.eup %8364 }
 0xfae   :  { %8366 = vrcp.f32 %v3882_v4  ;;  %v3889_v46 = vadd.f32 1.0, %v8365_v22 }
 0xfb0   :  { %8368 = vrcp.f32 %v3889_v46  ;;  %v4162_v46 = vld [vmem:[#allocation2 + $0x28] sm:$0x3] }
 0xfbb   :  { %v8367_v18 = vpop.eup %8366 }
 0xfbc   :  { %v3892_v14 = vmul.f32 %v8367_v18, %v3873_v48 }
 0xfbd   :  { %v8369_v11 = vpop.eup %8368 }
 0xfbe   :  { %v3893_v19 = vadd.f32 %v3892_v14, %v3792_v9  ;;  %v3895_v61 = vsub.f32 1.0, %v8369_v11  ;;  %v3900_v31 = vmul.f32 %v8369_v11, %v3898_v49 }
 0xfc0   :  { %8370 = vtanh.f32 %v3893_v19 }
 0xfcd   :  { %v8371_v8 = vpop.eup %8370 }
 0xfce   :  { %v3896_v63 = vmul.f32 %v8371_v8, %v3895_v61 }
 0xfd0   :  { %v9582_v3 = vadd.f32 %v3900_v31, %v3896_v63  ;;  %v4163_v63 = vld [vmem:[#allocation2 + $0x10] sm:$0x3] }
 0xfd2   :  { %v3902_v40 = vpack.c.bf16 %v9582_v3, %v9582_v3 }
 0xfd4   :  { %v3906_v37 = vrot.slane %v3902_v40, 7  ;;  %4102 = vmatmul.mubr.bf16.vlgmr.msra.gmra.mxu0 %v3902_v40  ;;  %7551 = vmatmul.mubr.bf16.vlgmr.msra.gmra.mxu1 %v3902_v40 }
 0xfd5   :  { %4326 = vmatpush1.bf16.msra.mxu0 %v9584_v7  ;;  %7555 = vmatpush3.bf16.msra.mxu1 %v9586_v2 }
 0xfd6   :  { %3908 = vst [vmem:[#allocation3 + $0x4] sm:$0x2] %v3906_v37  ;;  %4327 = vmatprep.subr.bf16.mxu0 %v9590_v16  ;;  %7556 = vmatprep.subr.bf16.mxu1 %v10312_v1 }
 0xfd7   :  { %4357 = vmatprep.mubr.bf16.mxu0 %v10313_v20  ;;  %7570 = vmatprep.mubr.msk.bf16.mxu1 %vm8580_vm0, %v10312_v1 }
 0xfd9   :  { %4328 = vmatpush1.bf16.msra.mxu0 %v9594_v52  ;;  %7557 = vmatpush3.bf16.msra.mxu1 %v9596_v28 }
 0xfda   :  { %4329 = vmatprep.subr.bf16.mxu0 %v9600_v56  ;;  %7558 = vmatprep.subr.bf16.mxu1 %v10312_v1 }
 0xfdd   :  { %4330 = vmatpush1.bf16.msra.mxu0 %v9607_v0  ;;  %7559 = vmatpush3.bf16.msra.mxu1 %v9609_v59 }
 0xfde   :  { %4331 = vmatprep.subr.bf16.mxu0 %v9613_v62  ;;  %7560 = vmatprep.subr.bf16.mxu1 %v10312_v1 }
 0xfe1   :  { %4332 = vmatpush1.bf16.msra.mxu0 %v9617_v53  ;;  %7561 = vmatpush3.bf16.msra.mxu1 %v9619_v25 }
 0xfe2   :  { %4333 = vmatprep.subr.bf16.mxu0 %v9623_v47  ;;  %7562 = vmatprep.subr.bf16.mxu1 %v10312_v1 }
 0xfe5   :  { %4334 = vmatpush1.bf16.msra.mxu0 %v9627_v38  ;;  %7563 = vmatpush3.bf16.msra.mxu1 %v9629_v36 }
 0xfe6   :  { %4335 = vmatprep.subr.bf16.mxu0 %v9633_v34  ;;  %7564 = vmatprep.subr.bf16.mxu1 %v10312_v1 }
 0xfe9   :  { %4336 = vmatpush1.bf16.msra.mxu0 %v9637_v39  ;;  %7565 = vmatpush3.bf16.msra.mxu1 %v9639_v10 }
 0xfea   :  { %4337 = vmatprep.subr.bf16.mxu0 %v9643_v15  ;;  %7566 = vmatprep.subr.bf16.mxu1 %v10312_v1 }
 0xfed   :  { %4338 = vmatpush1.bf16.msra.mxu0 %v9647_v42  ;;  %7567 = vmatpush3.bf16.msra.mxu1 %v9649_v43 }
 0xfee   :  { %4339 = vmatprep.subr.bf16.mxu0 %v9653_v12  ;;  %7568 = vmatprep.subr.bf16.mxu1 %v10312_v1 }
 0xff1   :  { %4340 = vmatpush1.bf16.msra.mxu0 %v9657_v45  ;;  %7569 = vmatpush3.bf16.msra.mxu1 %v9659_v5 }
 0xff2   :  { %4431 = vmatprep.subr.bf16.mxu0 %v9574_v35  ;;  %7574 = vmatprep.subr.bf16.mxu1 %v10312_v1 }
 0xff4   :  { %4358 = vmatmul.mubr.bf16.vlgmr.msra.gmra.mxu0 %v3902_v40  ;;  %7571 = vmatmul.mubr.bf16.vlgmr.msra.gmra.mxu1 %v3902_v40 }
 0xff5   :  { %4432 = vmatpush1.bf16.msra.mxu0 %v9584_v7  ;;  %7575 = vmatpush3.bf16.msra.mxu1 %v9586_v2 }
 0xff6   :  { %4433 = vmatprep.subr.bf16.mxu0 %v9590_v16  ;;  %7576 = vmatprep.subr.bf16.mxu1 %v10312_v1 }
 0xff7   :  { %4463 = vmatprep.mubr.bf16.mxu0 %v10313_v20  ;;  %7590 = vmatprep.mubr.msk.bf16.mxu1 %vm8580_vm0, %v10312_v1 }
 0xff9   :  { %4434 = vmatpush1.bf16.msra.mxu0 %v9594_v52  ;;  %7577 = vmatpush3.bf16.msra.mxu1 %v9596_v28 }
 0xffa   :  { %4435 = vmatprep.subr.bf16.mxu0 %v9600_v56  ;;  %7578 = vmatprep.subr.bf16.mxu1 %v10312_v1 }
 0xffd   :  { %4436 = vmatpush1.bf16.msra.mxu0 %v9607_v0  ;;  %7579 = vmatpush3.bf16.msra.mxu1 %v9609_v59 }
 0xffe   :  { %4437 = vmatprep.subr.bf16.mxu0 %v9613_v62  ;;  %7580 = vmatprep.subr.bf16.mxu1 %v10312_v1 }
0x1001   :  { %4438 = vmatpush1.bf16.msra.mxu0 %v9617_v53  ;;  %7581 = vmatpush3.bf16.msra.mxu1 %v9619_v25 }
0x1002   :  { %4439 = vmatprep.subr.bf16.mxu0 %v9623_v47  ;;  %7582 = vmatprep.subr.bf16.mxu1 %v10312_v1 }
0x1005   :  { %4440 = vmatpush1.bf16.msra.mxu0 %v9627_v38  ;;  %7583 = vmatpush3.bf16.msra.mxu1 %v9629_v36 }
0x1006   :  { %4441 = vmatprep.subr.bf16.mxu0 %v9633_v34  ;;  %7584 = vmatprep.subr.bf16.mxu1 %v10312_v1 }
0x1009   :  { %4442 = vmatpush1.bf16.msra.mxu0 %v9637_v39  ;;  %7585 = vmatpush3.bf16.msra.mxu1 %v9639_v10 }
0x100a   :  { %4443 = vmatprep.subr.bf16.mxu0 %v9643_v15  ;;  %7586 = vmatprep.subr.bf16.mxu1 %v10312_v1 }
0x100d   :  { %4444 = vmatpush1.bf16.msra.mxu0 %v9647_v42  ;;  %7587 = vmatpush3.bf16.msra.mxu1 %v9649_v43 }
0x100e   :  { %4445 = vmatprep.subr.bf16.mxu0 %v9653_v12  ;;  %7588 = vmatprep.subr.bf16.mxu1 %v10312_v1 }
0x1011   :  { %4446 = vmatpush1.bf16.msra.mxu0 %v9657_v45  ;;  %7589 = vmatpush3.bf16.msra.mxu1 %v9659_v5 }
0x1012   :  { %4552 = vmatprep.subr.bf16.mxu0 %v9574_v35  ;;  %7594 = vmatprep.subr.bf16.mxu1 %v10312_v1 }
0x1094   :  { %v4103_v24 = vpop.f32.mrf.mxu0  ;;  %v4144_v13 = vpop.f32.mrf.mxu1 }
0x1095   :  { %v4104_v26 = vadd.f32 %v4103_v24, %v10314_v33  ;;  %v4145_v32 = vadd.f32 %v4144_v13, %v10315_v41 }
0x1096   :  { %v4105_v27 = vpop.f32.mrf.mxu0  ;;  %v7552_v29 = vpop.f32.mrf.mxu1 }
0x1097   :  { %v4153_v44 = vrot.slane %v4104_v26, 6  ;;  %v4155_v17 = vrot.slane %v4145_v32, 6  ;;  %v4106_v50 = vadd.f32 %v4105_v27, %v8776_v6 }
0x1098   :  { %v4107_v54 = vpop.f32.mrf.mxu0  ;;  %v4147_v30 = vpop.f32.mrf.mxu1 }
0x1099   :  { %4159 = vst [vmem:[#allocation2] sm:$0xc] %v4153_v44  ;;  %4161 = vst [vmem:[#allocation2 + $0x20] sm:$0xc] %v4155_v17  ;;  %v4154_v55 = vrot.slane %v4106_v50, 6 }
0x109a   :  { %v4108_v57 = vpop.f32.mrf.mxu0  ;;  %v7553_v58 = vpop.f32.mrf.mxu1  ;;  %v4164_v44 = vld [vmem:[#allocation2 + $0x8] sm:$0x3] }
0x109b   :  { %4160 = vst [vmem:[#allocation2 + $0x18] sm:$0xc] %v4154_v55 }
0x10b4   :  { %v4359_v60 = vpop.f32.mrf.mxu0  ;;  %v4400_v4 = vpop.f32.mrf.mxu1 }
0x10b5   :  { %v4360_v22 = vadd.f32 %v4359_v60, %v8786_v21  ;;  %v4401_v32 = vadd.f32 %v4400_v4, %v8792_v51 }
0x10b6   :  { %v4361_v48 = vpop.f32.mrf.mxu0  ;;  %v7572_v18 = vpop.f32.mrf.mxu1 }
0x10b7   :  { %v4406_v14 = vadd.f32 %v4360_v22, %v4162_v46  ;;  %v4362_v49 = vadd.f32 %v4361_v48, %v8788_v23 }
0x10b8   :  { %v4363_v9 = vpop.f32.mrf.mxu0  ;;  %v4403_v19 = vpop.f32.mrf.mxu1 }
0x10b9   :  { %v6717_v11 = vmul.f32 -1.442695, %v4406_v14  ;;  %v4413_v31 = vadd.f32 %v4362_v49, %v4163_v63  ;;  %v4427_v9 = vld [vmem:[#allocation2 + $0x28] sm:$0xc] }
0x10ba   :  { %v4364_v61 = vpop.f32.mrf.mxu0  ;;  %v7573_v8 = vpop.f32.mrf.mxu1 }
0x10bb   :  { %8372 = vpow2.f32 %v6717_v11  ;;  %v6718_v40 = vmul.f32 -1.442695, %v4413_v31 }
0x10bd   :  { %8374 = vpow2.f32 %v6718_v40  ;;  %v4428_v40 = vld [vmem:[#allocation2 + $0x10] sm:$0xc] }
0x10c8   :  { %v8373_v37 = vpop.eup %8372 }
0x10c9   :  { %v4410_v24 = vadd.f32 1.0, %v8373_v37 }
0x10ca   :  { %v8375_v13 = vpop.eup %8374 }
0x10cb   :  { %8376 = vrcp.f32 %v4410_v24  ;;  %v4417_v26 = vadd.f32 1.0, %v8375_v13 }
0x10cd   :  { %8378 = vrcp.f32 %v4417_v26 }
0x10d8   :  { %v8377_v27 = vpop.eup %8376 }
0x10d9   :  { %v4420_v29 = vmul.f32 %v8377_v27, %v4401_v32 }
0x10da   :  { %v8379_v50 = vpop.eup %8378 }
0x10db   :  { %v4421_v17 = vadd.f32 %v4420_v29, %v4164_v44  ;;  %v4423_v54 = vsub.f32 1.0, %v8379_v50  ;;  %v4425_v57 = vmul.f32 %v8379_v50, %v9582_v3 }
0x10dd   :  { %8380 = vtanh.f32 %v4421_v17 }
0x10ea   :  { %v8381_v30 = vpop.eup %8380 }
0x10eb   :  { %v4424_v55 = vmul.f32 %v8381_v30, %v4423_v54  ;;  %v4429_v54 = vld [vmem:[#allocation2 + $0x8] sm:$0xc] }
0x10ed   :  { %v9709_v58 = vadd.f32 %v4425_v57, %v4424_v55 }
0x10ef   :  { %v4430_v60 = vpack.c.bf16 %v9709_v58, %v9709_v58  ;;  %v4541_v57 = vrot.slane %v9709_v58, 6 }
0x10f1   :  { %4464 = vmatmul.mubr.bf16.vlgmr.msra.gmra.mxu0 %v4430_v60  ;;  %7591 = vmatmul.mubr.bf16.vlgmr.msra.gmra.mxu1 %v4430_v60 }
0x10f2   :  { %4553 = vmatpush1.bf16.msra.mxu0 %v9584_v7  ;;  %7595 = vmatpush3.bf16.msra.mxu1 %v9586_v2 }
0x10f3   :  { %4554 = vmatprep.subr.bf16.mxu0 %v9590_v16  ;;  %7596 = vmatprep.subr.bf16.mxu1 %v10312_v1 }
0x10f4   :  { %4584 = vmatprep.mubr.bf16.mxu0 %v10313_v20  ;;  %7610 = vmatprep.mubr.msk.bf16.mxu1 %vm8580_vm0, %v10312_v1 }
0x10f6   :  { %4555 = vmatpush1.bf16.msra.mxu0 %v9594_v52  ;;  %7597 = vmatpush3.bf16.msra.mxu1 %v9596_v28 }
0x10f7   :  { %4556 = vmatprep.subr.bf16.mxu0 %v9600_v56  ;;  %7598 = vmatprep.subr.bf16.mxu1 %v10312_v1 }
0x10fa   :  { %4557 = vmatpush1.bf16.msra.mxu0 %v9607_v0  ;;  %7599 = vmatpush3.bf16.msra.mxu1 %v9609_v59 }
0x10fb   :  { %4558 = vmatprep.subr.bf16.mxu0 %v9613_v62  ;;  %7600 = vmatprep.subr.bf16.mxu1 %v10312_v1 }
0x10fe   :  { %4559 = vmatpush1.bf16.msra.mxu0 %v9617_v53  ;;  %7601 = vmatpush3.bf16.msra.mxu1 %v9619_v25 }
0x10ff   :  { %4560 = vmatprep.subr.bf16.mxu0 %v9623_v47  ;;  %7602 = vmatprep.subr.bf16.mxu1 %v10312_v1 }
0x1102   :  { %4561 = vmatpush1.bf16.msra.mxu0 %v9627_v38  ;;  %7603 = vmatpush3.bf16.msra.mxu1 %v9629_v36 }
0x1103   :  { %4562 = vmatprep.subr.bf16.mxu0 %v9633_v34  ;;  %7604 = vmatprep.subr.bf16.mxu1 %v10312_v1 }
0x1106   :  { %4563 = vmatpush1.bf16.msra.mxu0 %v9637_v39  ;;  %7605 = vmatpush3.bf16.msra.mxu1 %v9639_v10 }
0x1107   :  { %4564 = vmatprep.subr.bf16.mxu0 %v9643_v15  ;;  %7606 = vmatprep.subr.bf16.mxu1 %v10312_v1 }
0x110a   :  { %4565 = vmatpush1.bf16.msra.mxu0 %v9647_v42  ;;  %7607 = vmatpush3.bf16.msra.mxu1 %v9649_v43 }
0x110b   :  { %4566 = vmatprep.subr.bf16.mxu0 %v9653_v12  ;;  %7608 = vmatprep.subr.bf16.mxu1 %v10312_v1 }
0x110e   :  { %4567 = vmatpush1.bf16.msra.mxu0 %v9657_v45  ;;  %7609 = vmatpush3.bf16.msra.mxu1 %v9659_v5 }
0x110f   :  { %4673 = vmatprep.subr.bf16.mxu0 %v9574_v35  ;;  %7614 = vmatprep.subr.bf16.mxu1 %v10312_v1 }
0x11b1   :  { %v4465_v3 = vpop.f32.mrf.mxu0  ;;  %v4506_v4 = vpop.f32.mrf.mxu1 }
0x11b2   :  { %v4466_v22 = vadd.f32 %v4465_v3, %v8786_v21  ;;  %v4507_v27 = vadd.f32 %v4506_v4, %v8792_v51 }
0x11b3   :  { %v4467_v46 = vpop.f32.mrf.mxu0  ;;  %v7592_v48 = vpop.f32.mrf.mxu1 }
0x11b4   :  { %v4513_v18 = vrot.slane %v4466_v22, 6  ;;  %v4468_v14 = vadd.f32 %v4467_v46, %v8788_v23  ;;  %v4533_v44 = vrot.slane %v4507_v27, 6 }
0x11b5   :  { %v4469_v19 = vpop.f32.mrf.mxu0  ;;  %v4509_v11 = vpop.f32.mrf.mxu1 }
0x11b6   :  { %v4515_v49 = vadd.f32 %v4513_v18, %v4427_v9  ;;  %v4523_v31 = vrot.slane %v4468_v14, 6 }
0x11b7   :  { %v4470_v61 = vpop.f32.mrf.mxu0  ;;  %v7593_v8 = vpop.f32.mrf.mxu1 }
0x11b8   :  { %v6719_v63 = vmul.f32 -1.442695, %v4515_v49  ;;  %v4525_v37 = vadd.f32 %v4523_v31, %v4428_v40  ;;  %v4545_v8 = vld [vmem:[#allocation2 + $0x28] sm:$0x30] }
0x11ba   :  { %8382 = vpow2.f32 %v6719_v63  ;;  %v6720_v24 = vmul.f32 -1.442695, %v4525_v37 }
0x11bc   :  { %8384 = vpow2.f32 %v6720_v24 }
0x11c7   :  { %v8383_v13 = vpop.eup %8382 }
0x11c8   :  { %v4519_v26 = vadd.f32 1.0, %v8383_v13 }
0x11c9   :  { %v8385_v32 = vpop.eup %8384 }
0x11ca   :  { %8386 = vrcp.f32 %v4519_v26  ;;  %v4529_v29 = vadd.f32 1.0, %v8385_v32  ;;  %v4546_v32 = vld [vmem:[#allocation2 + $0x10] sm:$0x30] }
0x11cc   :  { %8388 = vrcp.f32 %v4529_v29 }
0x11d7   :  { %v8387_v17 = vpop.eup %8386 }
0x11d8   :  { %v4535_v50 = vmul.f32 %v8387_v17, %v4533_v44 }
0x11d9   :  { %v8389_v55 = vpop.eup %8388 }
0x11da   :  { %v4536_v30 = vadd.f32 %v4535_v50, %v4429_v54  ;;  %v4538_v60 = vsub.f32 1.0, %v8389_v55  ;;  %v4543_v46 = vmul.f32 %v8389_v55, %v4541_v57 }
0x11dc   :  { %8390 = vtanh.f32 %v4536_v30 }
0x11e9   :  { %v8391_v3 = vpop.eup %8390 }
0x11ea   :  { %v4539_v22 = vmul.f32 %v8391_v3, %v4538_v60  ;;  %v4547_v3 = vld [vmem:[#allocation2 + $0x8] sm:$0x30] }
0x11ec   :  { %v9752_v48 = vadd.f32 %v4543_v46, %v4539_v22 }
0x11ee   :  { %v4548_v4 = vpack.c.bf16 %v9752_v48, %v9752_v48 }
0x11f0   :  { %v4550_v18 = vrot.slane %v4548_v4, 1  ;;  %v4662_v4 = vrot.slane %v9752_v48, 6 }
0x11f2   :  { %4585 = vmatmul.mubr.bf16.vlgmr.msra.gmra.mxu0 %v4550_v18  ;;  %7611 = vmatmul.mubr.bf16.vlgmr.msra.gmra.mxu1 %v4550_v18 }
0x11f3   :  { %4674 = vmatpush1.bf16.msra.mxu0 %v9584_v7  ;;  %7615 = vmatpush3.bf16.msra.mxu1 %v9586_v2 }
0x11f4   :  { %4675 = vmatprep.subr.bf16.mxu0 %v9590_v16  ;;  %7616 = vmatprep.subr.bf16.mxu1 %v10312_v1 }
0x11f5   :  { %4705 = vmatprep.mubr.bf16.mxu0 %v10313_v20  ;;  %7630 = vmatprep.mubr.msk.bf16.mxu1 %vm8580_vm0, %v10312_v1 }
0x11f7   :  { %4676 = vmatpush1.bf16.msra.mxu0 %v9594_v52  ;;  %7617 = vmatpush3.bf16.msra.mxu1 %v9596_v28 }
0x11f8   :  { %4677 = vmatprep.subr.bf16.mxu0 %v9600_v56  ;;  %7618 = vmatprep.subr.bf16.mxu1 %v10312_v1 }
0x11fb   :  { %4678 = vmatpush1.bf16.msra.mxu0 %v9607_v0  ;;  %7619 = vmatpush3.bf16.msra.mxu1 %v9609_v59 }
0x11fc   :  { %4679 = vmatprep.subr.bf16.mxu0 %v9613_v62  ;;  %7620 = vmatprep.subr.bf16.mxu1 %v10312_v1 }
0x11ff   :  { %4680 = vmatpush1.bf16.msra.mxu0 %v9617_v53  ;;  %7621 = vmatpush3.bf16.msra.mxu1 %v9619_v25 }
0x1200   :  { %4681 = vmatprep.subr.bf16.mxu0 %v9623_v47  ;;  %7622 = vmatprep.subr.bf16.mxu1 %v10312_v1 }
0x1203   :  { %4682 = vmatpush1.bf16.msra.mxu0 %v9627_v38  ;;  %7623 = vmatpush3.bf16.msra.mxu1 %v9629_v36 }
0x1204   :  { %4683 = vmatprep.subr.bf16.mxu0 %v9633_v34  ;;  %7624 = vmatprep.subr.bf16.mxu1 %v10312_v1 }
0x1207   :  { %4684 = vmatpush1.bf16.msra.mxu0 %v9637_v39  ;;  %7625 = vmatpush3.bf16.msra.mxu1 %v9639_v10 }
0x1208   :  { %4685 = vmatprep.subr.bf16.mxu0 %v9643_v15  ;;  %7626 = vmatprep.subr.bf16.mxu1 %v10312_v1 }
0x120b   :  { %4686 = vmatpush1.bf16.msra.mxu0 %v9647_v42  ;;  %7627 = vmatpush3.bf16.msra.mxu1 %v9649_v43 }
0x120c   :  { %4687 = vmatprep.subr.bf16.mxu0 %v9653_v12  ;;  %7628 = vmatprep.subr.bf16.mxu1 %v10312_v1 }
0x120f   :  { %4688 = vmatpush1.bf16.msra.mxu0 %v9657_v45  ;;  %7629 = vmatpush3.bf16.msra.mxu1 %v9659_v5 }
0x1210   :  { %4794 = vmatprep.subr.bf16.mxu0 %v9574_v35  ;;  %7634 = vmatprep.subr.bf16.mxu1 %v10312_v1 }
0x12b2   :  { %v4586_v58 = vpop.f32.mrf.mxu0  ;;  %v4627_v14 = vpop.f32.mrf.mxu1 }
0x12b3   :  { %v4587_v9 = vadd.f32 %v4586_v58, %v8786_v21  ;;  %v4628_v54 = vadd.f32 %v4627_v14, %v8792_v51 }
0x12b4   :  { %v4588_v19 = vpop.f32.mrf.mxu0  ;;  %v7612_v11 = vpop.f32.mrf.mxu1 }
0x12b5   :  { %v4634_v49 = vrot.slane %v4587_v9, 4  ;;  %v4589_v61 = vadd.f32 %v4588_v19, %v8788_v23  ;;  %v4654_v55 = vrot.slane %v4628_v54, 4 }
0x12b6   :  { %v4590_v63 = vpop.f32.mrf.mxu0  ;;  %v4630_v31 = vpop.f32.mrf.mxu1 }
0x12b7   :  { %v4636_v40 = vadd.f32 %v4634_v49, %v4545_v8  ;;  %v4644_v26 = vrot.slane %v4589_v61, 4 }
0x12b8   :  { %v4591_v37 = vpop.f32.mrf.mxu0  ;;  %v7613_v24 = vpop.f32.mrf.mxu1 }
0x12b9   :  { %v6721_v13 = vmul.f32 -1.442695, %v4636_v40  ;;  %v4646_v27 = vadd.f32 %v4644_v26, %v4546_v32  ;;  %v4666_v24 = vld [vmem:[#allocation2 + $0x28] sm:$0xc0] }
0x12bb   :  { %8392 = vpow2.f32 %v6721_v13  ;;  %v6722_v29 = vmul.f32 -1.442695, %v4646_v27 }
0x12bd   :  { %8394 = vpow2.f32 %v6722_v29 }
0x12c8   :  { %v8393_v44 = vpop.eup %8392 }
0x12c9   :  { %v4640_v17 = vadd.f32 1.0, %v8393_v44 }
0x12ca   :  { %v8395_v50 = vpop.eup %8394 }
0x12cb   :  { %8396 = vrcp.f32 %v4640_v17  ;;  %v4650_v30 = vadd.f32 1.0, %v8395_v50 }
0x12cd   :  { %8398 = vrcp.f32 %v4650_v30 }
0x12d8   :  { %v8397_v57 = vpop.eup %8396 }
0x12d9   :  { %v4656_v60 = vmul.f32 %v8397_v57, %v4654_v55 }
0x12da   :  { %v8399_v46 = vpop.eup %8398 }
0x12db   :  { %v4657_v22 = vadd.f32 %v4656_v60, %v4547_v3  ;;  %v4659_v18 = vsub.f32 1.0, %v8399_v46  ;;  %v4664_v19 = vmul.f32 %v8399_v46, %v4662_v4 }
0x12dd   :  { %8400 = vtanh.f32 %v4657_v22 }
0x12ea   :  { %v8401_v58 = vpop.eup %8400 }
0x12eb   :  { %v4660_v9 = vmul.f32 %v8401_v58, %v4659_v18  ;;  %v4668_v18 = vld [vmem:[#allocation2 + $0x8] sm:$0xc0] }
0x12ed   :  { %v9795_v11 = vadd.f32 %v4664_v19, %v4660_v9 }
0x12ef   :  { %v4669_v14 = vpack.c.bf16 %v9795_v11, %v9795_v11  ;;  %v4783_v19 = vrot.slane %v9795_v11, 6  ;;  %v4789_v11 = vld [vmem:[#allocation2 + $0x20] sm:$0x3] }
0x12f1   :  { %v4671_v49 = vrot.slane %v4669_v14, 2 }
0x12f3   :  { %4706 = vmatmul.mubr.bf16.vlgmr.msra.gmra.mxu0 %v4671_v49  ;;  %7631 = vmatmul.mubr.bf16.vlgmr.msra.gmra.mxu1 %v4671_v49 }
0x12f4   :  { %4795 = vmatpush1.bf16.msra.mxu0 %v9584_v7  ;;  %7635 = vmatpush3.bf16.msra.mxu1 %v9586_v2 }
0x12f5   :  { %4796 = vmatprep.subr.bf16.mxu0 %v9590_v16  ;;  %7636 = vmatprep.subr.bf16.mxu1 %v10312_v1 }
0x12f6   :  { %4826 = vmatprep.mubr.bf16.mxu0 %v10313_v20  ;;  %7650 = vmatprep.mubr.msk.bf16.mxu1 %vm8580_vm0, %v10312_v1 }
0x12f8   :  { %4797 = vmatpush1.bf16.msra.mxu0 %v9594_v52  ;;  %7637 = vmatpush3.bf16.msra.mxu1 %v9596_v28 }
0x12f9   :  { %4798 = vmatprep.subr.bf16.mxu0 %v9600_v56  ;;  %7638 = vmatprep.subr.bf16.mxu1 %v10312_v1 }
0x12fc   :  { %4799 = vmatpush1.bf16.msra.mxu0 %v9607_v0  ;;  %7639 = vmatpush3.bf16.msra.mxu1 %v9609_v59 }
0x12fd   :  { %4800 = vmatprep.subr.bf16.mxu0 %v9613_v62  ;;  %7640 = vmatprep.subr.bf16.mxu1 %v10312_v1 }
0x1300   :  { %4801 = vmatpush1.bf16.msra.mxu0 %v9617_v53  ;;  %7641 = vmatpush3.bf16.msra.mxu1 %v9619_v25 }
0x1301   :  { %4802 = vmatprep.subr.bf16.mxu0 %v9623_v47  ;;  %7642 = vmatprep.subr.bf16.mxu1 %v10312_v1 }
0x1304   :  { %4803 = vmatpush1.bf16.msra.mxu0 %v9627_v38  ;;  %7643 = vmatpush3.bf16.msra.mxu1 %v9629_v36 }
0x1305   :  { %4804 = vmatprep.subr.bf16.mxu0 %v9633_v34  ;;  %7644 = vmatprep.subr.bf16.mxu1 %v10312_v1 }
0x1308   :  { %4805 = vmatpush1.bf16.msra.mxu0 %v9637_v39  ;;  %7645 = vmatpush3.bf16.msra.mxu1 %v9639_v10 }
0x1309   :  { %4806 = vmatprep.subr.bf16.mxu0 %v9643_v15  ;;  %7646 = vmatprep.subr.bf16.mxu1 %v10312_v1 }
0x130c   :  { %4807 = vmatpush1.bf16.msra.mxu0 %v9647_v42  ;;  %7647 = vmatpush3.bf16.msra.mxu1 %v9649_v43 }
0x130d   :  { %4808 = vmatprep.subr.bf16.mxu0 %v9653_v12  ;;  %7648 = vmatprep.subr.bf16.mxu1 %v10312_v1 }
0x1310   :  { %4809 = vmatpush1.bf16.msra.mxu0 %v9657_v45  ;;  %7649 = vmatpush3.bf16.msra.mxu1 %v9659_v5 }
0x1311   :  { %4903 = vmatprep.subr.bf16.mxu0 %v9574_v35  ;;  %7654 = vmatprep.subr.bf16.mxu1 %v10312_v1  ;;  %v4667_v35 = vld [vmem:[#allocation2 + $0x10] sm:$0xc0] }
0x13b3   :  { %v4707_v48 = vpop.f32.mrf.mxu0  ;;  %v4748_v61 = vpop.f32.mrf.mxu1 }
0x13b4   :  { %v4708_v8 = vadd.f32 %v4707_v48, %v8786_v21  ;;  %v4749_v60 = vadd.f32 %v4748_v61, %v8792_v51 }
0x13b5   :  { %v4709_v63 = vpop.f32.mrf.mxu0  ;;  %v7632_v31 = vpop.f32.mrf.mxu1 }
0x13b6   :  { %v4755_v40 = vrot.slane %v4708_v8, 2  ;;  %v4710_v37 = vadd.f32 %v4709_v63, %v8788_v23  ;;  %v4775_v22 = vrot.slane %v4749_v60, 2  ;;  %v8157_v60 = vld [vmem:[#allocation4 + $0x78] ss:$12 sps:$4 sm:$0xff]  }
0x13b7   :  { %v4711_v13 = vpop.f32.mrf.mxu0  ;;  %v4751_v26 = vpop.f32.mrf.mxu1 }
0x13b8   :  { %v4757_v32 = vadd.f32 %v4755_v40, %v4666_v24  ;;  %v4765_v17 = vrot.slane %v4710_v37, 2 }
0x13b9   :  { %v4712_v27 = vpop.f32.mrf.mxu0  ;;  %v7633_v29 = vpop.f32.mrf.mxu1 }
0x13ba   :  { %v6723_v44 = vmul.f32 -1.442695, %v4757_v32  ;;  %v4767_v50 = vadd.f32 %v4765_v17, %v4667_v35  ;;  %v8151_v17 = vld [vmem:[#allocation4 + $0xac] ss:$12 sps:$4 sm:$0xff]   ;;  %v8149_v35 = vld [vmem:[#allocation4 + $0xa8] ss:$12 sps:$4 sm:$0xff]  }
0x13bc   :  { %8402 = vpow2.f32 %v6723_v44  ;;  %v6724_v54 = vmul.f32 -1.442695, %v4767_v50  ;;  %v8152_v50 = vld [vmem:[#allocation4 + $0xb0] ss:$12 sps:$4 sm:$0xff]  }
0x13be   :  { %8404 = vpow2.f32 %v6724_v54  ;;  %v8155_v54 = vld [vmem:[#allocation4 + $0x94] ss:$12 sps:$4 sm:$0xff]  }
0x13c9   :  { %v8403_v30 = vpop.eup %8402 }
0x13ca   :  { %v4761_v55 = vadd.f32 1.0, %v8403_v30  ;;  %v8153_v30 = vld [vmem:[#allocation4 + $0x90] ss:$12 sps:$4 sm:$0xff]  }
0x13cb   :  { %v8405_v57 = vpop.eup %8404 }
0x13cc   :  { %8406 = vrcp.f32 %v4761_v55  ;;  %v4771_v3 = vadd.f32 1.0, %v8405_v57  ;;  %v8156_v55 = vld [vmem:[#allocation4 + $0x98] ss:$12 sps:$4 sm:$0xff]   ;;  %v8159_v57 = vld [vmem:[#allocation4 + $0x7c] ss:$12 sps:$4 sm:$0xff]  }
0x13ce   :  { %8408 = vrcp.f32 %v4771_v3  ;;  %v8160_v3 = vld [vmem:[#allocation4 + $0x80] ss:$12 sps:$4 sm:$0xff]  }
0x13d9   :  { %v8407_v46 = vpop.eup %8406 }
0x13da   :  { %v4777_v4 = vmul.f32 %v8407_v46, %v4775_v22  ;;  %v8163_v22 = vld [vmem:[#allocation4 + $0x64] ss:$12 sps:$4 sm:$0xff]   ;;  %v8161_v46 = vld [vmem:[#allocation4 + $0x60] ss:$12 sps:$4 sm:$0xff]  }
0x13db   :  { %v8409_v9 = vpop.eup %8408 }
0x13dc   :  { %v4778_v58 = vadd.f32 %v4777_v4, %v4668_v18  ;;  %v4780_v14 = vsub.f32 1.0, %v8409_v9  ;;  %v4785_v8 = vmul.f32 %v8409_v9, %v4783_v19  ;;  %v8164_v4 = vld [vmem:[#allocation4 + $0x68] ss:$12 sps:$4 sm:$0xff]   ;;  %v8167_v18 = vld [vmem:[#allocation4 + $0x4c] ss:$12 sps:$4 sm:$0xff]  }
0x13dd   :  { %v8168_v9 = vld [vmem:[#allocation4 + $0x50] ss:$12 sps:$4 sm:$0xff]   ;;  %v8171_v19 = vld [vmem:[#allocation4 + $0x34] ss:$12 sps:$4 sm:$0xff]  }
0x13de   :  { %8410 = vtanh.f32 %v4778_v58  ;;  %v8165_v58 = vld [vmem:[#allocation4 + $0x48] ss:$12 sps:$4 sm:$0xff]  }
0x13eb   :  { %v8411_v49 = vpop.eup %8410 }
0x13ec   :  { %v4781_v48 = vmul.f32 %v8411_v49, %v4780_v14  ;;  %v8169_v14 = vld [vmem:[#allocation4 + $0x30] ss:$12 sps:$4 sm:$0xff]   ;;  %v8172_v49 = vld [vmem:[#allocation4 + $0x38] ss:$12 sps:$4 sm:$0xff]  }
0x13ee   :  { %v9838_v63 = vadd.f32 %v4785_v8, %v4781_v48  ;;  %v8175_v48 = vld [vmem:[#allocation4 + $0x1c] ss:$12 sps:$4 sm:$0xff]   ;;  %v8173_v8 = vld [vmem:[#allocation4 + $0x18] ss:$12 sps:$4 sm:$0xff]  }
0x13f0   :  { %v4790_v61 = vpack.c.bf16 %v9838_v63, %v9838_v63  ;;  %v4895_v24 = vrot.slane %v9838_v63, 6  ;;  %v8176_v63 = vld [vmem:[#allocation4 + $0x20] ss:$12 sps:$4 sm:$0xff]  }
0x13f2   :  { %v4792_v31 = vrot.slane %v4790_v61, 3  ;;  %v8179_v61 = vld [vmem:[#allocation4 + $0x4] ss:$12 sps:$4 sm:$0xff]  }
0x13f4   :  { %4827 = vmatmul.mubr.bf16.vlgmr.msra.gmra.mxu0 %v4792_v31  ;;  %7651 = vmatmul.mubr.bf16.vlgmr.msra.gmra.mxu1 %v4792_v31  ;;  %v8177_v31 = vld [vmem:[#allocation4] ss:$12 sps:$4 sm:$0xff]  }
0x13f5   :  { %4904 = vmatpush1.bf16.msra.mxu0 %v9584_v7  ;;  %7655 = vmatpush3.bf16.msra.mxu1 %v9586_v2 }
0x13f6   :  { %4905 = vmatprep.subr.bf16.mxu0 %v9590_v16  ;;  %7656 = vmatprep.subr.bf16.mxu1 %v10312_v1 }
0x13f7   :  { %4935 = vmatprep.mubr.bf16.mxu0 %v10313_v20  ;;  %7670 = vmatprep.mubr.msk.bf16.mxu1 %vm8580_vm0, %v10312_v1 }
0x13f9   :  { %4906 = vmatpush1.bf16.msra.mxu0 %v9594_v52  ;;  %7657 = vmatpush3.bf16.msra.mxu1 %v9596_v28  ;;  %v4787_v52 = vld [vmem:[#allocation2] sm:$0x3] }
0x13fa   :  { %4907 = vmatprep.subr.bf16.mxu0 %v9600_v56  ;;  %7658 = vmatprep.subr.bf16.mxu1 %v10312_v1 }
0x13fd   :  { %4908 = vmatpush1.bf16.msra.mxu0 %v9607_v0  ;;  %7659 = vmatpush3.bf16.msra.mxu1 %v9609_v59 }
0x13fe   :  { %4909 = vmatprep.subr.bf16.mxu0 %v9613_v62  ;;  %7660 = vmatprep.subr.bf16.mxu1 %v10312_v1 }
0x1401   :  { %4910 = vmatpush1.bf16.msra.mxu0 %v9617_v53  ;;  %7661 = vmatpush3.bf16.msra.mxu1 %v9619_v25 }
0x1402   :  { %4911 = vmatprep.subr.bf16.mxu0 %v9623_v47  ;;  %7662 = vmatprep.subr.bf16.mxu1 %v10312_v1 }
0x1405   :  { %4912 = vmatpush1.bf16.msra.mxu0 %v9627_v38  ;;  %7663 = vmatpush3.bf16.msra.mxu1 %v9629_v36  ;;  %v4788_v36 = vld [vmem:[#allocation2 + $0x18] sm:$0x3] }
0x1406   :  { %4913 = vmatprep.subr.bf16.mxu0 %v9633_v34  ;;  %7664 = vmatprep.subr.bf16.mxu1 %v10312_v1 }
0x1409   :  { %4914 = vmatpush1.bf16.msra.mxu0 %v9637_v39  ;;  %7665 = vmatpush3.bf16.msra.mxu1 %v9639_v10 }
0x140a   :  { %4915 = vmatprep.subr.bf16.mxu0 %v9643_v15  ;;  %7666 = vmatprep.subr.bf16.mxu1 %v10312_v1 }
0x140d   :  { %4916 = vmatpush1.bf16.msra.mxu0 %v9647_v42  ;;  %7667 = vmatpush3.bf16.msra.mxu1 %v9649_v43 }
0x140e   :  { %4917 = vmatprep.subr.bf16.mxu0 %v9653_v12  ;;  %7668 = vmatprep.subr.bf16.mxu1 %v10312_v1 }
0x1411   :  { %4918 = vmatpush1.bf16.msra.mxu0 %v9657_v45  ;;  %7669 = vmatpush3.bf16.msra.mxu1 %v9659_v5 }
0x1412   :  { %7674 = vmatprep.subr.bf16.mxu1 %v10312_v1  ;;  %5186 = vmatprep.subr.bf16.mxu0 %v8151_v17 }
0x14b4   :  { %v4828_v7 = vpop.f32.mrf.mxu0  ;;  %v4869_v2 = vpop.f32.mrf.mxu1 }
0x14b5   :  { %v4829_v16 = vadd.f32 %v4828_v7, %v8786_v21  ;;  %v4870_v12 = vadd.f32 %v4869_v2, %v8792_v51  ;;  %v8180_v7 = vld [vmem:[#allocation4 + $0x8] ss:$12 sps:$4 sm:$0xff]   ;;  %v9894_v2 = vld [vmem:[#allocation6 + $0xac] ss:$12 sps:$4 sm:$0xff]  }
0x14b6   :  { %v4830_v28 = vpop.f32.mrf.mxu0  ;;  %v7652_v56 = vpop.f32.mrf.mxu1 }
0x14b7   :  { %v4875_v0 = vadd.f32 %v4829_v16, %v4787_v52  ;;  %v4831_v25 = vadd.f32 %v4830_v28, %v8788_v23 }
0x14b8   :  { %v4832_v59 = vpop.f32.mrf.mxu0  ;;  %v4872_v62 = vpop.f32.mrf.mxu1 }
0x14b9   :  { %v6725_v53 = vmul.f32 -1.442695, %v4875_v0  ;;  %v4882_v34 = vadd.f32 %v4831_v25, %v4788_v36 }
0x14ba   :  { %v4833_v47 = vpop.f32.mrf.mxu0  ;;  %v7653_v38 = vpop.f32.mrf.mxu1 }
0x14bb   :  { %8412 = vpow2.f32 %v6725_v53  ;;  %v6726_v39 = vmul.f32 -1.442695, %v4882_v34  ;;  %v4899_v53 = vld [vmem:[#allocation2] sm:$0xc] }
0x14bd   :  { %8414 = vpow2.f32 %v6726_v39 }
0x14c8   :  { %v8413_v10 = vpop.eup %8412 }
0x14c9   :  { %v4879_v15 = vadd.f32 1.0, %v8413_v10 }
0x14ca   :  { %v8415_v42 = vpop.eup %8414 }
0x14cb   :  { %8416 = vrcp.f32 %v4879_v15  ;;  %v4886_v43 = vadd.f32 1.0, %v8415_v42  ;;  %v4900_v15 = vld [vmem:[#allocation2 + $0x18] sm:$0xc] }
0x14cd   :  { %8418 = vrcp.f32 %v4886_v43 }
0x14d8   :  { %v8417_v45 = vpop.eup %8416 }
0x14d9   :  { %v4889_v5 = vmul.f32 %v8417_v45, %v4870_v12 }
0x14da   :  { %v8419_v37 = vpop.eup %8418 }
0x14db   :  { %v4890_v40 = vadd.f32 %v4889_v5, %v4789_v11  ;;  %v4892_v13 = vsub.f32 1.0, %v8419_v37  ;;  %v4897_v27 = vmul.f32 %v8419_v37, %v4895_v24 }
0x14dd   :  { %8420 = vtanh.f32 %v4890_v40 }
0x14ea   :  { %v8421_v26 = vpop.eup %8420 }
0x14eb   :  { %v4893_v32 = vmul.f32 %v8421_v26, %v4892_v13  ;;  %v4901_v26 = vld [vmem:[#allocation2 + $0x20] sm:$0xc] }
0x14ed   :  { %v9880_v29 = vadd.f32 %v4897_v27, %v4893_v32 }
0x14ef   :  { %v4902_v44 = vpack.c.bf16 %v9880_v29, %v9880_v29 }
0x14f1   :  { %4936 = vmatmul.mubr.bf16.vlgmr.msra.gmra.mxu0 %v4902_v44  ;;  %7671 = vmatmul.mubr.bf16.vlgmr.msra.gmra.mxu1 %v4902_v44  ;;  %v5013_v44 = vrot.slane %v9880_v29, 6  ;;  %v9914_v29 = vld [vmem:[#allocation6 + $0x90] ss:$12 sps:$4 sm:$0xff]  }
0x14f2   :  { %5218 = vmatprep.mubr.bf16.mxu0 %v10313_v20  ;;  %7690 = vmatprep.mubr.msk.bf16.mxu1 %vm8580_vm0, %v10312_v1 }
0x14f3   :  { %5187 = vmatpush1.bf16.msra.mxu0 %v8149_v35  ;;  %7675 = vmatpush3.bf16.msra.mxu1 %v8152_v50 }
0x14f4   :  { %7676 = vmatprep.subr.bf16.mxu1 %v10312_v1  ;;  %5188 = vmatprep.subr.bf16.mxu0 %v8155_v54 }
0x14f7   :  { %5189 = vmatpush1.bf16.msra.mxu0 %v8153_v30  ;;  %7677 = vmatpush3.bf16.msra.mxu1 %v8156_v55 }
0x14f8   :  { %7678 = vmatprep.subr.bf16.mxu1 %v10312_v1  ;;  %5190 = vmatprep.subr.bf16.mxu0 %v8159_v57  ;;  %v9906_v57 = vld [vmem:[#allocation6 + $0xa8] ss:$12 sps:$4 sm:$0xff]  }
0x14fb   :  { %5191 = vmatpush1.bf16.msra.mxu0 %v8157_v60  ;;  %7679 = vmatpush3.bf16.msra.mxu1 %v8160_v3  ;;  %v9908_v60 = vld [vmem:[#allocation6 + $0xb0] ss:$12 sps:$4 sm:$0xff]  }
0x14fc   :  { %7680 = vmatprep.subr.bf16.mxu1 %v10312_v1  ;;  %5192 = vmatprep.subr.bf16.mxu0 %v8163_v22 }
0x14ff   :  { %5193 = vmatpush1.bf16.msra.mxu0 %v8161_v46  ;;  %7681 = vmatpush3.bf16.msra.mxu1 %v8164_v4  ;;  %v9910_v46 = vld [vmem:[#allocation6 + $0x94] ss:$12 sps:$4 sm:$0xff]   ;;  %v9916_v4 = vld [vmem:[#allocation6 + $0x98] ss:$12 sps:$4 sm:$0xff]  }
0x1500   :  { %5194 = vmatprep.subr.bf16.mxu0 %v8167_v18  ;;  %7682 = vmatprep.subr.bf16.mxu1 %v10312_v1  ;;  %v9920_v18 = vld [vmem:[#allocation6 + $0x7c] ss:$12 sps:$4 sm:$0xff]  }
0x1503   :  { %5195 = vmatpush1.bf16.msra.mxu0 %v8165_v58  ;;  %7683 = vmatpush3.bf16.msra.mxu1 %v8168_v9  ;;  %v9927_v58 = vld [vmem:[#allocation6 + $0x78] ss:$12 sps:$4 sm:$0xff]   ;;  %v9929_v9 = vld [vmem:[#allocation6 + $0x80] ss:$12 sps:$4 sm:$0xff]  }
0x1504   :  { %5196 = vmatprep.subr.bf16.mxu0 %v8171_v19  ;;  %7684 = vmatprep.subr.bf16.mxu1 %v10312_v1  ;;  %v9933_v19 = vld [vmem:[#allocation6 + $0x64] ss:$12 sps:$4 sm:$0xff]  }
0x1507   :  { %5197 = vmatpush1.bf16.msra.mxu0 %v8169_v14  ;;  %7685 = vmatpush3.bf16.msra.mxu1 %v8172_v49  ;;  %v9937_v14 = vld [vmem:[#allocation6 + $0x60] ss:$12 sps:$4 sm:$0xff]   ;;  %v9939_v49 = vld [vmem:[#allocation6 + $0x68] ss:$12 sps:$4 sm:$0xff]  }
0x1508   :  { %5198 = vmatprep.subr.bf16.mxu0 %v8175_v48  ;;  %7686 = vmatprep.subr.bf16.mxu1 %v10312_v1  ;;  %v9943_v48 = vld [vmem:[#allocation6 + $0x4c] ss:$12 sps:$4 sm:$0xff]  }
0x150b   :  { %5199 = vmatpush1.bf16.msra.mxu0 %v8173_v8  ;;  %7687 = vmatpush3.bf16.msra.mxu1 %v8176_v63  ;;  %v9947_v8 = vld [vmem:[#allocation6 + $0x48] ss:$12 sps:$4 sm:$0xff]   ;;  %v9949_v63 = vld [vmem:[#allocation6 + $0x50] ss:$12 sps:$4 sm:$0xff]  }
0x150c   :  { %5200 = vmatprep.subr.bf16.mxu0 %v8179_v61  ;;  %7688 = vmatprep.subr.bf16.mxu1 %v10312_v1  ;;  %v9953_v61 = vld [vmem:[#allocation6 + $0x34] ss:$12 sps:$4 sm:$0xff]  }
0x150f   :  { %5201 = vmatpush1.bf16.msra.mxu0 %v8177_v31  ;;  %7689 = vmatpush3.bf16.msra.mxu1 %v8180_v7  ;;  %v9957_v31 = vld [vmem:[#allocation6 + $0x30] ss:$12 sps:$4 sm:$0xff]   ;;  %v9959_v7 = vld [vmem:[#allocation6 + $0x38] ss:$12 sps:$4 sm:$0xff]  }
0x1510   :  { %5442 = vmatprep.subr.bf16.mxu0 %v9894_v2  ;;  %7694 = vmatprep.subr.bf16.mxu1 %v10312_v1 }
0x15b1   :  { %v4937_v16 = vpop.f32.mrf.mxu0  ;;  %v4978_v52 = vpop.f32.mrf.mxu1 }
0x15b2   :  { %v4938_v28 = vadd.f32 %v4937_v16, %v8786_v21  ;;  %v4979_v11 = vadd.f32 %v4978_v52, %v8792_v51  ;;  %v9963_v16 = vld [vmem:[#allocation6 + $0x1c] ss:$12 sps:$4 sm:$0xff]   ;;  %v9967_v52 = vld [vmem:[#allocation6 + $0x18] ss:$12 sps:$4 sm:$0xff]  }
0x15b3   :  { %v4939_v56 = vpop.f32.mrf.mxu0  ;;  %v7672_v0 = vpop.f32.mrf.mxu1 }
0x15b4   :  { %v4985_v59 = vrot.slane %v4938_v28, 6  ;;  %v4940_v62 = vadd.f32 %v4939_v56, %v8788_v23  ;;  %v5005_v37 = vrot.slane %v4979_v11, 6  ;;  %v9969_v28 = vld [vmem:[#allocation6 + $0x20] ss:$12 sps:$4 sm:$0xff]   ;;  %v9973_v56 = vld [vmem:[#allocation6 + $0x4] ss:$12 sps:$4 sm:$0xff]  }
0x15b5   :  { %v4941_v25 = vpop.f32.mrf.mxu0  ;;  %v4981_v47 = vpop.f32.mrf.mxu1  ;;  %v9977_v0 = vld [vmem:[#allocation6] ss:$12 sps:$4 sm:$0xff]  }
0x15b6   :  { %v4987_v38 = vadd.f32 %v4985_v59, %v4899_v53  ;;  %v4995_v10 = vrot.slane %v4940_v62, 6  ;;  %v9979_v59 = vld [vmem:[#allocation6 + $0x8] ss:$12 sps:$4 sm:$0xff]  }
0x15b7   :  { %v4942_v36 = vpop.f32.mrf.mxu0  ;;  %v7673_v34 = vpop.f32.mrf.mxu1 }
0x15b8   :  { %v6727_v39 = vmul.f32 -1.442695, %v4987_v38  ;;  %v4997_v42 = vadd.f32 %v4995_v10, %v4900_v15 }
0x15ba   :  { %8422 = vpow2.f32 %v6727_v39  ;;  %v6728_v43 = vmul.f32 -1.442695, %v4997_v42 }
0x15bc   :  { %8424 = vpow2.f32 %v6728_v43 }
0x15c7   :  { %v8423_v12 = vpop.eup %8422 }
0x15c8   :  { %v4991_v45 = vadd.f32 1.0, %v8423_v12 }
0x15c9   :  { %v8425_v5 = vpop.eup %8424 }
0x15ca   :  { %8426 = vrcp.f32 %v4991_v45  ;;  %v5001_v40 = vadd.f32 1.0, %v8425_v5 }
0x15cc   :  { %8428 = vrcp.f32 %v5001_v40  ;;  %v5279_v40 = vld [vmem:[#allocation2 + $0x28] sm:$0x3] }
0x15d7   :  { %v8427_v24 = vpop.eup %8426 }
0x15d8   :  { %v5007_v13 = vmul.f32 %v8427_v24, %v5005_v37 }
0x15d9   :  { %v8429_v27 = vpop.eup %8428 }
0x15da   :  { %v5008_v32 = vadd.f32 %v5007_v13, %v4901_v26  ;;  %v5010_v17 = vsub.f32 1.0, %v8429_v27  ;;  %v5015_v54 = vmul.f32 %v8429_v27, %v5013_v44 }
0x15dc   :  { %8430 = vtanh.f32 %v5008_v32 }
0x15e9   :  { %v8431_v35 = vpop.eup %8430 }
0x15ea   :  { %v5011_v50 = vmul.f32 %v8431_v35, %v5010_v17  ;;  %v5280_v17 = vld [vmem:[#allocation2 + $0x10] sm:$0x3] }
0x15ec   :  { %v9902_v30 = vadd.f32 %v5015_v54, %v5011_v50 }
0x15ee   :  { %v5017_v55 = vpack.c.bf16 %v9902_v30, %v9902_v30 }
0x15f0   :  { %v5021_v3 = vrot.slane %v5017_v55, 7  ;;  %v5056_v22 = vrot.slane %v5017_v55, 1 }
0x15f2   :  { %5023 = vst [vmem:[#allocation3 + $0x4] sm:$0x4] %v5021_v3  ;;  %5219 = vmatmul.mubr.bf16.vlgmr.msra.gmra.mxu0 %v5056_v22  ;;  %7691 = vmatmul.mubr.bf16.vlgmr.msra.gmra.mxu1 %v5056_v22 }
0x15f3   :  { %5443 = vmatpush1.bf16.msra.mxu0 %v9906_v57  ;;  %7695 = vmatpush3.bf16.msra.mxu1 %v9908_v60 }
0x15f4   :  { %5444 = vmatprep.subr.bf16.mxu0 %v9910_v46  ;;  %7696 = vmatprep.subr.bf16.mxu1 %v10312_v1 }
0x15f5   :  { %5474 = vmatprep.mubr.bf16.mxu0 %v10313_v20  ;;  %7710 = vmatprep.mubr.msk.bf16.mxu1 %vm8580_vm0, %v10312_v1 }
0x15f7   :  { %5445 = vmatpush1.bf16.msra.mxu0 %v9914_v29  ;;  %7697 = vmatpush3.bf16.msra.mxu1 %v9916_v4 }
0x15f8   :  { %5446 = vmatprep.subr.bf16.mxu0 %v9920_v18  ;;  %7698 = vmatprep.subr.bf16.mxu1 %v10312_v1 }
0x15fb   :  { %5447 = vmatpush1.bf16.msra.mxu0 %v9927_v58  ;;  %7699 = vmatpush3.bf16.msra.mxu1 %v9929_v9 }
0x15fc   :  { %5448 = vmatprep.subr.bf16.mxu0 %v9933_v19  ;;  %7700 = vmatprep.subr.bf16.mxu1 %v10312_v1 }
0x15ff   :  { %5449 = vmatpush1.bf16.msra.mxu0 %v9937_v14  ;;  %7701 = vmatpush3.bf16.msra.mxu1 %v9939_v49 }
0x1600   :  { %5450 = vmatprep.subr.bf16.mxu0 %v9943_v48  ;;  %7702 = vmatprep.subr.bf16.mxu1 %v10312_v1 }
0x1603   :  { %5451 = vmatpush1.bf16.msra.mxu0 %v9947_v8  ;;  %7703 = vmatpush3.bf16.msra.mxu1 %v9949_v63 }
0x1604   :  { %5452 = vmatprep.subr.bf16.mxu0 %v9953_v61  ;;  %7704 = vmatprep.subr.bf16.mxu1 %v10312_v1 }
0x1607   :  { %5453 = vmatpush1.bf16.msra.mxu0 %v9957_v31  ;;  %7705 = vmatpush3.bf16.msra.mxu1 %v9959_v7 }
0x1608   :  { %5454 = vmatprep.subr.bf16.mxu0 %v9963_v16  ;;  %7706 = vmatprep.subr.bf16.mxu1 %v10312_v1 }
0x160b   :  { %5455 = vmatpush1.bf16.msra.mxu0 %v9967_v52  ;;  %7707 = vmatpush3.bf16.msra.mxu1 %v9969_v28 }
0x160c   :  { %5456 = vmatprep.subr.bf16.mxu0 %v9973_v56  ;;  %7708 = vmatprep.subr.bf16.mxu1 %v10312_v1 }
0x160f   :  { %5457 = vmatpush1.bf16.msra.mxu0 %v9977_v0  ;;  %7709 = vmatpush3.bf16.msra.mxu1 %v9979_v59 }
0x1610   :  { %5551 = vmatprep.subr.bf16.mxu0 %v9894_v2  ;;  %7714 = vmatprep.subr.bf16.mxu1 %v10312_v1 }
0x1612   :  { %5475 = vmatmul.mubr.bf16.vlgmr.msra.gmra.mxu0 %v5056_v22  ;;  %7711 = vmatmul.mubr.bf16.vlgmr.msra.gmra.mxu1 %v5056_v22 }
0x1613   :  { %5552 = vmatpush1.bf16.msra.mxu0 %v9906_v57  ;;  %7715 = vmatpush3.bf16.msra.mxu1 %v9908_v60 }
0x1614   :  { %5553 = vmatprep.subr.bf16.mxu0 %v9910_v46  ;;  %7716 = vmatprep.subr.bf16.mxu1 %v10312_v1 }
0x1615   :  { %5583 = vmatprep.mubr.bf16.mxu0 %v10313_v20  ;;  %7730 = vmatprep.mubr.msk.bf16.mxu1 %vm8580_vm0, %v10312_v1 }
0x1617   :  { %5554 = vmatpush1.bf16.msra.mxu0 %v9914_v29  ;;  %7717 = vmatpush3.bf16.msra.mxu1 %v9916_v4 }
0x1618   :  { %5555 = vmatprep.subr.bf16.mxu0 %v9920_v18  ;;  %7718 = vmatprep.subr.bf16.mxu1 %v10312_v1 }
0x161b   :  { %5556 = vmatpush1.bf16.msra.mxu0 %v9927_v58  ;;  %7719 = vmatpush3.bf16.msra.mxu1 %v9929_v9 }
0x161c   :  { %5557 = vmatprep.subr.bf16.mxu0 %v9933_v19  ;;  %7720 = vmatprep.subr.bf16.mxu1 %v10312_v1 }
0x161f   :  { %5558 = vmatpush1.bf16.msra.mxu0 %v9937_v14  ;;  %7721 = vmatpush3.bf16.msra.mxu1 %v9939_v49 }
0x1620   :  { %5559 = vmatprep.subr.bf16.mxu0 %v9943_v48  ;;  %7722 = vmatprep.subr.bf16.mxu1 %v10312_v1 }
0x1623   :  { %5560 = vmatpush1.bf16.msra.mxu0 %v9947_v8  ;;  %7723 = vmatpush3.bf16.msra.mxu1 %v9949_v63 }
0x1624   :  { %5561 = vmatprep.subr.bf16.mxu0 %v9953_v61  ;;  %7724 = vmatprep.subr.bf16.mxu1 %v10312_v1 }
0x1627   :  { %5562 = vmatpush1.bf16.msra.mxu0 %v9957_v31  ;;  %7725 = vmatpush3.bf16.msra.mxu1 %v9959_v7 }
0x1628   :  { %5563 = vmatprep.subr.bf16.mxu0 %v9963_v16  ;;  %7726 = vmatprep.subr.bf16.mxu1 %v10312_v1 }
0x162b   :  { %5564 = vmatpush1.bf16.msra.mxu0 %v9967_v52  ;;  %7727 = vmatpush3.bf16.msra.mxu1 %v9969_v28 }
0x162c   :  { %5565 = vmatprep.subr.bf16.mxu0 %v9973_v56  ;;  %7728 = vmatprep.subr.bf16.mxu1 %v10312_v1 }
0x162f   :  { %5566 = vmatpush1.bf16.msra.mxu0 %v9977_v0  ;;  %7729 = vmatpush3.bf16.msra.mxu1 %v9979_v59 }
0x1630   :  { %5672 = vmatprep.subr.bf16.mxu0 %v9894_v2  ;;  %7734 = vmatprep.subr.bf16.mxu1 %v10312_v1 }
0x16b2   :  { %v5220_v62 = vpop.f32.mrf.mxu0  ;;  %v5261_v53 = vpop.f32.mrf.mxu1 }
0x16b3   :  { %v5221_v25 = vadd.f32 %v5220_v62, %v10314_v33  ;;  %v5262_v47 = vadd.f32 %v5261_v53, %v10315_v41 }
0x16b4   :  { %v5222_v38 = vpop.f32.mrf.mxu0  ;;  %v7692_v36 = vpop.f32.mrf.mxu1 }
0x16b5   :  { %v5270_v34 = vrot.slane %v5221_v25, 4  ;;  %v5272_v39 = vrot.slane %v5262_v47, 4  ;;  %v5223_v10 = vadd.f32 %v5222_v38, %v8776_v6  ;;  %v5281_v47 = vld [vmem:[#allocation2 + $0x8] sm:$0x3] }
0x16b6   :  { %v5224_v15 = vpop.f32.mrf.mxu0  ;;  %v5264_v42 = vpop.f32.mrf.mxu1 }
0x16b7   :  { %5276 = vst [vmem:[#allocation2] sm:$0x30] %v5270_v34  ;;  %5278 = vst [vmem:[#allocation2 + $0x20] sm:$0x30] %v5272_v39  ;;  %v5271_v43 = vrot.slane %v5223_v10, 4  ;;  %v5543_v34 = vrot.slane %v9902_v30, 2 }
0x16b8   :  { %v5225_v12 = vpop.f32.mrf.mxu0  ;;  %v7693_v45 = vpop.f32.mrf.mxu1 }
0x16b9   :  { %5277 = vst [vmem:[#allocation2 + $0x18] sm:$0x30] %v5271_v43 }
0x16d2   :  { %v5476_v5 = vpop.f32.mrf.mxu0  ;;  %v5517_v11 = vpop.f32.mrf.mxu1 }
0x16d3   :  { %v5477_v33 = vadd.f32 %v5476_v5, %v8786_v21  ;;  %v5518_v62 = vadd.f32 %v5517_v11, %v8792_v51 }
0x16d4   :  { %v5478_v41 = vpop.f32.mrf.mxu0  ;;  %v7712_v37 = vpop.f32.mrf.mxu1 }
0x16d5   :  { %v5523_v24 = vadd.f32 %v5477_v33, %v5279_v40  ;;  %v5479_v6 = vadd.f32 %v5478_v41, %v8788_v23  ;;  %v5547_v37 = vld [vmem:[#allocation2 + $0x28] sm:$0xc] }
0x16d6   :  { %v5480_v13 = vpop.f32.mrf.mxu0  ;;  %v5520_v26 = vpop.f32.mrf.mxu1 }
0x16d7   :  { %v6778_v32 = vmul.f32 -1.442695, %v5523_v24  ;;  %v5530_v35 = vadd.f32 %v5479_v6, %v5280_v17  ;;  %v5548_v17 = vld [vmem:[#allocation2 + $0x10] sm:$0xc] }
0x16d8   :  { %v5481_v27 = vpop.f32.mrf.mxu0  ;;  %v7713_v44 = vpop.f32.mrf.mxu1 }
0x16d9   :  { %8432 = vpow2.f32 %v6778_v32  ;;  %v6779_v50 = vmul.f32 -1.442695, %v5530_v35 }
0x16db   :  { %8434 = vpow2.f32 %v6779_v50 }
0x16e6   :  { %v8433_v54 = vpop.eup %8432 }
0x16e7   :  { %v5527_v55 = vadd.f32 1.0, %v8433_v54 }
0x16e8   :  { %v8435_v3 = vpop.eup %8434 }
0x16e9   :  { %8436 = vrcp.f32 %v5527_v55  ;;  %v5534_v22 = vadd.f32 1.0, %v8435_v3 }
0x16eb   :  { %8438 = vrcp.f32 %v5534_v22 }
0x16f6   :  { %v8437_v53 = vpop.eup %8436 }
0x16f7   :  { %v5537_v25 = vmul.f32 %v8437_v53, %v5518_v62 }
0x16f8   :  { %v8439_v36 = vpop.eup %8438 }
0x16f9   :  { %v5538_v38 = vadd.f32 %v5537_v25, %v5281_v47  ;;  %v5540_v39 = vsub.f32 1.0, %v8439_v36  ;;  %v5545_v42 = vmul.f32 %v8439_v36, %v5543_v34 }
0x16fb   :  { %8440 = vtanh.f32 %v5538_v38  ;;  %v5549_v38 = vld [vmem:[#allocation2 + $0x8] sm:$0xc] }
0x1708   :  { %v8441_v10 = vpop.eup %8440 }
0x1709   :  { %v5541_v15 = vmul.f32 %v8441_v10, %v5540_v39 }
0x170b   :  { %v10029_v43 = vadd.f32 %v5545_v42, %v5541_v15 }
0x170d   :  { %v5550_v12 = vpack.c.bf16 %v10029_v43, %v10029_v43  ;;  %v5661_v39 = vrot.slane %v10029_v43, 6 }
0x170f   :  { %5584 = vmatmul.mubr.bf16.vlgmr.msra.gmra.mxu0 %v5550_v12  ;;  %7731 = vmatmul.mubr.bf16.vlgmr.msra.gmra.mxu1 %v5550_v12 }
0x1710   :  { %5673 = vmatpush1.bf16.msra.mxu0 %v9906_v57  ;;  %7735 = vmatpush3.bf16.msra.mxu1 %v9908_v60 }
0x1711   :  { %5674 = vmatprep.subr.bf16.mxu0 %v9910_v46  ;;  %7736 = vmatprep.subr.bf16.mxu1 %v10312_v1 }
0x1712   :  { %5704 = vmatprep.mubr.bf16.mxu0 %v10313_v20  ;;  %7750 = vmatprep.mubr.msk.bf16.mxu1 %vm8580_vm0, %v10312_v1 }
0x1714   :  { %5675 = vmatpush1.bf16.msra.mxu0 %v9914_v29  ;;  %7737 = vmatpush3.bf16.msra.mxu1 %v9916_v4 }
0x1715   :  { %5676 = vmatprep.subr.bf16.mxu0 %v9920_v18  ;;  %7738 = vmatprep.subr.bf16.mxu1 %v10312_v1 }
0x1718   :  { %5677 = vmatpush1.bf16.msra.mxu0 %v9927_v58  ;;  %7739 = vmatpush3.bf16.msra.mxu1 %v9929_v9 }
0x1719   :  { %5678 = vmatprep.subr.bf16.mxu0 %v9933_v19  ;;  %7740 = vmatprep.subr.bf16.mxu1 %v10312_v1 }
0x171c   :  { %5679 = vmatpush1.bf16.msra.mxu0 %v9937_v14  ;;  %7741 = vmatpush3.bf16.msra.mxu1 %v9939_v49 }
0x171d   :  { %5680 = vmatprep.subr.bf16.mxu0 %v9943_v48  ;;  %7742 = vmatprep.subr.bf16.mxu1 %v10312_v1 }
0x1720   :  { %5681 = vmatpush1.bf16.msra.mxu0 %v9947_v8  ;;  %7743 = vmatpush3.bf16.msra.mxu1 %v9949_v63 }
0x1721   :  { %5682 = vmatprep.subr.bf16.mxu0 %v9953_v61  ;;  %7744 = vmatprep.subr.bf16.mxu1 %v10312_v1 }
0x1724   :  { %5683 = vmatpush1.bf16.msra.mxu0 %v9957_v31  ;;  %7745 = vmatpush3.bf16.msra.mxu1 %v9959_v7 }
0x1725   :  { %5684 = vmatprep.subr.bf16.mxu0 %v9963_v16  ;;  %7746 = vmatprep.subr.bf16.mxu1 %v10312_v1 }
0x1728   :  { %5685 = vmatpush1.bf16.msra.mxu0 %v9967_v52  ;;  %7747 = vmatpush3.bf16.msra.mxu1 %v9969_v28 }
0x1729   :  { %5686 = vmatprep.subr.bf16.mxu0 %v9973_v56  ;;  %7748 = vmatprep.subr.bf16.mxu1 %v10312_v1 }
0x172c   :  { %5687 = vmatpush1.bf16.msra.mxu0 %v9977_v0  ;;  %7749 = vmatpush3.bf16.msra.mxu1 %v9979_v59 }
0x172d   :  { %5793 = vmatprep.subr.bf16.mxu0 %v9894_v2  ;;  %7754 = vmatprep.subr.bf16.mxu1 %v10312_v1 }
0x17cf   :  { %v5585_v30 = vpop.f32.mrf.mxu0  ;;  %v5626_v45 = vpop.f32.mrf.mxu1 }
0x17d0   :  { %v5586_v5 = vadd.f32 %v5585_v30, %v8786_v21  ;;  %v5627_v22 = vadd.f32 %v5626_v45, %v8792_v51 }
0x17d1   :  { %v5587_v11 = vpop.f32.mrf.mxu0  ;;  %v7732_v33 = vpop.f32.mrf.mxu1 }
0x17d2   :  { %v5633_v40 = vrot.slane %v5586_v5, 6  ;;  %v5588_v41 = vadd.f32 %v5587_v11, %v8788_v23  ;;  %v5653_v53 = vrot.slane %v5627_v22, 6 }
0x17d3   :  { %v5589_v24 = vpop.f32.mrf.mxu0  ;;  %v5629_v13 = vpop.f32.mrf.mxu1 }
0x17d4   :  { %v5635_v26 = vadd.f32 %v5633_v40, %v5547_v37  ;;  %v5643_v44 = vrot.slane %v5588_v41, 6  ;;  %v5665_v13 = vld [vmem:[#allocation2 + $0x28] sm:$0x30] }
0x17d5   :  { %v5590_v32 = vpop.f32.mrf.mxu0  ;;  %v7733_v6 = vpop.f32.mrf.mxu1 }
0x17d6   :  { %v6780_v27 = vmul.f32 -1.442695, %v5635_v26  ;;  %v5645_v35 = vadd.f32 %v5643_v44, %v5548_v17 }
0x17d8   :  { %8442 = vpow2.f32 %v6780_v27  ;;  %v6781_v50 = vmul.f32 -1.442695, %v5645_v35 }
0x17da   :  { %8444 = vpow2.f32 %v6781_v50  ;;  %v5666_v50 = vld [vmem:[#allocation2 + $0x10] sm:$0x30] }
0x17e5   :  { %v8443_v54 = vpop.eup %8442 }
0x17e6   :  { %v5639_v55 = vadd.f32 1.0, %v8443_v54 }
0x17e7   :  { %v8445_v3 = vpop.eup %8444 }
0x17e8   :  { %8446 = vrcp.f32 %v5639_v55  ;;  %v5649_v62 = vadd.f32 1.0, %v8445_v3 }
0x17ea   :  { %8448 = vrcp.f32 %v5649_v62 }
0x17f5   :  { %v8447_v25 = vpop.eup %8446 }
0x17f6   :  { %v5655_v47 = vmul.f32 %v8447_v25, %v5653_v53 }
0x17f7   :  { %v8449_v34 = vpop.eup %8448 }
0x17f8   :  { %v5656_v36 = vadd.f32 %v5655_v47, %v5549_v38  ;;  %v5658_v10 = vsub.f32 1.0, %v8449_v34  ;;  %v5663_v12 = vmul.f32 %v8449_v34, %v5661_v39  ;;  %v5667_v34 = vld [vmem:[#allocation2 + $0x8] sm:$0x30] }
0x17fa   :  { %8450 = vtanh.f32 %v5656_v36 }
0x1807   :  { %v8451_v15 = vpop.eup %8450 }
0x1808   :  { %v5659_v42 = vmul.f32 %v8451_v15, %v5658_v10 }
0x180a   :  { %v10072_v30 = vadd.f32 %v5663_v12, %v5659_v42 }
0x180c   :  { %v5668_v45 = vpack.c.bf16 %v10072_v30, %v10072_v30  ;;  %v5782_v15 = vrot.slane %v10072_v30, 6 }
0x180e   :  { %v5670_v5 = vrot.slane %v5668_v45, 1 }
0x1810   :  { %5705 = vmatmul.mubr.bf16.vlgmr.msra.gmra.mxu0 %v5670_v5  ;;  %7751 = vmatmul.mubr.bf16.vlgmr.msra.gmra.mxu1 %v5670_v5 }
0x1811   :  { %5794 = vmatpush1.bf16.msra.mxu0 %v9906_v57  ;;  %7755 = vmatpush3.bf16.msra.mxu1 %v9908_v60 }
0x1812   :  { %5795 = vmatprep.subr.bf16.mxu0 %v9910_v46  ;;  %7756 = vmatprep.subr.bf16.mxu1 %v10312_v1 }
0x1813   :  { %5825 = vmatprep.mubr.bf16.mxu0 %v10313_v20  ;;  %7770 = vmatprep.mubr.msk.bf16.mxu1 %vm8580_vm0, %v10312_v1 }
0x1815   :  { %5796 = vmatpush1.bf16.msra.mxu0 %v9914_v29  ;;  %7757 = vmatpush3.bf16.msra.mxu1 %v9916_v4 }
0x1816   :  { %5797 = vmatprep.subr.bf16.mxu0 %v9920_v18  ;;  %7758 = vmatprep.subr.bf16.mxu1 %v10312_v1 }
0x1819   :  { %5798 = vmatpush1.bf16.msra.mxu0 %v9927_v58  ;;  %7759 = vmatpush3.bf16.msra.mxu1 %v9929_v9 }
0x181a   :  { %5799 = vmatprep.subr.bf16.mxu0 %v9933_v19  ;;  %7760 = vmatprep.subr.bf16.mxu1 %v10312_v1 }
0x181d   :  { %5800 = vmatpush1.bf16.msra.mxu0 %v9937_v14  ;;  %7761 = vmatpush3.bf16.msra.mxu1 %v9939_v49 }
0x181e   :  { %5801 = vmatprep.subr.bf16.mxu0 %v9943_v48  ;;  %7762 = vmatprep.subr.bf16.mxu1 %v10312_v1 }
0x1821   :  { %5802 = vmatpush1.bf16.msra.mxu0 %v9947_v8  ;;  %7763 = vmatpush3.bf16.msra.mxu1 %v9949_v63 }
0x1822   :  { %5803 = vmatprep.subr.bf16.mxu0 %v9953_v61  ;;  %7764 = vmatprep.subr.bf16.mxu1 %v10312_v1 }
0x1825   :  { %5804 = vmatpush1.bf16.msra.mxu0 %v9957_v31  ;;  %7765 = vmatpush3.bf16.msra.mxu1 %v9959_v7 }
0x1826   :  { %5805 = vmatprep.subr.bf16.mxu0 %v9963_v16  ;;  %7766 = vmatprep.subr.bf16.mxu1 %v10312_v1 }
0x1829   :  { %5806 = vmatpush1.bf16.msra.mxu0 %v9967_v52  ;;  %7767 = vmatpush3.bf16.msra.mxu1 %v9969_v28 }
0x182a   :  { %5807 = vmatprep.subr.bf16.mxu0 %v9973_v56  ;;  %7768 = vmatprep.subr.bf16.mxu1 %v10312_v1 }
0x182d   :  { %5808 = vmatpush1.bf16.msra.mxu0 %v9977_v0  ;;  %7769 = vmatpush3.bf16.msra.mxu1 %v9979_v59 }
0x182e   :  { %5914 = vmatprep.subr.bf16.mxu0 %v9894_v2  ;;  %7774 = vmatprep.subr.bf16.mxu1 %v10312_v1 }
0x18d0   :  { %v5706_v43 = vpop.f32.mrf.mxu0  ;;  %v5747_v11 = vpop.f32.mrf.mxu1 }
0x18d1   :  { %v5707_v33 = vadd.f32 %v5706_v43, %v8786_v21  ;;  %v5748_v53 = vadd.f32 %v5747_v11, %v8792_v51 }
0x18d2   :  { %v5708_v40 = vpop.f32.mrf.mxu0  ;;  %v7752_v41 = vpop.f32.mrf.mxu1 }
0x18d3   :  { %v5754_v37 = vrot.slane %v5707_v33, 4  ;;  %v5709_v24 = vadd.f32 %v5708_v40, %v8788_v23  ;;  %v5774_v47 = vrot.slane %v5748_v53, 4 }
0x18d4   :  { %v5710_v26 = vpop.f32.mrf.mxu0  ;;  %v5750_v32 = vpop.f32.mrf.mxu1 }
0x18d5   :  { %v5756_v6 = vadd.f32 %v5754_v37, %v5665_v13  ;;  %v5764_v35 = vrot.slane %v5709_v24, 4  ;;  %v5786_v32 = vld [vmem:[#allocation2 + $0x28] sm:$0xc0] }
0x18d6   :  { %v5711_v27 = vpop.f32.mrf.mxu0  ;;  %v7753_v44 = vpop.f32.mrf.mxu1 }
0x18d7   :  { %v6782_v17 = vmul.f32 -1.442695, %v5756_v6  ;;  %v5766_v54 = vadd.f32 %v5764_v35, %v5666_v50 }
0x18d9   :  { %8452 = vpow2.f32 %v6782_v17  ;;  %v6783_v55 = vmul.f32 -1.442695, %v5766_v54 }
0x18db   :  { %8454 = vpow2.f32 %v6783_v55  ;;  %v5787_v55 = vld [vmem:[#allocation2 + $0x10] sm:$0xc0] }
0x18e6   :  { %v8453_v3 = vpop.eup %8452 }
0x18e7   :  { %v5760_v22 = vadd.f32 1.0, %v8453_v3 }
0x18e8   :  { %v8455_v62 = vpop.eup %8454 }
0x18e9   :  { %8456 = vrcp.f32 %v5760_v22  ;;  %v5770_v25 = vadd.f32 1.0, %v8455_v62 }
0x18eb   :  { %8458 = vrcp.f32 %v5770_v25 }
0x18f6   :  { %v8457_v38 = vpop.eup %8456 }
0x18f7   :  { %v5776_v36 = vmul.f32 %v8457_v38, %v5774_v47 }
0x18f8   :  { %v8459_v10 = vpop.eup %8458 }
0x18f9   :  { %v5777_v39 = vadd.f32 %v5776_v36, %v5667_v34  ;;  %v5779_v42 = vsub.f32 1.0, %v8459_v10  ;;  %v5784_v5 = vmul.f32 %v8459_v10, %v5782_v15  ;;  %v5788_v10 = vld [vmem:[#allocation2 + $0x8] sm:$0xc0] }
0x18fb   :  { %8460 = vtanh.f32 %v5777_v39 }
0x1908   :  { %v8461_v12 = vpop.eup %8460 }
0x1909   :  { %v5780_v45 = vmul.f32 %v8461_v12, %v5779_v42 }
0x190b   :  { %v10115_v43 = vadd.f32 %v5784_v5, %v5780_v45 }
0x190d   :  { %v5789_v11 = vpack.c.bf16 %v10115_v43, %v10115_v43  ;;  %v5903_v12 = vrot.slane %v10115_v43, 6 }
0x190f   :  { %v5791_v33 = vrot.slane %v5789_v11, 2 }
0x1911   :  { %5826 = vmatmul.mubr.bf16.vlgmr.msra.gmra.mxu0 %v5791_v33  ;;  %7771 = vmatmul.mubr.bf16.vlgmr.msra.gmra.mxu1 %v5791_v33 }
0x1912   :  { %5915 = vmatpush1.bf16.msra.mxu0 %v9906_v57  ;;  %7775 = vmatpush3.bf16.msra.mxu1 %v9908_v60 }
0x1913   :  { %5916 = vmatprep.subr.bf16.mxu0 %v9910_v46  ;;  %7776 = vmatprep.subr.bf16.mxu1 %v10312_v1 }
0x1914   :  { %5946 = vmatprep.mubr.bf16.mxu0 %v10313_v20  ;;  %7790 = vmatprep.mubr.msk.bf16.mxu1 %vm8580_vm0, %v10312_v1 }
0x1916   :  { %5917 = vmatpush1.bf16.msra.mxu0 %v9914_v29  ;;  %7777 = vmatpush3.bf16.msra.mxu1 %v9916_v4 }
0x1917   :  { %5918 = vmatprep.subr.bf16.mxu0 %v9920_v18  ;;  %7778 = vmatprep.subr.bf16.mxu1 %v10312_v1 }
0x191a   :  { %5919 = vmatpush1.bf16.msra.mxu0 %v9927_v58  ;;  %7779 = vmatpush3.bf16.msra.mxu1 %v9929_v9 }
0x191b   :  { %5920 = vmatprep.subr.bf16.mxu0 %v9933_v19  ;;  %7780 = vmatprep.subr.bf16.mxu1 %v10312_v1 }
0x191e   :  { %5921 = vmatpush1.bf16.msra.mxu0 %v9937_v14  ;;  %7781 = vmatpush3.bf16.msra.mxu1 %v9939_v49 }
0x191f   :  { %5922 = vmatprep.subr.bf16.mxu0 %v9943_v48  ;;  %7782 = vmatprep.subr.bf16.mxu1 %v10312_v1 }
0x1922   :  { %5923 = vmatpush1.bf16.msra.mxu0 %v9947_v8  ;;  %7783 = vmatpush3.bf16.msra.mxu1 %v9949_v63 }
0x1923   :  { %5924 = vmatprep.subr.bf16.mxu0 %v9953_v61  ;;  %7784 = vmatprep.subr.bf16.mxu1 %v10312_v1 }
0x1926   :  { %5925 = vmatpush1.bf16.msra.mxu0 %v9957_v31  ;;  %7785 = vmatpush3.bf16.msra.mxu1 %v9959_v7 }
0x1927   :  { %5926 = vmatprep.subr.bf16.mxu0 %v9963_v16  ;;  %7786 = vmatprep.subr.bf16.mxu1 %v10312_v1 }
0x192a   :  { %5927 = vmatpush1.bf16.msra.mxu0 %v9967_v52  ;;  %7787 = vmatpush3.bf16.msra.mxu1 %v9969_v28 }
0x192b   :  { %5928 = vmatprep.subr.bf16.mxu0 %v9973_v56  ;;  %7788 = vmatprep.subr.bf16.mxu1 %v10312_v1 }
0x192e   :  { %5929 = vmatpush1.bf16.msra.mxu0 %v9977_v0  ;;  %7789 = vmatpush3.bf16.msra.mxu1 %v9979_v59 }
0x192f   :  { %6023 = vmatprep.subr.bf16.mxu0 %v9894_v2  ;;  %7794 = vmatprep.subr.bf16.mxu1 %v10312_v1 }
0x19d1   :  { %v5827_v30 = vpop.f32.mrf.mxu0  ;;  %v5868_v40 = vpop.f32.mrf.mxu1 }
0x19d2   :  { %v5828_v41 = vadd.f32 %v5827_v30, %v8786_v21  ;;  %v5869_v47 = vadd.f32 %v5868_v40, %v8792_v51 }
0x19d3   :  { %v5829_v37 = vpop.f32.mrf.mxu0  ;;  %v7772_v24 = vpop.f32.mrf.mxu1 }
0x19d4   :  { %v5875_v13 = vrot.slane %v5828_v41, 2  ;;  %v5830_v26 = vadd.f32 %v5829_v37, %v8788_v23  ;;  %v5895_v36 = vrot.slane %v5869_v47, 2 }
0x19d5   :  { %v5831_v6 = vpop.f32.mrf.mxu0  ;;  %v5871_v27 = vpop.f32.mrf.mxu1 }
0x19d6   :  { %v5877_v44 = vadd.f32 %v5875_v13, %v5786_v32  ;;  %v5885_v54 = vrot.slane %v5830_v26, 2  ;;  %v5907_v13 = vld [vmem:[#allocation2] sm:$0x3] }
0x19d7   :  { %v5832_v17 = vpop.f32.mrf.mxu0  ;;  %v7773_v35 = vpop.f32.mrf.mxu1 }
0x19d8   :  { %v6784_v50 = vmul.f32 -1.442695, %v5877_v44  ;;  %v5887_v3 = vadd.f32 %v5885_v54, %v5787_v55  ;;  %v5908_v55 = vld [vmem:[#allocation2 + $0x18] sm:$0x3] }
0x19da   :  { %8462 = vpow2.f32 %v6784_v50  ;;  %v6785_v22 = vmul.f32 -1.442695, %v5887_v3 }
0x19dc   :  { %8464 = vpow2.f32 %v6785_v22 }
0x19e7   :  { %v8463_v62 = vpop.eup %8462 }
0x19e8   :  { %v5881_v53 = vadd.f32 1.0, %v8463_v62 }
0x19e9   :  { %v8465_v25 = vpop.eup %8464 }
0x19ea   :  { %8466 = vrcp.f32 %v5881_v53  ;;  %v5891_v38 = vadd.f32 1.0, %v8465_v25 }
0x19ec   :  { %8468 = vrcp.f32 %v5891_v38 }
0x19f7   :  { %v8467_v34 = vpop.eup %8466 }
0x19f8   :  { %v5897_v39 = vmul.f32 %v8467_v34, %v5895_v36  ;;  %v5909_v34 = vld [vmem:[#allocation2 + $0x20] sm:$0x3] }
0x19f9   :  { %v8469_v42 = vpop.eup %8468 }
0x19fa   :  { %v5898_v15 = vadd.f32 %v5897_v39, %v5788_v10  ;;  %v5900_v45 = vsub.f32 1.0, %v8469_v42  ;;  %v5905_v33 = vmul.f32 %v8469_v42, %v5903_v12 }
0x19fc   :  { %8470 = vtanh.f32 %v5898_v15 }
0x1a09   :  { %v8471_v5 = vpop.eup %8470 }
0x1a0a   :  { %v5901_v11 = vmul.f32 %v8471_v5, %v5900_v45 }
0x1a0c   :  { %v10158_v30 = vadd.f32 %v5905_v33, %v5901_v11 }
0x1a0e   :  { %v5910_v40 = vpack.c.bf16 %v10158_v30, %v10158_v30  ;;  %v6015_v15 = vrot.slane %v10158_v30, 6 }
0x1a10   :  { %v5912_v41 = vrot.slane %v5910_v40, 3 }
0x1a12   :  { %5947 = vmatmul.mubr.bf16.vlgmr.msra.gmra.mxu0 %v5912_v41  ;;  %7791 = vmatmul.mubr.bf16.vlgmr.msra.gmra.mxu1 %v5912_v41  ;;  %v6021_v41 = vld [vmem:[#allocation2 + $0x20] sm:$0xc] }
0x1a13   :  { %6024 = vmatpush1.bf16.msra.mxu0 %v9906_v57  ;;  %7795 = vmatpush3.bf16.msra.mxu1 %v9908_v60 }
0x1a14   :  { %6025 = vmatprep.subr.bf16.mxu0 %v9910_v46  ;;  %7796 = vmatprep.subr.bf16.mxu1 %v10312_v1 }
0x1a15   :  { %6055 = vmatprep.mubr.bf16.mxu0 %v10313_v20  ;;  %7810 = vmatprep.mubr.msk.bf16.mxu1 %vm8580_vm0, %v10312_v1 }
0x1a17   :  { %6026 = vmatpush1.bf16.msra.mxu0 %v9914_v29  ;;  %7797 = vmatpush3.bf16.msra.mxu1 %v9916_v4 }
0x1a18   :  { %6027 = vmatprep.subr.bf16.mxu0 %v9920_v18  ;;  %7798 = vmatprep.subr.bf16.mxu1 %v10312_v1 }
0x1a1b   :  { %6028 = vmatpush1.bf16.msra.mxu0 %v9927_v58  ;;  %7799 = vmatpush3.bf16.msra.mxu1 %v9929_v9 }
0x1a1c   :  { %6029 = vmatprep.subr.bf16.mxu0 %v9933_v19  ;;  %7800 = vmatprep.subr.bf16.mxu1 %v10312_v1 }
0x1a1f   :  { %6030 = vmatpush1.bf16.msra.mxu0 %v9937_v14  ;;  %7801 = vmatpush3.bf16.msra.mxu1 %v9939_v49 }
0x1a20   :  { %6031 = vmatprep.subr.bf16.mxu0 %v9943_v48  ;;  %7802 = vmatprep.subr.bf16.mxu1 %v10312_v1 }
0x1a23   :  { %6032 = vmatpush1.bf16.msra.mxu0 %v9947_v8  ;;  %7803 = vmatpush3.bf16.msra.mxu1 %v9949_v63 }
0x1a24   :  { %6033 = vmatprep.subr.bf16.mxu0 %v9953_v61  ;;  %7804 = vmatprep.subr.bf16.mxu1 %v10312_v1 }
0x1a27   :  { %6034 = vmatpush1.bf16.msra.mxu0 %v9957_v31  ;;  %7805 = vmatpush3.bf16.msra.mxu1 %v9959_v7 }
0x1a28   :  { %6035 = vmatprep.subr.bf16.mxu0 %v9963_v16  ;;  %7806 = vmatprep.subr.bf16.mxu1 %v10312_v1 }
0x1a2b   :  { %6036 = vmatpush1.bf16.msra.mxu0 %v9967_v52  ;;  %7807 = vmatpush3.bf16.msra.mxu1 %v9969_v28 }
0x1a2c   :  { %6037 = vmatprep.subr.bf16.mxu0 %v9973_v56  ;;  %7808 = vmatprep.subr.bf16.mxu1 %v10312_v1 }
0x1a2f   :  { %6038 = vmatpush1.bf16.msra.mxu0 %v9977_v0  ;;  %7809 = vmatpush3.bf16.msra.mxu1 %v9979_v59 }
0x1a30   :  { %6144 = vmatprep.subr.bf16.mxu0 %v9894_v2  ;;  %7814 = vmatprep.subr.bf16.mxu1 %v10312_v1 }
0x1ad2   :  { %v5948_v43 = vpop.f32.mrf.mxu0  ;;  %v5989_v37 = vpop.f32.mrf.mxu1 }
0x1ad3   :  { %v5949_v24 = vadd.f32 %v5948_v43, %v8786_v21  ;;  %v5990_v47 = vadd.f32 %v5989_v37, %v8792_v51 }
0x1ad4   :  { %v5950_v26 = vpop.f32.mrf.mxu0  ;;  %v7792_v32 = vpop.f32.mrf.mxu1 }
0x1ad5   :  { %v5995_v6 = vadd.f32 %v5949_v24, %v5907_v13  ;;  %v5951_v35 = vadd.f32 %v5950_v26, %v8788_v23 }
0x1ad6   :  { %v5952_v27 = vpop.f32.mrf.mxu0  ;;  %v5992_v44 = vpop.f32.mrf.mxu1 }
0x1ad7   :  { %v6786_v17 = vmul.f32 -1.442695, %v5995_v6  ;;  %v6002_v2 = vadd.f32 %v5951_v35, %v5908_v55  ;;  %v8213_v35 = vld [vmem:[%s10299_s6 + $0x38] sm:$0xff]   ;;  %v8216_v55 = vld [vmem:[%s10299_s6 + $0x20] sm:$0xff]  }
0x1ad8   :  { %v5953_v50 = vpop.f32.mrf.mxu0  ;;  %v7793_v54 = vpop.f32.mrf.mxu1 }
0x1ad9   :  { %8472 = vpow2.f32 %v6786_v17  ;;  %v6787_v3 = vmul.f32 -1.442695, %v6002_v2  ;;  %v8214_v50 = vld [vmem:[%s10299_s6 + $0x30] sm:$0xff]   ;;  %v8215_v54 = vld [vmem:[%s10299_s6 + $0x28] sm:$0xff]   ;;  %v8217_v2 = vld [vmem:[%s10299_s6 + $0x18] sm:$0xff]  }
0x1adb   :  { %8474 = vpow2.f32 %v6787_v3  ;;  %v8218_v3 = vld [vmem:[%s10299_s6 + $0x10] sm:$0xff]  }
0x1ae6   :  { %v8473_v22 = vpop.eup %8472 }
0x1ae7   :  { %v5999_v62 = vadd.f32 1.0, %v8473_v22  ;;  %v8219_v22 = vld [vmem:[%s10299_s6 + $0x8] sm:$0xff]  }
0x1ae8   :  { %v8475_v53 = vpop.eup %8474 }
0x1ae9   :  { %8476 = vrcp.f32 %v5999_v62  ;;  %v6006_v25 = vadd.f32 1.0, %v8475_v53  ;;  %v8220_v62 = vld [vmem:[%s10299_s6] sm:$0xff]  }
0x1aeb   :  { %8478 = vrcp.f32 %v6006_v25 }
0x1af6   :  { %v8477_v38 = vpop.eup %8476 }
0x1af7   :  { %v6009_v36 = vmul.f32 %v8477_v38, %v5990_v47 }
0x1af8   :  { %v8479_v10 = vpop.eup %8478 }
0x1af9   :  { %v6010_v39 = vadd.f32 %v6009_v36, %v5909_v34  ;;  %v6012_v42 = vsub.f32 1.0, %v8479_v10  ;;  %v6017_v5 = vmul.f32 %v8479_v10, %v6015_v15  ;;  %v6137_v10 = vld [vmem:[#allocation2] sm:$0x30] }
0x1afb   :  { %8480 = vtanh.f32 %v6010_v39 }
0x1b08   :  { %v8481_v12 = vpop.eup %8480 }
0x1b09   :  { %v6013_v45 = vmul.f32 %v8481_v12, %v6012_v42 }
0x1b0b   :  { %v10201_v11 = vadd.f32 %v6017_v5, %v6013_v45 }
0x1b0d   :  { %v6022_v33 = vpack.c.bf16 %v10201_v11, %v10201_v11  ;;  %v6133_v24 = vrot.slane %v10201_v11, 6 }
0x1b0f   :  { %6056 = vmatmul.mubr.bf16.vlgmr.msra.gmra.mxu0 %v6022_v33  ;;  %7811 = vmatmul.mubr.bf16.vlgmr.msra.gmra.mxu1 %v6022_v33 }
0x1b10   :  { %6145 = vmatpush1.bf16.msra.mxu0 %v9906_v57  ;;  %7815 = vmatpush3.bf16.msra.mxu1 %v9908_v60 }
0x1b11   :  { %6146 = vmatprep.subr.bf16.mxu0 %v9910_v46  ;;  %7816 = vmatprep.subr.bf16.mxu1 %v10312_v1 }
0x1b12   :  { %6176 = vmatprep.mubr.bf16.mxu0 %v10313_v20  ;;  %7830 = vmatprep.mubr.msk.bf16.mxu1 %vm8580_vm0, %v10312_v1 }
0x1b14   :  { %6147 = vmatpush1.bf16.msra.mxu0 %v9914_v29  ;;  %7817 = vmatpush3.bf16.msra.mxu1 %v9916_v4 }
0x1b15   :  { %6148 = vmatprep.subr.bf16.mxu0 %v9920_v18  ;;  %7818 = vmatprep.subr.bf16.mxu1 %v10312_v1 }
0x1b18   :  { %6149 = vmatpush1.bf16.msra.mxu0 %v9927_v58  ;;  %7819 = vmatpush3.bf16.msra.mxu1 %v9929_v9  ;;  %v6019_v58 = vld [vmem:[#allocation2] sm:$0xc] }
0x1b19   :  { %6150 = vmatprep.subr.bf16.mxu0 %v9933_v19  ;;  %7820 = vmatprep.subr.bf16.mxu1 %v10312_v1 }
0x1b1c   :  { %6151 = vmatpush1.bf16.msra.mxu0 %v9937_v14  ;;  %7821 = vmatpush3.bf16.msra.mxu1 %v9939_v49 }
0x1b1d   :  { %6152 = vmatprep.subr.bf16.mxu0 %v9943_v48  ;;  %7822 = vmatprep.subr.bf16.mxu1 %v10312_v1 }
0x1b20   :  { %6153 = vmatpush1.bf16.msra.mxu0 %v9947_v8  ;;  %7823 = vmatpush3.bf16.msra.mxu1 %v9949_v63 }
0x1b21   :  { %6154 = vmatprep.subr.bf16.mxu0 %v9953_v61  ;;  %7824 = vmatprep.subr.bf16.mxu1 %v10312_v1  ;;  %v6020_v61 = vld [vmem:[#allocation2 + $0x18] sm:$0xc] }
0x1b24   :  { %6155 = vmatpush1.bf16.msra.mxu0 %v9957_v31  ;;  %7825 = vmatpush3.bf16.msra.mxu1 %v9959_v7 }
0x1b25   :  { %6156 = vmatprep.subr.bf16.mxu0 %v9963_v16  ;;  %7826 = vmatprep.subr.bf16.mxu1 %v10312_v1 }
0x1b28   :  { %6157 = vmatpush1.bf16.msra.mxu0 %v9967_v52  ;;  %7827 = vmatpush3.bf16.msra.mxu1 %v9969_v28 }
0x1b29   :  { %6158 = vmatprep.subr.bf16.mxu0 %v9973_v56  ;;  %7828 = vmatprep.subr.bf16.mxu1 %v10312_v1 }
0x1b2c   :  { %6159 = vmatpush1.bf16.msra.mxu0 %v9977_v0  ;;  %7829 = vmatpush3.bf16.msra.mxu1 %v9979_v59 }
0x1b2d   :  { %7834 = vmatprep.subr.bf16.mxu0 %v10312_v1 }
0x1bcf   :  { %v6057_v20 = vpop.f32.mrf.mxu0  ;;  %v6098_v57 = vpop.f32.mrf.mxu1 }
0x1bd0   :  { %v6058_v60 = vadd.f32 %v6057_v20, %v8786_v21  ;;  %v6099_v56 = vadd.f32 %v6098_v57, %v8792_v51 }
0x1bd1   :  { %v6059_v46 = vpop.f32.mrf.mxu0  ;;  %v7812_v29 = vpop.f32.mrf.mxu1 }
0x1bd2   :  { %v6105_v4 = vrot.slane %v6058_v60, 6  ;;  %v6060_v18 = vadd.f32 %v6059_v46, %v8788_v23  ;;  %v6125_v59 = vrot.slane %v6099_v56, 6 }
0x1bd3   :  { %v6061_v9 = vpop.f32.mrf.mxu0  ;;  %v6101_v19 = vpop.f32.mrf.mxu1 }
0x1bd4   :  { %v6107_v14 = vadd.f32 %v6105_v4, %v6019_v58  ;;  %v6115_v63 = vrot.slane %v6060_v18, 6  ;;  %v6139_v9 = vld [vmem:[#allocation2 + $0x20] sm:$0x30] }
0x1bd5   :  { %v6062_v49 = vpop.f32.mrf.mxu0  ;;  %v7813_v48 = vpop.f32.mrf.mxu1 }
0x1bd6   :  { %v6788_v8 = vmul.f32 -1.442695, %v6107_v14  ;;  %v6117_v31 = vadd.f32 %v6115_v63, %v6020_v61 }
0x1bd8   :  { %8482 = vpow2.f32 %v6788_v8  ;;  %v6789_v7 = vmul.f32 -1.442695, %v6117_v31 }
0x1bda   :  { %8484 = vpow2.f32 %v6789_v7 }
0x1be5   :  { %v8483_v16 = vpop.eup %8482 }
0x1be6   :  { %v6111_v52 = vadd.f32 1.0, %v8483_v16 }
0x1be7   :  { %v8485_v28 = vpop.eup %8484 }
0x1be8   :  { %8486 = vrcp.f32 %v6111_v52  ;;  %v6121_v0 = vadd.f32 1.0, %v8485_v28  ;;  %v6793_v52 = vld [vmem:[%s10300_s7] ss:$0 sm:$0xff] }
0x1bea   :  { %8488 = vrcp.f32 %v6121_v0 }
0x1bf5   :  { %v8487_v30 = vpop.eup %8486 }
0x1bf6   :  { %v6127_v40 = vmul.f32 %v8487_v30, %v6125_v59 }
0x1bf7   :  { %v8489_v37 = vpop.eup %8488 }
0x1bf8   :  { %v6128_v43 = vadd.f32 %v6127_v40, %v6021_v41  ;;  %v6130_v13 = vsub.f32 1.0, %v8489_v37  ;;  %v6135_v6 = vmul.f32 %v8489_v37, %v6133_v24 }
0x1bfa   :  { %8490 = vtanh.f32 %v6128_v43 }
0x1c07   :  { %v8491_v26 = vpop.eup %8490 }
0x1c08   :  { %v6131_v32 = vmul.f32 %v8491_v26, %v6130_v13 }
0x1c0a   :  { %v10243_v27 = vadd.f32 %v6135_v6, %v6131_v32 }
0x1c0c   :  { %v6140_v44 = vpack.c.bf16 %v10243_v27, %v10243_v27  ;;  %v6254_v49 = vrot.slane %v10243_v27, 6 }
0x1c0e   :  { %v6142_v17 = vrot.slane %v6140_v44, 1 }
0x1c10   :  { %6177 = vmatmul.mubr.bf16.vlgmr.msra.gmra.mxu0 %v6142_v17  ;;  %7831 = vmatmul.mubr.bf16.vlgmr.msra.gmra.mxu1 %v6142_v17 }
0x1c11   :  { %7850 = vmatprep.mubr.msk.bf16.mxu0 %vm8580_vm0, %v10312_v1  ;;  %7835 = vmatpush3.bf16.msra.mxu0 %v8213_v35 }
0x1c12   :  { %7836 = vmatprep.subr.bf16.mxu0 %v10312_v1 }
0x1c15   :  { %7837 = vmatpush3.bf16.msra.mxu0 %v8214_v50 }
0x1c16   :  { %7838 = vmatprep.subr.bf16.mxu0 %v10312_v1 }
0x1c19   :  { %7839 = vmatpush3.bf16.msra.mxu0 %v8215_v54 }
0x1c1a   :  { %7840 = vmatprep.subr.bf16.mxu0 %v10312_v1 }
0x1c1d   :  { %7841 = vmatpush3.bf16.msra.mxu0 %v8216_v55 }
0x1c1e   :  { %7842 = vmatprep.subr.bf16.mxu0 %v10312_v1 }
0x1c21   :  { %7843 = vmatpush3.bf16.msra.mxu0 %v8217_v2 }
0x1c22   :  { %7844 = vmatprep.subr.bf16.mxu0 %v10312_v1 }
0x1c25   :  { %7845 = vmatpush3.bf16.msra.mxu0 %v8218_v3 }
0x1c26   :  { %7846 = vmatprep.subr.bf16.mxu0 %v10312_v1 }
0x1c29   :  { %7847 = vmatpush3.bf16.msra.mxu0 %v8219_v22 }
0x1c2a   :  { %7848 = vmatprep.subr.bf16.mxu0 %v10312_v1  ;;  %v6138_v1 = vld [vmem:[#allocation2 + $0x18] sm:$0x30] }
0x1c2d   :  { %7849 = vmatpush3.bf16.msra.mxu0 %v8220_v62 }
0x1cd0   :  { %v6178_v53 = vpop.f32.mrf.mxu0  ;;  %v6219_v25 = vpop.f32.mrf.mxu1 }
0x1cd1   :  { %v6179_v47 = vadd.f32 %v6178_v53, %v8786_v21  ;;  %v6220_v29 = vadd.f32 %v6219_v25, %v8792_v51 }
0x1cd2   :  { %v6180_v38 = vpop.f32.mrf.mxu0  ;;  %v7832_v36 = vpop.f32.mrf.mxu1 }
0x1cd3   :  { %v6226_v34 = vrot.slane %v6179_v47, 4  ;;  %v6181_v39 = vadd.f32 %v6180_v38, %v8788_v23  ;;  %v6246_v4 = vrot.slane %v6220_v29, 4 }
0x1cd4   :  { %v6182_v15 = vpop.f32.mrf.mxu0  ;;  %v6222_v42 = vpop.f32.mrf.mxu1 }
0x1cd5   :  { %v6228_v12 = vadd.f32 %v6226_v34, %v6137_v10  ;;  %v6236_v33 = vrot.slane %v6181_v39, 4 }
0x1cd6   :  { %v6183_v45 = vpop.f32.mrf.mxu0  ;;  %v7833_v5 = vpop.f32.mrf.mxu1 }
0x1cd7   :  { %v6790_v11 = vmul.f32 -1.442695, %v6228_v12  ;;  %v6238_v20 = vadd.f32 %v6236_v33, %v6138_v1 }
0x1cd9   :  { %8492 = vpow2.f32 %v6790_v11  ;;  %v6791_v57 = vmul.f32 -1.442695, %v6238_v20 }
0x1cdb   :  { %8494 = vpow2.f32 %v6791_v57 }
0x1ce6   :  { %v8493_v60 = vpop.eup %8492 }
0x1ce7   :  { %v6232_v21 = vadd.f32 1.0, %v8493_v60 }
0x1ce8   :  { %v8495_v46 = vpop.eup %8494 }
0x1ce9   :  { %8496 = vrcp.f32 %v6232_v21  ;;  %v6242_v23 = vadd.f32 1.0, %v8495_v46 }
0x1ceb   :  { %8498 = vrcp.f32 %v6242_v23 }
0x1cf6   :  { %v8497_v18 = vpop.eup %8496 }
0x1cf7   :  { %v6248_v58 = vmul.f32 %v8497_v18, %v6246_v4 }
0x1cf8   :  { %v8499_v14 = vpop.eup %8498 }
0x1cf9   :  { %v6249_v19 = vadd.f32 %v6248_v58, %v6139_v9  ;;  %v6251_v48 = vsub.f32 1.0, %v8499_v14  ;;  %v6256_v61 = vmul.f32 %v8499_v14, %v6254_v49 }
0x1cfb   :  { %8500 = vtanh.f32 %v6249_v19 }
0x1d08   :  { %v8501_v8 = vpop.eup %8500 }
0x1d09   :  { %v6252_v63 = vmul.f32 %v8501_v8, %v6251_v48 }
0x1d0b   :  { %v6257_v31 = vadd.f32 %v6256_v61, %v6252_v63 }
0x1d0d   :  { %v6809_v7 = vpack.c.bf16 %v6257_v31, %v6257_v31 }
0x1d0f   :  { %v6262_v16 = vrot.slane %v6809_v7, 7 }
0x1d11   :  { %6264 = vst [vmem:[#allocation3 + $0x4] sm:$0x8] %v6262_v16 }
0x1d18   :  { %v8221_v51 = vld [vmem:[#allocation3] sm:$0xff]  }
0x1d19   :  { %7851 = vmatmul.mubr.bf16.vlgmr.msra.gmra.mxu0 %v8221_v51 }
0x1dd9   :  { %v6378_v28 = vpop.f32.mrf.mxu0 }
0x1dda   :  { %v6379_v56 = vadd.f32 %v6793_v52, %v6378_v28 }
0x1ddb   :  { %v7852_v0 = vpop.f32.mrf.mxu0 }
0x1ddc   :  { %6385 = vst [vmem:[%s10301_s8] sm:$0xff] %v6379_v56 }
0x1ddd   :  { %v6381_v59 = vpop.f32.mrf.mxu0 }
0x1dde   :  { %v6382_v30 = vadd.f32 %v6793_v52, %v6381_v59 }
0x1ddf   :  { %v7853_v40 = vpop.f32.mrf.mxu0 }
0x1de0   :  { %6386 = vst [vmem:[%s10301_s8 + $0x8] sm:$0xff] %v6382_v30 }
0x1de1   :  { %6391 = vsyncpa [#allocation5], 1 }
0x1de2   :  { %6392 = vsyncpa [#allocation7], 1 }

</bundles_post_ra>
